<compile_context>
chip_gen: v6e
topology: v6e:2x2x1
jax: 0.10.0
libtpu: 0.0.40
codegen_flags: <defaults>
</compile_context>

<pallas_src>
import functools

import jax
import jax.numpy as jnp
from jax.experimental import pallas as pl
from jax.experimental.pallas import tpu as pltpu

RELU_FACTOR = 0.2
HIDDEN = 512
IN_FEATURES = 784
K_PAD = 896  # 7 * 128


def _round_up(x, m):
    return (x + m - 1) // m * m


def _tpu_generation():
    """Best-effort TPU generation (4/5/6/7) from device_kind; 0 if unknown."""
    try:
        kind = jax.devices()[0].device_kind.lower()
    except Exception:
        return 0
    for g in (7, 6, 5, 4):
        if str(g) in kind:
            return g
    return 0


def use_bf16_elementwise(gen=None):
    gen = _tpu_generation() if gen is None else gen
    return gen >= 6  # v6e / v7x have a bf16 VPU; v5e does not


def disc_kernel(x_ref,
                w1_ref, b1_ref,
                w2_ref, b2_ref,
                w3_ref, b3_ref,
                w4_ref, b4_ref,
                w5_ref, b5_ref,
                w6_ref, b6_ref,
                o_ref, *, elementwise_bf16):
    # MXU matmuls take bf16 inputs and accumulate in f32.  Elementwise math
    # (bias add + LeakyReLU) runs in bf16 on v6e/v7x, f32 on v5e.
    ew = jnp.bfloat16 if elementwise_bf16 else jnp.float32

    def block(h_bf16, w_ref, b_ref):
        z = jnp.dot(h_bf16, w_ref[...], preferred_element_type=jnp.float32)
        z = z.astype(ew) + b_ref[...]          # b_ref is already in `ew` dtype
        # TODO(synk): nn.Dropout(0.3) is identity in eval mode; training-mode
        # dropout (pltpu.prng_seed + prng_random_bits mask + 1/(1-p) scale) is
        # intentionally omitted.
        return jnp.where(z > 0, z, RELU_FACTOR * z)      # `ew` dtype

    h = block(x_ref[...], w1_ref, b1_ref)
    h = block(h.astype(jnp.bfloat16), w2_ref, b2_ref)
    h = block(h.astype(jnp.bfloat16), w3_ref, b3_ref)
    h = block(h.astype(jnp.bfloat16), w4_ref, b4_ref)
    h = block(h.astype(jnp.bfloat16), w5_ref, b5_ref)

    # Final Linear(512 -> 1): an N=1 matmul would use 1/128..1/256 of the MXU,
    # so do it as a broadcast-multiply + lane reduction in f32 (h promotes
    # bf16 -> f32 against the f32 w6 row).
    z = jnp.sum(h * w6_ref[...], axis=-1, keepdims=True) + b6_ref[...]
    # Sigmoid: exp + approximate reciprocal both on the EUP slot (free under
    # the MXU-bound steps); z is only (tm, 1).
    o_ref[...] = pl.reciprocal(1.0 + jnp.exp(-z), approx=True)


def _pick_tile(B, gen, tm):
    """Pick (tm, n_steps): small padding waste, amortized grid-step overhead."""
    if tm is not None:
        tm = max(8, _round_up(tm, 8))
        return tm, pl.cdiv(B, tm)
    tm_max = {5: 2048, 6: 2048, 7: 2048}.get(gen, 1024)
    n_steps = pl.cdiv(B, tm_max)
    if gen == 7 and B >= 256:
        # v7x has 2 TensorCores: ensure an even number of >=2 "parallel" steps
        # so both cores get work (harmless elsewhere).
        n_steps = max(n_steps, 2)
        n_steps += n_steps % 2
    tm = _round_up(pl.cdiv(B, n_steps), 8)   # <8 padded rows per step
    return tm, n_steps


def disc_forward(x_nchw, params, *, tm=None, elementwise_bf16=None):
    """x_nchw: (B, 1, 28, 28) float32. Returns (B, 1) float32."""
    B = x_nchw.shape[0]
    gen = _tpu_generation()
    if elementwise_bf16 is None:
        elementwise_bf16 = use_bf16_elementwise(gen)
    ew = jnp.bfloat16 if elementwise_bf16 else jnp.float32

    x_flat = x_nchw.reshape(B, -1)                      # torch.flatten(x, 1)
    assert x_flat.shape[1] == IN_FEATURES

    tm, n_steps = _pick_tile(B, gen, tm)
    b_pad = tm * n_steps

    # Pad batch rows and K 784 -> 896 directly in bf16: one fused pad, no f32
    # intermediate copy of the padded array in HBM.
    x_p = jnp.pad(x_flat.astype(jnp.bfloat16),
                  ((0, b_pad - B), (0, K_PAD - IN_FEATURES)))

    (w1, b1), (w2, b2), (w3, b3), (w4, b4), (w5, b5), (w6, b6) = params
    w1_p = jnp.pad(w1.astype(jnp.bfloat16), ((0, K_PAD - IN_FEATURES), (0, 0)))

    flat_params = [
        w1_p,                     b1.reshape(1, HIDDEN).astype(ew),
        w2.astype(jnp.bfloat16),  b2.reshape(1, HIDDEN).astype(ew),
        w3.astype(jnp.bfloat16),  b3.reshape(1, HIDDEN).astype(ew),
        w4.astype(jnp.bfloat16),  b4.reshape(1, HIDDEN).astype(ew),
        w5.astype(jnp.bfloat16),  b5.reshape(1, HIDDEN).astype(ew),
        w6.reshape(1, HIDDEN).astype(jnp.float32),   # (512,1) -> f32 row vector
        b6.reshape(1, 1).astype(jnp.float32),
    ]

    const_shapes = [
        (K_PAD, HIDDEN), (1, HIDDEN),
        (HIDDEN, HIDDEN), (1, HIDDEN),
        (HIDDEN, HIDDEN), (1, HIDDEN),
        (HIDDEN, HIDDEN), (1, HIDDEN),
        (HIDDEN, HIDDEN), (1, HIDDEN),
        (1, HIDDEN),                                  # w6 row
        (1, 1),                                       # b6
    ]
    const_map = lambda i: (0, 0)   # same block every step -> VMEM-resident

    vmem_limit = (48 if gen in (0, 7) else 64) * 1024 * 1024
    kernel = functools.partial(disc_kernel, elementwise_bf16=elementwise_bf16)

    def run(single_buffer_consts):
        if single_buffer_consts:
            const_spec = lambda s: pl.BlockSpec(s, const_map,
                                                pipeline_mode=pl.Buffered(1))
        else:
            const_spec = lambda s: pl.BlockSpec(s, const_map)
        in_specs = ([pl.BlockSpec((tm, K_PAD), lambda i: (i, 0))]  # x over batch
                    + [const_spec(s) for s in const_shapes])
        out_specs = pl.BlockSpec((tm, 1), lambda i: (i, 0))
        return pl.pallas_call(
            kernel,
            out_shape=jax.ShapeDtypeStruct((b_pad, 1), jnp.float32),
            grid=(n_steps,),
            in_specs=in_specs,
            out_specs=out_specs,
            compiler_params=pltpu.CompilerParams(
                dimension_semantics=("parallel",),
                vmem_limit_bytes=vmem_limit,
            ),
        )(x_p, *flat_params)

    try:
        # Constant-index blocks never re-DMA after step 0: single-buffer them
        # so the pipeliner doesn't spend ~3 MiB of VMEM on dead second buffers.
        out = run(single_buffer_consts=True)
    except Exception:
        # This jax build rejects pipeline_mode=pl.Buffered(1); default
        # double-buffered constants are still correct (just use more VMEM).
        out = run(single_buffer_consts=False)

    return out[:B]


def init_params(key):
    """Deterministic params matching nn.Linear shapes (stored transposed)."""
    dims = [(IN_FEATURES, HIDDEN), (HIDDEN, HIDDEN), (HIDDEN, HIDDEN),
            (HIDDEN, HIDDEN), (HIDDEN, HIDDEN), (HIDDEN, 1)]
    params = []
    for (fan_in, fan_out) in dims:
        key, kw, kb = jax.random.split(key, 3)
        bound = 1.0 / (fan_in ** 0.5)  # torch default Linear init range
        w = jax.random.uniform(kw, (fan_in, fan_out), jnp.float32, -bound, bound)
        b = jax.random.uniform(kb, (fan_out,), jnp.float32, -bound, bound)
        params.append((w, b))
    return params


def disc_reference_f32(x_nchw, params):
    """Pure f32 reference (matches the PyTorch module exactly)."""
    h = x_nchw.reshape(x_nchw.shape[0], -1)
    for i, (w, b) in enumerate(params):
        h = h @ w + b
        if i < len(params) - 1:
            h = jnp.where(h > 0, h, RELU_FACTOR * h)
    return jax.nn.sigmoid(h)


def disc_reference_match(x_nchw, params, *, elementwise_bf16):
    """Reference matching the kernel numerics: bf16 MXU inputs, f32 accumulate,
    bf16-or-f32 elementwise, f32 final (512->1) head."""
    ew = jnp.bfloat16 if elementwise_bf16 else jnp.float32
    h_mm = x_nchw.reshape(x_nchw.shape[0], -1).astype(jnp.bfloat16)
    a = None
    for (w, b) in params[:-1]:
        z = jnp.dot(h_mm, w.astype(jnp.bfloat16),
                    preferred_element_type=jnp.float32)
        z = z.astype(ew) + b.astype(ew)
        a = jnp.where(z > 0, z, RELU_FACTOR * z)
        h_mm = a.astype(jnp.bfloat16)
    w6, b6 = params[-1]
    z = (jnp.sum(a * w6.reshape(1, -1).astype(jnp.float32), axis=-1,
                 keepdims=True)
         + b6.reshape(1, 1).astype(jnp.float32))
    return jax.nn.sigmoid(z)


if __name__ == "__main__":
    key = jax.random.PRNGKey(0)
    key, kx = jax.random.split(key)
    # MNIST-style input implied by Linear(784, ...): (B, 1, 28, 28)
    x = jax.random.normal(kx, (2, 1, 28, 28), jnp.float32)

    params = init_params(key)
    ew_bf16 = use_bf16_elementwise()

    out = jax.block_until_ready(
        disc_forward(x, params, elementwise_bf16=ew_bf16))
    assert out.shape == (2, 1), out.shape

    ref_match = disc_reference_match(x, params, elementwise_bf16=ew_bf16)
    ref_f32 = disc_reference_f32(x, params)
    assert jnp.allclose(out, ref_match, atol=2e-3, rtol=2e-3), (out, ref_match)
    assert jnp.allclose(out, ref_f32, atol=5e-2, rtol=5e-2), (out, ref_f32)

    # Exercise the multi-step batch grid + padding/slicing path (grid=(3,)).
    key, kx2 = jax.random.split(key)
    x2 = jax.random.normal(kx2, (44, 1, 28, 28), jnp.float32)
    out2 = jax.block_until_ready(
        disc_forward(x2, params, tm=16, elementwise_bf16=ew_bf16))
    ref2 = disc_reference_match(x2, params, elementwise_bf16=ew_bf16)
    assert out2.shape == (44, 1), out2.shape
    assert jnp.allclose(out2, ref2, atol=2e-3, rtol=2e-3), (out2, ref2)

    print("KERNEL_OK")
</pallas_src>

<mosaic_0001>
module attributes {stable_mosaic.version = 11 : i64} {
  func.func @disc_kernel(%arg0: i32, %arg1: memref<8x896xbf16, #tpu.memory_space<vmem>>, %arg2: memref<896x512xbf16, #tpu.memory_space<vmem>>, %arg3: memref<1x512xf32, #tpu.memory_space<vmem>>, %arg4: memref<512x512xbf16, #tpu.memory_space<vmem>>, %arg5: memref<1x512xf32, #tpu.memory_space<vmem>>, %arg6: memref<512x512xbf16, #tpu.memory_space<vmem>>, %arg7: memref<1x512xf32, #tpu.memory_space<vmem>>, %arg8: memref<512x512xbf16, #tpu.memory_space<vmem>>, %arg9: memref<1x512xf32, #tpu.memory_space<vmem>>, %arg10: memref<512x512xbf16, #tpu.memory_space<vmem>>, %arg11: memref<1x512xf32, #tpu.memory_space<vmem>>, %arg12: memref<1x512xf32, #tpu.memory_space<vmem>>, %arg13: memref<1x1xf32, #tpu.memory_space<vmem>>, %arg14: memref<8x1xf32, #tpu.memory_space<vmem>>) attributes {dimension_semantics = [#tpu.dimension_semantics<parallel>], iteration_bounds = array<i64: 1>, scalar_prefetch = 0 : i64, scratch_operands = 0 : i64, tpu.core_type = #tpu.core_type<tc>, window_params = [{transform_indices = @transform_0, window_bounds = array<i64: 8, 896>}, {pipeline_mode = #tpu.pipeline_mode<synchronous>, transform_indices = @transform_1, window_bounds = array<i64: 896, 512>}, {pipeline_mode = #tpu.pipeline_mode<synchronous>, transform_indices = @transform_2, window_bounds = array<i64: 1, 512>}, {pipeline_mode = #tpu.pipeline_mode<synchronous>, transform_indices = @transform_3, window_bounds = array<i64: 512, 512>}, {pipeline_mode = #tpu.pipeline_mode<synchronous>, transform_indices = @transform_4, window_bounds = array<i64: 1, 512>}, {pipeline_mode = #tpu.pipeline_mode<synchronous>, transform_indices = @transform_5, window_bounds = array<i64: 512, 512>}, {pipeline_mode = #tpu.pipeline_mode<synchronous>, transform_indices = @transform_6, window_bounds = array<i64: 1, 512>}, {pipeline_mode = #tpu.pipeline_mode<synchronous>, transform_indices = @transform_7, window_bounds = array<i64: 512, 512>}, {pipeline_mode = #tpu.pipeline_mode<synchronous>, transform_indices = @transform_8, window_bounds = array<i64: 1, 512>}, {pipeline_mode = #tpu.pipeline_mode<synchronous>, transform_indices = @transform_9, window_bounds = array<i64: 512, 512>}, {pipeline_mode = #tpu.pipeline_mode<synchronous>, transform_indices = @transform_10, window_bounds = array<i64: 1, 512>}, {pipeline_mode = #tpu.pipeline_mode<synchronous>, transform_indices = @transform_11, window_bounds = array<i64: 1, 512>}, {pipeline_mode = #tpu.pipeline_mode<synchronous>, transform_indices = @transform_12, window_bounds = array<i64: 1, 1>}, {transform_indices = @transform_13, window_bounds = array<i64: 8, 1>}]} {
    %c0 = arith.constant 0 : index
    %c0_0 = arith.constant 0 : index
    %0 = vector.load %arg1[%c0, %c0_0] : memref<8x896xbf16, #tpu.memory_space<vmem>>, vector<8x896xbf16>
    %c0_1 = arith.constant 0 : index
    %c0_2 = arith.constant 0 : index
    %1 = vector.load %arg2[%c0_1, %c0_2] : memref<896x512xbf16, #tpu.memory_space<vmem>>, vector<896x512xbf16>
    %cst = arith.constant dense<0.000000e+00> : vector<8x512xf32>
    %2 = tpu.matmul %0, %1, %cst {dimension_numbers = #tpu.dot_dimension_numbers<[1], [0], [0], [1], [0, 0, 1, 1], [], []>} : vector<8x896xbf16>, vector<896x512xbf16>, vector<8x512xf32> -> vector<8x512xf32>
    %c0_3 = arith.constant 0 : index
    %c0_4 = arith.constant 0 : index
    %3 = vector.load %arg3[%c0_3, %c0_4] : memref<1x512xf32, #tpu.memory_space<vmem>>, vector<1x512xf32>
    %4 = vector.broadcast %3 : vector<1x512xf32> to vector<8x512xf32>
    %5 = arith.addf %2, %4 : vector<8x512xf32>
    %cst_5 = arith.constant 0.000000e+00 : f32
    %6 = vector.broadcast %cst_5 : f32 to vector<8x512xf32>
    %7 = arith.cmpf ogt, %5, %6 : vector<8x512xf32>
    %cst_6 = arith.constant 2.000000e-01 : f32
    %8 = vector.broadcast %cst_6 : f32 to vector<8x512xf32>
    %9 = arith.mulf %8, %5 : vector<8x512xf32>
    %10 = arith.select %7, %5, %9 : vector<8x512xi1>, vector<8x512xf32>
    %11 = arith.truncf %10 : vector<8x512xf32> to vector<8x512xbf16>
    %c0_7 = arith.constant 0 : index
    %c0_8 = arith.constant 0 : index
    %12 = vector.load %arg4[%c0_7, %c0_8] : memref<512x512xbf16, #tpu.memory_space<vmem>>, vector<512x512xbf16>
    %cst_9 = arith.constant dense<0.000000e+00> : vector<8x512xf32>
    %13 = tpu.matmul %11, %12, %cst_9 {dimension_numbers = #tpu.dot_dimension_numbers<[1], [0], [0], [1], [0, 0, 1, 1], [], []>} : vector<8x512xbf16>, vector<512x512xbf16>, vector<8x512xf32> -> vector<8x512xf32>
    %c0_10 = arith.constant 0 : index
    %c0_11 = arith.constant 0 : index
    %14 = vector.load %arg5[%c0_10, %c0_11] : memref<1x512xf32, #tpu.memory_space<vmem>>, vector<1x512xf32>
    %15 = vector.broadcast %14 : vector<1x512xf32> to vector<8x512xf32>
    %16 = arith.addf %13, %15 : vector<8x512xf32>
    %cst_12 = arith.constant 0.000000e+00 : f32
    %17 = vector.broadcast %cst_12 : f32 to vector<8x512xf32>
    %18 = arith.cmpf ogt, %16, %17 : vector<8x512xf32>
    %cst_13 = arith.constant 2.000000e-01 : f32
    %19 = vector.broadcast %cst_13 : f32 to vector<8x512xf32>
    %20 = arith.mulf %19, %16 : vector<8x512xf32>
    %21 = arith.select %18, %16, %20 : vector<8x512xi1>, vector<8x512xf32>
    %22 = arith.truncf %21 : vector<8x512xf32> to vector<8x512xbf16>
    %c0_14 = arith.constant 0 : index
    %c0_15 = arith.constant 0 : index
    %23 = vector.load %arg6[%c0_14, %c0_15] : memref<512x512xbf16, #tpu.memory_space<vmem>>, vector<512x512xbf16>
    %cst_16 = arith.constant dense<0.000000e+00> : vector<8x512xf32>
    %24 = tpu.matmul %22, %23, %cst_16 {dimension_numbers = #tpu.dot_dimension_numbers<[1], [0], [0], [1], [0, 0, 1, 1], [], []>} : vector<8x512xbf16>, vector<512x512xbf16>, vector<8x512xf32> -> vector<8x512xf32>
    %c0_17 = arith.constant 0 : index
    %c0_18 = arith.constant 0 : index
    %25 = vector.load %arg7[%c0_17, %c0_18] : memref<1x512xf32, #tpu.memory_space<vmem>>, vector<1x512xf32>
    %26 = vector.broadcast %25 : vector<1x512xf32> to vector<8x512xf32>
    %27 = arith.addf %24, %26 : vector<8x512xf32>
    %cst_19 = arith.constant 0.000000e+00 : f32
    %28 = vector.broadcast %cst_19 : f32 to vector<8x512xf32>
    %29 = arith.cmpf ogt, %27, %28 : vector<8x512xf32>
    %cst_20 = arith.constant 2.000000e-01 : f32
    %30 = vector.broadcast %cst_20 : f32 to vector<8x512xf32>
    %31 = arith.mulf %30, %27 : vector<8x512xf32>
    %32 = arith.select %29, %27, %31 : vector<8x512xi1>, vector<8x512xf32>
    %33 = arith.truncf %32 : vector<8x512xf32> to vector<8x512xbf16>
    %c0_21 = arith.constant 0 : index
    %c0_22 = arith.constant 0 : index
    %34 = vector.load %arg8[%c0_21, %c0_22] : memref<512x512xbf16, #tpu.memory_space<vmem>>, vector<512x512xbf16>
    %cst_23 = arith.constant dense<0.000000e+00> : vector<8x512xf32>
    %35 = tpu.matmul %33, %34, %cst_23 {dimension_numbers = #tpu.dot_dimension_numbers<[1], [0], [0], [1], [0, 0, 1, 1], [], []>} : vector<8x512xbf16>, vector<512x512xbf16>, vector<8x512xf32> -> vector<8x512xf32>
    %c0_24 = arith.constant 0 : index
    %c0_25 = arith.constant 0 : index
    %36 = vector.load %arg9[%c0_24, %c0_25] : memref<1x512xf32, #tpu.memory_space<vmem>>, vector<1x512xf32>
    %37 = vector.broadcast %36 : vector<1x512xf32> to vector<8x512xf32>
    %38 = arith.addf %35, %37 : vector<8x512xf32>
    %cst_26 = arith.constant 0.000000e+00 : f32
    %39 = vector.broadcast %cst_26 : f32 to vector<8x512xf32>
    %40 = arith.cmpf ogt, %38, %39 : vector<8x512xf32>
    %cst_27 = arith.constant 2.000000e-01 : f32
    %41 = vector.broadcast %cst_27 : f32 to vector<8x512xf32>
    %42 = arith.mulf %41, %38 : vector<8x512xf32>
    %43 = arith.select %40, %38, %42 : vector<8x512xi1>, vector<8x512xf32>
    %44 = arith.truncf %43 : vector<8x512xf32> to vector<8x512xbf16>
    %c0_28 = arith.constant 0 : index
    %c0_29 = arith.constant 0 : index
    %45 = vector.load %arg10[%c0_28, %c0_29] : memref<512x512xbf16, #tpu.memory_space<vmem>>, vector<512x512xbf16>
    %cst_30 = arith.constant dense<0.000000e+00> : vector<8x512xf32>
    %46 = tpu.matmul %44, %45, %cst_30 {dimension_numbers = #tpu.dot_dimension_numbers<[1], [0], [0], [1], [0, 0, 1, 1], [], []>} : vector<8x512xbf16>, vector<512x512xbf16>, vector<8x512xf32> -> vector<8x512xf32>
    %c0_31 = arith.constant 0 : index
    %c0_32 = arith.constant 0 : index
    %47 = vector.load %arg11[%c0_31, %c0_32] : memref<1x512xf32, #tpu.memory_space<vmem>>, vector<1x512xf32>
    %48 = vector.broadcast %47 : vector<1x512xf32> to vector<8x512xf32>
    %49 = arith.addf %46, %48 : vector<8x512xf32>
    %cst_33 = arith.constant 0.000000e+00 : f32
    %50 = vector.broadcast %cst_33 : f32 to vector<8x512xf32>
    %51 = arith.cmpf ogt, %49, %50 : vector<8x512xf32>
    %cst_34 = arith.constant 2.000000e-01 : f32
    %52 = vector.broadcast %cst_34 : f32 to vector<8x512xf32>
    %53 = arith.mulf %52, %49 : vector<8x512xf32>
    %54 = arith.select %51, %49, %53 : vector<8x512xi1>, vector<8x512xf32>
    %c0_35 = arith.constant 0 : index
    %c0_36 = arith.constant 0 : index
    %55 = vector.load %arg12[%c0_35, %c0_36] : memref<1x512xf32, #tpu.memory_space<vmem>>, vector<1x512xf32>
    %56 = vector.broadcast %55 : vector<1x512xf32> to vector<8x512xf32>
    %57 = arith.mulf %54, %56 : vector<8x512xf32>
    %cst_37 = arith.constant dense<0.000000e+00> : vector<8xf32>
    %58 = vector.multi_reduction <add>, %57, %cst_37 [1] : vector<8x512xf32> to vector<8xf32>
    %59 = vector.shape_cast %58 : vector<8xf32> to vector<8x1xf32>
    %c0_38 = arith.constant 0 : index
    %c0_39 = arith.constant 0 : index
    %60 = vector.load %arg13[%c0_38, %c0_39] : memref<1x1xf32, #tpu.memory_space<vmem>>, vector<1x1xf32>
    %61 = vector.broadcast %60 : vector<1x1xf32> to vector<8x1xf32>
    %62 = arith.addf %59, %61 : vector<8x1xf32>
    %cst_40 = arith.constant 0.000000e+00 : f32
    %63 = vector.broadcast %cst_40 : f32 to vector<8x1xf32>
    %64 = arith.subf %63, %62 : vector<8x1xf32>
    %65 = math.exp %64 : vector<8x1xf32>
    %cst_41 = arith.constant 1.000000e+00 : f32
    %66 = vector.broadcast %cst_41 : f32 to vector<8x1xf32>
    %67 = arith.addf %66, %65 : vector<8x1xf32>
    %68 = tpu.reciprocal %67 {approx = true} : vector<8x1xf32> -> vector<8x1xf32>
    %c0_42 = arith.constant 0 : index
    %c0_43 = arith.constant 0 : index
    %69 = vector.load %arg14[%c0_42, %c0_43] : memref<8x1xf32, #tpu.memory_space<vmem>>, vector<8x1xf32>
    tpu.vector_store %arg14[%c0_42, %c0_43], %68 {strides = array<i32>} : memref<8x1xf32, #tpu.memory_space<vmem>>, vector<8x1xf32>,
    return
  }
  func.func @transform_0(%arg0: i32) -> (i32, i32) {
    %c0_i32 = arith.constant 0 : i32
    %c0_i32_0 = arith.constant 0 : i32
    return %arg0, %c0_i32 : i32, i32
  }
  func.func @transform_1(%arg0: i32) -> (i32, i32) {
    %c0_i32 = arith.constant 0 : i32
    %c0_i32_0 = arith.constant 0 : i32
    %c0_i32_1 = arith.constant 0 : i32
    return %c0_i32, %c0_i32_0 : i32, i32
  }
  func.func @transform_2(%arg0: i32) -> (i32, i32) {
    %c0_i32 = arith.constant 0 : i32
    %c0_i32_0 = arith.constant 0 : i32
    %c0_i32_1 = arith.constant 0 : i32
    return %c0_i32, %c0_i32_0 : i32, i32
  }
  func.func @transform_3(%arg0: i32) -> (i32, i32) {
    %c0_i32 = arith.constant 0 : i32
    %c0_i32_0 = arith.constant 0 : i32
    %c0_i32_1 = arith.constant 0 : i32
    return %c0_i32, %c0_i32_0 : i32, i32
  }
  func.func @transform_4(%arg0: i32) -> (i32, i32) {
    %c0_i32 = arith.constant 0 : i32
    %c0_i32_0 = arith.constant 0 : i32
    %c0_i32_1 = arith.constant 0 : i32
    return %c0_i32, %c0_i32_0 : i32, i32
  }
  func.func @transform_5(%arg0: i32) -> (i32, i32) {
    %c0_i32 = arith.constant 0 : i32
    %c0_i32_0 = arith.constant 0 : i32
    %c0_i32_1 = arith.constant 0 : i32
    return %c0_i32, %c0_i32_0 : i32, i32
  }
  func.func @transform_6(%arg0: i32) -> (i32, i32) {
    %c0_i32 = arith.constant 0 : i32
    %c0_i32_0 = arith.constant 0 : i32
    %c0_i32_1 = arith.constant 0 : i32
    return %c0_i32, %c0_i32_0 : i32, i32
  }
  func.func @transform_7(%arg0: i32) -> (i32, i32) {
    %c0_i32 = arith.constant 0 : i32
    %c0_i32_0 = arith.constant 0 : i32
    %c0_i32_1 = arith.constant 0 : i32
    return %c0_i32, %c0_i32_0 : i32, i32
  }
  func.func @transform_8(%arg0: i32) -> (i32, i32) {
    %c0_i32 = arith.constant 0 : i32
    %c0_i32_0 = arith.constant 0 : i32
    %c0_i32_1 = arith.constant 0 : i32
    return %c0_i32, %c0_i32_0 : i32, i32
  }
  func.func @transform_9(%arg0: i32) -> (i32, i32) {
    %c0_i32 = arith.constant 0 : i32
    %c0_i32_0 = arith.constant 0 : i32
    %c0_i32_1 = arith.constant 0 : i32
    return %c0_i32, %c0_i32_0 : i32, i32
  }
  func.func @transform_10(%arg0: i32) -> (i32, i32) {
    %c0_i32 = arith.constant 0 : i32
    %c0_i32_0 = arith.constant 0 : i32
    %c0_i32_1 = arith.constant 0 : i32
    return %c0_i32, %c0_i32_0 : i32, i32
  }
  func.func @transform_11(%arg0: i32) -> (i32, i32) {
    %c0_i32 = arith.constant 0 : i32
    %c0_i32_0 = arith.constant 0 : i32
    %c0_i32_1 = arith.constant 0 : i32
    return %c0_i32, %c0_i32_0 : i32, i32
  }
  func.func @transform_12(%arg0: i32) -> (i32, i32) {
    %c0_i32 = arith.constant 0 : i32
    %c0_i32_0 = arith.constant 0 : i32
    %c0_i32_1 = arith.constant 0 : i32
    return %c0_i32, %c0_i32_0 : i32, i32
  }
  func.func @transform_13(%arg0: i32) -> (i32, i32) {
    %c0_i32 = arith.constant 0 : i32
    %c0_i32_0 = arith.constant 0 : i32
    return %arg0, %c0_i32 : i32, i32
  }
}

module attributes {stable_mosaic.version = 11 : i64} {
  func.func @disc_kernel(%arg0: i32, %arg1: memref<8x896xbf16, #tpu.memory_space<vmem>>, %arg2: memref<896x512xbf16, #tpu.memory_space<vmem>>, %arg3: memref<1x512xf32, #tpu.memory_space<vmem>>, %arg4: memref<512x512xbf16, #tpu.memory_space<vmem>>, %arg5: memref<1x512xf32, #tpu.memory_space<vmem>>, %arg6: memref<512x512xbf16, #tpu.memory_space<vmem>>, %arg7: memref<1x512xf32, #tpu.memory_space<vmem>>, %arg8: memref<512x512xbf16, #tpu.memory_space<vmem>>, %arg9: memref<1x512xf32, #tpu.memory_space<vmem>>, %arg10: memref<512x512xbf16, #tpu.memory_space<vmem>>, %arg11: memref<1x512xf32, #tpu.memory_space<vmem>>, %arg12: memref<1x512xf32, #tpu.memory_space<vmem>>, %arg13: memref<1x1xf32, #tpu.memory_space<vmem>>, %arg14: memref<8x1xf32, #tpu.memory_space<vmem>>) attributes {dimension_semantics = [#tpu.dimension_semantics<parallel>], iteration_bounds = array<i64: 1>, scalar_prefetch = 0 : i64, scratch_operands = 0 : i64, tpu.core_type = #tpu.core_type<tc>, window_params = [{transform_indices = @transform_0, window_bounds = array<i64: 8, 896>}, {pipeline_mode = #tpu.pipeline_mode<synchronous>, transform_indices = @transform_1, window_bounds = array<i64: 896, 512>}, {pipeline_mode = #tpu.pipeline_mode<synchronous>, transform_indices = @transform_2, window_bounds = array<i64: 1, 512>}, {pipeline_mode = #tpu.pipeline_mode<synchronous>, transform_indices = @transform_3, window_bounds = array<i64: 512, 512>}, {pipeline_mode = #tpu.pipeline_mode<synchronous>, transform_indices = @transform_4, window_bounds = array<i64: 1, 512>}, {pipeline_mode = #tpu.pipeline_mode<synchronous>, transform_indices = @transform_5, window_bounds = array<i64: 512, 512>}, {pipeline_mode = #tpu.pipeline_mode<synchronous>, transform_indices = @transform_6, window_bounds = array<i64: 1, 512>}, {pipeline_mode = #tpu.pipeline_mode<synchronous>, transform_indices = @transform_7, window_bounds = array<i64: 512, 512>}, {pipeline_mode = #tpu.pipeline_mode<synchronous>, transform_indices = @transform_8, window_bounds = array<i64: 1, 512>}, {pipeline_mode = #tpu.pipeline_mode<synchronous>, transform_indices = @transform_9, window_bounds = array<i64: 512, 512>}, {pipeline_mode = #tpu.pipeline_mode<synchronous>, transform_indices = @transform_10, window_bounds = array<i64: 1, 512>}, {pipeline_mode = #tpu.pipeline_mode<synchronous>, transform_indices = @transform_11, window_bounds = array<i64: 1, 512>}, {pipeline_mode = #tpu.pipeline_mode<synchronous>, transform_indices = @transform_12, window_bounds = array<i64: 1, 1>}, {transform_indices = @transform_13, window_bounds = array<i64: 8, 1>}]} {
    %c0 = arith.constant 0 : index
    %c0_0 = arith.constant 0 : index
    %0 = vector.load %arg1[%c0, %c0_0] : memref<8x896xbf16, #tpu.memory_space<vmem>>, vector<8x896xbf16>
    %c0_1 = arith.constant 0 : index
    %c0_2 = arith.constant 0 : index
    %1 = vector.load %arg2[%c0_1, %c0_2] : memref<896x512xbf16, #tpu.memory_space<vmem>>, vector<896x512xbf16>
    %cst = arith.constant dense<0.000000e+00> : vector<8x512xf32>
    %2 = tpu.matmul %0, %1, %cst {dimension_numbers = #tpu.dot_dimension_numbers<[1], [0], [0], [1], [0, 0, 1, 1], [], []>} : vector<8x896xbf16>, vector<896x512xbf16>, vector<8x512xf32> -> vector<8x512xf32>
    %c0_3 = arith.constant 0 : index
    %c0_4 = arith.constant 0 : index
    %3 = vector.load %arg3[%c0_3, %c0_4] : memref<1x512xf32, #tpu.memory_space<vmem>>, vector<1x512xf32>
    %4 = vector.broadcast %3 : vector<1x512xf32> to vector<8x512xf32>
    %5 = arith.addf %2, %4 : vector<8x512xf32>
    %cst_5 = arith.constant 0.000000e+00 : f32
    %6 = vector.broadcast %cst_5 : f32 to vector<8x512xf32>
    %7 = arith.cmpf ogt, %5, %6 : vector<8x512xf32>
    %cst_6 = arith.constant 2.000000e-01 : f32
    %8 = vector.broadcast %cst_6 : f32 to vector<8x512xf32>
    %9 = arith.mulf %8, %5 : vector<8x512xf32>
    %10 = arith.select %7, %5, %9 : vector<8x512xi1>, vector<8x512xf32>
    %11 = arith.truncf %10 : vector<8x512xf32> to vector<8x512xbf16>
    %c0_7 = arith.constant 0 : index
    %c0_8 = arith.constant 0 : index
    %12 = vector.load %arg4[%c0_7, %c0_8] : memref<512x512xbf16, #tpu.memory_space<vmem>>, vector<512x512xbf16>
    %cst_9 = arith.constant dense<0.000000e+00> : vector<8x512xf32>
    %13 = tpu.matmul %11, %12, %cst_9 {dimension_numbers = #tpu.dot_dimension_numbers<[1], [0], [0], [1], [0, 0, 1, 1], [], []>} : vector<8x512xbf16>, vector<512x512xbf16>, vector<8x512xf32> -> vector<8x512xf32>
    %c0_10 = arith.constant 0 : index
    %c0_11 = arith.constant 0 : index
    %14 = vector.load %arg5[%c0_10, %c0_11] : memref<1x512xf32, #tpu.memory_space<vmem>>, vector<1x512xf32>
    %15 = vector.broadcast %14 : vector<1x512xf32> to vector<8x512xf32>
    %16 = arith.addf %13, %15 : vector<8x512xf32>
    %cst_12 = arith.constant 0.000000e+00 : f32
    %17 = vector.broadcast %cst_12 : f32 to vector<8x512xf32>
    %18 = arith.cmpf ogt, %16, %17 : vector<8x512xf32>
    %cst_13 = arith.constant 2.000000e-01 : f32
    %19 = vector.broadcast %cst_13 : f32 to vector<8x512xf32>
    %20 = arith.mulf %19, %16 : vector<8x512xf32>
    %21 = arith.select %18, %16, %20 : vector<8x512xi1>, vector<8x512xf32>
    %22 = arith.truncf %21 : vector<8x512xf32> to vector<8x512xbf16>
    %c0_14 = arith.constant 0 : index
    %c0_15 = arith.constant 0 : index
    %23 = vector.load %arg6[%c0_14, %c0_15] : memref<512x512xbf16, #tpu.memory_space<vmem>>, vector<512x512xbf16>
    %cst_16 = arith.constant dense<0.000000e+00> : vector<8x512xf32>
    %24 = tpu.matmul %22, %23, %cst_16 {dimension_numbers = #tpu.dot_dimension_numbers<[1], [0], [0], [1], [0, 0, 1, 1], [], []>} : vector<8x512xbf16>, vector<512x512xbf16>, vector<8x512xf32> -> vector<8x512xf32>
    %c0_17 = arith.constant 0 : index
    %c0_18 = arith.constant 0 : index
    %25 = vector.load %arg7[%c0_17, %c0_18] : memref<1x512xf32, #tpu.memory_space<vmem>>, vector<1x512xf32>
    %26 = vector.broadcast %25 : vector<1x512xf32> to vector<8x512xf32>
    %27 = arith.addf %24, %26 : vector<8x512xf32>
    %cst_19 = arith.constant 0.000000e+00 : f32
    %28 = vector.broadcast %cst_19 : f32 to vector<8x512xf32>
    %29 = arith.cmpf ogt, %27, %28 : vector<8x512xf32>
    %cst_20 = arith.constant 2.000000e-01 : f32
    %30 = vector.broadcast %cst_20 : f32 to vector<8x512xf32>
    %31 = arith.mulf %30, %27 : vector<8x512xf32>
    %32 = arith.select %29, %27, %31 : vector<8x512xi1>, vector<8x512xf32>
    %33 = arith.truncf %32 : vector<8x512xf32> to vector<8x512xbf16>
    %c0_21 = arith.constant 0 : index
    %c0_22 = arith.constant 0 : index
    %34 = vector.load %arg8[%c0_21, %c0_22] : memref<512x512xbf16, #tpu.memory_space<vmem>>, vector<512x512xbf16>
    %cst_23 = arith.constant dense<0.000000e+00> : vector<8x512xf32>
    %35 = tpu.matmul %33, %34, %cst_23 {dimension_numbers = #tpu.dot_dimension_numbers<[1], [0], [0], [1], [0, 0, 1, 1], [], []>} : vector<8x512xbf16>, vector<512x512xbf16>, vector<8x512xf32> -> vector<8x512xf32>
    %c0_24 = arith.constant 0 : index
    %c0_25 = arith.constant 0 : index
    %36 = vector.load %arg9[%c0_24, %c0_25] : memref<1x512xf32, #tpu.memory_space<vmem>>, vector<1x512xf32>
    %37 = vector.broadcast %36 : vector<1x512xf32> to vector<8x512xf32>
    %38 = arith.addf %35, %37 : vector<8x512xf32>
    %cst_26 = arith.constant 0.000000e+00 : f32
    %39 = vector.broadcast %cst_26 : f32 to vector<8x512xf32>
    %40 = arith.cmpf ogt, %38, %39 : vector<8x512xf32>
    %cst_27 = arith.constant 2.000000e-01 : f32
    %41 = vector.broadcast %cst_27 : f32 to vector<8x512xf32>
    %42 = arith.mulf %41, %38 : vector<8x512xf32>
    %43 = arith.select %40, %38, %42 : vector<8x512xi1>, vector<8x512xf32>
    %44 = arith.truncf %43 : vector<8x512xf32> to vector<8x512xbf16>
    %c0_28 = arith.constant 0 : index
    %c0_29 = arith.constant 0 : index
    %45 = vector.load %arg10[%c0_28, %c0_29] : memref<512x512xbf16, #tpu.memory_space<vmem>>, vector<512x512xbf16>
    %cst_30 = arith.constant dense<0.000000e+00> : vector<8x512xf32>
    %46 = tpu.matmul %44, %45, %cst_30 {dimension_numbers = #tpu.dot_dimension_numbers<[1], [0], [0], [1], [0, 0, 1, 1], [], []>} : vector<8x512xbf16>, vector<512x512xbf16>, vector<8x512xf32> -> vector<8x512xf32>
    %c0_31 = arith.constant 0 : index
    %c0_32 = arith.constant 0 : index
    %47 = vector.load %arg11[%c0_31, %c0_32] : memref<1x512xf32, #tpu.memory_space<vmem>>, vector<1x512xf32>
    %48 = vector.broadcast %47 : vector<1x512xf32> to vector<8x512xf32>
    %49 = arith.addf %46, %48 : vector<8x512xf32>
    %cst_33 = arith.constant 0.000000e+00 : f32
    %50 = vector.broadcast %cst_33 : f32 to vector<8x512xf32>
    %51 = arith.cmpf ogt, %49, %50 : vector<8x512xf32>
    %cst_34 = arith.constant 2.000000e-01 : f32
    %52 = vector.broadcast %cst_34 : f32 to vector<8x512xf32>
    %53 = arith.mulf %52, %49 : vector<8x512xf32>
    %54 = arith.select %51, %49, %53 : vector<8x512xi1>, vector<8x512xf32>
    %c0_35 = arith.constant 0 : index
    %c0_36 = arith.constant 0 : index
    %55 = vector.load %arg12[%c0_35, %c0_36] : memref<1x512xf32, #tpu.memory_space<vmem>>, vector<1x512xf32>
    %56 = vector.broadcast %55 : vector<1x512xf32> to vector<8x512xf32>
    %57 = arith.mulf %54, %56 : vector<8x512xf32>
    %cst_37 = arith.constant dense<0.000000e+00> : vector<8xf32>
    %58 = vector.multi_reduction <add>, %57, %cst_37 [1] : vector<8x512xf32> to vector<8xf32>
    %59 = vector.shape_cast %58 : vector<8xf32> to vector<8x1xf32>
    %c0_38 = arith.constant 0 : index
    %c0_39 = arith.constant 0 : index
    %60 = vector.load %arg13[%c0_38, %c0_39] : memref<1x1xf32, #tpu.memory_space<vmem>>, vector<1x1xf32>
    %61 = vector.broadcast %60 : vector<1x1xf32> to vector<8x1xf32>
    %62 = arith.addf %59, %61 : vector<8x1xf32>
    %cst_40 = arith.constant 0.000000e+00 : f32
    %63 = vector.broadcast %cst_40 : f32 to vector<8x1xf32>
    %64 = arith.subf %63, %62 : vector<8x1xf32>
    %65 = math.exp %64 : vector<8x1xf32>
    %cst_41 = arith.constant 1.000000e+00 : f32
    %66 = vector.broadcast %cst_41 : f32 to vector<8x1xf32>
    %67 = arith.addf %66, %65 : vector<8x1xf32>
    %68 = tpu.reciprocal %67 {approx = true} : vector<8x1xf32> -> vector<8x1xf32>
    %c0_42 = arith.constant 0 : index
    %c0_43 = arith.constant 0 : index
    %69 = vector.load %arg14[%c0_42, %c0_43] : memref<8x1xf32, #tpu.memory_space<vmem>>, vector<8x1xf32>
    tpu.vector_store %arg14[%c0_42, %c0_43], %68 {strides = array<i32>} : memref<8x1xf32, #tpu.memory_space<vmem>>, vector<8x1xf32>,
    return
  }
  func.func @transform_0(%arg0: i32) -> (i32, i32) {
    %c0_i32 = arith.constant 0 : i32
    %c0_i32_0 = arith.constant 0 : i32
    return %arg0, %c0_i32 : i32, i32
  }
  func.func @transform_1(%arg0: i32) -> (i32, i32) {
    %c0_i32 = arith.constant 0 : i32
    %c0_i32_0 = arith.constant 0 : i32
    %c0_i32_1 = arith.constant 0 : i32
    return %c0_i32, %c0_i32_0 : i32, i32
  }
  func.func @transform_2(%arg0: i32) -> (i32, i32) {
    %c0_i32 = arith.constant 0 : i32
    %c0_i32_0 = arith.constant 0 : i32
    %c0_i32_1 = arith.constant 0 : i32
    return %c0_i32, %c0_i32_0 : i32, i32
  }
  func.func @transform_3(%arg0: i32) -> (i32, i32) {
    %c0_i32 = arith.constant 0 : i32
    %c0_i32_0 = arith.constant 0 : i32
    %c0_i32_1 = arith.constant 0 : i32
    return %c0_i32, %c0_i32_0 : i32, i32
  }
  func.func @transform_4(%arg0: i32) -> (i32, i32) {
    %c0_i32 = arith.constant 0 : i32
    %c0_i32_0 = arith.constant 0 : i32
    %c0_i32_1 = arith.constant 0 : i32
    return %c0_i32, %c0_i32_0 : i32, i32
  }
  func.func @transform_5(%arg0: i32) -> (i32, i32) {
    %c0_i32 = arith.constant 0 : i32
    %c0_i32_0 = arith.constant 0 : i32
    %c0_i32_1 = arith.constant 0 : i32
    return %c0_i32, %c0_i32_0 : i32, i32
  }
  func.func @transform_6(%arg0: i32) -> (i32, i32) {
    %c0_i32 = arith.constant 0 : i32
    %c0_i32_0 = arith.constant 0 : i32
    %c0_i32_1 = arith.constant 0 : i32
    return %c0_i32, %c0_i32_0 : i32, i32
  }
  func.func @transform_7(%arg0: i32) -> (i32, i32) {
    %c0_i32 = arith.constant 0 : i32
    %c0_i32_0 = arith.constant 0 : i32
    %c0_i32_1 = arith.constant 0 : i32
    return %c0_i32, %c0_i32_0 : i32, i32
  }
  func.func @transform_8(%arg0: i32) -> (i32, i32) {
    %c0_i32 = arith.constant 0 : i32
    %c0_i32_0 = arith.constant 0 : i32
    %c0_i32_1 = arith.constant 0 : i32
    return %c0_i32, %c0_i32_0 : i32, i32
  }
  func.func @transform_9(%arg0: i32) -> (i32, i32) {
    %c0_i32 = arith.constant 0 : i32
    %c0_i32_0 = arith.constant 0 : i32
    %c0_i32_1 = arith.constant 0 : i32
    return %c0_i32, %c0_i32_0 : i32, i32
  }
  func.func @transform_10(%arg0: i32) -> (i32, i32) {
    %c0_i32 = arith.constant 0 : i32
    %c0_i32_0 = arith.constant 0 : i32
    %c0_i32_1 = arith.constant 0 : i32
    return %c0_i32, %c0_i32_0 : i32, i32
  }
  func.func @transform_11(%arg0: i32) -> (i32, i32) {
    %c0_i32 = arith.constant 0 : i32
    %c0_i32_0 = arith.constant 0 : i32
    %c0_i32_1 = arith.constant 0 : i32
    return %c0_i32, %c0_i32_0 : i32, i32
  }
  func.func @transform_12(%arg0: i32) -> (i32, i32) {
    %c0_i32 = arith.constant 0 : i32
    %c0_i32_0 = arith.constant 0 : i32
    %c0_i32_1 = arith.constant 0 : i32
    return %c0_i32, %c0_i32_0 : i32, i32
  }
  func.func @transform_13(%arg0: i32) -> (i32, i32) {
    %c0_i32 = arith.constant 0 : i32
    %c0_i32_0 = arith.constant 0 : i32
    return %arg0, %c0_i32 : i32, i32
  }
}

</mosaic_0001>

<bundles_post_ra>
// kernel: tpu_custom_call.1
= control target key start
LH: loop header
LB: loop body
LE: loop exit
PB: predicated region body
PF: predicated region fallthrough
CT: control target
= control target key end

     0   :  { %s8124_s0 = inlined_call_operand.hbm [shape: bf16[8,896], index: 0, kind: input, shape index: {}]   ;;  %s8125_s1 = inlined_call_operand.hbm [shape: bf16[896,512], index: 1, kind: input, shape index: {}]   ;;  %s8126_s2 = inlined_call_operand.vmem [shape: f32[1,512], index: 2, kind: input, shape index: {}]   ;;  %s8127_s3 = inlined_call_operand.hbm [shape: bf16[512,512], index: 3, kind: input, shape index: {}]   ;;  %s8128_s4 = inlined_call_operand.vmem [shape: f32[1,512], index: 4, kind: input, shape index: {}]   ;;  %s8129_s5 = inlined_call_operand.hbm [shape: bf16[512,512], index: 5, kind: input, shape index: {}]   ;;  %s8130_s6 = inlined_call_operand.vmem [shape: f32[1,512], index: 6, kind: input, shape index: {}]   ;;  %s8131_s7 = inlined_call_operand.hbm [shape: bf16[512,512], index: 7, kind: input, shape index: {}]   ;;  %s8132_s8 = inlined_call_operand.vmem [shape: f32[1,512], index: 8, kind: input, shape index: {}]   ;;  %s8133_s9 = inlined_call_operand.hbm [shape: bf16[512,512], index: 9, kind: input, shape index: {}]   ;;  %s8134_s10 = inlined_call_operand.vmem [shape: f32[1,512], index: 10, kind: input, shape index: {}]   ;;  %s8135_s11 = inlined_call_operand.hbm [shape: f32[1,512], index: 11, kind: input, shape index: {}]   ;;  %s8136_s12 = inlined_call_operand.<no memory space> [shape: f32[1,1], index: 12, kind: input, shape index: {}]   ;;  %s8137_s13 = inlined_call_operand.vmem [shape: f32[8,1], index: 13, kind: output, shape index: {}]  }
   0x1   :  { %v18_v0 = vstv %s8136_s12 }
   0x2   :  { %19 = vst [vmem:[#allocation2] sm:$0x1] %v18_v0 }
   0x3   :  { %20 = vsyncpa [#allocation4], 0 }
   0x4   :  { %21 = vsyncpa [#allocation6], 0 }
   0x5   :  { %22 = vsyncpa [#allocation9], 0 }
   0x6   :  { %23 = vsyncpa [#allocation12], 0  ;;  %s7825_s27 = smov [#allocation5]  }
   0x7   :  { %s39_s28 = sshll.u32 %s7825_s27, 4  ;;  %s40_s28 = int_to_ptr.vmem [resolvable:$true] %s39_s28 }
   0x8   :  { %s7685_s29 = scalar_lea.vmem %s40_s28, 28672  ;;  %p7690_p1 = scmp.lt.s32.totalorder %s40_s28, %s40_s28 }
   0x9   :  { %p7686_p0 = scmp.ne.s32.totalorder %s40_s28, %s7685_s29  ;;  %p7691_p2 = scmp.lt.s32.totalorder %s7685_s29, %s7685_s29 }
   0xb   :  { %p7692_p3 = por %p7691_p2, %p7690_p1 }
   0xd   :  { %p7693_p4 = pnand %p7692_p3, %p7686_p0 }
   0xf   :  { %7696 = shalt.err (!%p7693_p4)
}
  0x10   :  { %s7826_s30 = smov 256   ;;  %s7827_s14 = smov 16  }
  0x11   :  { %45 = dma.hbm_to_vmem [thread:$0]  %s8125_s1, 28672, %s40_s28, [#allocation6], %s7826_s30, %s7826_s30, %s7827_s14  }
  0x12   :  { %s7828_s16 = smov [#allocation8]   ;;  %s7829_s18 = smov [#allocation11]  }
  0x13   :  { %s67_s17 = sshll.u32 %s7828_s16, 4  ;;  %s95_s19 = sshll.u32 %s7829_s18, 4  ;;  %s68_s17 = int_to_ptr.vmem [resolvable:$true] %s67_s17  ;;  %s96_s19 = int_to_ptr.vmem [resolvable:$true] %s95_s19 }
  0x14   :  { %s7705_s20 = scalar_lea.vmem %s68_s17, 16384  ;;  %p7710_p6 = scmp.lt.s32.totalorder %s68_s17, %s68_s17 }
  0x15   :  { %p7706_p5 = scmp.ne.s32.totalorder %s68_s17, %s7705_s20  ;;  %p7711_p7 = scmp.lt.s32.totalorder %s7705_s20, %s7705_s20 }
  0x17   :  { %p7712_p8 = por %p7711_p7, %p7710_p6 }
  0x19   :  { %p7713_p9 = pnand %p7712_p8, %p7706_p5 }
  0x1b   :  { %7716 = shalt.err (!%p7713_p9)
}
  0x1c   :  { %73 = dma.hbm_to_vmem [thread:$0]  %s8129_s5, 16384, %s68_s17, [#allocation9], %s7826_s30, %s7826_s30, %s7827_s14  }
  0x1d   :  { %s7725_s1 = scalar_lea.vmem %s96_s19, 16384  ;;  %p7730_p11 = scmp.lt.s32.totalorder %s96_s19, %s96_s19 }
  0x1e   :  { %p7726_p10 = scmp.ne.s32.totalorder %s96_s19, %s7725_s1  ;;  %p7731_p12 = scmp.lt.s32.totalorder %s7725_s1, %s7725_s1 }
  0x20   :  { %p7732_p13 = por %p7731_p12, %p7730_p11 }
  0x22   :  { %p7733_p0 = pnand %p7732_p13, %p7726_p10 }
  0x24   :  { %7736 = shalt.err (!%p7733_p0)
}
  0x25   :  { %101 = dma.hbm_to_vmem [thread:$0]  %s8133_s9, 16384, %s96_s19, [#allocation12], %s7826_s30, %s7826_s30, %s7827_s14  }
  0x26   :  { %s7830_s25 = smov [#allocation3]   ;;  %s7831_s27 = smov [#allocation7]  }
  0x27   :  { %s30_s26 = sshll.u32 %s7830_s25, 4  ;;  %s53_s5 = sshll.u32 %s7831_s27, 4  ;;  %s31_s26 = int_to_ptr.vmem [resolvable:$true] %s30_s26  ;;  %s54_s5 = int_to_ptr.vmem [resolvable:$true] %s53_s5 }
  0x28   :  { %s7745_s28 = scalar_lea.vmem %s31_s26, 448  ;;  %p7750_p2 = scmp.lt.s32.totalorder %s31_s26, %s31_s26 }
  0x29   :  { %p7746_p1 = scmp.ne.s32.totalorder %s31_s26, %s7745_s28  ;;  %p7751_p3 = scmp.lt.s32.totalorder %s7745_s28, %s7745_s28 }
  0x2b   :  { %p7752_p4 = por %p7751_p3, %p7750_p2 }
  0x2d   :  { %p7753_p5 = pnand %p7752_p4, %p7746_p1 }
  0x2f   :  { %7756 = shalt.err (!%p7753_p5)
}
  0x30   :  { %33 = dma.hbm_to_vmem [thread:$0]  %s8124_s0, 448, %s31_s26, [#allocation4]  }
  0x31   :  { %s7765_s15 = scalar_lea.vmem %s54_s5, 16384  ;;  %p7770_p7 = scmp.lt.s32.totalorder %s54_s5, %s54_s5 }
  0x32   :  { %p7766_p6 = scmp.ne.s32.totalorder %s54_s5, %s7765_s15  ;;  %p7771_p8 = scmp.lt.s32.totalorder %s7765_s15, %s7765_s15 }
  0x34   :  { %p7772_p9 = por %p7771_p8, %p7770_p7 }
  0x36   :  { %p7773_p10 = pnand %p7772_p9, %p7766_p6 }
  0x38   :  { %7776 = shalt.err (!%p7773_p10)
}
  0x39   :  { %59 = dma.hbm_to_vmem [thread:$0]  %s8127_s3, 16384, %s54_s5, [#allocation6], %s7826_s30, %s7826_s30, %s7827_s14  }
  0x3a   :  { %s7832_s17 = smov [#allocation10]   ;;  %s7833_s19 = smov [#allocation13]  }
  0x3b   :  { %s81_s18 = sshll.u32 %s7832_s17, 4  ;;  %s110_s0 = sshll.u32 %s7833_s19, 4  ;;  %s82_s18 = int_to_ptr.vmem [resolvable:$true] %s81_s18  ;;  %s111_s0 = int_to_ptr.vmem [resolvable:$true] %s110_s0 }
  0x3c   :  { %s7785_s20 = scalar_lea.vmem %s82_s18, 16384  ;;  %p7790_p12 = scmp.lt.s32.totalorder %s82_s18, %s82_s18 }
  0x3d   :  { %p7786_p11 = scmp.ne.s32.totalorder %s82_s18, %s7785_s20  ;;  %p7791_p13 = scmp.lt.s32.totalorder %s7785_s20, %s7785_s20 }
  0x3f   :  { %p7792_p0 = por %p7791_p13, %p7790_p12 }
  0x41   :  { %p7793_p1 = pnand %p7792_p0, %p7786_p11 }
  0x43   :  { %7796 = shalt.err (!%p7793_p1)
}
  0x44   :  { %87 = dma.hbm_to_vmem [thread:$0]  %s8131_s7, 16384, %s82_s18, [#allocation9], %s7826_s30, %s7826_s30, %s7827_s14  }
  0x45   :  { %s7805_s3 = scalar_lea.vmem %s111_s0, 64  ;;  %p7810_p3 = scmp.lt.s32.totalorder %s111_s0, %s111_s0 }
  0x46   :  { %p7806_p2 = scmp.ne.s32.totalorder %s111_s0, %s7805_s3  ;;  %p7811_p4 = scmp.lt.s32.totalorder %s7805_s3, %s7805_s3 }
  0x48   :  { %p7812_p5 = por %p7811_p4, %p7810_p3 }
  0x4a   :  { %p7813_p6 = pnand %p7812_p5, %p7806_p2 }
  0x4c   :  { %7816 = shalt.err (!%p7813_p6)
}
  0x4d   :  { %113 = dma.hbm_to_vmem [thread:$0]  %s8135_s11, 64, %s111_s0, [#allocation12]  }
  0x4e   :  { %7817 = dma.done.wait [#allocation4], 448  }
  0x4f   :  { %7818 = vsyncadd [#allocation4], 4294966848 }
  0x50   :  { %7819 = dma.done.wait [#allocation6], 45056  }
  0x51   :  { %7820 = vsyncadd [#allocation6], 4294922240 }
  0x52   :  { %7821 = dma.done.wait [#allocation9], 32768  }
  0x53   :  { %7822 = vsyncadd [#allocation9], 4294934528 }
  0x54   :  { %7823 = dma.done.wait [#allocation12], 16448  }
  0x55   :  { %7824 = vsyncadd [#allocation12], 4294950848  ;;  %v6561_v1 = vld [vmem:[#allocation5 + $0xe4] ss:$16 sps:$4 sm:$0xff]   ;;  %v6565_v3 = vld [vmem:[#allocation5 + $0xe0] ss:$16 sps:$4 sm:$0xff]  }
  0x56   :  { %v6563_v2 = vld [vmem:[#allocation5 + $0x2e4] ss:$16 sps:$4 sm:$0xff]   ;;  %1533 = vmatprep.subr.bf16.mxu0 %v6561_v1  ;;  %v6566_v4 = vld [vmem:[#allocation5 + $0x2e0] ss:$16 sps:$4 sm:$0xff]  }
  0x57   :  { %1574 = vmatprep.subr.bf16.mxu1 %v6563_v2  ;;  %v6567_v5 = vld [vmem:[#allocation5 + $0xc4] ss:$16 sps:$4 sm:$0xff]   ;;  %1534 = vmatpush1.bf16.msra.mxu0 %v6565_v3  ;;  %v6571_v7 = vld [vmem:[#allocation5 + $0xc0] ss:$16 sps:$4 sm:$0xff]  }
  0x58   :  { %1575 = vmatpush1.bf16.msra.mxu1 %v6566_v4  ;;  %v6569_v6 = vld [vmem:[#allocation5 + $0x2c4] ss:$16 sps:$4 sm:$0xff]   ;;  %1535 = vmatprep.subr.bf16.mxu0 %v6567_v5  ;;  %v6572_v8 = vld [vmem:[#allocation5 + $0x2c0] ss:$16 sps:$4 sm:$0xff]  }
  0x59   :  { %1576 = vmatprep.subr.bf16.mxu1 %v6569_v6  ;;  %v6573_v9 = vld [vmem:[#allocation5 + $0xa4] ss:$16 sps:$4 sm:$0xff]   ;;  %v6577_v11 = vld [vmem:[#allocation5 + $0xa0] ss:$16 sps:$4 sm:$0xff]  }
  0x5a   :  { %v6575_v10 = vld [vmem:[#allocation5 + $0x2a4] ss:$16 sps:$4 sm:$0xff]   ;;  %v6578_v12 = vld [vmem:[#allocation5 + $0x2a0] ss:$16 sps:$4 sm:$0xff]  }
  0x5b   :  { %1536 = vmatpush1.bf16.msra.mxu0 %v6571_v7  ;;  %v6579_v13 = vld [vmem:[#allocation5 + $0x84] ss:$16 sps:$4 sm:$0xff]   ;;  %v6583_v15 = vld [vmem:[#allocation5 + $0x80] ss:$16 sps:$4 sm:$0xff]  }
  0x5c   :  { %1577 = vmatpush1.bf16.msra.mxu1 %v6572_v8  ;;  %1537 = vmatprep.subr.bf16.mxu0 %v6573_v9  ;;  %v6581_v14 = vld [vmem:[#allocation5 + $0x284] ss:$16 sps:$4 sm:$0xff]   ;;  %v6584_v16 = vld [vmem:[#allocation5 + $0x280] ss:$16 sps:$4 sm:$0xff]  }
  0x5d   :  { %1578 = vmatprep.subr.bf16.mxu1 %v6575_v10  ;;  %v6585_v17 = vld [vmem:[#allocation5 + $0x64] ss:$16 sps:$4 sm:$0xff]   ;;  %v6589_v19 = vld [vmem:[#allocation5 + $0x60] ss:$16 sps:$4 sm:$0xff]  }
  0x5e   :  { %v6587_v18 = vld [vmem:[#allocation5 + $0x264] ss:$16 sps:$4 sm:$0xff]   ;;  %v6590_v20 = vld [vmem:[#allocation5 + $0x260] ss:$16 sps:$4 sm:$0xff]  }
  0x5f   :  { %1538 = vmatpush1.bf16.msra.mxu0 %v6577_v11  ;;  %v6591_v21 = vld [vmem:[#allocation5 + $0x44] ss:$16 sps:$4 sm:$0xff]   ;;  %v6595_v23 = vld [vmem:[#allocation5 + $0x40] ss:$16 sps:$4 sm:$0xff]  }
  0x60   :  { %1579 = vmatpush1.bf16.msra.mxu1 %v6578_v12  ;;  %1539 = vmatprep.subr.bf16.mxu0 %v6579_v13  ;;  %v6593_v22 = vld [vmem:[#allocation5 + $0x244] ss:$16 sps:$4 sm:$0xff]   ;;  %v6596_v24 = vld [vmem:[#allocation5 + $0x240] ss:$16 sps:$4 sm:$0xff]  }
  0x61   :  { %1580 = vmatprep.subr.bf16.mxu1 %v6581_v14  ;;  %v6597_v25 = vld [vmem:[#allocation5 + $0x24] ss:$16 sps:$4 sm:$0xff]   ;;  %v6601_v27 = vld [vmem:[#allocation5 + $0x20] ss:$16 sps:$4 sm:$0xff]  }
  0x62   :  { %v6599_v26 = vld [vmem:[#allocation5 + $0x224] ss:$16 sps:$4 sm:$0xff]   ;;  %v6602_v28 = vld [vmem:[#allocation5 + $0x220] ss:$16 sps:$4 sm:$0xff]  }
  0x63   :  { %1540 = vmatpush1.bf16.msra.mxu0 %v6583_v15  ;;  %v6603_v29 = vld [vmem:[#allocation5 + $0x4] ss:$16 sps:$4 sm:$0xff]   ;;  %v6607_v31 = vld [vmem:[#allocation5] ss:$16 sps:$4 sm:$0xff]  }
  0x64   :  { %1581 = vmatpush1.bf16.msra.mxu1 %v6584_v16  ;;  %1541 = vmatprep.subr.bf16.mxu0 %v6585_v17  ;;  %v6605_v30 = vld [vmem:[#allocation5 + $0x204] ss:$16 sps:$4 sm:$0xff]   ;;  %v6608_v32 = vld [vmem:[#allocation5 + $0x200] ss:$16 sps:$4 sm:$0xff]   ;;  %v7834_v17 = vmov 0  }
  0x65   :  { %1582 = vmatprep.subr.bf16.mxu1 %v6587_v18  ;;  %v6609_v33 = vld [vmem:[#allocation5 + $0x1e4] ss:$16 sps:$4 sm:$0xff]   ;;  %v6613_v35 = vld [vmem:[#allocation5 + $0x1e0] ss:$16 sps:$4 sm:$0xff]  }
  0x66   :  { %v6611_v34 = vld [vmem:[#allocation5 + $0x3e4] ss:$16 sps:$4 sm:$0xff]   ;;  %v6614_v36 = vld [vmem:[#allocation5 + $0x3e0] ss:$16 sps:$4 sm:$0xff]  }
  0x67   :  { %1542 = vmatpush1.bf16.msra.mxu0 %v6589_v19  ;;  %v6615_v37 = vld [vmem:[#allocation5 + $0x1c4] ss:$16 sps:$4 sm:$0xff]   ;;  %v6619_v39 = vld [vmem:[#allocation5 + $0x1c0] ss:$16 sps:$4 sm:$0xff]  }
  0x68   :  { %1583 = vmatpush1.bf16.msra.mxu1 %v6590_v20  ;;  %1543 = vmatprep.subr.bf16.mxu0 %v6591_v21  ;;  %v6617_v38 = vld [vmem:[#allocation5 + $0x3c4] ss:$16 sps:$4 sm:$0xff]   ;;  %v6620_v40 = vld [vmem:[#allocation5 + $0x3c0] ss:$16 sps:$4 sm:$0xff]  }
  0x69   :  { %1584 = vmatprep.subr.bf16.mxu1 %v6593_v22  ;;  %v6621_v41 = vld [vmem:[#allocation5 + $0x1a4] ss:$16 sps:$4 sm:$0xff]   ;;  %v6625_v43 = vld [vmem:[#allocation5 + $0x1a0] ss:$16 sps:$4 sm:$0xff]  }
  0x6a   :  { %v6623_v42 = vld [vmem:[#allocation5 + $0x3a4] ss:$16 sps:$4 sm:$0xff]   ;;  %v6626_v44 = vld [vmem:[#allocation5 + $0x3a0] ss:$16 sps:$4 sm:$0xff]  }
  0x6b   :  { %1544 = vmatpush1.bf16.msra.mxu0 %v6595_v23  ;;  %v6627_v45 = vld [vmem:[#allocation5 + $0x184] ss:$16 sps:$4 sm:$0xff]   ;;  %v139_v49 = vld [vmem:[#allocation3 + $0x8] sm:$0xff] }
  0x6c   :  { %1585 = vmatpush1.bf16.msra.mxu1 %v6596_v24  ;;  %1545 = vmatprep.subr.bf16.mxu0 %v6597_v25  ;;  %v6629_v46 = vld [vmem:[#allocation5 + $0x384] ss:$16 sps:$4 sm:$0xff]   ;;  %v6631_v50 = vld [vmem:[#allocation5 + $0x180] ss:$16 sps:$4 sm:$0xff]   ;;  %v7946_v52 = vcombine.high %v139_v49, %v139_v49  ;;  %v7952_v8 = vcombine.low %v139_v49, %v139_v49  ;;  %v6721_v49 = vld [vmem:[#allocation5 + $0xcc] ss:$16 sps:$4 sm:$0xff]  }
  0x6d   :  { %1586 = vmatprep.subr.bf16.mxu1 %v6599_v26  ;;  %v138_v47 = vld [vmem:[#allocation3] sm:$0xff]  ;;  %v6632_v51 = vld [vmem:[#allocation5 + $0x380] ss:$16 sps:$4 sm:$0xff]  }
  0x6e   :  { %v7944_v48 = vcombine.high %v138_v47, %v138_v47  ;;  %v6633_v53 = vld [vmem:[#allocation5 + $0x164] ss:$16 sps:$4 sm:$0xff]   ;;  %1606 = vmatprep.mubr.bf16.mxu1 %v7946_v52  ;;  %v6637_v55 = vld [vmem:[#allocation5 + $0x160] ss:$16 sps:$4 sm:$0xff]   ;;  %v7950_v7 = vcombine.low %v138_v47, %v138_v47 }
  0x6f   :  { %1546 = vmatpush1.bf16.msra.mxu0 %v6601_v27  ;;  %v6635_v54 = vld [vmem:[#allocation5 + $0x364] ss:$16 sps:$4 sm:$0xff]   ;;  %v6638_v56 = vld [vmem:[#allocation5 + $0x360] ss:$16 sps:$4 sm:$0xff]  }
  0x70   :  { %1587 = vmatpush1.bf16.msra.mxu1 %v6602_v28  ;;  %1547 = vmatprep.subr.bf16.mxu0 %v6603_v29  ;;  %v6639_v57 = vld [vmem:[#allocation5 + $0x144] ss:$16 sps:$4 sm:$0xff]   ;;  %v6643_v59 = vld [vmem:[#allocation5 + $0x140] ss:$16 sps:$4 sm:$0xff]  }
  0x71   :  { %1588 = vmatprep.subr.bf16.mxu1 %v6605_v30  ;;  %1565 = vmatprep.mubr.bf16.mxu0 %v7944_v48  ;;  %v6641_v58 = vld [vmem:[#allocation5 + $0x344] ss:$16 sps:$4 sm:$0xff]   ;;  %v6644_v60 = vld [vmem:[#allocation5 + $0x340] ss:$16 sps:$4 sm:$0xff]  }
  0x72   :  { %v6645_v61 = vld [vmem:[#allocation5 + $0x124] ss:$16 sps:$4 sm:$0xff]   ;;  %v6649_v63 = vld [vmem:[#allocation5 + $0x120] ss:$16 sps:$4 sm:$0xff]  }
  0x73   :  { %1548 = vmatpush1.bf16.msra.mxu0 %v6607_v31  ;;  %v6647_v62 = vld [vmem:[#allocation5 + $0x324] ss:$16 sps:$4 sm:$0xff]   ;;  %v6650_v0 = vld [vmem:[#allocation5 + $0x320] ss:$16 sps:$4 sm:$0xff]  }
  0x74   :  { %1589 = vmatpush1.bf16.msra.mxu1 %v6608_v32  ;;  %1549 = vmatprep.subr.bf16.mxu0 %v6609_v33  ;;  %v6651_v1 = vld [vmem:[#allocation5 + $0x104] ss:$16 sps:$4 sm:$0xff]   ;;  %v6655_v3 = vld [vmem:[#allocation5 + $0x100] ss:$16 sps:$4 sm:$0xff]  }
  0x75   :  { %1590 = vmatprep.subr.bf16.mxu1 %v6611_v34  ;;  %v6653_v2 = vld [vmem:[#allocation5 + $0x304] ss:$16 sps:$4 sm:$0xff]   ;;  %v6656_v4 = vld [vmem:[#allocation5 + $0x300] ss:$16 sps:$4 sm:$0xff]  }
  0x76   :  { %v6663_v5 = vld [vmem:[#allocation5 + $0x4e4] ss:$16 sps:$4 sm:$0xff]   ;;  %v6661_v9 = vld [vmem:[#allocation5 + $0x4e0] ss:$16 sps:$4 sm:$0xff]  }
  0x77   :  { %1550 = vmatpush2.bf16.msra.mxu0 %v6613_v35  ;;  %v6666_v6 = vld [vmem:[#allocation5 + $0x6e4] ss:$16 sps:$4 sm:$0xff]   ;;  %v6664_v10 = vld [vmem:[#allocation5 + $0x6e0] ss:$16 sps:$4 sm:$0xff]  }
  0x78   :  { %1591 = vmatpush2.bf16.msra.mxu1 %v6614_v36  ;;  %1551 = vmatprep.subr.bf16.mxu0 %v6615_v37  ;;  %v6669_v11 = vld [vmem:[#allocation5 + $0x4c4] ss:$16 sps:$4 sm:$0xff]   ;;  %v6667_v13 = vld [vmem:[#allocation5 + $0x4c0] ss:$16 sps:$4 sm:$0xff]  }
  0x79   :  { %1592 = vmatprep.subr.bf16.mxu1 %v6617_v38  ;;  %v6672_v12 = vld [vmem:[#allocation5 + $0x6c4] ss:$16 sps:$4 sm:$0xff]   ;;  %v6670_v14 = vld [vmem:[#allocation5 + $0x6c0] ss:$16 sps:$4 sm:$0xff]  }
  0x7a   :  { %v6675_v15 = vld [vmem:[#allocation5 + $0x4a4] ss:$16 sps:$4 sm:$0xff]   ;;  %v6673_v18 = vld [vmem:[#allocation5 + $0x4a0] ss:$16 sps:$4 sm:$0xff]  }
  0x7b   :  { %1552 = vmatpush2.bf16.msra.mxu0 %v6619_v39  ;;  %v6678_v16 = vld [vmem:[#allocation5 + $0x6a4] ss:$16 sps:$4 sm:$0xff]   ;;  %v6676_v19 = vld [vmem:[#allocation5 + $0x6a0] ss:$16 sps:$4 sm:$0xff]  }
  0x7c   :  { %1593 = vmatpush2.bf16.msra.mxu1 %v6620_v40  ;;  %1553 = vmatprep.subr.bf16.mxu0 %v6621_v41  ;;  %v6681_v20 = vld [vmem:[#allocation5 + $0x484] ss:$16 sps:$4 sm:$0xff]   ;;  %v6679_v22 = vld [vmem:[#allocation5 + $0x480] ss:$16 sps:$4 sm:$0xff]  }
  0x7d   :  { %1594 = vmatprep.subr.bf16.mxu1 %v6623_v42  ;;  %v6684_v21 = vld [vmem:[#allocation5 + $0x684] ss:$16 sps:$4 sm:$0xff]   ;;  %v6682_v23 = vld [vmem:[#allocation5 + $0x680] ss:$16 sps:$4 sm:$0xff]  }
  0x7e   :  { %v6687_v24 = vld [vmem:[#allocation5 + $0x464] ss:$16 sps:$4 sm:$0xff]   ;;  %v6685_v26 = vld [vmem:[#allocation5 + $0x460] ss:$16 sps:$4 sm:$0xff]  }
  0x7f   :  { %1554 = vmatpush2.bf16.msra.mxu0 %v6625_v43  ;;  %v6690_v25 = vld [vmem:[#allocation5 + $0x664] ss:$16 sps:$4 sm:$0xff]   ;;  %v6688_v27 = vld [vmem:[#allocation5 + $0x660] ss:$16 sps:$4 sm:$0xff]   ;;  %v6715_v43 = vld [vmem:[#allocation5 + $0xec] ss:$16 sps:$4 sm:$0xff]  }
  0x80   :  { %1595 = vmatpush2.bf16.msra.mxu1 %v6626_v44  ;;  %1555 = vmatprep.subr.bf16.mxu0 %v6627_v45  ;;  %v6693_v28 = vld [vmem:[#allocation5 + $0x444] ss:$16 sps:$4 sm:$0xff]   ;;  %v6691_v30 = vld [vmem:[#allocation5 + $0x440] ss:$16 sps:$4 sm:$0xff]   ;;  %v6712_v45 = vld [vmem:[#allocation3 + $0x18] ss:$0 sps:$4 sm:$0xff]  }
  0x81   :  { %1596 = vmatprep.subr.bf16.mxu1 %v6629_v46  ;;  %v6696_v29 = vld [vmem:[#allocation5 + $0x644] ss:$16 sps:$4 sm:$0xff]   ;;  %v6694_v31 = vld [vmem:[#allocation5 + $0x640] ss:$16 sps:$4 sm:$0xff]   ;;  %v6713_v46 = vld [vmem:[#allocation5 + $0xe8] ss:$16 sps:$4 sm:$0xff]  }
  0x82   :  { %v6699_v32 = vld [vmem:[#allocation5 + $0x424] ss:$16 sps:$4 sm:$0xff]   ;;  %v6697_v35 = vld [vmem:[#allocation5 + $0x420] ss:$16 sps:$4 sm:$0xff]  }
  0x83   :  { %1556 = vmatpush2.bf16.msra.mxu0 %v6631_v50  ;;  %v6702_v33 = vld [vmem:[#allocation5 + $0x624] ss:$16 sps:$4 sm:$0xff]   ;;  %v6700_v37 = vld [vmem:[#allocation5 + $0x620] ss:$16 sps:$4 sm:$0xff]  }
  0x84   :  { %1597 = vmatpush2.bf16.msra.mxu1 %v6632_v51  ;;  %1557 = vmatprep.subr.bf16.mxu0 %v6633_v53  ;;  %v7957_v34 = vld [vmem:[#allocation3 + $0x10] sm:$0xff]  ;;  %v6703_v40 = vld [vmem:[#allocation5 + $0x400] ss:$16 sps:$4 sm:$0xff]  }
  0x85   :  { %1598 = vmatprep.subr.bf16.mxu1 %v6635_v54  ;;  %v7961_v36 = vcombine.high %v7957_v34, %v7957_v34  ;;  %v6705_v38 = vld [vmem:[#allocation5 + $0x404] ss:$16 sps:$4 sm:$0xff]   ;;  %v6706_v41 = vld [vmem:[#allocation5 + $0x600] ss:$16 sps:$4 sm:$0xff]   ;;  %v6719_v51 = vld [vmem:[#allocation5 + $0xc8] ss:$16 sps:$4 sm:$0xff]  }
  0x86   :  { %v6708_v39 = vld [vmem:[#allocation5 + $0x604] ss:$16 sps:$4 sm:$0xff]   ;;  %v6709_v44 = vld [vmem:[#allocation5 + $0x5e0] ss:$16 sps:$4 sm:$0xff]   ;;  %v6727_v54 = vld [vmem:[#allocation5 + $0xac] ss:$16 sps:$4 sm:$0xff]  }
  0x87   :  { %1558 = vmatpush2.bf16.msra.mxu0 %v6637_v55  ;;  %v6711_v42 = vld [vmem:[#allocation5 + $0x5e4] ss:$16 sps:$4 sm:$0xff]   ;;  %v6716_v50 = vld [vmem:[#allocation5 + $0x5c0] ss:$16 sps:$4 sm:$0xff]  }
  0x88   :  { %1599 = vmatpush2.bf16.msra.mxu1 %v6638_v56  ;;  %1559 = vmatprep.subr.bf16.mxu0 %v6639_v57  ;;  %v6718_v47 = vld [vmem:[#allocation5 + $0x5c4] ss:$16 sps:$4 sm:$0xff]   ;;  %v6722_v55 = vld [vmem:[#allocation5 + $0x5a0] ss:$16 sps:$4 sm:$0xff]   ;;  %v6725_v56 = vld [vmem:[#allocation5 + $0xa8] ss:$16 sps:$4 sm:$0xff]  }
  0x89   :  { %1600 = vmatprep.subr.bf16.mxu1 %v6641_v58  ;;  %v6724_v53 = vld [vmem:[#allocation5 + $0x5a4] ss:$16 sps:$4 sm:$0xff]   ;;  %v6733_v58 = vld [vmem:[#allocation5 + $0x8c] ss:$16 sps:$4 sm:$0xff]  }
  0x8a   :  { %v6730_v57 = vld [vmem:[#allocation5 + $0x584] ss:$16 sps:$4 sm:$0xff]  }
  0x8b   :  { %1560 = vmatpush2.bf16.msra.mxu0 %v6643_v59  ;;  %v6728_v59 = vld [vmem:[#allocation5 + $0x580] ss:$16 sps:$4 sm:$0xff]  }
  0x8c   :  { %1601 = vmatpush2.bf16.msra.mxu1 %v6644_v60  ;;  %1561 = vmatprep.subr.bf16.mxu0 %v6645_v61  ;;  %v6731_v60 = vld [vmem:[#allocation5 + $0x88] ss:$16 sps:$4 sm:$0xff]   ;;  %v6736_v61 = vld [vmem:[#allocation5 + $0x564] ss:$16 sps:$4 sm:$0xff]  }
  0x8d   :  { %1602 = vmatprep.subr.bf16.mxu1 %v6647_v62  ;;  %v6739_v62 = vld [vmem:[#allocation5 + $0x6c] ss:$16 sps:$4 sm:$0xff]  }
  0x8f   :  { %1562 = vmatpush2.bf16.msra.mxu0 %v6649_v63  ;;  %v6734_v63 = vld [vmem:[#allocation5 + $0x560] ss:$16 sps:$4 sm:$0xff]  }
  0x90   :  { %1603 = vmatpush2.bf16.msra.mxu1 %v6650_v0  ;;  %1563 = vmatprep.subr.bf16.mxu0 %v6651_v1  ;;  %v6742_v0 = vld [vmem:[#allocation5 + $0x544] ss:$16 sps:$4 sm:$0xff]   ;;  %v6745_v1 = vld [vmem:[#allocation5 + $0x4c] ss:$16 sps:$4 sm:$0xff]  }
  0x91   :  { %1604 = vmatprep.subr.bf16.mxu1 %v6653_v2  ;;  %v6740_v2 = vld [vmem:[#allocation5 + $0x540] ss:$16 sps:$4 sm:$0xff]  }
  0x93   :  { %1564 = vmatpush2.bf16.msra.mxu0 %v6655_v3  ;;  %v6743_v3 = vld [vmem:[#allocation5 + $0x48] ss:$16 sps:$4 sm:$0xff]  }
  0x94   :  { %1605 = vmatpush2.bf16.msra.mxu1 %v6656_v4  ;;  %1615 = vmatprep.subr.bf16.mxu0 %v6663_v5  ;;  %v6748_v4 = vld [vmem:[#allocation5 + $0x524] ss:$16 sps:$4 sm:$0xff]   ;;  %v6751_v5 = vld [vmem:[#allocation5 + $0x2c] ss:$16 sps:$4 sm:$0xff]  }
  0x95   :  { %1656 = vmatprep.subr.bf16.mxu1 %v6666_v6  ;;  %v6746_v6 = vld [vmem:[#allocation5 + $0x520] ss:$16 sps:$4 sm:$0xff]  }
  0x96   :  { %1566 = vmatmul.mubr.bf16.vlgmr.msra.gmra.mxu0 %v7950_v7 }
  0x97   :  { %1607 = vmatmul.mubr.bf16.vlgmr.msra.gmra.mxu1 %v7952_v8  ;;  %1616 = vmatpush1.bf16.msra.mxu0 %v6661_v9  ;;  %v6749_v9 = vld [vmem:[#allocation5 + $0x28] ss:$16 sps:$4 sm:$0xff]  }
  0x98   :  { %1657 = vmatpush1.bf16.msra.mxu1 %v6664_v10  ;;  %1617 = vmatprep.subr.bf16.mxu0 %v6669_v11  ;;  %v6754_v10 = vld [vmem:[#allocation5 + $0x504] ss:$16 sps:$4 sm:$0xff]   ;;  %v6757_v11 = vld [vmem:[#allocation5 + $0xc] ss:$16 sps:$4 sm:$0xff]  }
  0x99   :  { %1658 = vmatprep.subr.bf16.mxu1 %v6672_v12  ;;  %1688 = vmatprep.mubr.bf16.mxu1 %v7834_v17  ;;  %v6752_v12 = vld [vmem:[#allocation5 + $0x500] ss:$16 sps:$4 sm:$0xff]  }
  0x9a   :  { %1647 = vmatprep.mubr.bf16.mxu0 %v7961_v36 }
  0x9b   :  { %1618 = vmatpush1.bf16.msra.mxu0 %v6667_v13  ;;  %v6755_v13 = vld [vmem:[#allocation5 + $0x8] ss:$16 sps:$4 sm:$0xff]  }
  0x9c   :  { %1659 = vmatpush1.bf16.msra.mxu1 %v6670_v14  ;;  %1619 = vmatprep.subr.bf16.mxu0 %v6675_v15  ;;  %v6762_v14 = vld [vmem:[#allocation5 + $0x1ec] ss:$16 sps:$4 sm:$0xff]  }
  0x9d   :  { %1660 = vmatprep.subr.bf16.mxu1 %v6678_v16  ;;  %v6765_v15 = vld [vmem:[#allocation5 + $0x2ec] ss:$16 sps:$4 sm:$0xff]   ;;  %v7967_v16 = vcombine.low %v7957_v34, %v7957_v34  ;;  %v6784_v34 = vld [vmem:[#allocation5 + $0x168] ss:$16 sps:$4 sm:$0xff]  }
  0x9f   :  { %1620 = vmatpush1.bf16.msra.mxu0 %v6673_v18  ;;  %v6760_v18 = vld [vmem:[#allocation5 + $0x1e8] ss:$16 sps:$4 sm:$0xff]  }
  0xa0   :  { %1661 = vmatpush1.bf16.msra.mxu1 %v6676_v19  ;;  %1621 = vmatprep.subr.bf16.mxu0 %v6681_v20  ;;  %v6763_v19 = vld [vmem:[#allocation5 + $0x2e8] ss:$16 sps:$4 sm:$0xff]   ;;  %v6768_v20 = vld [vmem:[#allocation5 + $0x1cc] ss:$16 sps:$4 sm:$0xff]  }
  0xa1   :  { %1662 = vmatprep.subr.bf16.mxu1 %v6684_v21  ;;  %v6771_v21 = vld [vmem:[#allocation5 + $0x2cc] ss:$16 sps:$4 sm:$0xff]  }
  0xa3   :  { %1622 = vmatpush1.bf16.msra.mxu0 %v6679_v22  ;;  %v6766_v22 = vld [vmem:[#allocation5 + $0x1c8] ss:$16 sps:$4 sm:$0xff]  }
  0xa4   :  { %1663 = vmatpush1.bf16.msra.mxu1 %v6682_v23  ;;  %1623 = vmatprep.subr.bf16.mxu0 %v6687_v24  ;;  %v6769_v23 = vld [vmem:[#allocation5 + $0x2c8] ss:$16 sps:$4 sm:$0xff]   ;;  %v6774_v24 = vld [vmem:[#allocation5 + $0x1ac] ss:$16 sps:$4 sm:$0xff]  }
  0xa5   :  { %1664 = vmatprep.subr.bf16.mxu1 %v6690_v25  ;;  %v6777_v25 = vld [vmem:[#allocation5 + $0x2ac] ss:$16 sps:$4 sm:$0xff]  }
  0xa7   :  { %1624 = vmatpush1.bf16.msra.mxu0 %v6685_v26  ;;  %v6772_v26 = vld [vmem:[#allocation5 + $0x1a8] ss:$16 sps:$4 sm:$0xff]  }
  0xa8   :  { %1665 = vmatpush1.bf16.msra.mxu1 %v6688_v27  ;;  %1625 = vmatprep.subr.bf16.mxu0 %v6693_v28  ;;  %v6775_v27 = vld [vmem:[#allocation5 + $0x2a8] ss:$16 sps:$4 sm:$0xff]   ;;  %v6780_v28 = vld [vmem:[#allocation5 + $0x18c] ss:$16 sps:$4 sm:$0xff]  }
  0xa9   :  { %1666 = vmatprep.subr.bf16.mxu1 %v6696_v29  ;;  %v6783_v29 = vld [vmem:[#allocation5 + $0x28c] ss:$16 sps:$4 sm:$0xff]  }
  0xab   :  { %1626 = vmatpush1.bf16.msra.mxu0 %v6691_v30  ;;  %v6778_v30 = vld [vmem:[#allocation5 + $0x188] ss:$16 sps:$4 sm:$0xff]  }
  0xac   :  { %1667 = vmatpush1.bf16.msra.mxu1 %v6694_v31  ;;  %1627 = vmatprep.subr.bf16.mxu0 %v6699_v32  ;;  %v6781_v31 = vld [vmem:[#allocation5 + $0x288] ss:$16 sps:$4 sm:$0xff]   ;;  %v6786_v32 = vld [vmem:[#allocation5 + $0x16c] ss:$16 sps:$4 sm:$0xff]  }
  0xad   :  { %1668 = vmatprep.subr.bf16.mxu1 %v6702_v33  ;;  %v6789_v33 = vld [vmem:[#allocation5 + $0x26c] ss:$16 sps:$4 sm:$0xff]  }
  0xaf   :  { %1628 = vmatpush1.bf16.msra.mxu0 %v6697_v35  ;;  %v6792_v35 = vld [vmem:[#allocation5 + $0x14c] ss:$16 sps:$4 sm:$0xff]  }
  0xb0   :  { %1669 = vmatpush1.bf16.msra.mxu1 %v6700_v37  ;;  %1629 = vmatprep.subr.bf16.mxu0 %v6705_v38  ;;  %v6795_v37 = vld [vmem:[#allocation5 + $0x24c] ss:$16 sps:$4 sm:$0xff]   ;;  %v6790_v38 = vld [vmem:[#allocation5 + $0x148] ss:$16 sps:$4 sm:$0xff]  }
  0xb1   :  { %1670 = vmatprep.subr.bf16.mxu1 %v6708_v39  ;;  %v6793_v39 = vld [vmem:[#allocation5 + $0x248] ss:$16 sps:$4 sm:$0xff]  }
  0xb3   :  { %1630 = vmatpush1.bf16.msra.mxu0 %v6703_v40  ;;  %v6798_v40 = vld [vmem:[#allocation5 + $0x12c] ss:$16 sps:$4 sm:$0xff]  }
  0xb4   :  { %1671 = vmatpush1.bf16.msra.mxu1 %v6706_v41  ;;  %1631 = vmatprep.subr.bf16.mxu0 %v6711_v42  ;;  %v6801_v41 = vld [vmem:[#allocation5 + $0x22c] ss:$16 sps:$4 sm:$0xff]   ;;  %v6796_v42 = vld [vmem:[#allocation5 + $0x128] ss:$16 sps:$4 sm:$0xff]  }
  0xb5   :  { %1697 = vmatprep.subr.bf16.mxu1 %v6715_v43  ;;  %v6799_v43 = vld [vmem:[#allocation5 + $0x228] ss:$16 sps:$4 sm:$0xff]  }
  0xb7   :  { %1689 = vmatmul.mubr.bf16.vlgmr.msra.gmra.mxu1 %v6712_v45  ;;  %1632 = vmatpush2.bf16.msra.mxu0 %v6709_v44  ;;  %v6804_v44 = vld [vmem:[#allocation5 + $0x10c] ss:$16 sps:$4 sm:$0xff]  }
  0xb8   :  { %1698 = vmatpush1.bf16.msra.mxu1 %v6713_v46  ;;  %1633 = vmatprep.subr.bf16.mxu0 %v6718_v47  ;;  %v6807_v45 = vld [vmem:[#allocation5 + $0x20c] ss:$16 sps:$4 sm:$0xff]   ;;  %v6802_v46 = vld [vmem:[#allocation5 + $0x108] ss:$16 sps:$4 sm:$0xff]  }
  0xb9   :  { %1699 = vmatprep.subr.bf16.mxu1 %v6721_v49  ;;  %1729 = vmatprep.mubr.bf16.mxu1 %v7944_v48  ;;  %v6737_v48 = vld [vmem:[#allocation5 + $0x68] ss:$16 sps:$4 sm:$0xff]   ;;  %v6810_v49 = vld [vmem:[#allocation5 + $0x3ec] ss:$16 sps:$4 sm:$0xff]  }
  0xba   :  { %v6805_v47 = vld [vmem:[#allocation5 + $0x208] ss:$16 sps:$4 sm:$0xff]  }
  0xbb   :  { %1634 = vmatpush2.bf16.msra.mxu0 %v6716_v50  ;;  %v6813_v50 = vld [vmem:[#allocation5 + $0x4ec] ss:$16 sps:$4 sm:$0xff]  }
  0xbc   :  { %1700 = vmatpush1.bf16.msra.mxu1 %v6719_v51  ;;  %1635 = vmatprep.subr.bf16.mxu0 %v6724_v53  ;;  %v6808_v51 = vld [vmem:[#allocation5 + $0x3e8] ss:$16 sps:$4 sm:$0xff]  }
  0xbd   :  { %1701 = vmatprep.subr.bf16.mxu1 %v6727_v54  ;;  %v6811_v53 = vld [vmem:[#allocation5 + $0x4e8] ss:$16 sps:$4 sm:$0xff]   ;;  %v6816_v54 = vld [vmem:[#allocation5 + $0x3cc] ss:$16 sps:$4 sm:$0xff]  }
  0xbf   :  { %1636 = vmatpush2.bf16.msra.mxu0 %v6722_v55  ;;  %v6819_v55 = vld [vmem:[#allocation5 + $0x4cc] ss:$16 sps:$4 sm:$0xff]  }
  0xc0   :  { %1702 = vmatpush1.bf16.msra.mxu1 %v6725_v56  ;;  %1637 = vmatprep.subr.bf16.mxu0 %v6730_v57  ;;  %v6814_v56 = vld [vmem:[#allocation5 + $0x3c8] ss:$16 sps:$4 sm:$0xff]  }
  0xc1   :  { %1703 = vmatprep.subr.bf16.mxu1 %v6733_v58  ;;  %v6817_v57 = vld [vmem:[#allocation5 + $0x4c8] ss:$16 sps:$4 sm:$0xff]   ;;  %v6822_v58 = vld [vmem:[#allocation5 + $0x3ac] ss:$16 sps:$4 sm:$0xff]  }
  0xc3   :  { %1638 = vmatpush2.bf16.msra.mxu0 %v6728_v59  ;;  %v6825_v59 = vld [vmem:[#allocation5 + $0x4ac] ss:$16 sps:$4 sm:$0xff]  }
  0xc4   :  { %1704 = vmatpush1.bf16.msra.mxu1 %v6731_v60  ;;  %1639 = vmatprep.subr.bf16.mxu0 %v6736_v61  ;;  %v6820_v60 = vld [vmem:[#allocation5 + $0x3a8] ss:$16 sps:$4 sm:$0xff]  }
  0xc5   :  { %1705 = vmatprep.subr.bf16.mxu1 %v6739_v62  ;;  %v6823_v61 = vld [vmem:[#allocation5 + $0x4a8] ss:$16 sps:$4 sm:$0xff]   ;;  %v6828_v62 = vld [vmem:[#allocation5 + $0x38c] ss:$16 sps:$4 sm:$0xff]  }
  0xc7   :  { %1640 = vmatpush2.bf16.msra.mxu0 %v6734_v63  ;;  %v6831_v63 = vld [vmem:[#allocation5 + $0x48c] ss:$16 sps:$4 sm:$0xff]  }
  0xc8   :  { %1706 = vmatpush1.bf16.msra.mxu1 %v6737_v48  ;;  %1641 = vmatprep.subr.bf16.mxu0 %v6742_v0  ;;  %v6826_v48 = vld [vmem:[#allocation5 + $0x388] ss:$16 sps:$4 sm:$0xff]   ;;  %v6834_v0 = vld [vmem:[#allocation5 + $0x36c] ss:$16 sps:$4 sm:$0xff]  }
  0xc9   :  { %1707 = vmatprep.subr.bf16.mxu1 %v6745_v1  ;;  %v6837_v1 = vld [vmem:[#allocation5 + $0x46c] ss:$16 sps:$4 sm:$0xff]  }
  0xcb   :  { %1642 = vmatpush2.bf16.msra.mxu0 %v6740_v2  ;;  %v6832_v2 = vld [vmem:[#allocation5 + $0x368] ss:$16 sps:$4 sm:$0xff]  }
  0xcc   :  { %1708 = vmatpush1.bf16.msra.mxu1 %v6743_v3  ;;  %1643 = vmatprep.subr.bf16.mxu0 %v6748_v4  ;;  %v6835_v3 = vld [vmem:[#allocation5 + $0x468] ss:$16 sps:$4 sm:$0xff]   ;;  %v6840_v4 = vld [vmem:[#allocation5 + $0x34c] ss:$16 sps:$4 sm:$0xff]  }
  0xcd   :  { %1709 = vmatprep.subr.bf16.mxu1 %v6751_v5  ;;  %v6843_v5 = vld [vmem:[#allocation5 + $0x44c] ss:$16 sps:$4 sm:$0xff]  }
  0xcf   :  { %1644 = vmatpush2.bf16.msra.mxu0 %v6746_v6  ;;  %v6841_v6 = vld [vmem:[#allocation5 + $0x448] ss:$16 sps:$4 sm:$0xff]  }
  0xd0   :  { %1710 = vmatpush1.bf16.msra.mxu1 %v6749_v9  ;;  %1645 = vmatprep.subr.bf16.mxu0 %v6754_v10  ;;  %v6846_v9 = vld [vmem:[#allocation5 + $0x32c] ss:$16 sps:$4 sm:$0xff]  }
  0xd1   :  { %1711 = vmatprep.subr.bf16.mxu1 %v6757_v11  ;;  %v6849_v10 = vld [vmem:[#allocation5 + $0x42c] ss:$16 sps:$4 sm:$0xff]   ;;  %v6844_v11 = vld [vmem:[#allocation5 + $0x328] ss:$16 sps:$4 sm:$0xff]  }
  0xd3   :  { %1646 = vmatpush2.bf16.msra.mxu0 %v6752_v12  ;;  %v6847_v12 = vld [vmem:[#allocation5 + $0x428] ss:$16 sps:$4 sm:$0xff]  }
  0xd4   :  { %1712 = vmatpush1.bf16.msra.mxu1 %v6755_v13  ;;  %1738 = vmatprep.subr.bf16.mxu0 %v6765_v15  ;;  %v6852_v13 = vld [vmem:[#allocation5 + $0x30c] ss:$16 sps:$4 sm:$0xff]   ;;  %v6850_v15 = vld [vmem:[#allocation5 + $0x308] ss:$16 sps:$4 sm:$0xff]  }
  0xd5   :  { %1713 = vmatprep.subr.bf16.mxu1 %v6762_v14  ;;  %v6855_v14 = vld [vmem:[#allocation5 + $0x40c] ss:$16 sps:$4 sm:$0xff]  }
  0xd6   :  { %1648 = vmatmul.mubr.bf16.vlgmr.msra.gmra.mxu0 %v7967_v16 }
  0xd7   :  { %1739 = vmatpush1.bf16.msra.mxu0 %v6763_v19  ;;  %1770 = vmatprep.mubr.bf16.mxu0 %v7946_v52  ;;  %v6787_v52 = vld [vmem:[#allocation5 + $0x268] ss:$16 sps:$4 sm:$0xff]   ;;  %v6858_v19 = vld [vmem:[#allocation5 + $0x5ec] ss:$16 sps:$4 sm:$0xff]  }
  0xd8   :  { %1714 = vmatpush2.bf16.msra.mxu1 %v6760_v18  ;;  %1740 = vmatprep.subr.bf16.mxu0 %v6771_v21  ;;  %v6853_v18 = vld [vmem:[#allocation5 + $0x408] ss:$16 sps:$4 sm:$0xff]  }
  0xd9   :  { %1715 = vmatprep.subr.bf16.mxu1 %v6768_v20  ;;  %v6861_v20 = vld [vmem:[#allocation5 + $0x6ec] ss:$16 sps:$4 sm:$0xff]   ;;  %v6856_v21 = vld [vmem:[#allocation5 + $0x5e8] ss:$16 sps:$4 sm:$0xff]  }
  0xdb   :  { %1741 = vmatpush1.bf16.msra.mxu0 %v6769_v23  ;;  %v6864_v23 = vld [vmem:[#allocation5 + $0x5cc] ss:$16 sps:$4 sm:$0xff]  }
  0xdc   :  { %1716 = vmatpush2.bf16.msra.mxu1 %v6766_v22  ;;  %1742 = vmatprep.subr.bf16.mxu0 %v6777_v25  ;;  %v6859_v22 = vld [vmem:[#allocation5 + $0x6e8] ss:$16 sps:$4 sm:$0xff]  }
  0xdd   :  { %1717 = vmatprep.subr.bf16.mxu1 %v6774_v24  ;;  %v6867_v24 = vld [vmem:[#allocation5 + $0x6cc] ss:$16 sps:$4 sm:$0xff]   ;;  %v6862_v25 = vld [vmem:[#allocation5 + $0x5c8] ss:$16 sps:$4 sm:$0xff]  }
  0xdf   :  { %1743 = vmatpush1.bf16.msra.mxu0 %v6775_v27  ;;  %v6870_v27 = vld [vmem:[#allocation5 + $0x5ac] ss:$16 sps:$4 sm:$0xff]  }
  0xe0   :  { %1718 = vmatpush2.bf16.msra.mxu1 %v6772_v26  ;;  %1744 = vmatprep.subr.bf16.mxu0 %v6783_v29  ;;  %v6865_v26 = vld [vmem:[#allocation5 + $0x6c8] ss:$16 sps:$4 sm:$0xff]  }
  0xe1   :  { %1719 = vmatprep.subr.bf16.mxu1 %v6780_v28  ;;  %v6873_v28 = vld [vmem:[#allocation5 + $0x6ac] ss:$16 sps:$4 sm:$0xff]   ;;  %v6868_v29 = vld [vmem:[#allocation5 + $0x5a8] ss:$16 sps:$4 sm:$0xff]  }
  0xe3   :  { %1745 = vmatpush1.bf16.msra.mxu0 %v6781_v31  ;;  %v6876_v31 = vld [vmem:[#allocation5 + $0x58c] ss:$16 sps:$4 sm:$0xff]  }
  0xe4   :  { %1720 = vmatpush2.bf16.msra.mxu1 %v6778_v30  ;;  %1746 = vmatprep.subr.bf16.mxu0 %v6789_v33  ;;  %v6871_v30 = vld [vmem:[#allocation5 + $0x6a8] ss:$16 sps:$4 sm:$0xff]  }
  0xe5   :  { %1721 = vmatprep.subr.bf16.mxu1 %v6786_v32  ;;  %v6879_v32 = vld [vmem:[#allocation5 + $0x68c] ss:$16 sps:$4 sm:$0xff]   ;;  %v6874_v33 = vld [vmem:[#allocation5 + $0x588] ss:$16 sps:$4 sm:$0xff]  }
  0xe7   :  { %1747 = vmatpush1.bf16.msra.mxu0 %v6787_v52  ;;  %v6882_v52 = vld [vmem:[#allocation5 + $0x56c] ss:$16 sps:$4 sm:$0xff]  }
  0xe8   :  { %1722 = vmatpush2.bf16.msra.mxu1 %v6784_v34  ;;  %1748 = vmatprep.subr.bf16.mxu0 %v6795_v37  ;;  %v6877_v34 = vld [vmem:[#allocation5 + $0x688] ss:$16 sps:$4 sm:$0xff]  }
  0xe9   :  { %1723 = vmatprep.subr.bf16.mxu1 %v6792_v35  ;;  %v6880_v35 = vld [vmem:[#allocation5 + $0x568] ss:$16 sps:$4 sm:$0xff]  }
  0xea   :  { %v6883_v37 = vld [vmem:[#allocation5 + $0x668] ss:$16 sps:$4 sm:$0xff]  }
  0xeb   :  { %1749 = vmatpush1.bf16.msra.mxu0 %v6793_v39  ;;  %v6886_v39 = vld [vmem:[#allocation5 + $0x548] ss:$16 sps:$4 sm:$0xff]  }
  0xec   :  { %1724 = vmatpush2.bf16.msra.mxu1 %v6790_v38  ;;  %1750 = vmatprep.subr.bf16.mxu0 %v6801_v41  ;;  %v6891_v38 = vld [vmem:[#allocation5 + $0x64c] ss:$16 sps:$4 sm:$0xff]  }
  0xed   :  { %1725 = vmatprep.subr.bf16.mxu1 %v6798_v40  ;;  %v6889_v40 = vld [vmem:[#allocation5 + $0x648] ss:$16 sps:$4 sm:$0xff]   ;;  %v6894_v41 = vld [vmem:[#allocation5 + $0x52c] ss:$16 sps:$4 sm:$0xff]  }
  0xef   :  { %1751 = vmatpush1.bf16.msra.mxu0 %v6799_v43  ;;  %v6892_v43 = vld [vmem:[#allocation5 + $0x528] ss:$16 sps:$4 sm:$0xff]  }
  0xf0   :  { %1726 = vmatpush2.bf16.msra.mxu1 %v6796_v42  ;;  %1752 = vmatprep.subr.bf16.mxu0 %v6807_v45  ;;  %v6897_v42 = vld [vmem:[#allocation5 + $0x62c] ss:$16 sps:$4 sm:$0xff]  }
  0xf1   :  { %1727 = vmatprep.subr.bf16.mxu1 %v6804_v44  ;;  %v6895_v44 = vld [vmem:[#allocation5 + $0x628] ss:$16 sps:$4 sm:$0xff]   ;;  %v6900_v45 = vld [vmem:[#allocation5 + $0x50c] ss:$16 sps:$4 sm:$0xff]  }
  0xf3   :  { %1753 = vmatpush1.bf16.msra.mxu0 %v6805_v47  ;;  %v6898_v47 = vld [vmem:[#allocation5 + $0x508] ss:$16 sps:$4 sm:$0xff]  }
  0xf4   :  { %1728 = vmatpush2.bf16.msra.mxu1 %v6802_v46  ;;  %1754 = vmatprep.subr.bf16.mxu0 %v6810_v49  ;;  %v6903_v46 = vld [vmem:[#allocation5 + $0x60c] ss:$16 sps:$4 sm:$0xff]   ;;  %v6901_v49 = vld [vmem:[#allocation5 + $0x608] ss:$16 sps:$4 sm:$0xff]  }
  0xf5   :  { %1779 = vmatprep.subr.bf16.mxu1 %v6813_v50  ;;  %v6906_v50 = vld [vmem:[#allocation7 + $0xe4] ss:$16 sps:$4 sm:$0xff]  }
  0xf7   :  { %1730 = vmatmul.mubr.bf16.vlgmr.msra.gmra.mxu1 %v7950_v7  ;;  %1755 = vmatpush2.bf16.msra.mxu0 %v6808_v51  ;;  %v6829_v7 = vld [vmem:[#allocation5 + $0x488] ss:$16 sps:$4 sm:$0xff]   ;;  %v6904_v51 = vld [vmem:[#allocation7 + $0xe0] ss:$16 sps:$4 sm:$0xff]  }
  0xf8   :  { %1780 = vmatpush1.bf16.msra.mxu1 %v6811_v53  ;;  %1756 = vmatprep.subr.bf16.mxu0 %v6816_v54  ;;  %v6909_v53 = vld [vmem:[#allocation7 + $0xc4] ss:$16 sps:$4 sm:$0xff]   ;;  %v6907_v54 = vld [vmem:[#allocation7 + $0xc0] ss:$16 sps:$4 sm:$0xff]  }
  0xf9   :  { %1781 = vmatprep.subr.bf16.mxu1 %v6819_v55  ;;  %1811 = vmatprep.mubr.bf16.mxu1 %v7961_v36  ;;  %v6838_v36 = vld [vmem:[#allocation5 + $0x348] ss:$16 sps:$4 sm:$0xff]   ;;  %v7676_v55 = vld [vmem:[#allocation3 + $0x18] ss:$0 sps:$4 sm:$0xff]  }
  0xfb   :  { %1757 = vmatpush2.bf16.msra.mxu0 %v6814_v56  ;;  %v6912_v56 = vld [vmem:[#allocation7 + $0xa4] ss:$16 sps:$4 sm:$0xff]  }
  0xfc   :  { %1782 = vmatpush1.bf16.msra.mxu1 %v6817_v57  ;;  %1758 = vmatprep.subr.bf16.mxu0 %v6822_v58  ;;  %v6910_v57 = vld [vmem:[#allocation7 + $0xa0] ss:$16 sps:$4 sm:$0xff]   ;;  %v6915_v58 = vld [vmem:[#allocation7 + $0x84] ss:$16 sps:$4 sm:$0xff]  }
  0xfd   :  { %1783 = vmatprep.subr.bf16.mxu1 %v6825_v59  ;;  %v6913_v59 = vld [vmem:[#allocation7 + $0x80] ss:$16 sps:$4 sm:$0xff]  }
  0xff   :  { %1759 = vmatpush2.bf16.msra.mxu0 %v6820_v60  ;;  %v6918_v60 = vld [vmem:[#allocation7 + $0x64] ss:$16 sps:$4 sm:$0xff]  }
 0x100   :  { %1784 = vmatpush1.bf16.msra.mxu1 %v6823_v61  ;;  %1760 = vmatprep.subr.bf16.mxu0 %v6828_v62  ;;  %v6976_v61 = vld [vmem:[#allocation7 + $0x2e0] ss:$16 sps:$4 sm:$0xff]   ;;  %v6978_v62 = vld [vmem:[#allocation7 + $0x2e4] ss:$16 sps:$4 sm:$0xff]  }
 0x101   :  { %1785 = vmatprep.subr.bf16.mxu1 %v6831_v63  ;;  %v6916_v63 = vld [vmem:[#allocation7 + $0x60] ss:$16 sps:$4 sm:$0xff]  }
 0x103   :  { %1761 = vmatpush2.bf16.msra.mxu0 %v6826_v48  ;;  %v6982_v48 = vld [vmem:[#allocation7 + $0x2c0] ss:$16 sps:$4 sm:$0xff]  }
 0x104   :  { %1786 = vmatpush1.bf16.msra.mxu1 %v6829_v7  ;;  %1762 = vmatprep.subr.bf16.mxu0 %v6834_v0  ;;  %v6984_v7 = vld [vmem:[#allocation7 + $0x2c4] ss:$16 sps:$4 sm:$0xff]   ;;  %v6919_v0 = vld [vmem:[#allocation7 + $0x40] ss:$16 sps:$4 sm:$0xff]  }
 0x105   :  { %1787 = vmatprep.subr.bf16.mxu1 %v6837_v1  ;;  %v6924_v1 = vld [vmem:[#allocation7 + $0x24] ss:$16 sps:$4 sm:$0xff]  }
 0x107   :  { %1763 = vmatpush2.bf16.msra.mxu0 %v6832_v2  ;;  %v6988_v2 = vld [vmem:[#allocation7 + $0x2a0] ss:$16 sps:$4 sm:$0xff]  }
 0x108   :  { %1788 = vmatpush1.bf16.msra.mxu1 %v6835_v3  ;;  %1764 = vmatprep.subr.bf16.mxu0 %v6840_v4  ;;  %v6990_v3 = vld [vmem:[#allocation7 + $0x2a4] ss:$16 sps:$4 sm:$0xff]   ;;  %v6922_v4 = vld [vmem:[#allocation7 + $0x20] ss:$16 sps:$4 sm:$0xff]  }
 0x109   :  { %1789 = vmatprep.subr.bf16.mxu1 %v6843_v5  ;;  %v6927_v5 = vld [vmem:[#allocation7 + $0x4] ss:$16 sps:$4 sm:$0xff]  }
 0x10b   :  { %1765 = vmatpush2.bf16.msra.mxu0 %v6838_v36  ;;  %v6994_v36 = vld [vmem:[#allocation7 + $0x280] ss:$16 sps:$4 sm:$0xff]  }
 0x10c   :  { %1790 = vmatpush1.bf16.msra.mxu1 %v6841_v6  ;;  %1766 = vmatprep.subr.bf16.mxu0 %v6846_v9  ;;  %v6996_v6 = vld [vmem:[#allocation7 + $0x284] ss:$16 sps:$4 sm:$0xff]   ;;  %v6925_v9 = vld [vmem:[#allocation7] ss:$16 sps:$4 sm:$0xff]  }
 0x10d   :  { %1791 = vmatprep.subr.bf16.mxu1 %v6849_v10  ;;  %v6930_v10 = vld [vmem:[#allocation7 + $0x1e4] ss:$16 sps:$4 sm:$0xff]  }
 0x10f   :  { %1767 = vmatpush2.bf16.msra.mxu0 %v6844_v11  ;;  %v7000_v11 = vld [vmem:[#allocation7 + $0x260] ss:$16 sps:$4 sm:$0xff]  }
 0x110   :  { %1792 = vmatpush1.bf16.msra.mxu1 %v6847_v12  ;;  %1768 = vmatprep.subr.bf16.mxu0 %v6852_v13  ;;  %v7002_v12 = vld [vmem:[#allocation7 + $0x264] ss:$16 sps:$4 sm:$0xff]   ;;  %v6928_v13 = vld [vmem:[#allocation7 + $0x1e0] ss:$16 sps:$4 sm:$0xff]  }
 0x111   :  { %1793 = vmatprep.subr.bf16.mxu1 %v6855_v14  ;;  %v6933_v14 = vld [vmem:[#allocation7 + $0x1c4] ss:$16 sps:$4 sm:$0xff]  }
 0x113   :  { %1769 = vmatpush2.bf16.msra.mxu0 %v6850_v15  ;;  %v6931_v15 = vld [vmem:[#allocation7 + $0x1c0] ss:$16 sps:$4 sm:$0xff]  }
 0x114   :  { %1794 = vmatpush1.bf16.msra.mxu1 %v6853_v18  ;;  %1820 = vmatprep.subr.bf16.mxu0 %v6861_v20  ;;  %v7008_v18 = vld [vmem:[#allocation7 + $0x244] ss:$16 sps:$4 sm:$0xff]  }
 0x115   :  { %1795 = vmatprep.subr.bf16.mxu1 %v6858_v19 }
 0x116   :  { %1771 = vmatmul.mubr.bf16.vlgmr.msra.gmra.mxu0 %v7952_v8  ;;  %v6885_v8 = vld [vmem:[#allocation5 + $0x66c] ss:$16 sps:$4 sm:$0xff]  }
 0x117   :  { %1821 = vmatpush1.bf16.msra.mxu0 %v6859_v22  ;;  %1852 = vmatprep.mubr.bf16.mxu0 %v7834_v17  ;;  %v6888_v17 = vld [vmem:[#allocation5 + $0x54c] ss:$16 sps:$4 sm:$0xff]   ;;  %v7006_v22 = vld [vmem:[#allocation7 + $0x240] ss:$16 sps:$4 sm:$0xff]  }
 0x118   :  { %1796 = vmatpush2.bf16.msra.mxu1 %v6856_v21  ;;  %1822 = vmatprep.subr.bf16.mxu0 %v6867_v24  ;;  %v6936_v21 = vld [vmem:[#allocation7 + $0x1a4] ss:$16 sps:$4 sm:$0xff]  }
 0x119   :  { %1797 = vmatprep.subr.bf16.mxu1 %v6864_v23 }
 0x11b   :  { %1823 = vmatpush1.bf16.msra.mxu0 %v6865_v26 }
 0x11c   :  { %1798 = vmatpush2.bf16.msra.mxu1 %v6862_v25  ;;  %1824 = vmatprep.subr.bf16.mxu0 %v6873_v28  ;;  %v7014_v25 = vld [vmem:[#allocation7 + $0x224] ss:$16 sps:$4 sm:$0xff]   ;;  %v6934_v28 = vld [vmem:[#allocation7 + $0x1a0] ss:$16 sps:$4 sm:$0xff]  }
 0x11d   :  { %1799 = vmatprep.subr.bf16.mxu1 %v6870_v27 }
 0x11f   :  { %1825 = vmatpush1.bf16.msra.mxu0 %v6871_v30 }
 0x120   :  { %1800 = vmatpush2.bf16.msra.mxu1 %v6868_v29  ;;  %1826 = vmatprep.subr.bf16.mxu0 %v6879_v32  ;;  %v7012_v29 = vld [vmem:[#allocation7 + $0x220] ss:$16 sps:$4 sm:$0xff]   ;;  %v6939_v32 = vld [vmem:[#allocation7 + $0x184] ss:$16 sps:$4 sm:$0xff]  }
 0x121   :  { %1801 = vmatprep.subr.bf16.mxu1 %v6876_v31 }
 0x123   :  { %1827 = vmatpush1.bf16.msra.mxu0 %v6877_v34  ;;  %v7020_v34 = vld [vmem:[#allocation7 + $0x204] ss:$16 sps:$4 sm:$0xff]  }
 0x124   :  { %1802 = vmatpush2.bf16.msra.mxu1 %v6874_v33  ;;  %1828 = vmatprep.subr.bf16.mxu0 %v6885_v8  ;;  %v7018_v33 = vld [vmem:[#allocation7 + $0x200] ss:$16 sps:$4 sm:$0xff]   ;;  %v6942_v8 = vld [vmem:[#allocation7 + $0x164] ss:$16 sps:$4 sm:$0xff]  }
 0x125   :  { %1803 = vmatprep.subr.bf16.mxu1 %v6882_v52  ;;  %v6937_v52 = vld [vmem:[#allocation7 + $0x180] ss:$16 sps:$4 sm:$0xff]  }
 0x127   :  { %1829 = vmatpush1.bf16.msra.mxu0 %v6883_v37  ;;  %v7026_v37 = vld [vmem:[#allocation7 + $0x3e4] ss:$16 sps:$4 sm:$0xff]  }
 0x128   :  { %1804 = vmatpush2.bf16.msra.mxu1 %v6880_v35  ;;  %1830 = vmatprep.subr.bf16.mxu0 %v6891_v38  ;;  %v7024_v35 = vld [vmem:[#allocation7 + $0x3e0] ss:$16 sps:$4 sm:$0xff]   ;;  %v7029_v38 = vld [vmem:[#allocation7 + $0x3c4] ss:$16 sps:$4 sm:$0xff]  }
 0x129   :  { %1805 = vmatprep.subr.bf16.mxu1 %v6888_v17  ;;  %v6940_v17 = vld [vmem:[#allocation7 + $0x160] ss:$16 sps:$4 sm:$0xff]  }
 0x12b   :  { %1831 = vmatpush1.bf16.msra.mxu0 %v6889_v40  ;;  %v7027_v40 = vld [vmem:[#allocation7 + $0x3c0] ss:$16 sps:$4 sm:$0xff]  }
 0x12c   :  { %1806 = vmatpush2.bf16.msra.mxu1 %v6886_v39  ;;  %1832 = vmatprep.subr.bf16.mxu0 %v6897_v42  ;;  %v6945_v39 = vld [vmem:[#allocation7 + $0x144] ss:$16 sps:$4 sm:$0xff]  }
 0x12d   :  { %1807 = vmatprep.subr.bf16.mxu1 %v6894_v41  ;;  %v6943_v41 = vld [vmem:[#allocation7 + $0x140] ss:$16 sps:$4 sm:$0xff]   ;;  %v7032_v42 = vld [vmem:[#allocation7 + $0x3a4] ss:$16 sps:$4 sm:$0xff]  }
 0x12f   :  { %1833 = vmatpush1.bf16.msra.mxu0 %v6895_v44  ;;  %v7030_v44 = vld [vmem:[#allocation7 + $0x3a0] ss:$16 sps:$4 sm:$0xff]  }
 0x130   :  { %1808 = vmatpush2.bf16.msra.mxu1 %v6892_v43  ;;  %1834 = vmatprep.subr.bf16.mxu0 %v6903_v46  ;;  %v6948_v43 = vld [vmem:[#allocation7 + $0x124] ss:$16 sps:$4 sm:$0xff]   ;;  %v6946_v46 = vld [vmem:[#allocation7 + $0x120] ss:$16 sps:$4 sm:$0xff]  }
 0x131   :  { %1809 = vmatprep.subr.bf16.mxu1 %v6900_v45  ;;  %v7035_v45 = vld [vmem:[#allocation7 + $0x384] ss:$16 sps:$4 sm:$0xff]  }
 0x133   :  { %1835 = vmatpush1.bf16.msra.mxu0 %v6901_v49  ;;  %v7033_v49 = vld [vmem:[#allocation7 + $0x380] ss:$16 sps:$4 sm:$0xff]  }
 0x134   :  { %1810 = vmatpush2.bf16.msra.mxu1 %v6898_v47  ;;  %2667 = vmatprep.subr.bf16.mxu0 %v6906_v50  ;;  %v6951_v47 = vld [vmem:[#allocation7 + $0x104] ss:$16 sps:$4 sm:$0xff]  }
 0x135   :  { %2708 = vmatprep.subr.bf16.mxu1 %v6978_v62  ;;  %v7038_v50 = vld [vmem:[#allocation7 + $0x364] ss:$16 sps:$4 sm:$0xff]  }
 0x136   :  { %1853 = vmatmul.mubr.bf16.vlgmr.msra.gmra.mxu0 %v7676_v55  ;;  %v7041_v55 = vld [vmem:[#allocation7 + $0x344] ss:$16 sps:$4 sm:$0xff]  }
 0x137   :  { %1812 = vmatmul.mubr.bf16.vlgmr.msra.gmra.mxu1 %v7967_v16  ;;  %2668 = vmatpush1.bf16.msra.mxu0 %v6904_v51  ;;  %v6921_v16 = vld [vmem:[#allocation7 + $0x44] ss:$16 sps:$4 sm:$0xff]   ;;  %v6949_v51 = vld [vmem:[#allocation7 + $0x100] ss:$16 sps:$4 sm:$0xff]  }
 0x138   :  { %2669 = vmatprep.subr.bf16.mxu0 %v6909_v53  ;;  %2709 = vmatpush1.bf16.msra.mxu1 %v6976_v61  ;;  %v6954_v53 = vld [vmem:[#allocation7 + $0xec] ss:$16 sps:$4 sm:$0xff]   ;;  %v7042_v61 = vld [vmem:[#allocation7 + $0x320] ss:$16 sps:$4 sm:$0xff]  }
 0x139   :  { %2710 = vmatprep.subr.bf16.mxu1 %v6984_v7  ;;  %v7050_v7 = vld [vmem:[#allocation7 + $0x2ec] ss:$16 sps:$4 sm:$0xff]  }
 0x13b   :  { %2670 = vmatpush1.bf16.msra.mxu0 %v6907_v54  ;;  %v7036_v54 = vld [vmem:[#allocation7 + $0x360] ss:$16 sps:$4 sm:$0xff]  }
 0x13c   :  { %2671 = vmatprep.subr.bf16.mxu0 %v6912_v56  ;;  %2711 = vmatpush1.bf16.msra.mxu1 %v6982_v48  ;;  %v368_v48 = vlaneseq }
 0x13d   :  { %2712 = vmatprep.subr.bf16.mxu1 %v6990_v3 }
 0x13f   :  { %2672 = vmatpush1.bf16.msra.mxu0 %v6910_v57  ;;  %v7039_v57 = vld [vmem:[#allocation7 + $0x340] ss:$16 sps:$4 sm:$0xff]  }
 0x140   :  { %2673 = vmatprep.subr.bf16.mxu0 %v6915_v58  ;;  %2713 = vmatpush1.bf16.msra.mxu1 %v6988_v2 }
 0x141   :  { %2714 = vmatprep.subr.bf16.mxu1 %v6996_v6 }
 0x143   :  { %2674 = vmatpush1.bf16.msra.mxu0 %v6913_v59  ;;  %v7044_v59 = vld [vmem:[#allocation7 + $0x324] ss:$16 sps:$4 sm:$0xff]  }
 0x144   :  { %2675 = vmatprep.subr.bf16.mxu0 %v6918_v60  ;;  %2715 = vmatpush1.bf16.msra.mxu1 %v6994_v36 }
 0x145   :  { %2716 = vmatprep.subr.bf16.mxu1 %v7002_v12 }
 0x147   :  { %2676 = vmatpush1.bf16.msra.mxu0 %v6916_v63  ;;  %v7047_v63 = vld [vmem:[#allocation7 + $0x304] ss:$16 sps:$4 sm:$0xff]  }
 0x148   :  { %2677 = vmatprep.subr.bf16.mxu0 %v6921_v16  ;;  %2717 = vmatpush1.bf16.msra.mxu1 %v7000_v11  ;;  %v7045_v16 = vld [vmem:[#allocation7 + $0x300] ss:$16 sps:$4 sm:$0xff]  }
 0x149   :  { %2718 = vmatprep.subr.bf16.mxu1 %v7008_v18 }
 0x14b   :  { %2678 = vmatpush1.bf16.msra.mxu0 %v6919_v0  ;;  %v7984_v0 = vshrl.u32 %v368_v48, 7  ;;  %v7021_v48 = vld [vmem:[#allocation7 + $0x108] ss:$16 sps:$4 sm:$0xff]  }
 0x14c   :  { %2679 = vmatprep.subr.bf16.mxu0 %v6924_v1  ;;  %2719 = vmatpush1.bf16.msra.mxu1 %v7006_v22  ;;  %v7989_v1 = vld [vmem:[%s8126_s2] sm:$0xf] }
 0x14d   :  { %2720 = vmatprep.subr.bf16.mxu1 %v7014_v25  ;;  %v7992_v2 = vsub.s32 0, %v7984_v0  ;;  %v7995_v3 = vsub.s32 1, %v7984_v0 }
 0x14f   :  { %2680 = vmatpush1.bf16.msra.mxu0 %v6922_v4  ;;  %v371_v4 = vrot.slane %v7989_v1, %v7992_v2 }
 0x150   :  { %2681 = vmatprep.subr.bf16.mxu0 %v6927_v5  ;;  %2721 = vmatpush1.bf16.msra.mxu1 %v7012_v29  ;;  %v375_v5 = vrot.slane %v7989_v1, %v7995_v3  ;;  %v6957_v29 = vld [vmem:[#allocation7 + $0xcc] ss:$16 sps:$4 sm:$0xff]  }
 0x151   :  { %2722 = vmatprep.subr.bf16.mxu1 %v7020_v34  ;;  %v6966_v34 = vld [vmem:[#allocation7 + $0x6c] ss:$16 sps:$4 sm:$0xff]  }
 0x153   :  { %2682 = vmatpush1.bf16.msra.mxu0 %v6925_v9 }
 0x154   :  { %2683 = vmatprep.subr.bf16.mxu0 %v6930_v10  ;;  %2723 = vmatpush1.bf16.msra.mxu1 %v7018_v33  ;;  %v6961_v33 = vld [vmem:[#allocation7 + $0x88] ss:$16 sps:$4 sm:$0xff]  }
 0x155   :  { %2724 = vmatprep.subr.bf16.mxu1 %v7026_v37  ;;  %v6972_v37 = vld [vmem:[#allocation7 + $0x2c] ss:$16 sps:$4 sm:$0xff]  }
 0x156   :  { %v7976_v19 = vpop.f32.mrf.mxu0 }
 0x157   :  { %v7978_v20 = vpop.f32.mrf.mxu1  ;;  %2684 = vmatpush2.bf16.msra.mxu0 %v6928_v13  ;;  %v1568_v36 = vadd.f32 %v7976_v19, %v371_v4  ;;  %v7098_v4 = vld [vmem:[#allocation8 + $0xe4] ss:$16 sps:$4 sm:$0xff]  }
 0x158   :  { %v7980_v23 = vpop.f32.mrf.mxu0  ;;  %2685 = vmatprep.subr.bf16.mxu0 %v6933_v14  ;;  %2725 = vmatpush2.bf16.msra.mxu1 %v7024_v35  ;;  %v6967_v35 = vld [vmem:[#allocation7 + $0x48] ss:$16 sps:$4 sm:$0xff]  }
 0x159   :  { %v7982_v24 = vpop.f32.mrf.mxu1  ;;  %2726 = vmatprep.subr.bf16.mxu1 %v7029_v38  ;;  %v1570_v6 = vadd.f32 %v7980_v23, %v375_v5  ;;  %v1609_v9 = vadd.f32 %v7978_v20, %v1568_v36  ;;  %v6952_v23 = vld [vmem:[#allocation7 + $0xe8] ss:$16 sps:$4 sm:$0xff]   ;;  %v7101_v5 = vld [vmem:[#allocation8 + $0xc4] ss:$16 sps:$4 sm:$0xff]   ;;  %v8014_v36 = vsub.s32 2, %v7984_v0 }
 0x15a   :  { %v1571_v26 = vpop.f32.mrf.mxu0 }
 0x15b   :  { %v1612_v27 = vpop.f32.mrf.mxu1  ;;  %2686 = vmatpush2.bf16.msra.mxu0 %v6931_v15  ;;  %v1611_v11 = vadd.f32 %v7982_v24, %v1570_v6  ;;  %v6955_v24 = vld [vmem:[#allocation7 + $0xc8] ss:$16 sps:$4 sm:$0xff]   ;;  %v7099_v6 = vld [vmem:[#allocation8 + $0xc0] ss:$16 sps:$4 sm:$0xff]  }
 0x15c   :  { %v1572_v30 = vpop.f32.mrf.mxu0  ;;  %2687 = vmatprep.subr.bf16.mxu0 %v6936_v21  ;;  %2727 = vmatpush2.bf16.msra.mxu1 %v7027_v40  ;;  %v6975_v40 = vld [vmem:[#allocation7 + $0xc] ss:$16 sps:$4 sm:$0xff]  }
 0x15d   :  { %v1613_v31 = vpop.f32.mrf.mxu1  ;;  %2728 = vmatprep.subr.bf16.mxu1 %v7032_v42  ;;  %v6960_v30 = vld [vmem:[#allocation7 + $0xac] ss:$16 sps:$4 sm:$0xff]  }
 0x15e   :  { %v6958_v31 = vld [vmem:[#allocation7 + $0xa8] ss:$16 sps:$4 sm:$0xff]  }
 0x15f   :  { %2688 = vmatpush2.bf16.msra.mxu0 %v6934_v28 }
 0x160   :  { %2689 = vmatprep.subr.bf16.mxu0 %v6939_v32  ;;  %2729 = vmatpush2.bf16.msra.mxu1 %v7030_v44  ;;  %v6963_v32 = vld [vmem:[#allocation7 + $0x8c] ss:$16 sps:$4 sm:$0xff]  }
 0x161   :  { %2730 = vmatprep.subr.bf16.mxu1 %v7035_v45  ;;  %v6981_v44 = vld [vmem:[#allocation7 + $0x1ec] ss:$16 sps:$4 sm:$0xff]   ;;  %v6979_v45 = vld [vmem:[#allocation7 + $0x1e8] ss:$16 sps:$4 sm:$0xff]  }
 0x163   :  { %2690 = vmatpush2.bf16.msra.mxu0 %v6937_v52  ;;  %v6964_v52 = vld [vmem:[#allocation7 + $0x68] ss:$16 sps:$4 sm:$0xff]  }
 0x164   :  { %2691 = vmatprep.subr.bf16.mxu0 %v6942_v8  ;;  %2731 = vmatpush2.bf16.msra.mxu1 %v7033_v49  ;;  %v6969_v8 = vld [vmem:[#allocation7 + $0x4c] ss:$16 sps:$4 sm:$0xff]  }
 0x165   :  { %2732 = vmatprep.subr.bf16.mxu1 %v7038_v50  ;;  %v6993_v49 = vld [vmem:[#allocation7 + $0x1ac] ss:$16 sps:$4 sm:$0xff]   ;;  %v6991_v50 = vld [vmem:[#allocation7 + $0x1a8] ss:$16 sps:$4 sm:$0xff]  }
 0x167   :  { %2692 = vmatpush2.bf16.msra.mxu0 %v6940_v17 }
 0x168   :  { %2693 = vmatprep.subr.bf16.mxu0 %v6945_v39  ;;  %2733 = vmatpush2.bf16.msra.mxu1 %v7036_v54  ;;  %v6970_v39 = vld [vmem:[#allocation7 + $0x28] ss:$16 sps:$4 sm:$0xff]   ;;  %v7005_v54 = vld [vmem:[#allocation7 + $0x16c] ss:$16 sps:$4 sm:$0xff]  }
 0x169   :  { %2734 = vmatprep.subr.bf16.mxu1 %v7041_v55  ;;  %v7003_v55 = vld [vmem:[#allocation7 + $0x168] ss:$16 sps:$4 sm:$0xff]  }
 0x16b   :  { %2694 = vmatpush2.bf16.msra.mxu0 %v6943_v41 }
 0x16c   :  { %2695 = vmatprep.subr.bf16.mxu0 %v6948_v43  ;;  %2735 = vmatpush2.bf16.msra.mxu1 %v7039_v57  ;;  %v6973_v43 = vld [vmem:[#allocation7 + $0x8] ss:$16 sps:$4 sm:$0xff]  }
 0x16d   :  { %2736 = vmatprep.subr.bf16.mxu1 %v7044_v59  ;;  %v7009_v57 = vld [vmem:[#allocation7 + $0x148] ss:$16 sps:$4 sm:$0xff]  }
 0x16f   :  { %2696 = vmatpush2.bf16.msra.mxu0 %v6946_v46  ;;  %v6987_v46 = vld [vmem:[#allocation7 + $0x1cc] ss:$16 sps:$4 sm:$0xff]  }
 0x170   :  { %2697 = vmatprep.subr.bf16.mxu0 %v6951_v47  ;;  %2737 = vmatpush2.bf16.msra.mxu1 %v7042_v61  ;;  %v6985_v47 = vld [vmem:[#allocation7 + $0x1c8] ss:$16 sps:$4 sm:$0xff]  }
 0x171   :  { %2738 = vmatprep.subr.bf16.mxu1 %v7047_v63  ;;  %v7015_v61 = vld [vmem:[#allocation7 + $0x128] ss:$16 sps:$4 sm:$0xff]  }
 0x173   :  { %2698 = vmatpush2.bf16.msra.mxu0 %v6949_v51  ;;  %v6999_v51 = vld [vmem:[#allocation7 + $0x18c] ss:$16 sps:$4 sm:$0xff]  }
 0x174   :  { %2749 = vmatprep.subr.bf16.mxu0 %v6954_v53  ;;  %2739 = vmatpush2.bf16.msra.mxu1 %v7045_v16  ;;  %v6997_v53 = vld [vmem:[#allocation7 + $0x188] ss:$16 sps:$4 sm:$0xff]  }
 0x175   :  { %2790 = vmatprep.subr.bf16.mxu1 %v7050_v7  ;;  %v7096_v7 = vld [vmem:[#allocation8 + $0xe0] ss:$16 sps:$4 sm:$0xff]  }
 0x177   :  { %v1690_v56 = vpop.f32.mrf.mxu1 }
 0x179   :  { %v1692_v58 = vpop.f32.mrf.mxu1 }
 0x17b   :  { %v1694_v60 = vpop.f32.mrf.mxu1 }
 0x17d   :  { %v1695_v62 = vpop.f32.mrf.mxu1 }
 0x17e   :  { %v7023_v62 = vld [vmem:[#allocation7 + $0x10c] ss:$16 sps:$4 sm:$0xff]  }
 0x196   :  { %v1649_v10 = vpop.f32.mrf.mxu0 }
 0x197   :  { %v1650_v12 = vadd.f32 %v1649_v10, %v1609_v9  ;;  %v8017_v9 = vsub.s32 3, %v7984_v0  ;;  %v7104_v10 = vld [vmem:[#allocation8 + $0xa4] ss:$16 sps:$4 sm:$0xff]  }
 0x198   :  { %v1651_v13 = vpop.f32.mrf.mxu0 }
 0x199   :  { %v1691_v14 = vadd.f32 %v1690_v56, %v1650_v12  ;;  %v1652_v15 = vadd.f32 %v1651_v13, %v1611_v11  ;;  %v7011_v56 = vld [vmem:[#allocation7 + $0x14c] ss:$16 sps:$4 sm:$0xff]   ;;  %v379_v11 = vrot.slane %v7989_v1, %v8014_v36  ;;  %v7102_v12 = vld [vmem:[#allocation8 + $0xa0] ss:$16 sps:$4 sm:$0xff]   ;;  %v383_v13 = vrot.slane %v7989_v1, %v8017_v9 }
 0x19a   :  { %v1653_v18 = vpop.f32.mrf.mxu0 }
 0x19b   :  { %vm1861_vm0 = vcmp.gt.f32.partialorder %v1691_v14, 0.0  ;;  %v1865_v21 = vmul.f32 0.2, %v1691_v14  ;;  %v1693_v22 = vadd.f32 %v1692_v58, %v1652_v15  ;;  %v7017_v58 = vld [vmem:[#allocation7 + $0x12c] ss:$16 sps:$4 sm:$0xff]  }
 0x19c   :  { %v1654_v25 = vpop.f32.mrf.mxu0  ;;  %v7105_v18 = vld [vmem:[#allocation8 + $0x80] ss:$16 sps:$4 sm:$0xff]  }
 0x19d   :  { %v1866_v26 = vmul.f32 0.2, %v1693_v22  ;;  %vm1862_vm1 = vcmp.gt.f32.partialorder %v1693_v22, 0.0  ;;  %v1869_v27 = vsel %vm1861_vm0, %v1691_v14, %v1865_v21  ;;  %v7107_v14 = vld [vmem:[#allocation8 + $0x84] ss:$16 sps:$4 sm:$0xff]  }
 0x19e   :  { %v8005_v20 = vpack.c.bf16 %v1869_v27, %v1869_v27 }
 0x19f   :  { %v1870_v19 = vsel %vm1862_vm1, %v1693_v22, %v1866_v26  ;;  %v7110_v22 = vld [vmem:[#allocation8 + $0x64] ss:$16 sps:$4 sm:$0xff]  }
 0x1a0   :  { %v1874_v28 = vpack.c.bf16 %v1870_v19, %v1870_v19 }
 0x1a2   :  { %2699 = vmatprep.mubr.bf16.mxu0 %v1874_v28 }
 0x1a3   :  { %2700 = vmatmul.mubr.bf16.vlgmr.msra.gmra.mxu0 %v8005_v20 }
 0x1a4   :  { %2750 = vmatpush1.bf16.msra.mxu0 %v6952_v23  ;;  %2781 = vmatprep.mubr.bf16.mxu0 %v1874_v28 }
 0x1a5   :  { %2751 = vmatprep.subr.bf16.mxu0 %v6957_v29  ;;  %v7108_v29 = vld [vmem:[#allocation8 + $0x60] ss:$16 sps:$4 sm:$0xff]  }
 0x1a8   :  { %2752 = vmatpush1.bf16.msra.mxu0 %v6955_v24  ;;  %v7113_v24 = vld [vmem:[#allocation8 + $0x44] ss:$16 sps:$4 sm:$0xff]  }
 0x1a9   :  { %2753 = vmatprep.subr.bf16.mxu0 %v6960_v30 }
 0x1ac   :  { %2754 = vmatpush1.bf16.msra.mxu0 %v6958_v31 }
 0x1ad   :  { %2755 = vmatprep.subr.bf16.mxu0 %v6963_v32 }
 0x1b0   :  { %2756 = vmatpush1.bf16.msra.mxu0 %v6961_v33 }
 0x1b1   :  { %2757 = vmatprep.subr.bf16.mxu0 %v6966_v34 }
 0x1b4   :  { %2758 = vmatpush1.bf16.msra.mxu0 %v6964_v52 }
 0x1b5   :  { %2759 = vmatprep.subr.bf16.mxu0 %v6969_v8  ;;  %v7111_v8 = vld [vmem:[#allocation8 + $0x40] ss:$16 sps:$4 sm:$0xff]  }
 0x1b7   :  { %v8008_v17 = vpop.f32.mrf.mxu1 }
 0x1b8   :  { %2760 = vmatpush1.bf16.msra.mxu0 %v6967_v35  ;;  %v1732_v15 = vadd.f32 %v8008_v17, %v379_v11  ;;  %v7125_v11 = vld [vmem:[#allocation8 + $0x1c4] ss:$16 sps:$4 sm:$0xff]  }
 0x1b9   :  { %v8010_v38 = vpop.f32.mrf.mxu1  ;;  %2761 = vmatprep.subr.bf16.mxu0 %v6972_v37 }
 0x1ba   :  { %v1734_v21 = vadd.f32 %v8010_v38, %v383_v13  ;;  %v7123_v13 = vld [vmem:[#allocation8 + $0x1c0] ss:$16 sps:$4 sm:$0xff]  }
 0x1bb   :  { %v1735_v41 = vpop.f32.mrf.mxu1 }
 0x1bc   :  { %2762 = vmatpush1.bf16.msra.mxu0 %v6970_v39  ;;  %v7048_v39 = vld [vmem:[#allocation7 + $0x2e8] ss:$16 sps:$4 sm:$0xff]   ;;  %v7053_v41 = vld [vmem:[#allocation7 + $0x2cc] ss:$16 sps:$4 sm:$0xff]  }
 0x1bd   :  { %v1736_v42 = vpop.f32.mrf.mxu1  ;;  %2763 = vmatprep.subr.bf16.mxu0 %v6975_v40 }
 0x1be   :  { %v7051_v42 = vld [vmem:[#allocation7 + $0x2c8] ss:$16 sps:$4 sm:$0xff]  }
 0x1c0   :  { %2764 = vmatpush1.bf16.msra.mxu0 %v6973_v43  ;;  %v7056_v43 = vld [vmem:[#allocation7 + $0x2ac] ss:$16 sps:$4 sm:$0xff]  }
 0x1c1   :  { %2765 = vmatprep.subr.bf16.mxu0 %v6981_v44  ;;  %v7054_v44 = vld [vmem:[#allocation7 + $0x2a8] ss:$16 sps:$4 sm:$0xff]  }
 0x1c4   :  { %2766 = vmatpush2.bf16.msra.mxu0 %v6979_v45  ;;  %v7059_v45 = vld [vmem:[#allocation7 + $0x28c] ss:$16 sps:$4 sm:$0xff]  }
 0x1c5   :  { %2767 = vmatprep.subr.bf16.mxu0 %v6987_v46  ;;  %v7057_v46 = vld [vmem:[#allocation7 + $0x288] ss:$16 sps:$4 sm:$0xff]  }
 0x1c8   :  { %2768 = vmatpush2.bf16.msra.mxu0 %v6985_v47  ;;  %v7062_v47 = vld [vmem:[#allocation7 + $0x26c] ss:$16 sps:$4 sm:$0xff]  }
 0x1c9   :  { %2769 = vmatprep.subr.bf16.mxu0 %v6993_v49  ;;  %v7060_v49 = vld [vmem:[#allocation7 + $0x268] ss:$16 sps:$4 sm:$0xff]  }
 0x1cc   :  { %2770 = vmatpush2.bf16.msra.mxu0 %v6991_v50  ;;  %v7065_v50 = vld [vmem:[#allocation7 + $0x24c] ss:$16 sps:$4 sm:$0xff]  }
 0x1cd   :  { %2771 = vmatprep.subr.bf16.mxu0 %v6999_v51  ;;  %v7063_v51 = vld [vmem:[#allocation7 + $0x248] ss:$16 sps:$4 sm:$0xff]  }
 0x1d0   :  { %2772 = vmatpush2.bf16.msra.mxu0 %v6997_v53  ;;  %v7068_v53 = vld [vmem:[#allocation7 + $0x22c] ss:$16 sps:$4 sm:$0xff]  }
 0x1d1   :  { %2773 = vmatprep.subr.bf16.mxu0 %v7005_v54  ;;  %v7066_v54 = vld [vmem:[#allocation7 + $0x228] ss:$16 sps:$4 sm:$0xff]  }
 0x1d4   :  { %2774 = vmatpush2.bf16.msra.mxu0 %v7003_v55  ;;  %v7071_v55 = vld [vmem:[#allocation7 + $0x20c] ss:$16 sps:$4 sm:$0xff]  }
 0x1d5   :  { %2775 = vmatprep.subr.bf16.mxu0 %v7011_v56  ;;  %v7069_v56 = vld [vmem:[#allocation7 + $0x208] ss:$16 sps:$4 sm:$0xff]  }
 0x1d6   :  { %v1772_v59 = vpop.f32.mrf.mxu0 }
 0x1d7   :  { %v1773_v0 = vadd.f32 %v1772_v59, %v1732_v15  ;;  %v7077_v59 = vld [vmem:[#allocation7 + $0x3cc] ss:$16 sps:$4 sm:$0xff]   ;;  %v7128_v15 = vld [vmem:[#allocation8 + $0x1a4] ss:$16 sps:$4 sm:$0xff]  }
 0x1d8   :  { %2776 = vmatpush2.bf16.msra.mxu0 %v7009_v57  ;;  %v1774_v60 = vpop.f32.mrf.mxu0  ;;  %v7074_v57 = vld [vmem:[#allocation7 + $0x3ec] ss:$16 sps:$4 sm:$0xff]  }
 0x1d9   :  { %2777 = vmatprep.subr.bf16.mxu0 %v7017_v58  ;;  %v1775_v27 = vadd.f32 %v1774_v60, %v1734_v21  ;;  %v7072_v58 = vld [vmem:[#allocation7 + $0x3e8] ss:$16 sps:$4 sm:$0xff]   ;;  %v7126_v21 = vld [vmem:[#allocation8 + $0x1a0] ss:$16 sps:$4 sm:$0xff]  }
 0x1da   :  { %v1776_v63 = vpop.f32.mrf.mxu0  ;;  %v7075_v60 = vld [vmem:[#allocation7 + $0x3c8] ss:$16 sps:$4 sm:$0xff]  }
 0x1db   :  { %v7114_v63 = vld [vmem:[#allocation8 + $0x20] ss:$16 sps:$4 sm:$0xff]  }
 0x1dc   :  { %2778 = vmatpush2.bf16.msra.mxu0 %v7015_v61  ;;  %v1777_v16 = vpop.f32.mrf.mxu0  ;;  %v7116_v61 = vld [vmem:[#allocation8 + $0x24] ss:$16 sps:$4 sm:$0xff]  }
 0x1dd   :  { %2779 = vmatprep.subr.bf16.mxu0 %v7023_v62  ;;  %v7080_v62 = vld [vmem:[#allocation7 + $0x3ac] ss:$16 sps:$4 sm:$0xff]   ;;  %v7078_v16 = vld [vmem:[#allocation7 + $0x3a8] ss:$16 sps:$4 sm:$0xff]  }
 0x1e0   :  { %2780 = vmatpush2.bf16.msra.mxu0 %v7021_v48  ;;  %v7119_v48 = vld [vmem:[#allocation8 + $0x4] ss:$16 sps:$4 sm:$0xff]  }
 0x1e1   :  { %3637 = vmatprep.subr.bf16.mxu0 %v7098_v4  ;;  %v7117_v4 = vld [vmem:[#allocation8] ss:$16 sps:$4 sm:$0xff]  }
 0x1e3   :  { %2782 = vmatmul.mubr.bf16.vlgmr.msra.gmra.mxu0 %v8005_v20 }
 0x1e4   :  { %3638 = vmatpush1.bf16.msra.mxu0 %v7096_v7  ;;  %v7083_v7 = vld [vmem:[#allocation7 + $0x38c] ss:$16 sps:$4 sm:$0xff]  }
 0x1e5   :  { %3639 = vmatprep.subr.bf16.mxu0 %v7101_v5  ;;  %v7122_v5 = vld [vmem:[#allocation8 + $0x1e4] ss:$16 sps:$4 sm:$0xff]  }
 0x1e8   :  { %3640 = vmatpush1.bf16.msra.mxu0 %v7099_v6  ;;  %v7120_v6 = vld [vmem:[#allocation8 + $0x1e0] ss:$16 sps:$4 sm:$0xff]  }
 0x1e9   :  { %3641 = vmatprep.subr.bf16.mxu0 %v7104_v10  ;;  %v7081_v10 = vld [vmem:[#allocation7 + $0x388] ss:$16 sps:$4 sm:$0xff]  }
 0x1ec   :  { %3642 = vmatpush1.bf16.msra.mxu0 %v7102_v12  ;;  %v7086_v12 = vld [vmem:[#allocation7 + $0x36c] ss:$16 sps:$4 sm:$0xff]  }
 0x1ed   :  { %3643 = vmatprep.subr.bf16.mxu0 %v7107_v14  ;;  %v7084_v14 = vld [vmem:[#allocation7 + $0x368] ss:$16 sps:$4 sm:$0xff]  }
 0x1f0   :  { %3644 = vmatpush1.bf16.msra.mxu0 %v7105_v18  ;;  %v7089_v18 = vld [vmem:[#allocation7 + $0x34c] ss:$16 sps:$4 sm:$0xff]  }
 0x1f1   :  { %3645 = vmatprep.subr.bf16.mxu0 %v7110_v22  ;;  %v7131_v22 = vld [vmem:[#allocation8 + $0x184] ss:$16 sps:$4 sm:$0xff]  }
 0x1f4   :  { %3646 = vmatpush1.bf16.msra.mxu0 %v7108_v29  ;;  %v7093_v29 = vld [vmem:[#allocation7 + $0x308] ss:$16 sps:$4 sm:$0xff]  }
 0x1f5   :  { %3647 = vmatprep.subr.bf16.mxu0 %v7113_v24  ;;  %v7140_v24 = vld [vmem:[#allocation8 + $0x124] ss:$16 sps:$4 sm:$0xff]  }
 0x1f6   :  { %v1854_v26 = vpop.f32.mrf.mxu0 }
 0x1f7   :  { %v1813_v25 = vpop.f32.mrf.mxu1 }
 0x1f8   :  { %v1814_v19 = vadd.f32 %v1813_v25, %v1773_v0  ;;  %v1856_v23 = vpop.f32.mrf.mxu0  ;;  %3648 = vmatpush1.bf16.msra.mxu0 %v7111_v8  ;;  %v7087_v0 = vld [vmem:[#allocation7 + $0x348] ss:$16 sps:$4 sm:$0xff]   ;;  %v7092_v25 = vld [vmem:[#allocation7 + $0x32c] ss:$16 sps:$4 sm:$0xff]   ;;  %v7150_v8 = vld [vmem:[#allocation8 + $0x2c0] ss:$16 sps:$4 sm:$0xff]  }
 0x1f9   :  { %v1815_v28 = vpop.f32.mrf.mxu1  ;;  %3649 = vmatprep.subr.bf16.mxu0 %v7116_v61  ;;  %v7212_v61 = vld [vmem:[#allocation8 + $0x384] ss:$16 sps:$4 sm:$0xff]  }
 0x1fa   :  { %v1855_v1 = vadd.f32 %v1854_v26, %v1814_v19  ;;  %v1816_v20 = vadd.f32 %v1815_v28, %v1775_v27  ;;  %v1858_v31 = vpop.f32.mrf.mxu0  ;;  %v7129_v26 = vld [vmem:[#allocation8 + $0x180] ss:$16 sps:$4 sm:$0xff]   ;;  %v7090_v27 = vld [vmem:[#allocation7 + $0x328] ss:$16 sps:$4 sm:$0xff]   ;;  %v7134_v19 = vld [vmem:[#allocation8 + $0x164] ss:$16 sps:$4 sm:$0xff]  }
 0x1fb   :  { %v1817_v30 = vpop.f32.mrf.mxu1  ;;  %v7095_v28 = vld [vmem:[#allocation7 + $0x30c] ss:$16 sps:$4 sm:$0xff]   ;;  %v7143_v31 = vld [vmem:[#allocation8 + $0x104] ss:$16 sps:$4 sm:$0xff]  }
 0x1fc   :  { %vm1863_vm2 = vcmp.gt.f32.partialorder %v1855_v1, 0.0  ;;  %v1867_v32 = vmul.f32 0.2, %v1855_v1  ;;  %v1857_v33 = vadd.f32 %v1856_v23, %v1816_v20  ;;  %v1859_v52 = vpop.f32.mrf.mxu0  ;;  %3650 = vmatpush1.bf16.msra.mxu0 %v7114_v63  ;;  %v7132_v23 = vld [vmem:[#allocation8 + $0x160] ss:$16 sps:$4 sm:$0xff]  }
 0x1fd   :  { %v1818_v34 = vpop.f32.mrf.mxu1  ;;  %3651 = vmatprep.subr.bf16.mxu0 %v7119_v48  ;;  %v7135_v20 = vld [vmem:[#allocation8 + $0x140] ss:$16 sps:$4 sm:$0xff]   ;;  %v7149_v52 = vld [vmem:[#allocation8 + $0xec] ss:$16 sps:$4 sm:$0xff]   ;;  %v7218_v63 = vld [vmem:[#allocation8 + $0x364] ss:$16 sps:$4 sm:$0xff]  }
 0x1fe   :  { %vm1864_vm3 = vcmp.gt.f32.partialorder %v1857_v33, 0.0  ;;  %v1868_v35 = vmul.f32 0.2, %v1857_v33  ;;  %v1871_v37 = vsel %vm1863_vm2, %v1855_v1, %v1867_v32  ;;  %v7137_v1 = vld [vmem:[#allocation8 + $0x144] ss:$16 sps:$4 sm:$0xff]  }
 0x1ff   :  { %v8025_v40 = vpack.c.bf16 %v1871_v37, %v1871_v37  ;;  %v7138_v30 = vld [vmem:[#allocation8 + $0x120] ss:$16 sps:$4 sm:$0xff]   ;;  %v7146_v34 = vld [vmem:[#allocation8 + $0x2e4] ss:$16 sps:$4 sm:$0xff]  }
 0x200   :  { %v1872_v17 = vsel %vm1864_vm3, %v1857_v33, %v1868_v35  ;;  %3652 = vmatpush1.bf16.msra.mxu0 %v7117_v4  ;;  %v7141_v32 = vld [vmem:[#allocation8 + $0x100] ss:$16 sps:$4 sm:$0xff]   ;;  %v7152_v35 = vld [vmem:[#allocation8 + $0x2c4] ss:$16 sps:$4 sm:$0xff]  }
 0x201   :  { %v1876_v38 = vpack.c.bf16 %v1872_v17, %v1872_v17  ;;  %3653 = vmatprep.subr.bf16.mxu0 %v7122_v5  ;;  %v7144_v33 = vld [vmem:[#allocation8 + $0x2e0] ss:$16 sps:$4 sm:$0xff]   ;;  %v7158_v17 = vld [vmem:[#allocation8 + $0x2a4] ss:$16 sps:$4 sm:$0xff]  }
 0x202   :  { %v7156_v37 = vld [vmem:[#allocation8 + $0x2a0] ss:$16 sps:$4 sm:$0xff]   ;;  %v7224_v48 = vld [vmem:[#allocation8 + $0x344] ss:$16 sps:$4 sm:$0xff]  }
 0x203   :  { %2740 = vmatprep.mubr.bf16.mxu1 %v1876_v38  ;;  %v7228_v4 = vld [vmem:[#allocation8 + $0x320] ss:$16 sps:$4 sm:$0xff]   ;;  %v7236_v5 = vld [vmem:[#allocation8 + $0x304] ss:$16 sps:$4 sm:$0xff]  }
 0x204   :  { %2741 = vmatmul.mubr.bf16.vlgmr.msra.gmra.mxu1 %v8025_v40  ;;  %3654 = vmatpush2.bf16.msra.mxu0 %v7120_v6  ;;  %v7234_v6 = vld [vmem:[#allocation8 + $0x300] ss:$16 sps:$4 sm:$0xff]  }
 0x205   :  { %2791 = vmatpush1.bf16.msra.mxu1 %v7048_v39  ;;  %2822 = vmatprep.mubr.bf16.mxu1 %v1876_v38  ;;  %v7162_v38 = vld [vmem:[#allocation8 + $0x280] ss:$16 sps:$4 sm:$0xff]   ;;  %v7164_v39 = vld [vmem:[#allocation8 + $0x284] ss:$16 sps:$4 sm:$0xff]  }
 0x206   :  { %2792 = vmatprep.subr.bf16.mxu1 %v7053_v41  ;;  %3655 = vmatprep.subr.bf16.mxu0 %v7125_v11  ;;  %v7170_v41 = vld [vmem:[#allocation8 + $0x264] ss:$16 sps:$4 sm:$0xff]  }
 0x208   :  { %3656 = vmatpush2.bf16.msra.mxu0 %v7123_v13 }
 0x209   :  { %2793 = vmatpush1.bf16.msra.mxu1 %v7051_v42  ;;  %3657 = vmatprep.subr.bf16.mxu0 %v7128_v15  ;;  %v7174_v42 = vld [vmem:[#allocation8 + $0x240] ss:$16 sps:$4 sm:$0xff]  }
 0x20a   :  { %2794 = vmatprep.subr.bf16.mxu1 %v7056_v43  ;;  %v7176_v43 = vld [vmem:[#allocation8 + $0x244] ss:$16 sps:$4 sm:$0xff]  }
 0x20b   :  { %v8036_v15 = vld [vmem:[%s8128_s4] sm:$0xf] }
 0x20c   :  { %3658 = vmatpush2.bf16.msra.mxu0 %v7126_v21  ;;  %v2014_v21 = vrot.slane %v8036_v15, %v7995_v3 }
 0x20d   :  { %2795 = vmatpush1.bf16.msra.mxu1 %v7054_v44  ;;  %3659 = vmatprep.subr.bf16.mxu0 %v7131_v22 }
 0x20e   :  { %2796 = vmatprep.subr.bf16.mxu1 %v7059_v45  ;;  %v7180_v45 = vld [vmem:[#allocation8 + $0x220] ss:$16 sps:$4 sm:$0xff]  }
 0x210   :  { %3660 = vmatpush2.bf16.msra.mxu0 %v7129_v26 }
 0x211   :  { %2797 = vmatpush1.bf16.msra.mxu1 %v7057_v46  ;;  %3661 = vmatprep.subr.bf16.mxu0 %v7134_v19  ;;  %v7182_v46 = vld [vmem:[#allocation8 + $0x224] ss:$16 sps:$4 sm:$0xff]  }
 0x212   :  { %2798 = vmatprep.subr.bf16.mxu1 %v7062_v47 }
 0x214   :  { %3662 = vmatpush2.bf16.msra.mxu0 %v7132_v23 }
 0x215   :  { %2799 = vmatpush1.bf16.msra.mxu1 %v7060_v49  ;;  %3663 = vmatprep.subr.bf16.mxu0 %v7137_v1 }
 0x216   :  { %2800 = vmatprep.subr.bf16.mxu1 %v7065_v50  ;;  %v7186_v50 = vld [vmem:[#allocation8 + $0x200] ss:$16 sps:$4 sm:$0xff]  }
 0x218   :  { %3664 = vmatpush2.bf16.msra.mxu0 %v7135_v20 }
 0x219   :  { %2801 = vmatpush1.bf16.msra.mxu1 %v7063_v51  ;;  %3665 = vmatprep.subr.bf16.mxu0 %v7140_v24  ;;  %v7188_v51 = vld [vmem:[#allocation8 + $0x204] ss:$16 sps:$4 sm:$0xff]  }
 0x21a   :  { %2802 = vmatprep.subr.bf16.mxu1 %v7068_v53 }
 0x21c   :  { %3666 = vmatpush2.bf16.msra.mxu0 %v7138_v30 }
 0x21d   :  { %2803 = vmatpush1.bf16.msra.mxu1 %v7066_v54  ;;  %3667 = vmatprep.subr.bf16.mxu0 %v7143_v31  ;;  %v7192_v54 = vld [vmem:[#allocation8 + $0x3e0] ss:$16 sps:$4 sm:$0xff]   ;;  %v7147_v31 = vld [vmem:[#allocation8 + $0xe8] ss:$16 sps:$4 sm:$0xff]  }
 0x21e   :  { %2804 = vmatprep.subr.bf16.mxu1 %v7071_v55  ;;  %v7194_v55 = vld [vmem:[#allocation8 + $0x3e4] ss:$16 sps:$4 sm:$0xff]  }
 0x220   :  { %3668 = vmatpush2.bf16.msra.mxu0 %v7141_v32 }
 0x221   :  { %2805 = vmatpush1.bf16.msra.mxu1 %v7069_v56  ;;  %3719 = vmatprep.subr.bf16.mxu0 %v7149_v52  ;;  %v7198_v56 = vld [vmem:[#allocation8 + $0x3c0] ss:$16 sps:$4 sm:$0xff]   ;;  %v7161_v52 = vld [vmem:[#allocation8 + $0xac] ss:$16 sps:$4 sm:$0xff]  }
 0x222   :  { %2806 = vmatprep.subr.bf16.mxu1 %v7074_v57  ;;  %v7200_v57 = vld [vmem:[#allocation8 + $0x3c4] ss:$16 sps:$4 sm:$0xff]  }
 0x225   :  { %2807 = vmatpush2.bf16.msra.mxu1 %v7072_v58  ;;  %v7204_v58 = vld [vmem:[#allocation8 + $0x3a0] ss:$16 sps:$4 sm:$0xff]  }
 0x226   :  { %2808 = vmatprep.subr.bf16.mxu1 %v7077_v59  ;;  %v7206_v59 = vld [vmem:[#allocation8 + $0x3a4] ss:$16 sps:$4 sm:$0xff]  }
 0x229   :  { %2809 = vmatpush2.bf16.msra.mxu1 %v7075_v60  ;;  %v7210_v60 = vld [vmem:[#allocation8 + $0x380] ss:$16 sps:$4 sm:$0xff]  }
 0x22a   :  { %2810 = vmatprep.subr.bf16.mxu1 %v7080_v62  ;;  %v7216_v62 = vld [vmem:[#allocation8 + $0x360] ss:$16 sps:$4 sm:$0xff]  }
 0x22d   :  { %2811 = vmatpush2.bf16.msra.mxu1 %v7078_v16  ;;  %v7222_v16 = vld [vmem:[#allocation8 + $0x340] ss:$16 sps:$4 sm:$0xff]  }
 0x22e   :  { %2812 = vmatprep.subr.bf16.mxu1 %v7083_v7  ;;  %v7230_v7 = vld [vmem:[#allocation8 + $0x324] ss:$16 sps:$4 sm:$0xff]  }
 0x231   :  { %2813 = vmatpush2.bf16.msra.mxu1 %v7081_v10  ;;  %v7242_v10 = vld [vmem:[#allocation8 + $0x2ec] ss:$16 sps:$4 sm:$0xff]  }
 0x232   :  { %2814 = vmatprep.subr.bf16.mxu1 %v7086_v12 }
 0x235   :  { %2815 = vmatpush2.bf16.msra.mxu1 %v7084_v14 }
 0x236   :  { %2816 = vmatprep.subr.bf16.mxu1 %v7089_v18  ;;  %v2010_v18 = vrot.slane %v8036_v15, %v7992_v2 }
 0x239   :  { %2817 = vmatpush2.bf16.msra.mxu1 %v7087_v0 }
 0x23a   :  { %2818 = vmatprep.subr.bf16.mxu1 %v7092_v25 }
 0x23d   :  { %2819 = vmatpush2.bf16.msra.mxu1 %v7090_v27 }
 0x23e   :  { %2820 = vmatprep.subr.bf16.mxu1 %v7095_v28 }
 0x241   :  { %2821 = vmatpush2.bf16.msra.mxu1 %v7093_v29 }
 0x242   :  { %3678 = vmatprep.subr.bf16.mxu1 %v7146_v34  ;;  %v7153_v34 = vld [vmem:[#allocation8 + $0xc8] ss:$16 sps:$4 sm:$0xff]  }
 0x244   :  { %2823 = vmatmul.mubr.bf16.vlgmr.msra.gmra.mxu1 %v8025_v40  ;;  %v7168_v40 = vld [vmem:[#allocation8 + $0x260] ss:$16 sps:$4 sm:$0xff]  }
 0x245   :  { %3679 = vmatpush1.bf16.msra.mxu1 %v7144_v33  ;;  %v7155_v33 = vld [vmem:[#allocation8 + $0xcc] ss:$16 sps:$4 sm:$0xff]  }
 0x246   :  { %3680 = vmatprep.subr.bf16.mxu1 %v7152_v35  ;;  %v7167_v35 = vld [vmem:[#allocation8 + $0x8c] ss:$16 sps:$4 sm:$0xff]  }
 0x249   :  { %3681 = vmatpush1.bf16.msra.mxu1 %v7150_v8  ;;  %v7159_v8 = vld [vmem:[#allocation8 + $0xa8] ss:$16 sps:$4 sm:$0xff]  }
 0x24a   :  { %3682 = vmatprep.subr.bf16.mxu1 %v7158_v17  ;;  %v7173_v17 = vld [vmem:[#allocation8 + $0x6c] ss:$16 sps:$4 sm:$0xff]  }
 0x24d   :  { %3683 = vmatpush1.bf16.msra.mxu1 %v7156_v37  ;;  %v7165_v37 = vld [vmem:[#allocation8 + $0x88] ss:$16 sps:$4 sm:$0xff]  }
 0x24e   :  { %3684 = vmatprep.subr.bf16.mxu1 %v7164_v39  ;;  %v7179_v39 = vld [vmem:[#allocation8 + $0x4c] ss:$16 sps:$4 sm:$0xff]  }
 0x251   :  { %3685 = vmatpush1.bf16.msra.mxu1 %v7162_v38  ;;  %v7171_v38 = vld [vmem:[#allocation8 + $0x68] ss:$16 sps:$4 sm:$0xff]  }
 0x252   :  { %3686 = vmatprep.subr.bf16.mxu1 %v7170_v41  ;;  %v7185_v41 = vld [vmem:[#allocation8 + $0x2c] ss:$16 sps:$4 sm:$0xff]  }
 0x255   :  { %3687 = vmatpush1.bf16.msra.mxu1 %v7168_v40  ;;  %v7177_v40 = vld [vmem:[#allocation8 + $0x48] ss:$16 sps:$4 sm:$0xff]  }
 0x256   :  { %3688 = vmatprep.subr.bf16.mxu1 %v7176_v43  ;;  %v7191_v43 = vld [vmem:[#allocation8 + $0xc] ss:$16 sps:$4 sm:$0xff]  }
 0x259   :  { %3689 = vmatpush1.bf16.msra.mxu1 %v7174_v42  ;;  %v7183_v42 = vld [vmem:[#allocation8 + $0x28] ss:$16 sps:$4 sm:$0xff]  }
 0x25a   :  { %3690 = vmatprep.subr.bf16.mxu1 %v7182_v46  ;;  %v7195_v46 = vld [vmem:[#allocation8 + $0x1e8] ss:$16 sps:$4 sm:$0xff]  }
 0x25d   :  { %3691 = vmatpush1.bf16.msra.mxu1 %v7180_v45  ;;  %v7197_v45 = vld [vmem:[#allocation8 + $0x1ec] ss:$16 sps:$4 sm:$0xff]  }
 0x25e   :  { %3692 = vmatprep.subr.bf16.mxu1 %v7188_v51  ;;  %v7207_v51 = vld [vmem:[#allocation8 + $0x1a8] ss:$16 sps:$4 sm:$0xff]  }
 0x261   :  { %3693 = vmatpush1.bf16.msra.mxu1 %v7186_v50  ;;  %v7209_v50 = vld [vmem:[#allocation8 + $0x1ac] ss:$16 sps:$4 sm:$0xff]  }
 0x262   :  { %3694 = vmatprep.subr.bf16.mxu1 %v7194_v55  ;;  %v7221_v55 = vld [vmem:[#allocation8 + $0x16c] ss:$16 sps:$4 sm:$0xff]  }
 0x263   :  { %v2701_v44 = vpop.f32.mrf.mxu0 }
 0x264   :  { %v2702_v0 = vadd.f32 %v2701_v44, %v2010_v18  ;;  %v7189_v44 = vld [vmem:[#allocation8 + $0x8] ss:$16 sps:$4 sm:$0xff]  }
 0x265   :  { %v2703_v47 = vpop.f32.mrf.mxu0  ;;  %3695 = vmatpush2.bf16.msra.mxu1 %v7192_v54  ;;  %v7213_v54 = vld [vmem:[#allocation8 + $0x188] ss:$16 sps:$4 sm:$0xff]  }
 0x266   :  { %3696 = vmatprep.subr.bf16.mxu1 %v7200_v57  ;;  %v2704_v25 = vadd.f32 %v2703_v47, %v2014_v21  ;;  %v7203_v47 = vld [vmem:[#allocation8 + $0x1cc] ss:$16 sps:$4 sm:$0xff]  }
 0x267   :  { %v2705_v49 = vpop.f32.mrf.mxu0  ;;  %v7227_v57 = vld [vmem:[#allocation8 + $0x14c] ss:$16 sps:$4 sm:$0xff]  }
 0x268   :  { %v7201_v49 = vld [vmem:[#allocation8 + $0x1c8] ss:$16 sps:$4 sm:$0xff]  }
 0x269   :  { %v2706_v53 = vpop.f32.mrf.mxu0  ;;  %3697 = vmatpush2.bf16.msra.mxu1 %v7198_v56  ;;  %v7219_v56 = vld [vmem:[#allocation8 + $0x168] ss:$16 sps:$4 sm:$0xff]  }
 0x26a   :  { %3698 = vmatprep.subr.bf16.mxu1 %v7206_v59  ;;  %v7215_v53 = vld [vmem:[#allocation8 + $0x18c] ss:$16 sps:$4 sm:$0xff]   ;;  %v7225_v59 = vld [vmem:[#allocation8 + $0x148] ss:$16 sps:$4 sm:$0xff]  }
 0x26d   :  { %3699 = vmatpush2.bf16.msra.mxu1 %v7204_v58  ;;  %v2018_v58 = vrot.slane %v8036_v15, %v8014_v36 }
 0x26e   :  { %3700 = vmatprep.subr.bf16.mxu1 %v7212_v61  ;;  %v7233_v61 = vld [vmem:[#allocation8 + $0x12c] ss:$16 sps:$4 sm:$0xff]  }
 0x271   :  { %3701 = vmatpush2.bf16.msra.mxu1 %v7210_v60  ;;  %v2022_v60 = vrot.slane %v8036_v15, %v8017_v9 }
 0x272   :  { %3702 = vmatprep.subr.bf16.mxu1 %v7218_v63 }
 0x275   :  { %3703 = vmatpush2.bf16.msra.mxu1 %v7216_v62 }
 0x276   :  { %3704 = vmatprep.subr.bf16.mxu1 %v7224_v48 }
 0x279   :  { %3705 = vmatpush2.bf16.msra.mxu1 %v7222_v16  ;;  %v7231_v16 = vld [vmem:[#allocation8 + $0x128] ss:$16 sps:$4 sm:$0xff]  }
 0x27a   :  { %3706 = vmatprep.subr.bf16.mxu1 %v7230_v7 }
 0x27d   :  { %3707 = vmatpush2.bf16.msra.mxu1 %v7228_v4  ;;  %v7239_v4 = vld [vmem:[#allocation8 + $0x10c] ss:$16 sps:$4 sm:$0xff]  }
 0x27e   :  { %3708 = vmatprep.subr.bf16.mxu1 %v7236_v5 }
 0x281   :  { %3709 = vmatpush2.bf16.msra.mxu1 %v7234_v6 }
 0x282   :  { %3760 = vmatprep.subr.bf16.mxu1 %v7242_v10 }
 0x2a3   :  { %v8029_v11 = vpop.f32.mrf.mxu0 }
 0x2a4   :  { %v2784_v62 = vadd.f32 %v8029_v11, %v2018_v58  ;;  %v7275_v58 = vld [vmem:[#allocation8 + $0x38c] ss:$16 sps:$4 sm:$0xff]  }
 0x2a5   :  { %v8031_v12 = vpop.f32.mrf.mxu0 }
 0x2a6   :  { %v2786_v48 = vadd.f32 %v8031_v12, %v2022_v60  ;;  %v7273_v60 = vld [vmem:[#allocation8 + $0x388] ss:$16 sps:$4 sm:$0xff]  }
 0x2a7   :  { %v2787_v13 = vpop.f32.mrf.mxu0 }
 0x2a9   :  { %v2788_v14 = vpop.f32.mrf.mxu0 }
 0x2aa   :  { %v7237_v14 = vld [vmem:[#allocation8 + $0x108] ss:$16 sps:$4 sm:$0xff]  }
 0x2c4   :  { %v2742_v22 = vpop.f32.mrf.mxu1 }
 0x2c5   :  { %v2743_v26 = vadd.f32 %v2742_v22, %v2702_v0  ;;  %v7240_v22 = vld [vmem:[#allocation8 + $0x2e8] ss:$16 sps:$4 sm:$0xff]  }
 0x2c6   :  { %v2744_v27 = vpop.f32.mrf.mxu1 }
 0x2c7   :  { %vm2831_vm4 = vcmp.gt.f32.partialorder %v2743_v26, 0.0  ;;  %v2835_v19 = vmul.f32 0.2, %v2743_v26  ;;  %v2745_v28 = vadd.f32 %v2744_v27, %v2704_v25  ;;  %v7245_v25 = vld [vmem:[#allocation8 + $0x2cc] ss:$16 sps:$4 sm:$0xff]  }
 0x2c8   :  { %v2746_v23 = vpop.f32.mrf.mxu1  ;;  %v7248_v27 = vld [vmem:[#allocation8 + $0x2ac] ss:$16 sps:$4 sm:$0xff]  }
 0x2c9   :  { %vm2832_vm5 = vcmp.gt.f32.partialorder %v2745_v28, 0.0  ;;  %v2836_v29 = vmul.f32 0.2, %v2745_v28  ;;  %v2839_v1 = vsel %vm2831_vm4, %v2743_v26, %v2835_v19  ;;  %v7243_v26 = vld [vmem:[#allocation8 + $0x2c8] ss:$16 sps:$4 sm:$0xff]   ;;  %vm5797_vm4 = vcmask 7168  }
 0x2ca   :  { %v2747_v20 = vpop.f32.mrf.mxu1  ;;  %v8042_v32 = vpack.c.bf16 %v2839_v1, %v2839_v1  ;;  %v7246_v19 = vld [vmem:[#allocation8 + $0x2a8] ss:$16 sps:$4 sm:$0xff]   ;;  %v7288_v23 = vld [vmem:[#allocation10 + $0xe0] ss:$16 sps:$4 sm:$0xff]   ;;  %v7293_v1 = vld [vmem:[#allocation10 + $0xc4] ss:$16 sps:$4 sm:$0xff]  }
 0x2cb   :  { %v2840_v24 = vsel %vm2832_vm5, %v2745_v28, %v2836_v29  ;;  %v7251_v28 = vld [vmem:[#allocation8 + $0x28c] ss:$16 sps:$4 sm:$0xff]   ;;  %v7290_v29 = vld [vmem:[#allocation10 + $0xe4] ss:$16 sps:$4 sm:$0xff]   ;;  %v7249_v20 = vld [vmem:[#allocation8 + $0x288] ss:$16 sps:$4 sm:$0xff]  }
 0x2cc   :  { %v2844_v30 = vpack.c.bf16 %v2840_v24, %v2840_v24  ;;  %v7291_v24 = vld [vmem:[#allocation10 + $0xc0] ss:$16 sps:$4 sm:$0xff]  }
 0x2ce   :  { %3669 = vmatprep.mubr.bf16.mxu0 %v2844_v30 }
 0x2cf   :  { %3670 = vmatmul.mubr.bf16.vlgmr.msra.gmra.mxu0 %v8042_v32 }
 0x2d0   :  { %3720 = vmatpush1.bf16.msra.mxu0 %v7147_v31  ;;  %3751 = vmatprep.mubr.bf16.mxu0 %v2844_v30  ;;  %v7254_v30 = vld [vmem:[#allocation8 + $0x26c] ss:$16 sps:$4 sm:$0xff]   ;;  %v7296_v31 = vld [vmem:[#allocation10 + $0xa4] ss:$16 sps:$4 sm:$0xff]  }
 0x2d1   :  { %3721 = vmatprep.subr.bf16.mxu0 %v7155_v33  ;;  %v7294_v33 = vld [vmem:[#allocation10 + $0xa0] ss:$16 sps:$4 sm:$0xff]  }
 0x2d4   :  { %3722 = vmatpush1.bf16.msra.mxu0 %v7153_v34  ;;  %v7257_v34 = vld [vmem:[#allocation8 + $0x24c] ss:$16 sps:$4 sm:$0xff]  }
 0x2d5   :  { %3723 = vmatprep.subr.bf16.mxu0 %v7161_v52  ;;  %v7299_v52 = vld [vmem:[#allocation10 + $0x84] ss:$16 sps:$4 sm:$0xff]  }
 0x2d8   :  { %3724 = vmatpush1.bf16.msra.mxu0 %v7159_v8  ;;  %v7255_v8 = vld [vmem:[#allocation8 + $0x248] ss:$16 sps:$4 sm:$0xff]  }
 0x2d9   :  { %3725 = vmatprep.subr.bf16.mxu0 %v7167_v35  ;;  %v7297_v35 = vld [vmem:[#allocation10 + $0x80] ss:$16 sps:$4 sm:$0xff]  }
 0x2dc   :  { %3726 = vmatpush1.bf16.msra.mxu0 %v7165_v37  ;;  %v7260_v37 = vld [vmem:[#allocation8 + $0x22c] ss:$16 sps:$4 sm:$0xff]  }
 0x2dd   :  { %3727 = vmatprep.subr.bf16.mxu0 %v7173_v17  ;;  %v7302_v17 = vld [vmem:[#allocation10 + $0x64] ss:$16 sps:$4 sm:$0xff]  }
 0x2e0   :  { %3728 = vmatpush1.bf16.msra.mxu0 %v7171_v38  ;;  %v7258_v38 = vld [vmem:[#allocation8 + $0x228] ss:$16 sps:$4 sm:$0xff]  }
 0x2e1   :  { %3729 = vmatprep.subr.bf16.mxu0 %v7179_v39  ;;  %v7300_v39 = vld [vmem:[#allocation10 + $0x60] ss:$16 sps:$4 sm:$0xff]  }
 0x2e4   :  { %3730 = vmatpush1.bf16.msra.mxu0 %v7177_v40  ;;  %v7263_v40 = vld [vmem:[#allocation8 + $0x20c] ss:$16 sps:$4 sm:$0xff]  }
 0x2e5   :  { %3731 = vmatprep.subr.bf16.mxu0 %v7185_v41  ;;  %v7305_v41 = vld [vmem:[#allocation10 + $0x44] ss:$16 sps:$4 sm:$0xff]  }
 0x2e8   :  { %3732 = vmatpush1.bf16.msra.mxu0 %v7183_v42  ;;  %v7261_v42 = vld [vmem:[#allocation8 + $0x208] ss:$16 sps:$4 sm:$0xff]  }
 0x2e9   :  { %3733 = vmatprep.subr.bf16.mxu0 %v7191_v43  ;;  %v7303_v43 = vld [vmem:[#allocation10 + $0x40] ss:$16 sps:$4 sm:$0xff]  }
 0x2ec   :  { %3734 = vmatpush1.bf16.msra.mxu0 %v7189_v44  ;;  %v7266_v44 = vld [vmem:[#allocation8 + $0x3ec] ss:$16 sps:$4 sm:$0xff]  }
 0x2ed   :  { %3735 = vmatprep.subr.bf16.mxu0 %v7197_v45  ;;  %v7308_v45 = vld [vmem:[#allocation10 + $0x24] ss:$16 sps:$4 sm:$0xff]  }
 0x2f0   :  { %3736 = vmatpush2.bf16.msra.mxu0 %v7195_v46  ;;  %v7264_v46 = vld [vmem:[#allocation8 + $0x3e8] ss:$16 sps:$4 sm:$0xff]  }
 0x2f1   :  { %3737 = vmatprep.subr.bf16.mxu0 %v7203_v47  ;;  %v7306_v47 = vld [vmem:[#allocation10 + $0x20] ss:$16 sps:$4 sm:$0xff]  }
 0x2f4   :  { %3738 = vmatpush2.bf16.msra.mxu0 %v7201_v49  ;;  %v7269_v49 = vld [vmem:[#allocation8 + $0x3cc] ss:$16 sps:$4 sm:$0xff]  }
 0x2f5   :  { %3739 = vmatprep.subr.bf16.mxu0 %v7209_v50  ;;  %v7311_v50 = vld [vmem:[#allocation10 + $0x4] ss:$16 sps:$4 sm:$0xff]  }
 0x2f8   :  { %3740 = vmatpush2.bf16.msra.mxu0 %v7207_v51  ;;  %v7267_v51 = vld [vmem:[#allocation8 + $0x3c8] ss:$16 sps:$4 sm:$0xff]  }
 0x2f9   :  { %3741 = vmatprep.subr.bf16.mxu0 %v7215_v53  ;;  %v7309_v53 = vld [vmem:[#allocation10] ss:$16 sps:$4 sm:$0xff]  }
 0x2fc   :  { %3742 = vmatpush2.bf16.msra.mxu0 %v7213_v54  ;;  %v7272_v54 = vld [vmem:[#allocation8 + $0x3ac] ss:$16 sps:$4 sm:$0xff]  }
 0x2fd   :  { %3743 = vmatprep.subr.bf16.mxu0 %v7221_v55  ;;  %v7314_v55 = vld [vmem:[#allocation10 + $0x1e4] ss:$16 sps:$4 sm:$0xff]  }
 0x300   :  { %3744 = vmatpush2.bf16.msra.mxu0 %v7219_v56  ;;  %v7270_v56 = vld [vmem:[#allocation8 + $0x3a8] ss:$16 sps:$4 sm:$0xff]  }
 0x301   :  { %3745 = vmatprep.subr.bf16.mxu0 %v7227_v57  ;;  %v7312_v57 = vld [vmem:[#allocation10 + $0x1e0] ss:$16 sps:$4 sm:$0xff]  }
 0x304   :  { %v2824_v63 = vpop.f32.mrf.mxu1  ;;  %3746 = vmatpush2.bf16.msra.mxu0 %v7225_v59  ;;  %v7317_v59 = vld [vmem:[#allocation10 + $0x1c4] ss:$16 sps:$4 sm:$0xff]  }
 0x305   :  { %v2825_v7 = vadd.f32 %v2824_v63, %v2784_v62  ;;  %3747 = vmatprep.subr.bf16.mxu0 %v7233_v61  ;;  %v7315_v61 = vld [vmem:[#allocation10 + $0x1c0] ss:$16 sps:$4 sm:$0xff]   ;;  %v7278_v62 = vld [vmem:[#allocation8 + $0x36c] ss:$16 sps:$4 sm:$0xff]   ;;  %v7320_v63 = vld [vmem:[#allocation10 + $0x1a4] ss:$16 sps:$4 sm:$0xff]  }
 0x306   :  { %v2826_v5 = vpop.f32.mrf.mxu1 }
 0x307   :  { %vm2833_vm6 = vcmp.gt.f32.partialorder %v2825_v7, 0.0  ;;  %v2837_v6 = vmul.f32 0.2, %v2825_v7  ;;  %v2827_v10 = vadd.f32 %v2826_v5, %v2786_v48  ;;  %v7318_v48 = vld [vmem:[#allocation10 + $0x1a0] ss:$16 sps:$4 sm:$0xff]  }
 0x308   :  { %v2828_v13 = vpop.f32.mrf.mxu1  ;;  %3748 = vmatpush2.bf16.msra.mxu0 %v7231_v16  ;;  %v7276_v16 = vld [vmem:[#allocation8 + $0x368] ss:$16 sps:$4 sm:$0xff]  }
 0x309   :  { %vm2834_vm7 = vcmp.gt.f32.partialorder %v2827_v10, 0.0  ;;  %v2838_v15 = vmul.f32 0.2, %v2827_v10  ;;  %3749 = vmatprep.subr.bf16.mxu0 %v7239_v4  ;;  %v2841_v18 = vsel %vm2833_vm6, %v2825_v7, %v2837_v6  ;;  %v7281_v7 = vld [vmem:[#allocation8 + $0x34c] ss:$16 sps:$4 sm:$0xff]  }
 0x30a   :  { %v2829_v11 = vpop.f32.mrf.mxu1  ;;  %v8051_v12 = vpack.c.bf16 %v2841_v18, %v2841_v18  ;;  %v7323_v4 = vld [vmem:[#allocation10 + $0x184] ss:$16 sps:$4 sm:$0xff]   ;;  %v7279_v5 = vld [vmem:[#allocation8 + $0x348] ss:$16 sps:$4 sm:$0xff]   ;;  %v7321_v6 = vld [vmem:[#allocation10 + $0x180] ss:$16 sps:$4 sm:$0xff]  }
 0x30b   :  { %v2842_v21 = vsel %vm2834_vm7, %v2827_v10, %v2838_v15  ;;  %v7284_v10 = vld [vmem:[#allocation8 + $0x32c] ss:$16 sps:$4 sm:$0xff]   ;;  %v7326_v13 = vld [vmem:[#allocation10 + $0x164] ss:$16 sps:$4 sm:$0xff]   ;;  %v7324_v15 = vld [vmem:[#allocation10 + $0x160] ss:$16 sps:$4 sm:$0xff]  }
 0x30c   :  { %3750 = vmatpush2.bf16.msra.mxu0 %v7237_v14  ;;  %v2846_v0 = vpack.c.bf16 %v2842_v21, %v2842_v21  ;;  %v7282_v14 = vld [vmem:[#allocation8 + $0x328] ss:$16 sps:$4 sm:$0xff]   ;;  %v7287_v18 = vld [vmem:[#allocation8 + $0x30c] ss:$16 sps:$4 sm:$0xff]   ;;  %v7329_v11 = vld [vmem:[#allocation10 + $0x144] ss:$16 sps:$4 sm:$0xff]  }
 0x30d   :  { %4607 = vmatprep.subr.bf16.mxu0 %v7290_v29  ;;  %v7285_v21 = vld [vmem:[#allocation8 + $0x308] ss:$16 sps:$4 sm:$0xff]   ;;  %v7342_v29 = vld [vmem:[#allocation10 + $0x2c0] ss:$16 sps:$4 sm:$0xff]  }
 0x30e   :  { %3710 = vmatprep.mubr.bf16.mxu1 %v2846_v0 }
 0x30f   :  { %3711 = vmatmul.mubr.bf16.vlgmr.msra.gmra.mxu1 %v8051_v12  ;;  %3752 = vmatmul.mubr.bf16.vlgmr.msra.gmra.mxu0 %v8042_v32  ;;  %v7252_v32 = vld [vmem:[#allocation8 + $0x268] ss:$16 sps:$4 sm:$0xff]  }
 0x310   :  { %3761 = vmatpush1.bf16.msra.mxu1 %v7240_v22  ;;  %3792 = vmatprep.mubr.bf16.mxu1 %v2846_v0  ;;  %v7327_v0 = vld [vmem:[#allocation10 + $0x140] ss:$16 sps:$4 sm:$0xff]   ;;  %v7332_v22 = vld [vmem:[#allocation10 + $0x124] ss:$16 sps:$4 sm:$0xff]  }
 0x311   :  { %3762 = vmatprep.subr.bf16.mxu1 %v7245_v25  ;;  %4608 = vmatpush1.bf16.msra.mxu0 %v7288_v23  ;;  %v7330_v25 = vld [vmem:[#allocation10 + $0x120] ss:$16 sps:$4 sm:$0xff]   ;;  %v7341_v23 = vld [vmem:[#allocation10 + $0xec] ss:$16 sps:$4 sm:$0xff]  }
 0x312   :  { %4609 = vmatprep.subr.bf16.mxu0 %v7293_v1  ;;  %v7344_v1 = vld [vmem:[#allocation10 + $0x2c4] ss:$16 sps:$4 sm:$0xff]  }
 0x314   :  { %3763 = vmatpush1.bf16.msra.mxu1 %v7243_v26  ;;  %v7335_v26 = vld [vmem:[#allocation10 + $0x104] ss:$16 sps:$4 sm:$0xff]  }
 0x315   :  { %3764 = vmatprep.subr.bf16.mxu1 %v7248_v27  ;;  %4610 = vmatpush1.bf16.msra.mxu0 %v7291_v24  ;;  %v7333_v27 = vld [vmem:[#allocation10 + $0x100] ss:$16 sps:$4 sm:$0xff]  }
 0x316   :  { %4611 = vmatprep.subr.bf16.mxu0 %v7296_v31  ;;  %v7354_v24 = vld [vmem:[#allocation10 + $0x280] ss:$16 sps:$4 sm:$0xff]  }
 0x317   :  { %v7360_v31 = vld [vmem:[#allocation10 + $0x260] ss:$16 sps:$4 sm:$0xff]  }
 0x318   :  { %3765 = vmatpush1.bf16.msra.mxu1 %v7246_v19  ;;  %v7336_v19 = vld [vmem:[#allocation10 + $0x2e0] ss:$16 sps:$4 sm:$0xff]  }
 0x319   :  { %3766 = vmatprep.subr.bf16.mxu1 %v7251_v28  ;;  %4612 = vmatpush1.bf16.msra.mxu0 %v7294_v33  ;;  %v7338_v28 = vld [vmem:[#allocation10 + $0x2e4] ss:$16 sps:$4 sm:$0xff]   ;;  %v7366_v33 = vld [vmem:[#allocation10 + $0x240] ss:$16 sps:$4 sm:$0xff]  }
 0x31a   :  { %4613 = vmatprep.subr.bf16.mxu0 %v7299_v52  ;;  %v7372_v52 = vld [vmem:[#allocation10 + $0x220] ss:$16 sps:$4 sm:$0xff]  }
 0x31c   :  { %3767 = vmatpush1.bf16.msra.mxu1 %v7249_v20  ;;  %v7348_v20 = vld [vmem:[#allocation10 + $0x2a0] ss:$16 sps:$4 sm:$0xff]  }
 0x31d   :  { %3768 = vmatprep.subr.bf16.mxu1 %v7254_v30  ;;  %4614 = vmatpush1.bf16.msra.mxu0 %v7297_v35  ;;  %v7356_v30 = vld [vmem:[#allocation10 + $0x284] ss:$16 sps:$4 sm:$0xff]   ;;  %v7378_v35 = vld [vmem:[#allocation10 + $0x200] ss:$16 sps:$4 sm:$0xff]  }
 0x31e   :  { %4615 = vmatprep.subr.bf16.mxu0 %v7302_v17  ;;  %v7384_v17 = vld [vmem:[#allocation10 + $0x3e0] ss:$16 sps:$4 sm:$0xff]  }
 0x320   :  { %3769 = vmatpush1.bf16.msra.mxu1 %v7252_v32  ;;  %v7362_v32 = vld [vmem:[#allocation10 + $0x264] ss:$16 sps:$4 sm:$0xff]  }
 0x321   :  { %3770 = vmatprep.subr.bf16.mxu1 %v7257_v34  ;;  %4616 = vmatpush1.bf16.msra.mxu0 %v7300_v39  ;;  %v7368_v34 = vld [vmem:[#allocation10 + $0x244] ss:$16 sps:$4 sm:$0xff]   ;;  %v7390_v39 = vld [vmem:[#allocation10 + $0x3c0] ss:$16 sps:$4 sm:$0xff]  }
 0x322   :  { %4617 = vmatprep.subr.bf16.mxu0 %v7305_v41  ;;  %v7396_v41 = vld [vmem:[#allocation10 + $0x3a0] ss:$16 sps:$4 sm:$0xff]  }
 0x324   :  { %3771 = vmatpush1.bf16.msra.mxu1 %v7255_v8  ;;  %v7374_v8 = vld [vmem:[#allocation10 + $0x224] ss:$16 sps:$4 sm:$0xff]  }
 0x325   :  { %3772 = vmatprep.subr.bf16.mxu1 %v7260_v37  ;;  %4618 = vmatpush1.bf16.msra.mxu0 %v7303_v43  ;;  %v7380_v37 = vld [vmem:[#allocation10 + $0x204] ss:$16 sps:$4 sm:$0xff]   ;;  %v7402_v43 = vld [vmem:[#allocation10 + $0x380] ss:$16 sps:$4 sm:$0xff]  }
 0x326   :  { %4619 = vmatprep.subr.bf16.mxu0 %v7308_v45  ;;  %v7408_v45 = vld [vmem:[#allocation10 + $0x360] ss:$16 sps:$4 sm:$0xff]  }
 0x328   :  { %3773 = vmatpush1.bf16.msra.mxu1 %v7258_v38  ;;  %v7386_v38 = vld [vmem:[#allocation10 + $0x3e4] ss:$16 sps:$4 sm:$0xff]  }
 0x329   :  { %3774 = vmatprep.subr.bf16.mxu1 %v7263_v40  ;;  %4620 = vmatpush1.bf16.msra.mxu0 %v7306_v47  ;;  %v7392_v40 = vld [vmem:[#allocation10 + $0x3c4] ss:$16 sps:$4 sm:$0xff]   ;;  %v7414_v47 = vld [vmem:[#allocation10 + $0x340] ss:$16 sps:$4 sm:$0xff]  }
 0x32a   :  { %4621 = vmatprep.subr.bf16.mxu0 %v7311_v50 }
 0x32c   :  { %3775 = vmatpush1.bf16.msra.mxu1 %v7261_v42  ;;  %v7398_v42 = vld [vmem:[#allocation10 + $0x3a4] ss:$16 sps:$4 sm:$0xff]  }
 0x32d   :  { %3776 = vmatprep.subr.bf16.mxu1 %v7266_v44  ;;  %4622 = vmatpush1.bf16.msra.mxu0 %v7309_v53  ;;  %v7404_v44 = vld [vmem:[#allocation10 + $0x384] ss:$16 sps:$4 sm:$0xff]   ;;  %v7420_v53 = vld [vmem:[#allocation10 + $0x320] ss:$16 sps:$4 sm:$0xff]  }
 0x32e   :  { %4623 = vmatprep.subr.bf16.mxu0 %v7314_v55 }
 0x330   :  { %3777 = vmatpush2.bf16.msra.mxu1 %v7264_v46  ;;  %v7410_v46 = vld [vmem:[#allocation10 + $0x364] ss:$16 sps:$4 sm:$0xff]  }
 0x331   :  { %3778 = vmatprep.subr.bf16.mxu1 %v7269_v49  ;;  %4624 = vmatpush2.bf16.msra.mxu0 %v7312_v57  ;;  %v7416_v49 = vld [vmem:[#allocation10 + $0x344] ss:$16 sps:$4 sm:$0xff]   ;;  %v7426_v57 = vld [vmem:[#allocation10 + $0x300] ss:$16 sps:$4 sm:$0xff]  }
 0x332   :  { %4625 = vmatprep.subr.bf16.mxu0 %v7317_v59  ;;  %v7434_v59 = vld [vmem:[#allocation10 + $0x2ec] ss:$16 sps:$4 sm:$0xff]  }
 0x334   :  { %3779 = vmatpush2.bf16.msra.mxu1 %v7267_v51  ;;  %v7422_v51 = vld [vmem:[#allocation10 + $0x324] ss:$16 sps:$4 sm:$0xff]  }
 0x335   :  { %3780 = vmatprep.subr.bf16.mxu1 %v7272_v54  ;;  %4626 = vmatpush2.bf16.msra.mxu0 %v7315_v61 }
 0x336   :  { %4627 = vmatprep.subr.bf16.mxu0 %v7320_v63 }
 0x338   :  { %3781 = vmatpush2.bf16.msra.mxu1 %v7270_v56  ;;  %v7428_v56 = vld [vmem:[#allocation10 + $0x304] ss:$16 sps:$4 sm:$0xff]  }
 0x339   :  { %3782 = vmatprep.subr.bf16.mxu1 %v7275_v58  ;;  %4628 = vmatpush2.bf16.msra.mxu0 %v7318_v48 }
 0x33a   :  { %4629 = vmatprep.subr.bf16.mxu0 %v7323_v4 }
 0x33c   :  { %3783 = vmatpush2.bf16.msra.mxu1 %v7273_v60  ;;  %v8059_v60 = vld [vmem:[%s8130_s6] sm:$0xf] }
 0x33d   :  { %3784 = vmatprep.subr.bf16.mxu1 %v7278_v62  ;;  %4630 = vmatpush2.bf16.msra.mxu0 %v7321_v6  ;;  %v2980_v61 = vrot.slane %v8059_v60, %v7992_v2  ;;  %v2984_v62 = vrot.slane %v8059_v60, %v7995_v3 }
 0x33e   :  { %4631 = vmatprep.subr.bf16.mxu0 %v7326_v13 }
 0x340   :  { %3785 = vmatpush2.bf16.msra.mxu1 %v7276_v16 }
 0x341   :  { %3786 = vmatprep.subr.bf16.mxu1 %v7281_v7  ;;  %4632 = vmatpush2.bf16.msra.mxu0 %v7324_v15 }
 0x342   :  { %4633 = vmatprep.subr.bf16.mxu0 %v7329_v11 }
 0x344   :  { %3787 = vmatpush2.bf16.msra.mxu1 %v7279_v5 }
 0x345   :  { %3788 = vmatprep.subr.bf16.mxu1 %v7284_v10  ;;  %4634 = vmatpush2.bf16.msra.mxu0 %v7327_v0 }
 0x346   :  { %4635 = vmatprep.subr.bf16.mxu0 %v7332_v22 }
 0x348   :  { %3789 = vmatpush2.bf16.msra.mxu1 %v7282_v14 }
 0x349   :  { %3790 = vmatprep.subr.bf16.mxu1 %v7287_v18  ;;  %4636 = vmatpush2.bf16.msra.mxu0 %v7330_v25 }
 0x34a   :  { %4637 = vmatprep.subr.bf16.mxu0 %v7335_v26  ;;  %v7339_v26 = vld [vmem:[#allocation10 + $0xe8] ss:$16 sps:$4 sm:$0xff]  }
 0x34c   :  { %3791 = vmatpush2.bf16.msra.mxu1 %v7285_v21 }
 0x34d   :  { %4638 = vmatpush2.bf16.msra.mxu0 %v7333_v27  ;;  %4648 = vmatprep.subr.bf16.mxu1 %v7338_v28  ;;  %v7345_v28 = vld [vmem:[#allocation10 + $0xc8] ss:$16 sps:$4 sm:$0xff]  }
 0x34e   :  { %4689 = vmatprep.subr.bf16.mxu0 %v7341_v23  ;;  %v7353_v23 = vld [vmem:[#allocation10 + $0xac] ss:$16 sps:$4 sm:$0xff]  }
 0x34f   :  { %3793 = vmatmul.mubr.bf16.vlgmr.msra.gmra.mxu1 %v8051_v12  ;;  %v7350_v12 = vld [vmem:[#allocation10 + $0x2a4] ss:$16 sps:$4 sm:$0xff]  }
 0x350   :  { %4649 = vmatpush1.bf16.msra.mxu1 %v7336_v19  ;;  %v7347_v19 = vld [vmem:[#allocation10 + $0xcc] ss:$16 sps:$4 sm:$0xff]  }
 0x351   :  { %4650 = vmatprep.subr.bf16.mxu1 %v7344_v1  ;;  %v7359_v1 = vld [vmem:[#allocation10 + $0x8c] ss:$16 sps:$4 sm:$0xff]  }
 0x354   :  { %4651 = vmatpush1.bf16.msra.mxu1 %v7342_v29  ;;  %v7351_v29 = vld [vmem:[#allocation10 + $0xa8] ss:$16 sps:$4 sm:$0xff]  }
 0x355   :  { %4652 = vmatprep.subr.bf16.mxu1 %v7350_v12  ;;  %v7365_v12 = vld [vmem:[#allocation10 + $0x6c] ss:$16 sps:$4 sm:$0xff]  }
 0x358   :  { %4653 = vmatpush1.bf16.msra.mxu1 %v7348_v20  ;;  %v7357_v20 = vld [vmem:[#allocation10 + $0x88] ss:$16 sps:$4 sm:$0xff]  }
 0x359   :  { %4654 = vmatprep.subr.bf16.mxu1 %v7356_v30  ;;  %v7371_v30 = vld [vmem:[#allocation10 + $0x4c] ss:$16 sps:$4 sm:$0xff]  }
 0x35c   :  { %4655 = vmatpush1.bf16.msra.mxu1 %v7354_v24  ;;  %v7363_v24 = vld [vmem:[#allocation10 + $0x68] ss:$16 sps:$4 sm:$0xff]  }
 0x35d   :  { %4656 = vmatprep.subr.bf16.mxu1 %v7362_v32  ;;  %v7377_v32 = vld [vmem:[#allocation10 + $0x2c] ss:$16 sps:$4 sm:$0xff]  }
 0x360   :  { %4657 = vmatpush1.bf16.msra.mxu1 %v7360_v31  ;;  %v7369_v31 = vld [vmem:[#allocation10 + $0x48] ss:$16 sps:$4 sm:$0xff]  }
 0x361   :  { %4658 = vmatprep.subr.bf16.mxu1 %v7368_v34  ;;  %v7383_v34 = vld [vmem:[#allocation10 + $0xc] ss:$16 sps:$4 sm:$0xff]  }
 0x364   :  { %4659 = vmatpush1.bf16.msra.mxu1 %v7366_v33  ;;  %v7375_v33 = vld [vmem:[#allocation10 + $0x28] ss:$16 sps:$4 sm:$0xff]  }
 0x365   :  { %4660 = vmatprep.subr.bf16.mxu1 %v7374_v8  ;;  %v7389_v8 = vld [vmem:[#allocation10 + $0x1ec] ss:$16 sps:$4 sm:$0xff]  }
 0x368   :  { %4661 = vmatpush1.bf16.msra.mxu1 %v7372_v52  ;;  %v7381_v52 = vld [vmem:[#allocation10 + $0x8] ss:$16 sps:$4 sm:$0xff]  }
 0x369   :  { %4662 = vmatprep.subr.bf16.mxu1 %v7380_v37  ;;  %v7395_v37 = vld [vmem:[#allocation10 + $0x1cc] ss:$16 sps:$4 sm:$0xff]  }
 0x36c   :  { %4663 = vmatpush1.bf16.msra.mxu1 %v7378_v35  ;;  %v7387_v35 = vld [vmem:[#allocation10 + $0x1e8] ss:$16 sps:$4 sm:$0xff]  }
 0x36d   :  { %4664 = vmatprep.subr.bf16.mxu1 %v7386_v38  ;;  %v7401_v38 = vld [vmem:[#allocation10 + $0x1ac] ss:$16 sps:$4 sm:$0xff]  }
 0x370   :  { %4665 = vmatpush2.bf16.msra.mxu1 %v7384_v17  ;;  %v7393_v17 = vld [vmem:[#allocation10 + $0x1c8] ss:$16 sps:$4 sm:$0xff]  }
 0x371   :  { %4666 = vmatprep.subr.bf16.mxu1 %v7392_v40  ;;  %v7407_v40 = vld [vmem:[#allocation10 + $0x18c] ss:$16 sps:$4 sm:$0xff]  }
 0x374   :  { %4667 = vmatpush2.bf16.msra.mxu1 %v7390_v39  ;;  %v7399_v39 = vld [vmem:[#allocation10 + $0x1a8] ss:$16 sps:$4 sm:$0xff]  }
 0x375   :  { %4668 = vmatprep.subr.bf16.mxu1 %v7398_v42  ;;  %v7413_v42 = vld [vmem:[#allocation10 + $0x16c] ss:$16 sps:$4 sm:$0xff]  }
 0x378   :  { %4669 = vmatpush2.bf16.msra.mxu1 %v7396_v41  ;;  %v7405_v41 = vld [vmem:[#allocation10 + $0x188] ss:$16 sps:$4 sm:$0xff]  }
 0x379   :  { %4670 = vmatprep.subr.bf16.mxu1 %v7404_v44  ;;  %v7419_v44 = vld [vmem:[#allocation10 + $0x14c] ss:$16 sps:$4 sm:$0xff]  }
 0x37c   :  { %4671 = vmatpush2.bf16.msra.mxu1 %v7402_v43  ;;  %v7411_v43 = vld [vmem:[#allocation10 + $0x168] ss:$16 sps:$4 sm:$0xff]  }
 0x37d   :  { %4672 = vmatprep.subr.bf16.mxu1 %v7410_v46  ;;  %v7417_v46 = vld [vmem:[#allocation10 + $0x148] ss:$16 sps:$4 sm:$0xff]  }
 0x380   :  { %4673 = vmatpush2.bf16.msra.mxu1 %v7408_v45  ;;  %v2988_v45 = vrot.slane %v8059_v60, %v8014_v36 }
 0x381   :  { %4674 = vmatprep.subr.bf16.mxu1 %v7416_v49  ;;  %v7425_v49 = vld [vmem:[#allocation10 + $0x12c] ss:$16 sps:$4 sm:$0xff]  }
 0x384   :  { %4675 = vmatpush2.bf16.msra.mxu1 %v7414_v47  ;;  %v2992_v47 = vrot.slane %v8059_v60, %v8017_v9 }
 0x385   :  { %4676 = vmatprep.subr.bf16.mxu1 %v7422_v51 }
 0x388   :  { %4677 = vmatpush2.bf16.msra.mxu1 %v7420_v53  ;;  %v7423_v53 = vld [vmem:[#allocation10 + $0x128] ss:$16 sps:$4 sm:$0xff]  }
 0x389   :  { %4678 = vmatprep.subr.bf16.mxu1 %v7428_v56  ;;  %v7431_v56 = vld [vmem:[#allocation10 + $0x10c] ss:$16 sps:$4 sm:$0xff]  }
 0x38c   :  { %4679 = vmatpush2.bf16.msra.mxu1 %v7426_v57 }
 0x38d   :  { %4730 = vmatprep.subr.bf16.mxu1 %v7434_v59 }
 0x38f   :  { %v3671_v50 = vpop.f32.mrf.mxu0 }
 0x390   :  { %v3672_v63 = vadd.f32 %v3671_v50, %v2980_v61 }
 0x391   :  { %v3673_v54 = vpop.f32.mrf.mxu0 }
 0x392   :  { %v3674_v7 = vadd.f32 %v3673_v54, %v2984_v62  ;;  %v7429_v62 = vld [vmem:[#allocation10 + $0x108] ss:$16 sps:$4 sm:$0xff]  }
 0x393   :  { %v3675_v55 = vpop.f32.mrf.mxu0 }
 0x395   :  { %v3676_v58 = vpop.f32.mrf.mxu0 }
 0x3cf   :  { %v3712_v16 = vpop.f32.mrf.mxu1  ;;  %v8065_v48 = vpop.f32.mrf.mxu0 }
 0x3d0   :  { %v3713_v4 = vadd.f32 %v3712_v16, %v3672_v63  ;;  %v3754_v50 = vadd.f32 %v8065_v48, %v2988_v45  ;;  %v7467_v45 = vld [vmem:[#allocation10 + $0x38c] ss:$16 sps:$4 sm:$0xff]  }
 0x3d1   :  { %v3714_v5 = vpop.f32.mrf.mxu1  ;;  %v8067_v6 = vpop.f32.mrf.mxu0 }
 0x3d2   :  { %vm3801_vm8 = vcmp.gt.f32.partialorder %v3713_v4, 0.0  ;;  %v3805_v10 = vmul.f32 0.2, %v3713_v4  ;;  %v3715_v13 = vadd.f32 %v3714_v5, %v3674_v7  ;;  %v3756_v54 = vadd.f32 %v8067_v6, %v2992_v47  ;;  %v7437_v6 = vld [vmem:[#allocation10 + $0x2cc] ss:$16 sps:$4 sm:$0xff]  }
 0x3d3   :  { %v3716_v14 = vpop.f32.mrf.mxu1  ;;  %v3757_v15 = vpop.f32.mrf.mxu0  ;;  %v7465_v47 = vld [vmem:[#allocation10 + $0x388] ss:$16 sps:$4 sm:$0xff]  }
 0x3d4   :  { %vm3802_vm9 = vcmp.gt.f32.partialorder %v3715_v13, 0.0  ;;  %v3806_v18 = vmul.f32 0.2, %v3715_v13  ;;  %v3809_v11 = vsel %vm3801_vm8, %v3713_v4, %v3805_v10  ;;  %v7432_v4 = vld [vmem:[#allocation10 + $0x2e8] ss:$16 sps:$4 sm:$0xff]  }
 0x3d5   :  { %v3717_v21 = vpop.f32.mrf.mxu1  ;;  %v3758_v0 = vpop.f32.mrf.mxu0  ;;  %v8069_v27 = vpack.c.bf16 %v3809_v11, %v3809_v11  ;;  %v7435_v10 = vld [vmem:[#allocation10 + $0x2c8] ss:$16 sps:$4 sm:$0xff]   ;;  %v7443_v15 = vld [vmem:[#allocation10 + $0x28c] ss:$16 sps:$4 sm:$0xff]   ;;  %v7482_v11 = vld [vmem:[#allocation11 + $0xe4] ss:$16 sps:$4 sm:$0xff]  }
 0x3d6   :  { %v3810_v22 = vsel %vm3802_vm9, %v3715_v13, %v3806_v18  ;;  %v7440_v13 = vld [vmem:[#allocation10 + $0x2ac] ss:$16 sps:$4 sm:$0xff]   ;;  %v7438_v14 = vld [vmem:[#allocation10 + $0x2a8] ss:$16 sps:$4 sm:$0xff]   ;;  %v7480_v18 = vld [vmem:[#allocation11 + $0xe0] ss:$16 sps:$4 sm:$0xff]  }
 0x3d7   :  { %v3814_v25 = vpack.c.bf16 %v3810_v22, %v3810_v22  ;;  %v7485_v21 = vld [vmem:[#allocation11 + $0xc4] ss:$16 sps:$4 sm:$0xff]   ;;  %v7441_v0 = vld [vmem:[#allocation10 + $0x288] ss:$16 sps:$4 sm:$0xff]   ;;  %v7483_v22 = vld [vmem:[#allocation11 + $0xc0] ss:$16 sps:$4 sm:$0xff]  }
 0x3d9   :  { %4639 = vmatprep.mubr.bf16.mxu0 %v3814_v25 }
 0x3da   :  { %4640 = vmatmul.mubr.bf16.vlgmr.msra.gmra.mxu0 %v8069_v27 }
 0x3db   :  { %4690 = vmatpush1.bf16.msra.mxu0 %v7339_v26  ;;  %4721 = vmatprep.mubr.bf16.mxu0 %v3814_v25  ;;  %v7446_v25 = vld [vmem:[#allocation10 + $0x26c] ss:$16 sps:$4 sm:$0xff]   ;;  %v7488_v26 = vld [vmem:[#allocation11 + $0xa4] ss:$16 sps:$4 sm:$0xff]  }
 0x3dc   :  { %4691 = vmatprep.subr.bf16.mxu0 %v7347_v19  ;;  %v7486_v19 = vld [vmem:[#allocation11 + $0xa0] ss:$16 sps:$4 sm:$0xff]  }
 0x3df   :  { %4692 = vmatpush1.bf16.msra.mxu0 %v7345_v28  ;;  %v7449_v28 = vld [vmem:[#allocation10 + $0x24c] ss:$16 sps:$4 sm:$0xff]  }
 0x3e0   :  { %4693 = vmatprep.subr.bf16.mxu0 %v7353_v23  ;;  %v7491_v23 = vld [vmem:[#allocation11 + $0x84] ss:$16 sps:$4 sm:$0xff]  }
 0x3e3   :  { %4694 = vmatpush1.bf16.msra.mxu0 %v7351_v29  ;;  %v7447_v29 = vld [vmem:[#allocation10 + $0x248] ss:$16 sps:$4 sm:$0xff]  }
 0x3e4   :  { %4695 = vmatprep.subr.bf16.mxu0 %v7359_v1  ;;  %v7489_v1 = vld [vmem:[#allocation11 + $0x80] ss:$16 sps:$4 sm:$0xff]  }
 0x3e7   :  { %4696 = vmatpush1.bf16.msra.mxu0 %v7357_v20  ;;  %v7452_v20 = vld [vmem:[#allocation10 + $0x22c] ss:$16 sps:$4 sm:$0xff]  }
 0x3e8   :  { %4697 = vmatprep.subr.bf16.mxu0 %v7365_v12  ;;  %v7494_v12 = vld [vmem:[#allocation11 + $0x64] ss:$16 sps:$4 sm:$0xff]  }
 0x3eb   :  { %4698 = vmatpush1.bf16.msra.mxu0 %v7363_v24  ;;  %v7450_v24 = vld [vmem:[#allocation10 + $0x228] ss:$16 sps:$4 sm:$0xff]  }
 0x3ec   :  { %4699 = vmatprep.subr.bf16.mxu0 %v7371_v30  ;;  %v7492_v30 = vld [vmem:[#allocation11 + $0x60] ss:$16 sps:$4 sm:$0xff]  }
 0x3ef   :  { %4700 = vmatpush1.bf16.msra.mxu0 %v7369_v31  ;;  %v7455_v31 = vld [vmem:[#allocation10 + $0x20c] ss:$16 sps:$4 sm:$0xff]  }
 0x3f0   :  { %4701 = vmatprep.subr.bf16.mxu0 %v7377_v32  ;;  %v7497_v32 = vld [vmem:[#allocation11 + $0x44] ss:$16 sps:$4 sm:$0xff]  }
 0x3f3   :  { %4702 = vmatpush1.bf16.msra.mxu0 %v7375_v33  ;;  %v7453_v33 = vld [vmem:[#allocation10 + $0x208] ss:$16 sps:$4 sm:$0xff]  }
 0x3f4   :  { %4703 = vmatprep.subr.bf16.mxu0 %v7383_v34  ;;  %v7495_v34 = vld [vmem:[#allocation11 + $0x40] ss:$16 sps:$4 sm:$0xff]  }
 0x3f7   :  { %4704 = vmatpush1.bf16.msra.mxu0 %v7381_v52  ;;  %v7458_v52 = vld [vmem:[#allocation10 + $0x3ec] ss:$16 sps:$4 sm:$0xff]  }
 0x3f8   :  { %4705 = vmatprep.subr.bf16.mxu0 %v7389_v8  ;;  %v7500_v8 = vld [vmem:[#allocation11 + $0x24] ss:$16 sps:$4 sm:$0xff]  }
 0x3fb   :  { %4706 = vmatpush2.bf16.msra.mxu0 %v7387_v35  ;;  %v7456_v35 = vld [vmem:[#allocation10 + $0x3e8] ss:$16 sps:$4 sm:$0xff]  }
 0x3fc   :  { %4707 = vmatprep.subr.bf16.mxu0 %v7395_v37  ;;  %v7498_v37 = vld [vmem:[#allocation11 + $0x20] ss:$16 sps:$4 sm:$0xff]  }
 0x3ff   :  { %4708 = vmatpush2.bf16.msra.mxu0 %v7393_v17  ;;  %v7461_v17 = vld [vmem:[#allocation10 + $0x3cc] ss:$16 sps:$4 sm:$0xff]  }
 0x400   :  { %4709 = vmatprep.subr.bf16.mxu0 %v7401_v38  ;;  %v7503_v38 = vld [vmem:[#allocation11 + $0x4] ss:$16 sps:$4 sm:$0xff]  }
 0x403   :  { %4710 = vmatpush2.bf16.msra.mxu0 %v7399_v39  ;;  %v7459_v39 = vld [vmem:[#allocation10 + $0x3c8] ss:$16 sps:$4 sm:$0xff]  }
 0x404   :  { %4711 = vmatprep.subr.bf16.mxu0 %v7407_v40  ;;  %v7501_v40 = vld [vmem:[#allocation11] ss:$16 sps:$4 sm:$0xff]  }
 0x407   :  { %4712 = vmatpush2.bf16.msra.mxu0 %v7405_v41  ;;  %v7464_v41 = vld [vmem:[#allocation10 + $0x3ac] ss:$16 sps:$4 sm:$0xff]  }
 0x408   :  { %4713 = vmatprep.subr.bf16.mxu0 %v7413_v42  ;;  %v7506_v42 = vld [vmem:[#allocation11 + $0x1e4] ss:$16 sps:$4 sm:$0xff]  }
 0x40b   :  { %4714 = vmatpush2.bf16.msra.mxu0 %v7411_v43  ;;  %v7462_v43 = vld [vmem:[#allocation10 + $0x3a8] ss:$16 sps:$4 sm:$0xff]  }
 0x40c   :  { %4715 = vmatprep.subr.bf16.mxu0 %v7419_v44  ;;  %v7504_v44 = vld [vmem:[#allocation11 + $0x1e0] ss:$16 sps:$4 sm:$0xff]  }
 0x40f   :  { %v3794_v51 = vpop.f32.mrf.mxu1  ;;  %4716 = vmatpush2.bf16.msra.mxu0 %v7417_v46  ;;  %v7509_v46 = vld [vmem:[#allocation11 + $0x1c4] ss:$16 sps:$4 sm:$0xff]  }
 0x410   :  { %v3795_v55 = vadd.f32 %v3794_v51, %v3754_v50  ;;  %4717 = vmatprep.subr.bf16.mxu0 %v7425_v49  ;;  %v7507_v49 = vld [vmem:[#allocation11 + $0x1c0] ss:$16 sps:$4 sm:$0xff]   ;;  %v7470_v50 = vld [vmem:[#allocation10 + $0x36c] ss:$16 sps:$4 sm:$0xff]   ;;  %v7512_v51 = vld [vmem:[#allocation11 + $0x1a4] ss:$16 sps:$4 sm:$0xff]  }
 0x411   :  { %v3796_v57 = vpop.f32.mrf.mxu1 }
 0x412   :  { %vm3803_vm10 = vcmp.gt.f32.partialorder %v3795_v55, 0.0  ;;  %v3807_v58 = vmul.f32 0.2, %v3795_v55  ;;  %v3797_v59 = vadd.f32 %v3796_v57, %v3756_v54  ;;  %v7510_v54 = vld [vmem:[#allocation11 + $0x1a0] ss:$16 sps:$4 sm:$0xff]  }
 0x413   :  { %v3798_v61 = vpop.f32.mrf.mxu1  ;;  %4718 = vmatpush2.bf16.msra.mxu0 %v7423_v53  ;;  %v7468_v53 = vld [vmem:[#allocation10 + $0x368] ss:$16 sps:$4 sm:$0xff]  }
 0x414   :  { %vm3804_vm11 = vcmp.gt.f32.partialorder %v3797_v59, 0.0  ;;  %v3808_v60 = vmul.f32 0.2, %v3797_v59  ;;  %4719 = vmatprep.subr.bf16.mxu0 %v7431_v56  ;;  %v3811_v63 = vsel %vm3803_vm10, %v3795_v55, %v3807_v58  ;;  %v7473_v55 = vld [vmem:[#allocation10 + $0x34c] ss:$16 sps:$4 sm:$0xff]  }
 0x415   :  { %v3799_v16 = vpop.f32.mrf.mxu1  ;;  %v8078_v5 = vpack.c.bf16 %v3811_v63, %v3811_v63  ;;  %v7515_v56 = vld [vmem:[#allocation11 + $0x184] ss:$16 sps:$4 sm:$0xff]   ;;  %v7471_v57 = vld [vmem:[#allocation10 + $0x348] ss:$16 sps:$4 sm:$0xff]   ;;  %v7513_v58 = vld [vmem:[#allocation11 + $0x180] ss:$16 sps:$4 sm:$0xff]  }
 0x416   :  { %v3812_v48 = vsel %vm3804_vm11, %v3797_v59, %v3808_v60  ;;  %v7476_v59 = vld [vmem:[#allocation10 + $0x32c] ss:$16 sps:$4 sm:$0xff]   ;;  %v7518_v61 = vld [vmem:[#allocation11 + $0x164] ss:$16 sps:$4 sm:$0xff]   ;;  %v7516_v60 = vld [vmem:[#allocation11 + $0x160] ss:$16 sps:$4 sm:$0xff]  }
 0x417   :  { %4720 = vmatpush2.bf16.msra.mxu0 %v7429_v62  ;;  %v3816_v7 = vpack.c.bf16 %v3812_v48, %v3812_v48  ;;  %v7474_v62 = vld [vmem:[#allocation10 + $0x328] ss:$16 sps:$4 sm:$0xff]   ;;  %v7479_v63 = vld [vmem:[#allocation10 + $0x30c] ss:$16 sps:$4 sm:$0xff]   ;;  %v7521_v16 = vld [vmem:[#allocation11 + $0x144] ss:$16 sps:$4 sm:$0xff]  }
 0x418   :  { %5577 = vmatprep.subr.bf16.mxu0 %v7482_v11  ;;  %v7477_v48 = vld [vmem:[#allocation10 + $0x308] ss:$16 sps:$4 sm:$0xff]   ;;  %v7534_v11 = vld [vmem:[#allocation11 + $0x2c0] ss:$16 sps:$4 sm:$0xff]  }
 0x419   :  { %4680 = vmatprep.mubr.bf16.mxu1 %v3816_v7 }
 0x41a   :  { %4681 = vmatmul.mubr.bf16.vlgmr.msra.gmra.mxu1 %v8078_v5  ;;  %4722 = vmatmul.mubr.bf16.vlgmr.msra.gmra.mxu0 %v8069_v27  ;;  %v7444_v27 = vld [vmem:[#allocation10 + $0x268] ss:$16 sps:$4 sm:$0xff]  }
 0x41b   :  { %4731 = vmatpush1.bf16.msra.mxu1 %v7432_v4  ;;  %4762 = vmatprep.mubr.bf16.mxu1 %v3816_v7  ;;  %v7519_v7 = vld [vmem:[#allocation11 + $0x140] ss:$16 sps:$4 sm:$0xff]   ;;  %v7524_v4 = vld [vmem:[#allocation11 + $0x124] ss:$16 sps:$4 sm:$0xff]  }
 0x41c   :  { %4732 = vmatprep.subr.bf16.mxu1 %v7437_v6  ;;  %5578 = vmatpush1.bf16.msra.mxu0 %v7480_v18  ;;  %v7522_v6 = vld [vmem:[#allocation11 + $0x120] ss:$16 sps:$4 sm:$0xff]   ;;  %v7533_v18 = vld [vmem:[#allocation11 + $0xec] ss:$16 sps:$4 sm:$0xff]  }
 0x41d   :  { %5579 = vmatprep.subr.bf16.mxu0 %v7485_v21  ;;  %v7536_v21 = vld [vmem:[#allocation11 + $0x2c4] ss:$16 sps:$4 sm:$0xff]  }
 0x41f   :  { %4733 = vmatpush1.bf16.msra.mxu1 %v7435_v10  ;;  %v7527_v10 = vld [vmem:[#allocation11 + $0x104] ss:$16 sps:$4 sm:$0xff]  }
 0x420   :  { %4734 = vmatprep.subr.bf16.mxu1 %v7440_v13  ;;  %5580 = vmatpush1.bf16.msra.mxu0 %v7483_v22  ;;  %v7525_v13 = vld [vmem:[#allocation11 + $0x100] ss:$16 sps:$4 sm:$0xff]  }
 0x421   :  { %5581 = vmatprep.subr.bf16.mxu0 %v7488_v26  ;;  %v7546_v22 = vld [vmem:[#allocation11 + $0x280] ss:$16 sps:$4 sm:$0xff]  }
 0x422   :  { %v7552_v26 = vld [vmem:[#allocation11 + $0x260] ss:$16 sps:$4 sm:$0xff]  }
 0x423   :  { %4735 = vmatpush1.bf16.msra.mxu1 %v7438_v14  ;;  %v7528_v14 = vld [vmem:[#allocation11 + $0x2e0] ss:$16 sps:$4 sm:$0xff]  }
 0x424   :  { %4736 = vmatprep.subr.bf16.mxu1 %v7443_v15  ;;  %5582 = vmatpush1.bf16.msra.mxu0 %v7486_v19  ;;  %v7530_v15 = vld [vmem:[#allocation11 + $0x2e4] ss:$16 sps:$4 sm:$0xff]   ;;  %v7558_v19 = vld [vmem:[#allocation11 + $0x240] ss:$16 sps:$4 sm:$0xff]  }
 0x425   :  { %5583 = vmatprep.subr.bf16.mxu0 %v7491_v23  ;;  %v7564_v23 = vld [vmem:[#allocation11 + $0x220] ss:$16 sps:$4 sm:$0xff]  }
 0x427   :  { %4737 = vmatpush1.bf16.msra.mxu1 %v7441_v0  ;;  %v7540_v0 = vld [vmem:[#allocation11 + $0x2a0] ss:$16 sps:$4 sm:$0xff]  }
 0x428   :  { %4738 = vmatprep.subr.bf16.mxu1 %v7446_v25  ;;  %5584 = vmatpush1.bf16.msra.mxu0 %v7489_v1  ;;  %v7548_v25 = vld [vmem:[#allocation11 + $0x284] ss:$16 sps:$4 sm:$0xff]   ;;  %v7570_v1 = vld [vmem:[#allocation11 + $0x200] ss:$16 sps:$4 sm:$0xff]  }
 0x429   :  { %5585 = vmatprep.subr.bf16.mxu0 %v7494_v12  ;;  %v7576_v12 = vld [vmem:[#allocation11 + $0x3e0] ss:$16 sps:$4 sm:$0xff]  }
 0x42b   :  { %4739 = vmatpush1.bf16.msra.mxu1 %v7444_v27  ;;  %v7554_v27 = vld [vmem:[#allocation11 + $0x264] ss:$16 sps:$4 sm:$0xff]  }
 0x42c   :  { %4740 = vmatprep.subr.bf16.mxu1 %v7449_v28  ;;  %5586 = vmatpush1.bf16.msra.mxu0 %v7492_v30  ;;  %v7560_v28 = vld [vmem:[#allocation11 + $0x244] ss:$16 sps:$4 sm:$0xff]   ;;  %v7582_v30 = vld [vmem:[#allocation11 + $0x3c0] ss:$16 sps:$4 sm:$0xff]  }
 0x42d   :  { %5587 = vmatprep.subr.bf16.mxu0 %v7497_v32  ;;  %v7588_v32 = vld [vmem:[#allocation11 + $0x3a0] ss:$16 sps:$4 sm:$0xff]  }
 0x42f   :  { %4741 = vmatpush1.bf16.msra.mxu1 %v7447_v29  ;;  %v7566_v29 = vld [vmem:[#allocation11 + $0x224] ss:$16 sps:$4 sm:$0xff]  }
 0x430   :  { %4742 = vmatprep.subr.bf16.mxu1 %v7452_v20  ;;  %5588 = vmatpush1.bf16.msra.mxu0 %v7495_v34  ;;  %v7572_v20 = vld [vmem:[#allocation11 + $0x204] ss:$16 sps:$4 sm:$0xff]   ;;  %v7594_v34 = vld [vmem:[#allocation11 + $0x380] ss:$16 sps:$4 sm:$0xff]  }
 0x431   :  { %5589 = vmatprep.subr.bf16.mxu0 %v7500_v8  ;;  %v7600_v8 = vld [vmem:[#allocation11 + $0x360] ss:$16 sps:$4 sm:$0xff]  }
 0x433   :  { %4743 = vmatpush1.bf16.msra.mxu1 %v7450_v24  ;;  %v7578_v24 = vld [vmem:[#allocation11 + $0x3e4] ss:$16 sps:$4 sm:$0xff]  }
 0x434   :  { %4744 = vmatprep.subr.bf16.mxu1 %v7455_v31  ;;  %5590 = vmatpush1.bf16.msra.mxu0 %v7498_v37  ;;  %v7584_v31 = vld [vmem:[#allocation11 + $0x3c4] ss:$16 sps:$4 sm:$0xff]   ;;  %v7606_v37 = vld [vmem:[#allocation11 + $0x340] ss:$16 sps:$4 sm:$0xff]  }
 0x435   :  { %5591 = vmatprep.subr.bf16.mxu0 %v7503_v38 }
 0x437   :  { %4745 = vmatpush1.bf16.msra.mxu1 %v7453_v33  ;;  %v7590_v33 = vld [vmem:[#allocation11 + $0x3a4] ss:$16 sps:$4 sm:$0xff]  }
 0x438   :  { %4746 = vmatprep.subr.bf16.mxu1 %v7458_v52  ;;  %5592 = vmatpush1.bf16.msra.mxu0 %v7501_v40  ;;  %v7596_v52 = vld [vmem:[#allocation11 + $0x384] ss:$16 sps:$4 sm:$0xff]   ;;  %v7612_v40 = vld [vmem:[#allocation11 + $0x320] ss:$16 sps:$4 sm:$0xff]  }
 0x439   :  { %5593 = vmatprep.subr.bf16.mxu0 %v7506_v42 }
 0x43b   :  { %4747 = vmatpush2.bf16.msra.mxu1 %v7456_v35  ;;  %v7602_v35 = vld [vmem:[#allocation11 + $0x364] ss:$16 sps:$4 sm:$0xff]  }
 0x43c   :  { %4748 = vmatprep.subr.bf16.mxu1 %v7461_v17  ;;  %5594 = vmatpush2.bf16.msra.mxu0 %v7504_v44  ;;  %v7608_v17 = vld [vmem:[#allocation11 + $0x344] ss:$16 sps:$4 sm:$0xff]   ;;  %v7618_v44 = vld [vmem:[#allocation11 + $0x300] ss:$16 sps:$4 sm:$0xff]  }
 0x43d   :  { %5595 = vmatprep.subr.bf16.mxu0 %v7509_v46  ;;  %v7626_v46 = vld [vmem:[#allocation11 + $0x2ec] ss:$16 sps:$4 sm:$0xff]  }
 0x43f   :  { %4749 = vmatpush2.bf16.msra.mxu1 %v7459_v39  ;;  %v7614_v39 = vld [vmem:[#allocation11 + $0x324] ss:$16 sps:$4 sm:$0xff]  }
 0x440   :  { %4750 = vmatprep.subr.bf16.mxu1 %v7464_v41  ;;  %5596 = vmatpush2.bf16.msra.mxu0 %v7507_v49 }
 0x441   :  { %5597 = vmatprep.subr.bf16.mxu0 %v7512_v51 }
 0x443   :  { %4751 = vmatpush2.bf16.msra.mxu1 %v7462_v43  ;;  %v7620_v43 = vld [vmem:[#allocation11 + $0x304] ss:$16 sps:$4 sm:$0xff]  }
 0x444   :  { %4752 = vmatprep.subr.bf16.mxu1 %v7467_v45  ;;  %5598 = vmatpush2.bf16.msra.mxu0 %v7510_v54 }
 0x445   :  { %5599 = vmatprep.subr.bf16.mxu0 %v7515_v56 }
 0x447   :  { %4753 = vmatpush2.bf16.msra.mxu1 %v7465_v47  ;;  %v8086_v47 = vld [vmem:[%s8132_s8] sm:$0xf] }
 0x448   :  { %4754 = vmatprep.subr.bf16.mxu1 %v7470_v50  ;;  %5600 = vmatpush2.bf16.msra.mxu0 %v7513_v58  ;;  %v3950_v49 = vrot.slane %v8086_v47, %v7992_v2  ;;  %v3954_v50 = vrot.slane %v8086_v47, %v7995_v3 }
 0x449   :  { %5601 = vmatprep.subr.bf16.mxu0 %v7518_v61 }
 0x44b   :  { %4755 = vmatpush2.bf16.msra.mxu1 %v7468_v53 }
 0x44c   :  { %4756 = vmatprep.subr.bf16.mxu1 %v7473_v55  ;;  %5602 = vmatpush2.bf16.msra.mxu0 %v7516_v60 }
 0x44d   :  { %5603 = vmatprep.subr.bf16.mxu0 %v7521_v16 }
 0x44f   :  { %4757 = vmatpush2.bf16.msra.mxu1 %v7471_v57 }
 0x450   :  { %4758 = vmatprep.subr.bf16.mxu1 %v7476_v59  ;;  %5604 = vmatpush2.bf16.msra.mxu0 %v7519_v7 }
 0x451   :  { %5605 = vmatprep.subr.bf16.mxu0 %v7524_v4 }
 0x453   :  { %4759 = vmatpush2.bf16.msra.mxu1 %v7474_v62 }
 0x454   :  { %4760 = vmatprep.subr.bf16.mxu1 %v7479_v63  ;;  %5606 = vmatpush2.bf16.msra.mxu0 %v7522_v6 }
 0x455   :  { %5607 = vmatprep.subr.bf16.mxu0 %v7527_v10  ;;  %v7531_v10 = vld [vmem:[#allocation11 + $0xe8] ss:$16 sps:$4 sm:$0xff]  }
 0x457   :  { %4761 = vmatpush2.bf16.msra.mxu1 %v7477_v48 }
 0x458   :  { %5608 = vmatpush2.bf16.msra.mxu0 %v7525_v13  ;;  %5618 = vmatprep.subr.bf16.mxu1 %v7530_v15  ;;  %v7537_v15 = vld [vmem:[#allocation11 + $0xc8] ss:$16 sps:$4 sm:$0xff]  }
 0x459   :  { %5659 = vmatprep.subr.bf16.mxu0 %v7533_v18  ;;  %v7545_v18 = vld [vmem:[#allocation11 + $0xac] ss:$16 sps:$4 sm:$0xff]  }
 0x45a   :  { %4763 = vmatmul.mubr.bf16.vlgmr.msra.gmra.mxu1 %v8078_v5  ;;  %v7542_v5 = vld [vmem:[#allocation11 + $0x2a4] ss:$16 sps:$4 sm:$0xff]  }
 0x45b   :  { %5619 = vmatpush1.bf16.msra.mxu1 %v7528_v14  ;;  %v7539_v14 = vld [vmem:[#allocation11 + $0xcc] ss:$16 sps:$4 sm:$0xff]  }
 0x45c   :  { %5620 = vmatprep.subr.bf16.mxu1 %v7536_v21  ;;  %v7551_v21 = vld [vmem:[#allocation11 + $0x8c] ss:$16 sps:$4 sm:$0xff]  }
 0x45f   :  { %5621 = vmatpush1.bf16.msra.mxu1 %v7534_v11  ;;  %v7543_v11 = vld [vmem:[#allocation11 + $0xa8] ss:$16 sps:$4 sm:$0xff]  }
 0x460   :  { %5622 = vmatprep.subr.bf16.mxu1 %v7542_v5  ;;  %v7557_v5 = vld [vmem:[#allocation11 + $0x6c] ss:$16 sps:$4 sm:$0xff]  }
 0x463   :  { %5623 = vmatpush1.bf16.msra.mxu1 %v7540_v0  ;;  %v7549_v0 = vld [vmem:[#allocation11 + $0x88] ss:$16 sps:$4 sm:$0xff]  }
 0x464   :  { %5624 = vmatprep.subr.bf16.mxu1 %v7548_v25  ;;  %v7563_v25 = vld [vmem:[#allocation11 + $0x4c] ss:$16 sps:$4 sm:$0xff]  }
 0x467   :  { %5625 = vmatpush1.bf16.msra.mxu1 %v7546_v22  ;;  %v7555_v22 = vld [vmem:[#allocation11 + $0x68] ss:$16 sps:$4 sm:$0xff]  }
 0x468   :  { %5626 = vmatprep.subr.bf16.mxu1 %v7554_v27  ;;  %v7569_v27 = vld [vmem:[#allocation11 + $0x2c] ss:$16 sps:$4 sm:$0xff]  }
 0x46b   :  { %5627 = vmatpush1.bf16.msra.mxu1 %v7552_v26  ;;  %v7561_v26 = vld [vmem:[#allocation11 + $0x48] ss:$16 sps:$4 sm:$0xff]  }
 0x46c   :  { %5628 = vmatprep.subr.bf16.mxu1 %v7560_v28  ;;  %v7575_v28 = vld [vmem:[#allocation11 + $0xc] ss:$16 sps:$4 sm:$0xff]  }
 0x46f   :  { %5629 = vmatpush1.bf16.msra.mxu1 %v7558_v19  ;;  %v7567_v19 = vld [vmem:[#allocation11 + $0x28] ss:$16 sps:$4 sm:$0xff]  }
 0x470   :  { %5630 = vmatprep.subr.bf16.mxu1 %v7566_v29  ;;  %v7581_v29 = vld [vmem:[#allocation11 + $0x1ec] ss:$16 sps:$4 sm:$0xff]  }
 0x473   :  { %5631 = vmatpush1.bf16.msra.mxu1 %v7564_v23  ;;  %v7573_v23 = vld [vmem:[#allocation11 + $0x8] ss:$16 sps:$4 sm:$0xff]  }
 0x474   :  { %5632 = vmatprep.subr.bf16.mxu1 %v7572_v20  ;;  %v7587_v20 = vld [vmem:[#allocation11 + $0x1cc] ss:$16 sps:$4 sm:$0xff]  }
 0x477   :  { %5633 = vmatpush1.bf16.msra.mxu1 %v7570_v1  ;;  %v7579_v1 = vld [vmem:[#allocation11 + $0x1e8] ss:$16 sps:$4 sm:$0xff]  }
 0x478   :  { %5634 = vmatprep.subr.bf16.mxu1 %v7578_v24  ;;  %v7593_v24 = vld [vmem:[#allocation11 + $0x1ac] ss:$16 sps:$4 sm:$0xff]  }
 0x47b   :  { %5635 = vmatpush2.bf16.msra.mxu1 %v7576_v12  ;;  %v7585_v12 = vld [vmem:[#allocation11 + $0x1c8] ss:$16 sps:$4 sm:$0xff]  }
 0x47c   :  { %5636 = vmatprep.subr.bf16.mxu1 %v7584_v31  ;;  %v7599_v31 = vld [vmem:[#allocation11 + $0x18c] ss:$16 sps:$4 sm:$0xff]  }
 0x47f   :  { %5637 = vmatpush2.bf16.msra.mxu1 %v7582_v30  ;;  %v7591_v30 = vld [vmem:[#allocation11 + $0x1a8] ss:$16 sps:$4 sm:$0xff]  }
 0x480   :  { %5638 = vmatprep.subr.bf16.mxu1 %v7590_v33  ;;  %v7605_v33 = vld [vmem:[#allocation11 + $0x16c] ss:$16 sps:$4 sm:$0xff]  }
 0x483   :  { %5639 = vmatpush2.bf16.msra.mxu1 %v7588_v32  ;;  %v7597_v32 = vld [vmem:[#allocation11 + $0x188] ss:$16 sps:$4 sm:$0xff]  }
 0x484   :  { %5640 = vmatprep.subr.bf16.mxu1 %v7596_v52  ;;  %v7611_v52 = vld [vmem:[#allocation11 + $0x14c] ss:$16 sps:$4 sm:$0xff]  }
 0x487   :  { %5641 = vmatpush2.bf16.msra.mxu1 %v7594_v34  ;;  %v7603_v34 = vld [vmem:[#allocation11 + $0x168] ss:$16 sps:$4 sm:$0xff]  }
 0x488   :  { %5642 = vmatprep.subr.bf16.mxu1 %v7602_v35  ;;  %v7609_v35 = vld [vmem:[#allocation11 + $0x148] ss:$16 sps:$4 sm:$0xff]  }
 0x48b   :  { %5643 = vmatpush2.bf16.msra.mxu1 %v7600_v8  ;;  %v3958_v8 = vrot.slane %v8086_v47, %v8014_v36 }
 0x48c   :  { %5644 = vmatprep.subr.bf16.mxu1 %v7608_v17  ;;  %v7617_v17 = vld [vmem:[#allocation11 + $0x12c] ss:$16 sps:$4 sm:$0xff]  }
 0x48f   :  { %5645 = vmatpush2.bf16.msra.mxu1 %v7606_v37  ;;  %v3962_v37 = vrot.slane %v8086_v47, %v8017_v9 }
 0x490   :  { %5646 = vmatprep.subr.bf16.mxu1 %v7614_v39 }
 0x493   :  { %5647 = vmatpush2.bf16.msra.mxu1 %v7612_v40  ;;  %v7615_v40 = vld [vmem:[#allocation11 + $0x128] ss:$16 sps:$4 sm:$0xff]  }
 0x494   :  { %5648 = vmatprep.subr.bf16.mxu1 %v7620_v43  ;;  %v7623_v43 = vld [vmem:[#allocation11 + $0x10c] ss:$16 sps:$4 sm:$0xff]  }
 0x497   :  { %5649 = vmatpush2.bf16.msra.mxu1 %v7618_v44 }
 0x498   :  { %5700 = vmatprep.subr.bf16.mxu1 %v7626_v46 }
 0x49a   :  { %v4641_v38 = vpop.f32.mrf.mxu0 }
 0x49b   :  { %v4642_v51 = vadd.f32 %v4641_v38, %v3950_v49 }
 0x49c   :  { %v4643_v41 = vpop.f32.mrf.mxu0 }
 0x49d   :  { %v4644_v55 = vadd.f32 %v4643_v41, %v3954_v50  ;;  %v7621_v50 = vld [vmem:[#allocation11 + $0x108] ss:$16 sps:$4 sm:$0xff]  }
 0x49e   :  { %v4645_v42 = vpop.f32.mrf.mxu0 }
 0x4a0   :  { %v4646_v45 = vpop.f32.mrf.mxu0 }
 0x4da   :  { %v4682_v53 = vpop.f32.mrf.mxu1  ;;  %v8092_v54 = vpop.f32.mrf.mxu0 }
 0x4db   :  { %v4683_v56 = vadd.f32 %v4682_v53, %v4642_v51  ;;  %v4724_v38 = vadd.f32 %v8092_v54, %v3958_v8 }
 0x4dc   :  { %v4684_v57 = vpop.f32.mrf.mxu1  ;;  %v8094_v58 = vpop.f32.mrf.mxu0 }
 0x4dd   :  { %vm4771_vm12 = vcmp.gt.f32.partialorder %v4683_v56, 0.0  ;;  %v4775_v59 = vmul.f32 0.2, %v4683_v56  ;;  %v4685_v61 = vadd.f32 %v4684_v57, %v4644_v55  ;;  %v4726_v41 = vadd.f32 %v8094_v58, %v3962_v37  ;;  %v7629_v58 = vld [vmem:[#allocation11 + $0x2cc] ss:$16 sps:$4 sm:$0xff]  }
 0x4de   :  { %v4686_v62 = vpop.f32.mrf.mxu1  ;;  %v4727_v60 = vpop.f32.mrf.mxu0 }
 0x4df   :  { %vm4772_vm13 = vcmp.gt.f32.partialorder %v4685_v61, 0.0  ;;  %v4776_v63 = vmul.f32 0.2, %v4685_v61  ;;  %v4779_v16 = vsel %vm4771_vm12, %v4683_v56, %v4775_v59  ;;  %v7624_v56 = vld [vmem:[#allocation11 + $0x2e8] ss:$16 sps:$4 sm:$0xff]  }
 0x4e0   :  { %v4687_v48 = vpop.f32.mrf.mxu1  ;;  %v4728_v7 = vpop.f32.mrf.mxu0  ;;  %v8096_v13 = vpack.c.bf16 %v4779_v16, %v4779_v16  ;;  %v7627_v59 = vld [vmem:[#allocation11 + $0x2c8] ss:$16 sps:$4 sm:$0xff]   ;;  %v7635_v60 = vld [vmem:[#allocation11 + $0x28c] ss:$16 sps:$4 sm:$0xff]  }
 0x4e1   :  { %v4780_v4 = vsel %vm4772_vm13, %v4685_v61, %v4776_v63  ;;  %v7632_v61 = vld [vmem:[#allocation11 + $0x2ac] ss:$16 sps:$4 sm:$0xff]   ;;  %v7630_v62 = vld [vmem:[#allocation11 + $0x2a8] ss:$16 sps:$4 sm:$0xff]  }
 0x4e2   :  { %v4784_v6 = vpack.c.bf16 %v4780_v4, %v4780_v4  ;;  %v7633_v63 = vld [vmem:[#allocation11 + $0x288] ss:$16 sps:$4 sm:$0xff]   ;;  %v7638_v16 = vld [vmem:[#allocation11 + $0x26c] ss:$16 sps:$4 sm:$0xff]  }
 0x4e3   :  { %v7636_v48 = vld [vmem:[#allocation11 + $0x268] ss:$16 sps:$4 sm:$0xff]   ;;  %v7641_v7 = vld [vmem:[#allocation11 + $0x24c] ss:$16 sps:$4 sm:$0xff]  }
 0x4e4   :  { %5609 = vmatprep.mubr.bf16.mxu0 %v4784_v6  ;;  %v7639_v4 = vld [vmem:[#allocation11 + $0x248] ss:$16 sps:$4 sm:$0xff]  }
 0x4e5   :  { %5610 = vmatmul.mubr.bf16.vlgmr.msra.gmra.mxu0 %v8096_v13 }
 0x4e6   :  { %5660 = vmatpush1.bf16.msra.mxu0 %v7531_v10  ;;  %5691 = vmatprep.mubr.bf16.mxu0 %v4784_v6  ;;  %v7644_v6 = vld [vmem:[#allocation11 + $0x22c] ss:$16 sps:$4 sm:$0xff]   ;;  %v7642_v10 = vld [vmem:[#allocation11 + $0x228] ss:$16 sps:$4 sm:$0xff]  }
 0x4e7   :  { %5661 = vmatprep.subr.bf16.mxu0 %v7539_v14  ;;  %v7645_v14 = vld [vmem:[#allocation11 + $0x208] ss:$16 sps:$4 sm:$0xff]  }
 0x4ea   :  { %5662 = vmatpush1.bf16.msra.mxu0 %v7537_v15  ;;  %v7650_v15 = vld [vmem:[#allocation11 + $0x3ec] ss:$16 sps:$4 sm:$0xff]  }
 0x4eb   :  { %5663 = vmatprep.subr.bf16.mxu0 %v7545_v18  ;;  %v7648_v18 = vld [vmem:[#allocation11 + $0x3e8] ss:$16 sps:$4 sm:$0xff]  }
 0x4ee   :  { %5664 = vmatpush1.bf16.msra.mxu0 %v7543_v11  ;;  %v7653_v11 = vld [vmem:[#allocation11 + $0x3cc] ss:$16 sps:$4 sm:$0xff]  }
 0x4ef   :  { %5665 = vmatprep.subr.bf16.mxu0 %v7551_v21  ;;  %v7651_v21 = vld [vmem:[#allocation11 + $0x3c8] ss:$16 sps:$4 sm:$0xff]  }
 0x4f2   :  { %5666 = vmatpush1.bf16.msra.mxu0 %v7549_v0  ;;  %v7656_v0 = vld [vmem:[#allocation11 + $0x3ac] ss:$16 sps:$4 sm:$0xff]  }
 0x4f3   :  { %5667 = vmatprep.subr.bf16.mxu0 %v7557_v5  ;;  %v7654_v5 = vld [vmem:[#allocation11 + $0x3a8] ss:$16 sps:$4 sm:$0xff]  }
 0x4f6   :  { %5668 = vmatpush1.bf16.msra.mxu0 %v7555_v22  ;;  %v7659_v22 = vld [vmem:[#allocation11 + $0x38c] ss:$16 sps:$4 sm:$0xff]  }
 0x4f7   :  { %5669 = vmatprep.subr.bf16.mxu0 %v7563_v25  ;;  %v7657_v25 = vld [vmem:[#allocation11 + $0x388] ss:$16 sps:$4 sm:$0xff]  }
 0x4fa   :  { %5670 = vmatpush1.bf16.msra.mxu0 %v7561_v26  ;;  %v7662_v26 = vld [vmem:[#allocation11 + $0x36c] ss:$16 sps:$4 sm:$0xff]  }
 0x4fb   :  { %5671 = vmatprep.subr.bf16.mxu0 %v7569_v27  ;;  %v7660_v27 = vld [vmem:[#allocation11 + $0x368] ss:$16 sps:$4 sm:$0xff]  }
 0x4fe   :  { %5672 = vmatpush1.bf16.msra.mxu0 %v7567_v19  ;;  %v7665_v19 = vld [vmem:[#allocation11 + $0x34c] ss:$16 sps:$4 sm:$0xff]  }
 0x4ff   :  { %5673 = vmatprep.subr.bf16.mxu0 %v7575_v28  ;;  %v7663_v28 = vld [vmem:[#allocation11 + $0x348] ss:$16 sps:$4 sm:$0xff]  }
 0x502   :  { %5674 = vmatpush1.bf16.msra.mxu0 %v7573_v23  ;;  %v7668_v23 = vld [vmem:[#allocation11 + $0x32c] ss:$16 sps:$4 sm:$0xff]  }
 0x503   :  { %5675 = vmatprep.subr.bf16.mxu0 %v7581_v29  ;;  %v7666_v29 = vld [vmem:[#allocation11 + $0x328] ss:$16 sps:$4 sm:$0xff]  }
 0x506   :  { %5676 = vmatpush2.bf16.msra.mxu0 %v7579_v1  ;;  %v7671_v1 = vld [vmem:[#allocation11 + $0x30c] ss:$16 sps:$4 sm:$0xff]  }
 0x507   :  { %5677 = vmatprep.subr.bf16.mxu0 %v7587_v20  ;;  %v7669_v20 = vld [vmem:[#allocation11 + $0x308] ss:$16 sps:$4 sm:$0xff]  }
 0x50a   :  { %5678 = vmatpush2.bf16.msra.mxu0 %v7585_v12 }
 0x50b   :  { %5679 = vmatprep.subr.bf16.mxu0 %v7593_v24 }
 0x50e   :  { %5680 = vmatpush2.bf16.msra.mxu0 %v7591_v30 }
 0x50f   :  { %5681 = vmatprep.subr.bf16.mxu0 %v7599_v31 }
 0x512   :  { %5682 = vmatpush2.bf16.msra.mxu0 %v7597_v32  ;;  %v4915_v32 = vld [vmem:[%s8134_s10] sm:$0xf] }
 0x513   :  { %5683 = vmatprep.subr.bf16.mxu0 %v7605_v33  ;;  %v4920_v33 = vrot.slane %v4915_v32, %v7992_v2 }
 0x516   :  { %5684 = vmatpush2.bf16.msra.mxu0 %v7603_v34  ;;  %v4924_v34 = vrot.slane %v4915_v32, %v7995_v3 }
 0x517   :  { %5685 = vmatprep.subr.bf16.mxu0 %v7611_v52 }
 0x51a   :  { %v4764_v39 = vpop.f32.mrf.mxu1  ;;  %5686 = vmatpush2.bf16.msra.mxu0 %v7609_v35 }
 0x51b   :  { %v4765_v42 = vadd.f32 %v4764_v39, %v4724_v38  ;;  %5687 = vmatprep.subr.bf16.mxu0 %v7617_v17  ;;  %v5753_v38 = vld [vmem:[#allocation13] sm:$0xf] }
 0x51c   :  { %v4766_v44 = vpop.f32.mrf.mxu1 }
 0x51d   :  { %vm4773_vm14 = vcmp.gt.f32.partialorder %v4765_v42, 0.0  ;;  %v4777_v45 = vmul.f32 0.2, %v4765_v42  ;;  %v4767_v46 = vadd.f32 %v4766_v44, %v4726_v41 }
 0x51e   :  { %v4768_v49 = vpop.f32.mrf.mxu1  ;;  %5688 = vmatpush2.bf16.msra.mxu0 %v7615_v40 }
 0x51f   :  { %vm4774_vm15 = vcmp.gt.f32.partialorder %v4767_v46, 0.0  ;;  %v4778_v47 = vmul.f32 0.2, %v4767_v46  ;;  %5689 = vmatprep.subr.bf16.mxu0 %v7623_v43  ;;  %v4781_v51 = vsel %vm4773_vm14, %v4765_v42, %v4777_v45  ;;  %v5758_v45 = vrot.slane %v5753_v38, %v7992_v2 }
 0x520   :  { %v4769_v53 = vpop.f32.mrf.mxu1  ;;  %v8105_v57 = vpack.c.bf16 %v4781_v51, %v4781_v51 }
 0x521   :  { %v4782_v54 = vsel %vm4774_vm15, %v4767_v46, %v4778_v47  ;;  %v5762_v46 = vrot.slane %v5753_v38, %v7995_v3  ;;  %v5766_v3 = vrot.slane %v5753_v38, %v8014_v36 }
 0x522   :  { %5690 = vmatpush2.bf16.msra.mxu0 %v7621_v50  ;;  %v4786_v55 = vpack.c.bf16 %v4782_v54, %v4782_v54 }
 0x524   :  { %5650 = vmatprep.mubr.bf16.mxu1 %v4786_v55 }
 0x525   :  { %5651 = vmatmul.mubr.bf16.vlgmr.msra.gmra.mxu1 %v8105_v57  ;;  %5692 = vmatmul.mubr.bf16.vlgmr.msra.gmra.mxu0 %v8096_v13  ;;  %v7647_v13 = vld [vmem:[#allocation11 + $0x20c] ss:$16 sps:$4 sm:$0xff]  }
 0x526   :  { %5701 = vmatpush1.bf16.msra.mxu1 %v7624_v56  ;;  %5732 = vmatprep.mubr.bf16.mxu1 %v4786_v55 }
 0x527   :  { %5702 = vmatprep.subr.bf16.mxu1 %v7629_v58  ;;  %v4932_v58 = vrot.slane %v4915_v32, %v8017_v9 }
 0x52a   :  { %5703 = vmatpush1.bf16.msra.mxu1 %v7627_v59 }
 0x52b   :  { %5704 = vmatprep.subr.bf16.mxu1 %v7632_v61 }
 0x52e   :  { %5705 = vmatpush1.bf16.msra.mxu1 %v7630_v62 }
 0x52f   :  { %5706 = vmatprep.subr.bf16.mxu1 %v7635_v60 }
 0x532   :  { %5707 = vmatpush1.bf16.msra.mxu1 %v7633_v63 }
 0x533   :  { %5708 = vmatprep.subr.bf16.mxu1 %v7638_v16 }
 0x536   :  { %5709 = vmatpush1.bf16.msra.mxu1 %v7636_v48 }
 0x537   :  { %5710 = vmatprep.subr.bf16.mxu1 %v7641_v7  ;;  %v5770_v7 = vrot.slane %v5753_v38, %v8017_v9 }
 0x53a   :  { %5711 = vmatpush1.bf16.msra.mxu1 %v7639_v4 }
 0x53b   :  { %5712 = vmatprep.subr.bf16.mxu1 %v7644_v6 }
 0x53e   :  { %5713 = vmatpush1.bf16.msra.mxu1 %v7642_v10 }
 0x53f   :  { %5714 = vmatprep.subr.bf16.mxu1 %v7647_v13 }
 0x542   :  { %5715 = vmatpush1.bf16.msra.mxu1 %v7645_v14 }
 0x543   :  { %5716 = vmatprep.subr.bf16.mxu1 %v7650_v15 }
 0x546   :  { %5717 = vmatpush2.bf16.msra.mxu1 %v7648_v18 }
 0x547   :  { %5718 = vmatprep.subr.bf16.mxu1 %v7653_v11 }
 0x54a   :  { %5719 = vmatpush2.bf16.msra.mxu1 %v7651_v21  ;;  %v6550_v21 = vld [vmem:[#allocation2] ss:$0 sm:$0xff] }
 0x54b   :  { %5720 = vmatprep.subr.bf16.mxu1 %v7656_v0 }
 0x54e   :  { %5721 = vmatpush2.bf16.msra.mxu1 %v7654_v5 }
 0x54f   :  { %5722 = vmatprep.subr.bf16.mxu1 %v7659_v22 }
 0x552   :  { %5723 = vmatpush2.bf16.msra.mxu1 %v7657_v25 }
 0x553   :  { %5724 = vmatprep.subr.bf16.mxu1 %v7662_v26 }
 0x556   :  { %5725 = vmatpush2.bf16.msra.mxu1 %v7660_v27 }
 0x557   :  { %5726 = vmatprep.subr.bf16.mxu1 %v7665_v19 }
 0x55a   :  { %5727 = vmatpush2.bf16.msra.mxu1 %v7663_v28 }
 0x55b   :  { %5728 = vmatprep.subr.bf16.mxu1 %v7668_v23 }
 0x55e   :  { %5729 = vmatpush2.bf16.msra.mxu1 %v7666_v29 }
 0x55f   :  { %5730 = vmatprep.subr.bf16.mxu1 %v7671_v1 }
 0x562   :  { %5731 = vmatpush2.bf16.msra.mxu1 %v7669_v20 }
 0x565   :  { %5733 = vmatmul.mubr.bf16.vlgmr.msra.gmra.mxu1 %v8105_v57  ;;  %v4928_v57 = vrot.slane %v4915_v32, %v8014_v36 }
 0x5a5   :  { %v5611_v12 = vpop.f32.mrf.mxu0 }
 0x5a6   :  { %v5612_v52 = vadd.f32 %v5611_v12, %v4920_v33 }
 0x5a7   :  { %v5613_v24 = vpop.f32.mrf.mxu0 }
 0x5a8   :  { %v5614_v37 = vadd.f32 %v5613_v24, %v4924_v34 }
 0x5a9   :  { %v5615_v30 = vpop.f32.mrf.mxu0 }
 0x5ab   :  { %v5616_v31 = vpop.f32.mrf.mxu0 }
 0x5e5   :  { %v5652_v8 = vpop.f32.mrf.mxu1  ;;  %v5693_v35 = vpop.f32.mrf.mxu0 }
 0x5e6   :  { %v5653_v17 = vadd.f32 %v5652_v8, %v5612_v52  ;;  %v5694_v59 = vadd.f32 %v5693_v35, %v4928_v57 }
 0x5e7   :  { %v5654_v39 = vpop.f32.mrf.mxu1  ;;  %v5695_v40 = vpop.f32.mrf.mxu0 }
 0x5e8   :  { %vm5741_vm0 = vcmp.gt.f32.partialorder %v5653_v17, 0.0  ;;  %v5745_v41 = vmul.f32 0.2, %v5653_v17  ;;  %v5655_v42 = vadd.f32 %v5654_v39, %v5614_v37  ;;  %v5696_v62 = vadd.f32 %v5695_v40, %v4932_v58 }
 0x5e9   :  { %v5656_v43 = vpop.f32.mrf.mxu1  ;;  %v5697_v44 = vpop.f32.mrf.mxu0 }
 0x5ea   :  { %v5749_v49 = vsel %vm5741_vm0, %v5653_v17, %v5745_v41  ;;  %vm5742_vm1 = vcmp.gt.f32.partialorder %v5655_v42, 0.0  ;;  %v5746_v50 = vmul.f32 0.2, %v5655_v42 }
 0x5eb   :  { %v5657_v47 = vpop.f32.mrf.mxu1  ;;  %v5698_v51 = vpop.f32.mrf.mxu0  ;;  %v5775_v54 = vmul.f32 %v5758_v45, %v5749_v49 }
 0x5ec   :  { %v5750_v53 = vsel %vm5742_vm1, %v5655_v42, %v5746_v50 }
 0x5ed   :  { %v5776_v55 = vmul.f32 %v5762_v46, %v5750_v53 }
 0x5ef   :  { %v5779_v56 = vadd.f32 %v5776_v55, %v5775_v54 }
 0x625   :  { %v5734_v61 = vpop.f32.mrf.mxu1 }
 0x626   :  { %v5735_v60 = vadd.f32 %v5734_v61, %v5694_v59 }
 0x627   :  { %v5736_v2 = vpop.f32.mrf.mxu1 }
 0x628   :  { %vm5743_vm2 = vcmp.gt.f32.partialorder %v5735_v60, 0.0  ;;  %v5747_v63 = vmul.f32 0.2, %v5735_v60  ;;  %v5737_v16 = vadd.f32 %v5736_v2, %v5696_v62 }
 0x629   :  { %v5738_v48 = vpop.f32.mrf.mxu1 }
 0x62a   :  { %vm5744_vm3 = vcmp.gt.f32.partialorder %v5737_v16, 0.0  ;;  %v5748_v4 = vmul.f32 0.2, %v5737_v16  ;;  %v5751_v6 = vsel %vm5743_vm2, %v5735_v60, %v5747_v63 }
 0x62b   :  { %v5739_v10 = vpop.f32.mrf.mxu1  ;;  %v5777_v13 = vmul.f32 %v5766_v3, %v5751_v6 }
 0x62c   :  { %v5752_v14 = vsel %vm5744_vm3, %v5737_v16, %v5748_v4 }
 0x62d   :  { %v5778_v15 = vmul.f32 %v5770_v7, %v5752_v14  ;;  %v5780_v18 = vadd.f32 %v5779_v56, %v5777_v13 }
 0x62f   :  { %v5781_v11 = vadd.f32 %v5780_v18, %v5778_v15 }
 0x631   :  { %5782 = vadd.xlane.f32.xlu0 %v5781_v11 }
 0x6ba   :  { %v5783_v0 = vpop.xlane.xlu0 %5782 }
 0x6bb   :  { %v5791_v5 = vadd.f32 %v6550_v21, %v5783_v0 }
 0x6bd   :  { %v5792_v36 = vsub.f32 0.0, %v5791_v5 }
 0x6bf   :  { %v5793_v22 = vmul.f32 1.442695, %v5792_v36 }
 0x6c1   :  { %7672 = vpow2.f32 %v5793_v22 }
 0x6ce   :  { %v7673_v25 = vpop.eup %7672 }
 0x6cf   :  { %v5795_v26 = vadd.f32 1.0, %v7673_v25 }
 0x6d1   :  { %7674 = vrcp.f32 %v5795_v26 }
 0x6de   :  { %v7675_v9 = vpop.eup %7674 }
 0x6df   :  { %5798 = vst.msk [vmem:[%s8137_s13] sm:$0xff] %vm5797_vm4, %v7675_v9 }
 0x6e0   :  { %5803 = vsyncpa [#allocation4], 1 }
 0x6e1   :  { %5804 = vsyncpa [#allocation6], 1 }
 0x6e2   :  { %5805 = vsyncpa [#allocation9], 1 }
 0x6e3   :  { %5806 = vsyncpa [#allocation12], 1 }

// kernel: tpu_custom_call.1
= control target key start
LH: loop header
LB: loop body
LE: loop exit
PB: predicated region body
PF: predicated region fallthrough
CT: control target
= control target key end

     0   :  { %s8124_s0 = inlined_call_operand.hbm [shape: bf16[8,896], index: 0, kind: input, shape index: {}]   ;;  %s8125_s1 = inlined_call_operand.hbm [shape: bf16[896,512], index: 1, kind: input, shape index: {}]   ;;  %s8126_s2 = inlined_call_operand.vmem [shape: f32[1,512], index: 2, kind: input, shape index: {}]   ;;  %s8127_s3 = inlined_call_operand.hbm [shape: bf16[512,512], index: 3, kind: input, shape index: {}]   ;;  %s8128_s4 = inlined_call_operand.vmem [shape: f32[1,512], index: 4, kind: input, shape index: {}]   ;;  %s8129_s5 = inlined_call_operand.hbm [shape: bf16[512,512], index: 5, kind: input, shape index: {}]   ;;  %s8130_s6 = inlined_call_operand.vmem [shape: f32[1,512], index: 6, kind: input, shape index: {}]   ;;  %s8131_s7 = inlined_call_operand.hbm [shape: bf16[512,512], index: 7, kind: input, shape index: {}]   ;;  %s8132_s8 = inlined_call_operand.vmem [shape: f32[1,512], index: 8, kind: input, shape index: {}]   ;;  %s8133_s9 = inlined_call_operand.hbm [shape: bf16[512,512], index: 9, kind: input, shape index: {}]   ;;  %s8134_s10 = inlined_call_operand.vmem [shape: f32[1,512], index: 10, kind: input, shape index: {}]   ;;  %s8135_s11 = inlined_call_operand.hbm [shape: f32[1,512], index: 11, kind: input, shape index: {}]   ;;  %s8136_s12 = inlined_call_operand.<no memory space> [shape: f32[1,1], index: 12, kind: input, shape index: {}]   ;;  %s8137_s13 = inlined_call_operand.vmem [shape: f32[8,1], index: 13, kind: output, shape index: {}]  }
   0x1   :  { %v18_v0 = vstv %s8136_s12 }
   0x2   :  { %19 = vst [vmem:[#allocation2] sm:$0x1] %v18_v0 }
   0x3   :  { %20 = vsyncpa [#allocation4], 0 }
   0x4   :  { %21 = vsyncpa [#allocation6], 0 }
   0x5   :  { %22 = vsyncpa [#allocation9], 0 }
   0x6   :  { %23 = vsyncpa [#allocation12], 0  ;;  %s7825_s27 = smov [#allocation5]  }
   0x7   :  { %s39_s28 = sshll.u32 %s7825_s27, 4  ;;  %s40_s28 = int_to_ptr.vmem [resolvable:$true] %s39_s28 }
   0x8   :  { %s7685_s29 = scalar_lea.vmem %s40_s28, 28672  ;;  %p7690_p1 = scmp.lt.s32.totalorder %s40_s28, %s40_s28 }
   0x9   :  { %p7686_p0 = scmp.ne.s32.totalorder %s40_s28, %s7685_s29  ;;  %p7691_p2 = scmp.lt.s32.totalorder %s7685_s29, %s7685_s29 }
   0xb   :  { %p7692_p3 = por %p7691_p2, %p7690_p1 }
   0xd   :  { %p7693_p4 = pnand %p7692_p3, %p7686_p0 }
   0xf   :  { %7696 = shalt.err (!%p7693_p4)
}
  0x10   :  { %s7826_s30 = smov 256   ;;  %s7827_s14 = smov 16  }
  0x11   :  { %45 = dma.hbm_to_vmem [thread:$0]  %s8125_s1, 28672, %s40_s28, [#allocation6], %s7826_s30, %s7826_s30, %s7827_s14  }
  0x12   :  { %s7828_s16 = smov [#allocation8]   ;;  %s7829_s18 = smov [#allocation11]  }
  0x13   :  { %s67_s17 = sshll.u32 %s7828_s16, 4  ;;  %s95_s19 = sshll.u32 %s7829_s18, 4  ;;  %s68_s17 = int_to_ptr.vmem [resolvable:$true] %s67_s17  ;;  %s96_s19 = int_to_ptr.vmem [resolvable:$true] %s95_s19 }
  0x14   :  { %s7705_s20 = scalar_lea.vmem %s68_s17, 16384  ;;  %p7710_p6 = scmp.lt.s32.totalorder %s68_s17, %s68_s17 }
  0x15   :  { %p7706_p5 = scmp.ne.s32.totalorder %s68_s17, %s7705_s20  ;;  %p7711_p7 = scmp.lt.s32.totalorder %s7705_s20, %s7705_s20 }
  0x17   :  { %p7712_p8 = por %p7711_p7, %p7710_p6 }
  0x19   :  { %p7713_p9 = pnand %p7712_p8, %p7706_p5 }
  0x1b   :  { %7716 = shalt.err (!%p7713_p9)
}
  0x1c   :  { %73 = dma.hbm_to_vmem [thread:$0]  %s8129_s5, 16384, %s68_s17, [#allocation9], %s7826_s30, %s7826_s30, %s7827_s14  }
  0x1d   :  { %s7725_s1 = scalar_lea.vmem %s96_s19, 16384  ;;  %p7730_p11 = scmp.lt.s32.totalorder %s96_s19, %s96_s19 }
  0x1e   :  { %p7726_p10 = scmp.ne.s32.totalorder %s96_s19, %s7725_s1  ;;  %p7731_p12 = scmp.lt.s32.totalorder %s7725_s1, %s7725_s1 }
  0x20   :  { %p7732_p13 = por %p7731_p12, %p7730_p11 }
  0x22   :  { %p7733_p0 = pnand %p7732_p13, %p7726_p10 }
  0x24   :  { %7736 = shalt.err (!%p7733_p0)
}
  0x25   :  { %101 = dma.hbm_to_vmem [thread:$0]  %s8133_s9, 16384, %s96_s19, [#allocation12], %s7826_s30, %s7826_s30, %s7827_s14  }
  0x26   :  { %s7830_s25 = smov [#allocation3]   ;;  %s7831_s27 = smov [#allocation7]  }
  0x27   :  { %s30_s26 = sshll.u32 %s7830_s25, 4  ;;  %s53_s5 = sshll.u32 %s7831_s27, 4  ;;  %s31_s26 = int_to_ptr.vmem [resolvable:$true] %s30_s26  ;;  %s54_s5 = int_to_ptr.vmem [resolvable:$true] %s53_s5 }
  0x28   :  { %s7745_s28 = scalar_lea.vmem %s31_s26, 448  ;;  %p7750_p2 = scmp.lt.s32.totalorder %s31_s26, %s31_s26 }
  0x29   :  { %p7746_p1 = scmp.ne.s32.totalorder %s31_s26, %s7745_s28  ;;  %p7751_p3 = scmp.lt.s32.totalorder %s7745_s28, %s7745_s28 }
  0x2b   :  { %p7752_p4 = por %p7751_p3, %p7750_p2 }
  0x2d   :  { %p7753_p5 = pnand %p7752_p4, %p7746_p1 }
  0x2f   :  { %7756 = shalt.err (!%p7753_p5)
}
  0x30   :  { %33 = dma.hbm_to_vmem [thread:$0]  %s8124_s0, 448, %s31_s26, [#allocation4]  }
  0x31   :  { %s7765_s15 = scalar_lea.vmem %s54_s5, 16384  ;;  %p7770_p7 = scmp.lt.s32.totalorder %s54_s5, %s54_s5 }
  0x32   :  { %p7766_p6 = scmp.ne.s32.totalorder %s54_s5, %s7765_s15  ;;  %p7771_p8 = scmp.lt.s32.totalorder %s7765_s15, %s7765_s15 }
  0x34   :  { %p7772_p9 = por %p7771_p8, %p7770_p7 }
  0x36   :  { %p7773_p10 = pnand %p7772_p9, %p7766_p6 }
  0x38   :  { %7776 = shalt.err (!%p7773_p10)
}
  0x39   :  { %59 = dma.hbm_to_vmem [thread:$0]  %s8127_s3, 16384, %s54_s5, [#allocation6], %s7826_s30, %s7826_s30, %s7827_s14  }
  0x3a   :  { %s7832_s17 = smov [#allocation10]   ;;  %s7833_s19 = smov [#allocation13]  }
  0x3b   :  { %s81_s18 = sshll.u32 %s7832_s17, 4  ;;  %s110_s0 = sshll.u32 %s7833_s19, 4  ;;  %s82_s18 = int_to_ptr.vmem [resolvable:$true] %s81_s18  ;;  %s111_s0 = int_to_ptr.vmem [resolvable:$true] %s110_s0 }
  0x3c   :  { %s7785_s20 = scalar_lea.vmem %s82_s18, 16384  ;;  %p7790_p12 = scmp.lt.s32.totalorder %s82_s18, %s82_s18 }
  0x3d   :  { %p7786_p11 = scmp.ne.s32.totalorder %s82_s18, %s7785_s20  ;;  %p7791_p13 = scmp.lt.s32.totalorder %s7785_s20, %s7785_s20 }
  0x3f   :  { %p7792_p0 = por %p7791_p13, %p7790_p12 }
  0x41   :  { %p7793_p1 = pnand %p7792_p0, %p7786_p11 }
  0x43   :  { %7796 = shalt.err (!%p7793_p1)
}
  0x44   :  { %87 = dma.hbm_to_vmem [thread:$0]  %s8131_s7, 16384, %s82_s18, [#allocation9], %s7826_s30, %s7826_s30, %s7827_s14  }
  0x45   :  { %s7805_s3 = scalar_lea.vmem %s111_s0, 64  ;;  %p7810_p3 = scmp.lt.s32.totalorder %s111_s0, %s111_s0 }
  0x46   :  { %p7806_p2 = scmp.ne.s32.totalorder %s111_s0, %s7805_s3  ;;  %p7811_p4 = scmp.lt.s32.totalorder %s7805_s3, %s7805_s3 }
  0x48   :  { %p7812_p5 = por %p7811_p4, %p7810_p3 }
  0x4a   :  { %p7813_p6 = pnand %p7812_p5, %p7806_p2 }
  0x4c   :  { %7816 = shalt.err (!%p7813_p6)
}
  0x4d   :  { %113 = dma.hbm_to_vmem [thread:$0]  %s8135_s11, 64, %s111_s0, [#allocation12]  }
  0x4e   :  { %7817 = dma.done.wait [#allocation4], 448  }
  0x4f   :  { %7818 = vsyncadd [#allocation4], 4294966848 }
  0x50   :  { %7819 = dma.done.wait [#allocation6], 45056  }
  0x51   :  { %7820 = vsyncadd [#allocation6], 4294922240 }
  0x52   :  { %7821 = dma.done.wait [#allocation9], 32768  }
  0x53   :  { %7822 = vsyncadd [#allocation9], 4294934528 }
  0x54   :  { %7823 = dma.done.wait [#allocation12], 16448  }
  0x55   :  { %7824 = vsyncadd [#allocation12], 4294950848  ;;  %v6561_v1 = vld [vmem:[#allocation5 + $0xe4] ss:$16 sps:$4 sm:$0xff]   ;;  %v6565_v3 = vld [vmem:[#allocation5 + $0xe0] ss:$16 sps:$4 sm:$0xff]  }
  0x56   :  { %v6563_v2 = vld [vmem:[#allocation5 + $0x2e4] ss:$16 sps:$4 sm:$0xff]   ;;  %1533 = vmatprep.subr.bf16.mxu0 %v6561_v1  ;;  %v6566_v4 = vld [vmem:[#allocation5 + $0x2e0] ss:$16 sps:$4 sm:$0xff]  }
  0x57   :  { %1574 = vmatprep.subr.bf16.mxu1 %v6563_v2  ;;  %v6567_v5 = vld [vmem:[#allocation5 + $0xc4] ss:$16 sps:$4 sm:$0xff]   ;;  %1534 = vmatpush1.bf16.msra.mxu0 %v6565_v3  ;;  %v6571_v7 = vld [vmem:[#allocation5 + $0xc0] ss:$16 sps:$4 sm:$0xff]  }
  0x58   :  { %1575 = vmatpush1.bf16.msra.mxu1 %v6566_v4  ;;  %v6569_v6 = vld [vmem:[#allocation5 + $0x2c4] ss:$16 sps:$4 sm:$0xff]   ;;  %1535 = vmatprep.subr.bf16.mxu0 %v6567_v5  ;;  %v6572_v8 = vld [vmem:[#allocation5 + $0x2c0] ss:$16 sps:$4 sm:$0xff]  }
  0x59   :  { %1576 = vmatprep.subr.bf16.mxu1 %v6569_v6  ;;  %v6573_v9 = vld [vmem:[#allocation5 + $0xa4] ss:$16 sps:$4 sm:$0xff]   ;;  %v6577_v11 = vld [vmem:[#allocation5 + $0xa0] ss:$16 sps:$4 sm:$0xff]  }
  0x5a   :  { %v6575_v10 = vld [vmem:[#allocation5 + $0x2a4] ss:$16 sps:$4 sm:$0xff]   ;;  %v6578_v12 = vld [vmem:[#allocation5 + $0x2a0] ss:$16 sps:$4 sm:$0xff]  }
  0x5b   :  { %1536 = vmatpush1.bf16.msra.mxu0 %v6571_v7  ;;  %v6579_v13 = vld [vmem:[#allocation5 + $0x84] ss:$16 sps:$4 sm:$0xff]   ;;  %v6583_v15 = vld [vmem:[#allocation5 + $0x80] ss:$16 sps:$4 sm:$0xff]  }
  0x5c   :  { %1577 = vmatpush1.bf16.msra.mxu1 %v6572_v8  ;;  %1537 = vmatprep.subr.bf16.mxu0 %v6573_v9  ;;  %v6581_v14 = vld [vmem:[#allocation5 + $0x284] ss:$16 sps:$4 sm:$0xff]   ;;  %v6584_v16 = vld [vmem:[#allocation5 + $0x280] ss:$16 sps:$4 sm:$0xff]  }
  0x5d   :  { %1578 = vmatprep.subr.bf16.mxu1 %v6575_v10  ;;  %v6585_v17 = vld [vmem:[#allocation5 + $0x64] ss:$16 sps:$4 sm:$0xff]   ;;  %v6589_v19 = vld [vmem:[#allocation5 + $0x60] ss:$16 sps:$4 sm:$0xff]  }
  0x5e   :  { %v6587_v18 = vld [vmem:[#allocation5 + $0x264] ss:$16 sps:$4 sm:$0xff]   ;;  %v6590_v20 = vld [vmem:[#allocation5 + $0x260] ss:$16 sps:$4 sm:$0xff]  }
  0x5f   :  { %1538 = vmatpush1.bf16.msra.mxu0 %v6577_v11  ;;  %v6591_v21 = vld [vmem:[#allocation5 + $0x44] ss:$16 sps:$4 sm:$0xff]   ;;  %v6595_v23 = vld [vmem:[#allocation5 + $0x40] ss:$16 sps:$4 sm:$0xff]  }
  0x60   :  { %1579 = vmatpush1.bf16.msra.mxu1 %v6578_v12  ;;  %1539 = vmatprep.subr.bf16.mxu0 %v6579_v13  ;;  %v6593_v22 = vld [vmem:[#allocation5 + $0x244] ss:$16 sps:$4 sm:$0xff]   ;;  %v6596_v24 = vld [vmem:[#allocation5 + $0x240] ss:$16 sps:$4 sm:$0xff]  }
  0x61   :  { %1580 = vmatprep.subr.bf16.mxu1 %v6581_v14  ;;  %v6597_v25 = vld [vmem:[#allocation5 + $0x24] ss:$16 sps:$4 sm:$0xff]   ;;  %v6601_v27 = vld [vmem:[#allocation5 + $0x20] ss:$16 sps:$4 sm:$0xff]  }
  0x62   :  { %v6599_v26 = vld [vmem:[#allocation5 + $0x224] ss:$16 sps:$4 sm:$0xff]   ;;  %v6602_v28 = vld [vmem:[#allocation5 + $0x220] ss:$16 sps:$4 sm:$0xff]  }
  0x63   :  { %1540 = vmatpush1.bf16.msra.mxu0 %v6583_v15  ;;  %v6603_v29 = vld [vmem:[#allocation5 + $0x4] ss:$16 sps:$4 sm:$0xff]   ;;  %v6607_v31 = vld [vmem:[#allocation5] ss:$16 sps:$4 sm:$0xff]  }
  0x64   :  { %1581 = vmatpush1.bf16.msra.mxu1 %v6584_v16  ;;  %1541 = vmatprep.subr.bf16.mxu0 %v6585_v17  ;;  %v6605_v30 = vld [vmem:[#allocation5 + $0x204] ss:$16 sps:$4 sm:$0xff]   ;;  %v6608_v32 = vld [vmem:[#allocation5 + $0x200] ss:$16 sps:$4 sm:$0xff]   ;;  %v7834_v17 = vmov 0  }
  0x65   :  { %1582 = vmatprep.subr.bf16.mxu1 %v6587_v18  ;;  %v6609_v33 = vld [vmem:[#allocation5 + $0x1e4] ss:$16 sps:$4 sm:$0xff]   ;;  %v6613_v35 = vld [vmem:[#allocation5 + $0x1e0] ss:$16 sps:$4 sm:$0xff]  }
  0x66   :  { %v6611_v34 = vld [vmem:[#allocation5 + $0x3e4] ss:$16 sps:$4 sm:$0xff]   ;;  %v6614_v36 = vld [vmem:[#allocation5 + $0x3e0] ss:$16 sps:$4 sm:$0xff]  }
  0x67   :  { %1542 = vmatpush1.bf16.msra.mxu0 %v6589_v19  ;;  %v6615_v37 = vld [vmem:[#allocation5 + $0x1c4] ss:$16 sps:$4 sm:$0xff]   ;;  %v6619_v39 = vld [vmem:[#allocation5 + $0x1c0] ss:$16 sps:$4 sm:$0xff]  }
  0x68   :  { %1583 = vmatpush1.bf16.msra.mxu1 %v6590_v20  ;;  %1543 = vmatprep.subr.bf16.mxu0 %v6591_v21  ;;  %v6617_v38 = vld [vmem:[#allocation5 + $0x3c4] ss:$16 sps:$4 sm:$0xff]   ;;  %v6620_v40 = vld [vmem:[#allocation5 + $0x3c0] ss:$16 sps:$4 sm:$0xff]  }
  0x69   :  { %1584 = vmatprep.subr.bf16.mxu1 %v6593_v22  ;;  %v6621_v41 = vld [vmem:[#allocation5 + $0x1a4] ss:$16 sps:$4 sm:$0xff]   ;;  %v6625_v43 = vld [vmem:[#allocation5 + $0x1a0] ss:$16 sps:$4 sm:$0xff]  }
  0x6a   :  { %v6623_v42 = vld [vmem:[#allocation5 + $0x3a4] ss:$16 sps:$4 sm:$0xff]   ;;  %v6626_v44 = vld [vmem:[#allocation5 + $0x3a0] ss:$16 sps:$4 sm:$0xff]  }
  0x6b   :  { %1544 = vmatpush1.bf16.msra.mxu0 %v6595_v23  ;;  %v6627_v45 = vld [vmem:[#allocation5 + $0x184] ss:$16 sps:$4 sm:$0xff]   ;;  %v139_v49 = vld [vmem:[#allocation3 + $0x8] sm:$0xff] }
  0x6c   :  { %1585 = vmatpush1.bf16.msra.mxu1 %v6596_v24  ;;  %1545 = vmatprep.subr.bf16.mxu0 %v6597_v25  ;;  %v6629_v46 = vld [vmem:[#allocation5 + $0x384] ss:$16 sps:$4 sm:$0xff]   ;;  %v6631_v50 = vld [vmem:[#allocation5 + $0x180] ss:$16 sps:$4 sm:$0xff]   ;;  %v7946_v52 = vcombine.high %v139_v49, %v139_v49  ;;  %v7952_v8 = vcombine.low %v139_v49, %v139_v49  ;;  %v6721_v49 = vld [vmem:[#allocation5 + $0xcc] ss:$16 sps:$4 sm:$0xff]  }
  0x6d   :  { %1586 = vmatprep.subr.bf16.mxu1 %v6599_v26  ;;  %v138_v47 = vld [vmem:[#allocation3] sm:$0xff]  ;;  %v6632_v51 = vld [vmem:[#allocation5 + $0x380] ss:$16 sps:$4 sm:$0xff]  }
  0x6e   :  { %v7944_v48 = vcombine.high %v138_v47, %v138_v47  ;;  %v6633_v53 = vld [vmem:[#allocation5 + $0x164] ss:$16 sps:$4 sm:$0xff]   ;;  %1606 = vmatprep.mubr.bf16.mxu1 %v7946_v52  ;;  %v6637_v55 = vld [vmem:[#allocation5 + $0x160] ss:$16 sps:$4 sm:$0xff]   ;;  %v7950_v7 = vcombine.low %v138_v47, %v138_v47 }
  0x6f   :  { %1546 = vmatpush1.bf16.msra.mxu0 %v6601_v27  ;;  %v6635_v54 = vld [vmem:[#allocation5 + $0x364] ss:$16 sps:$4 sm:$0xff]   ;;  %v6638_v56 = vld [vmem:[#allocation5 + $0x360] ss:$16 sps:$4 sm:$0xff]  }
  0x70   :  { %1587 = vmatpush1.bf16.msra.mxu1 %v6602_v28  ;;  %1547 = vmatprep.subr.bf16.mxu0 %v6603_v29  ;;  %v6639_v57 = vld [vmem:[#allocation5 + $0x144] ss:$16 sps:$4 sm:$0xff]   ;;  %v6643_v59 = vld [vmem:[#allocation5 + $0x140] ss:$16 sps:$4 sm:$0xff]  }
  0x71   :  { %1588 = vmatprep.subr.bf16.mxu1 %v6605_v30  ;;  %1565 = vmatprep.mubr.bf16.mxu0 %v7944_v48  ;;  %v6641_v58 = vld [vmem:[#allocation5 + $0x344] ss:$16 sps:$4 sm:$0xff]   ;;  %v6644_v60 = vld [vmem:[#allocation5 + $0x340] ss:$16 sps:$4 sm:$0xff]  }
  0x72   :  { %v6645_v61 = vld [vmem:[#allocation5 + $0x124] ss:$16 sps:$4 sm:$0xff]   ;;  %v6649_v63 = vld [vmem:[#allocation5 + $0x120] ss:$16 sps:$4 sm:$0xff]  }
  0x73   :  { %1548 = vmatpush1.bf16.msra.mxu0 %v6607_v31  ;;  %v6647_v62 = vld [vmem:[#allocation5 + $0x324] ss:$16 sps:$4 sm:$0xff]   ;;  %v6650_v0 = vld [vmem:[#allocation5 + $0x320] ss:$16 sps:$4 sm:$0xff]  }
  0x74   :  { %1589 = vmatpush1.bf16.msra.mxu1 %v6608_v32  ;;  %1549 = vmatprep.subr.bf16.mxu0 %v6609_v33  ;;  %v6651_v1 = vld [vmem:[#allocation5 + $0x104] ss:$16 sps:$4 sm:$0xff]   ;;  %v6655_v3 = vld [vmem:[#allocation5 + $0x100] ss:$16 sps:$4 sm:$0xff]  }
  0x75   :  { %1590 = vmatprep.subr.bf16.mxu1 %v6611_v34  ;;  %v6653_v2 = vld [vmem:[#allocation5 + $0x304] ss:$16 sps:$4 sm:$0xff]   ;;  %v6656_v4 = vld [vmem:[#allocation5 + $0x300] ss:$16 sps:$4 sm:$0xff]  }
  0x76   :  { %v6663_v5 = vld [vmem:[#allocation5 + $0x4e4] ss:$16 sps:$4 sm:$0xff]   ;;  %v6661_v9 = vld [vmem:[#allocation5 + $0x4e0] ss:$16 sps:$4 sm:$0xff]  }
  0x77   :  { %1550 = vmatpush2.bf16.msra.mxu0 %v6613_v35  ;;  %v6666_v6 = vld [vmem:[#allocation5 + $0x6e4] ss:$16 sps:$4 sm:$0xff]   ;;  %v6664_v10 = vld [vmem:[#allocation5 + $0x6e0] ss:$16 sps:$4 sm:$0xff]  }
  0x78   :  { %1591 = vmatpush2.bf16.msra.mxu1 %v6614_v36  ;;  %1551 = vmatprep.subr.bf16.mxu0 %v6615_v37  ;;  %v6669_v11 = vld [vmem:[#allocation5 + $0x4c4] ss:$16 sps:$4 sm:$0xff]   ;;  %v6667_v13 = vld [vmem:[#allocation5 + $0x4c0] ss:$16 sps:$4 sm:$0xff]  }
  0x79   :  { %1592 = vmatprep.subr.bf16.mxu1 %v6617_v38  ;;  %v6672_v12 = vld [vmem:[#allocation5 + $0x6c4] ss:$16 sps:$4 sm:$0xff]   ;;  %v6670_v14 = vld [vmem:[#allocation5 + $0x6c0] ss:$16 sps:$4 sm:$0xff]  }
  0x7a   :  { %v6675_v15 = vld [vmem:[#allocation5 + $0x4a4] ss:$16 sps:$4 sm:$0xff]   ;;  %v6673_v18 = vld [vmem:[#allocation5 + $0x4a0] ss:$16 sps:$4 sm:$0xff]  }
  0x7b   :  { %1552 = vmatpush2.bf16.msra.mxu0 %v6619_v39  ;;  %v6678_v16 = vld [vmem:[#allocation5 + $0x6a4] ss:$16 sps:$4 sm:$0xff]   ;;  %v6676_v19 = vld [vmem:[#allocation5 + $0x6a0] ss:$16 sps:$4 sm:$0xff]  }
  0x7c   :  { %1593 = vmatpush2.bf16.msra.mxu1 %v6620_v40  ;;  %1553 = vmatprep.subr.bf16.mxu0 %v6621_v41  ;;  %v6681_v20 = vld [vmem:[#allocation5 + $0x484] ss:$16 sps:$4 sm:$0xff]   ;;  %v6679_v22 = vld [vmem:[#allocation5 + $0x480] ss:$16 sps:$4 sm:$0xff]  }
  0x7d   :  { %1594 = vmatprep.subr.bf16.mxu1 %v6623_v42  ;;  %v6684_v21 = vld [vmem:[#allocation5 + $0x684] ss:$16 sps:$4 sm:$0xff]   ;;  %v6682_v23 = vld [vmem:[#allocation5 + $0x680] ss:$16 sps:$4 sm:$0xff]  }
  0x7e   :  { %v6687_v24 = vld [vmem:[#allocation5 + $0x464] ss:$16 sps:$4 sm:$0xff]   ;;  %v6685_v26 = vld [vmem:[#allocation5 + $0x460] ss:$16 sps:$4 sm:$0xff]  }
  0x7f   :  { %1554 = vmatpush2.bf16.msra.mxu0 %v6625_v43  ;;  %v6690_v25 = vld [vmem:[#allocation5 + $0x664] ss:$16 sps:$4 sm:$0xff]   ;;  %v6688_v27 = vld [vmem:[#allocation5 + $0x660] ss:$16 sps:$4 sm:$0xff]   ;;  %v6715_v43 = vld [vmem:[#allocation5 + $0xec] ss:$16 sps:$4 sm:$0xff]  }
  0x80   :  { %1595 = vmatpush2.bf16.msra.mxu1 %v6626_v44  ;;  %1555 = vmatprep.subr.bf16.mxu0 %v6627_v45  ;;  %v6693_v28 = vld [vmem:[#allocation5 + $0x444] ss:$16 sps:$4 sm:$0xff]   ;;  %v6691_v30 = vld [vmem:[#allocation5 + $0x440] ss:$16 sps:$4 sm:$0xff]   ;;  %v6712_v45 = vld [vmem:[#allocation3 + $0x18] ss:$0 sps:$4 sm:$0xff]  }
  0x81   :  { %1596 = vmatprep.subr.bf16.mxu1 %v6629_v46  ;;  %v6696_v29 = vld [vmem:[#allocation5 + $0x644] ss:$16 sps:$4 sm:$0xff]   ;;  %v6694_v31 = vld [vmem:[#allocation5 + $0x640] ss:$16 sps:$4 sm:$0xff]   ;;  %v6713_v46 = vld [vmem:[#allocation5 + $0xe8] ss:$16 sps:$4 sm:$0xff]  }
  0x82   :  { %v6699_v32 = vld [vmem:[#allocation5 + $0x424] ss:$16 sps:$4 sm:$0xff]   ;;  %v6697_v35 = vld [vmem:[#allocation5 + $0x420] ss:$16 sps:$4 sm:$0xff]  }
  0x83   :  { %1556 = vmatpush2.bf16.msra.mxu0 %v6631_v50  ;;  %v6702_v33 = vld [vmem:[#allocation5 + $0x624] ss:$16 sps:$4 sm:$0xff]   ;;  %v6700_v37 = vld [vmem:[#allocation5 + $0x620] ss:$16 sps:$4 sm:$0xff]  }
  0x84   :  { %1597 = vmatpush2.bf16.msra.mxu1 %v6632_v51  ;;  %1557 = vmatprep.subr.bf16.mxu0 %v6633_v53  ;;  %v7957_v34 = vld [vmem:[#allocation3 + $0x10] sm:$0xff]  ;;  %v6703_v40 = vld [vmem:[#allocation5 + $0x400] ss:$16 sps:$4 sm:$0xff]  }
  0x85   :  { %1598 = vmatprep.subr.bf16.mxu1 %v6635_v54  ;;  %v7961_v36 = vcombine.high %v7957_v34, %v7957_v34  ;;  %v6705_v38 = vld [vmem:[#allocation5 + $0x404] ss:$16 sps:$4 sm:$0xff]   ;;  %v6706_v41 = vld [vmem:[#allocation5 + $0x600] ss:$16 sps:$4 sm:$0xff]   ;;  %v6719_v51 = vld [vmem:[#allocation5 + $0xc8] ss:$16 sps:$4 sm:$0xff]  }
  0x86   :  { %v6708_v39 = vld [vmem:[#allocation5 + $0x604] ss:$16 sps:$4 sm:$0xff]   ;;  %v6709_v44 = vld [vmem:[#allocation5 + $0x5e0] ss:$16 sps:$4 sm:$0xff]   ;;  %v6727_v54 = vld [vmem:[#allocation5 + $0xac] ss:$16 sps:$4 sm:$0xff]  }
  0x87   :  { %1558 = vmatpush2.bf16.msra.mxu0 %v6637_v55  ;;  %v6711_v42 = vld [vmem:[#allocation5 + $0x5e4] ss:$16 sps:$4 sm:$0xff]   ;;  %v6716_v50 = vld [vmem:[#allocation5 + $0x5c0] ss:$16 sps:$4 sm:$0xff]  }
  0x88   :  { %1599 = vmatpush2.bf16.msra.mxu1 %v6638_v56  ;;  %1559 = vmatprep.subr.bf16.mxu0 %v6639_v57  ;;  %v6718_v47 = vld [vmem:[#allocation5 + $0x5c4] ss:$16 sps:$4 sm:$0xff]   ;;  %v6722_v55 = vld [vmem:[#allocation5 + $0x5a0] ss:$16 sps:$4 sm:$0xff]   ;;  %v6725_v56 = vld [vmem:[#allocation5 + $0xa8] ss:$16 sps:$4 sm:$0xff]  }
  0x89   :  { %1600 = vmatprep.subr.bf16.mxu1 %v6641_v58  ;;  %v6724_v53 = vld [vmem:[#allocation5 + $0x5a4] ss:$16 sps:$4 sm:$0xff]   ;;  %v6733_v58 = vld [vmem:[#allocation5 + $0x8c] ss:$16 sps:$4 sm:$0xff]  }
  0x8a   :  { %v6730_v57 = vld [vmem:[#allocation5 + $0x584] ss:$16 sps:$4 sm:$0xff]  }
  0x8b   :  { %1560 = vmatpush2.bf16.msra.mxu0 %v6643_v59  ;;  %v6728_v59 = vld [vmem:[#allocation5 + $0x580] ss:$16 sps:$4 sm:$0xff]  }
  0x8c   :  { %1601 = vmatpush2.bf16.msra.mxu1 %v6644_v60  ;;  %1561 = vmatprep.subr.bf16.mxu0 %v6645_v61  ;;  %v6731_v60 = vld [vmem:[#allocation5 + $0x88] ss:$16 sps:$4 sm:$0xff]   ;;  %v6736_v61 = vld [vmem:[#allocation5 + $0x564] ss:$16 sps:$4 sm:$0xff]  }
  0x8d   :  { %1602 = vmatprep.subr.bf16.mxu1 %v6647_v62  ;;  %v6739_v62 = vld [vmem:[#allocation5 + $0x6c] ss:$16 sps:$4 sm:$0xff]  }
  0x8f   :  { %1562 = vmatpush2.bf16.msra.mxu0 %v6649_v63  ;;  %v6734_v63 = vld [vmem:[#allocation5 + $0x560] ss:$16 sps:$4 sm:$0xff]  }
  0x90   :  { %1603 = vmatpush2.bf16.msra.mxu1 %v6650_v0  ;;  %1563 = vmatprep.subr.bf16.mxu0 %v6651_v1  ;;  %v6742_v0 = vld [vmem:[#allocation5 + $0x544] ss:$16 sps:$4 sm:$0xff]   ;;  %v6745_v1 = vld [vmem:[#allocation5 + $0x4c] ss:$16 sps:$4 sm:$0xff]  }
  0x91   :  { %1604 = vmatprep.subr.bf16.mxu1 %v6653_v2  ;;  %v6740_v2 = vld [vmem:[#allocation5 + $0x540] ss:$16 sps:$4 sm:$0xff]  }
  0x93   :  { %1564 = vmatpush2.bf16.msra.mxu0 %v6655_v3  ;;  %v6743_v3 = vld [vmem:[#allocation5 + $0x48] ss:$16 sps:$4 sm:$0xff]  }
  0x94   :  { %1605 = vmatpush2.bf16.msra.mxu1 %v6656_v4  ;;  %1615 = vmatprep.subr.bf16.mxu0 %v6663_v5  ;;  %v6748_v4 = vld [vmem:[#allocation5 + $0x524] ss:$16 sps:$4 sm:$0xff]   ;;  %v6751_v5 = vld [vmem:[#allocation5 + $0x2c] ss:$16 sps:$4 sm:$0xff]  }
  0x95   :  { %1656 = vmatprep.subr.bf16.mxu1 %v6666_v6  ;;  %v6746_v6 = vld [vmem:[#allocation5 + $0x520] ss:$16 sps:$4 sm:$0xff]  }
  0x96   :  { %1566 = vmatmul.mubr.bf16.vlgmr.msra.gmra.mxu0 %v7950_v7 }
  0x97   :  { %1607 = vmatmul.mubr.bf16.vlgmr.msra.gmra.mxu1 %v7952_v8  ;;  %1616 = vmatpush1.bf16.msra.mxu0 %v6661_v9  ;;  %v6749_v9 = vld [vmem:[#allocation5 + $0x28] ss:$16 sps:$4 sm:$0xff]  }
  0x98   :  { %1657 = vmatpush1.bf16.msra.mxu1 %v6664_v10  ;;  %1617 = vmatprep.subr.bf16.mxu0 %v6669_v11  ;;  %v6754_v10 = vld [vmem:[#allocation5 + $0x504] ss:$16 sps:$4 sm:$0xff]   ;;  %v6757_v11 = vld [vmem:[#allocation5 + $0xc] ss:$16 sps:$4 sm:$0xff]  }
  0x99   :  { %1658 = vmatprep.subr.bf16.mxu1 %v6672_v12  ;;  %1688 = vmatprep.mubr.bf16.mxu1 %v7834_v17  ;;  %v6752_v12 = vld [vmem:[#allocation5 + $0x500] ss:$16 sps:$4 sm:$0xff]  }
  0x9a   :  { %1647 = vmatprep.mubr.bf16.mxu0 %v7961_v36 }
  0x9b   :  { %1618 = vmatpush1.bf16.msra.mxu0 %v6667_v13  ;;  %v6755_v13 = vld [vmem:[#allocation5 + $0x8] ss:$16 sps:$4 sm:$0xff]  }
  0x9c   :  { %1659 = vmatpush1.bf16.msra.mxu1 %v6670_v14  ;;  %1619 = vmatprep.subr.bf16.mxu0 %v6675_v15  ;;  %v6762_v14 = vld [vmem:[#allocation5 + $0x1ec] ss:$16 sps:$4 sm:$0xff]  }
  0x9d   :  { %1660 = vmatprep.subr.bf16.mxu1 %v6678_v16  ;;  %v6765_v15 = vld [vmem:[#allocation5 + $0x2ec] ss:$16 sps:$4 sm:$0xff]   ;;  %v7967_v16 = vcombine.low %v7957_v34, %v7957_v34  ;;  %v6784_v34 = vld [vmem:[#allocation5 + $0x168] ss:$16 sps:$4 sm:$0xff]  }
  0x9f   :  { %1620 = vmatpush1.bf16.msra.mxu0 %v6673_v18  ;;  %v6760_v18 = vld [vmem:[#allocation5 + $0x1e8] ss:$16 sps:$4 sm:$0xff]  }
  0xa0   :  { %1661 = vmatpush1.bf16.msra.mxu1 %v6676_v19  ;;  %1621 = vmatprep.subr.bf16.mxu0 %v6681_v20  ;;  %v6763_v19 = vld [vmem:[#allocation5 + $0x2e8] ss:$16 sps:$4 sm:$0xff]   ;;  %v6768_v20 = vld [vmem:[#allocation5 + $0x1cc] ss:$16 sps:$4 sm:$0xff]  }
  0xa1   :  { %1662 = vmatprep.subr.bf16.mxu1 %v6684_v21  ;;  %v6771_v21 = vld [vmem:[#allocation5 + $0x2cc] ss:$16 sps:$4 sm:$0xff]  }
  0xa3   :  { %1622 = vmatpush1.bf16.msra.mxu0 %v6679_v22  ;;  %v6766_v22 = vld [vmem:[#allocation5 + $0x1c8] ss:$16 sps:$4 sm:$0xff]  }
  0xa4   :  { %1663 = vmatpush1.bf16.msra.mxu1 %v6682_v23  ;;  %1623 = vmatprep.subr.bf16.mxu0 %v6687_v24  ;;  %v6769_v23 = vld [vmem:[#allocation5 + $0x2c8] ss:$16 sps:$4 sm:$0xff]   ;;  %v6774_v24 = vld [vmem:[#allocation5 + $0x1ac] ss:$16 sps:$4 sm:$0xff]  }
  0xa5   :  { %1664 = vmatprep.subr.bf16.mxu1 %v6690_v25  ;;  %v6777_v25 = vld [vmem:[#allocation5 + $0x2ac] ss:$16 sps:$4 sm:$0xff]  }
  0xa7   :  { %1624 = vmatpush1.bf16.msra.mxu0 %v6685_v26  ;;  %v6772_v26 = vld [vmem:[#allocation5 + $0x1a8] ss:$16 sps:$4 sm:$0xff]  }
  0xa8   :  { %1665 = vmatpush1.bf16.msra.mxu1 %v6688_v27  ;;  %1625 = vmatprep.subr.bf16.mxu0 %v6693_v28  ;;  %v6775_v27 = vld [vmem:[#allocation5 + $0x2a8] ss:$16 sps:$4 sm:$0xff]   ;;  %v6780_v28 = vld [vmem:[#allocation5 + $0x18c] ss:$16 sps:$4 sm:$0xff]  }
  0xa9   :  { %1666 = vmatprep.subr.bf16.mxu1 %v6696_v29  ;;  %v6783_v29 = vld [vmem:[#allocation5 + $0x28c] ss:$16 sps:$4 sm:$0xff]  }
  0xab   :  { %1626 = vmatpush1.bf16.msra.mxu0 %v6691_v30  ;;  %v6778_v30 = vld [vmem:[#allocation5 + $0x188] ss:$16 sps:$4 sm:$0xff]  }
  0xac   :  { %1667 = vmatpush1.bf16.msra.mxu1 %v6694_v31  ;;  %1627 = vmatprep.subr.bf16.mxu0 %v6699_v32  ;;  %v6781_v31 = vld [vmem:[#allocation5 + $0x288] ss:$16 sps:$4 sm:$0xff]   ;;  %v6786_v32 = vld [vmem:[#allocation5 + $0x16c] ss:$16 sps:$4 sm:$0xff]  }
  0xad   :  { %1668 = vmatprep.subr.bf16.mxu1 %v6702_v33  ;;  %v6789_v33 = vld [vmem:[#allocation5 + $0x26c] ss:$16 sps:$4 sm:$0xff]  }
  0xaf   :  { %1628 = vmatpush1.bf16.msra.mxu0 %v6697_v35  ;;  %v6792_v35 = vld [vmem:[#allocation5 + $0x14c] ss:$16 sps:$4 sm:$0xff]  }
  0xb0   :  { %1669 = vmatpush1.bf16.msra.mxu1 %v6700_v37  ;;  %1629 = vmatprep.subr.bf16.mxu0 %v6705_v38  ;;  %v6795_v37 = vld [vmem:[#allocation5 + $0x24c] ss:$16 sps:$4 sm:$0xff]   ;;  %v6790_v38 = vld [vmem:[#allocation5 + $0x148] ss:$16 sps:$4 sm:$0xff]  }
  0xb1   :  { %1670 = vmatprep.subr.bf16.mxu1 %v6708_v39  ;;  %v6793_v39 = vld [vmem:[#allocation5 + $0x248] ss:$16 sps:$4 sm:$0xff]  }
  0xb3   :  { %1630 = vmatpush1.bf16.msra.mxu0 %v6703_v40  ;;  %v6798_v40 = vld [vmem:[#allocation5 + $0x12c] ss:$16 sps:$4 sm:$0xff]  }
  0xb4   :  { %1671 = vmatpush1.bf16.msra.mxu1 %v6706_v41  ;;  %1631 = vmatprep.subr.bf16.mxu0 %v6711_v42  ;;  %v6801_v41 = vld [vmem:[#allocation5 + $0x22c] ss:$16 sps:$4 sm:$0xff]   ;;  %v6796_v42 = vld [vmem:[#allocation5 + $0x128] ss:$16 sps:$4 sm:$0xff]  }
  0xb5   :  { %1697 = vmatprep.subr.bf16.mxu1 %v6715_v43  ;;  %v6799_v43 = vld [vmem:[#allocation5 + $0x228] ss:$16 sps:$4 sm:$0xff]  }
  0xb7   :  { %1689 = vmatmul.mubr.bf16.vlgmr.msra.gmra.mxu1 %v6712_v45  ;;  %1632 = vmatpush2.bf16.msra.mxu0 %v6709_v44  ;;  %v6804_v44 = vld [vmem:[#allocation5 + $0x10c] ss:$16 sps:$4 sm:$0xff]  }
  0xb8   :  { %1698 = vmatpush1.bf16.msra.mxu1 %v6713_v46  ;;  %1633 = vmatprep.subr.bf16.mxu0 %v6718_v47  ;;  %v6807_v45 = vld [vmem:[#allocation5 + $0x20c] ss:$16 sps:$4 sm:$0xff]   ;;  %v6802_v46 = vld [vmem:[#allocation5 + $0x108] ss:$16 sps:$4 sm:$0xff]  }
  0xb9   :  { %1699 = vmatprep.subr.bf16.mxu1 %v6721_v49  ;;  %1729 = vmatprep.mubr.bf16.mxu1 %v7944_v48  ;;  %v6737_v48 = vld [vmem:[#allocation5 + $0x68] ss:$16 sps:$4 sm:$0xff]   ;;  %v6810_v49 = vld [vmem:[#allocation5 + $0x3ec] ss:$16 sps:$4 sm:$0xff]  }
  0xba   :  { %v6805_v47 = vld [vmem:[#allocation5 + $0x208] ss:$16 sps:$4 sm:$0xff]  }
  0xbb   :  { %1634 = vmatpush2.bf16.msra.mxu0 %v6716_v50  ;;  %v6813_v50 = vld [vmem:[#allocation5 + $0x4ec] ss:$16 sps:$4 sm:$0xff]  }
  0xbc   :  { %1700 = vmatpush1.bf16.msra.mxu1 %v6719_v51  ;;  %1635 = vmatprep.subr.bf16.mxu0 %v6724_v53  ;;  %v6808_v51 = vld [vmem:[#allocation5 + $0x3e8] ss:$16 sps:$4 sm:$0xff]  }
  0xbd   :  { %1701 = vmatprep.subr.bf16.mxu1 %v6727_v54  ;;  %v6811_v53 = vld [vmem:[#allocation5 + $0x4e8] ss:$16 sps:$4 sm:$0xff]   ;;  %v6816_v54 = vld [vmem:[#allocation5 + $0x3cc] ss:$16 sps:$4 sm:$0xff]  }
  0xbf   :  { %1636 = vmatpush2.bf16.msra.mxu0 %v6722_v55  ;;  %v6819_v55 = vld [vmem:[#allocation5 + $0x4cc] ss:$16 sps:$4 sm:$0xff]  }
  0xc0   :  { %1702 = vmatpush1.bf16.msra.mxu1 %v6725_v56  ;;  %1637 = vmatprep.subr.bf16.mxu0 %v6730_v57  ;;  %v6814_v56 = vld [vmem:[#allocation5 + $0x3c8] ss:$16 sps:$4 sm:$0xff]  }
  0xc1   :  { %1703 = vmatprep.subr.bf16.mxu1 %v6733_v58  ;;  %v6817_v57 = vld [vmem:[#allocation5 + $0x4c8] ss:$16 sps:$4 sm:$0xff]   ;;  %v6822_v58 = vld [vmem:[#allocation5 + $0x3ac] ss:$16 sps:$4 sm:$0xff]  }
  0xc3   :  { %1638 = vmatpush2.bf16.msra.mxu0 %v6728_v59  ;;  %v6825_v59 = vld [vmem:[#allocation5 + $0x4ac] ss:$16 sps:$4 sm:$0xff]  }
  0xc4   :  { %1704 = vmatpush1.bf16.msra.mxu1 %v6731_v60  ;;  %1639 = vmatprep.subr.bf16.mxu0 %v6736_v61  ;;  %v6820_v60 = vld [vmem:[#allocation5 + $0x3a8] ss:$16 sps:$4 sm:$0xff]  }
  0xc5   :  { %1705 = vmatprep.subr.bf16.mxu1 %v6739_v62  ;;  %v6823_v61 = vld [vmem:[#allocation5 + $0x4a8] ss:$16 sps:$4 sm:$0xff]   ;;  %v6828_v62 = vld [vmem:[#allocation5 + $0x38c] ss:$16 sps:$4 sm:$0xff]  }
  0xc7   :  { %1640 = vmatpush2.bf16.msra.mxu0 %v6734_v63  ;;  %v6831_v63 = vld [vmem:[#allocation5 + $0x48c] ss:$16 sps:$4 sm:$0xff]  }
  0xc8   :  { %1706 = vmatpush1.bf16.msra.mxu1 %v6737_v48  ;;  %1641 = vmatprep.subr.bf16.mxu0 %v6742_v0  ;;  %v6826_v48 = vld [vmem:[#allocation5 + $0x388] ss:$16 sps:$4 sm:$0xff]   ;;  %v6834_v0 = vld [vmem:[#allocation5 + $0x36c] ss:$16 sps:$4 sm:$0xff]  }
  0xc9   :  { %1707 = vmatprep.subr.bf16.mxu1 %v6745_v1  ;;  %v6837_v1 = vld [vmem:[#allocation5 + $0x46c] ss:$16 sps:$4 sm:$0xff]  }
  0xcb   :  { %1642 = vmatpush2.bf16.msra.mxu0 %v6740_v2  ;;  %v6832_v2 = vld [vmem:[#allocation5 + $0x368] ss:$16 sps:$4 sm:$0xff]  }
  0xcc   :  { %1708 = vmatpush1.bf16.msra.mxu1 %v6743_v3  ;;  %1643 = vmatprep.subr.bf16.mxu0 %v6748_v4  ;;  %v6835_v3 = vld [vmem:[#allocation5 + $0x468] ss:$16 sps:$4 sm:$0xff]   ;;  %v6840_v4 = vld [vmem:[#allocation5 + $0x34c] ss:$16 sps:$4 sm:$0xff]  }
  0xcd   :  { %1709 = vmatprep.subr.bf16.mxu1 %v6751_v5  ;;  %v6843_v5 = vld [vmem:[#allocation5 + $0x44c] ss:$16 sps:$4 sm:$0xff]  }
  0xcf   :  { %1644 = vmatpush2.bf16.msra.mxu0 %v6746_v6  ;;  %v6841_v6 = vld [vmem:[#allocation5 + $0x448] ss:$16 sps:$4 sm:$0xff]  }
  0xd0   :  { %1710 = vmatpush1.bf16.msra.mxu1 %v6749_v9  ;;  %1645 = vmatprep.subr.bf16.mxu0 %v6754_v10  ;;  %v6846_v9 = vld [vmem:[#allocation5 + $0x32c] ss:$16 sps:$4 sm:$0xff]  }
  0xd1   :  { %1711 = vmatprep.subr.bf16.mxu1 %v6757_v11  ;;  %v6849_v10 = vld [vmem:[#allocation5 + $0x42c] ss:$16 sps:$4 sm:$0xff]   ;;  %v6844_v11 = vld [vmem:[#allocation5 + $0x328] ss:$16 sps:$4 sm:$0xff]  }
  0xd3   :  { %1646 = vmatpush2.bf16.msra.mxu0 %v6752_v12  ;;  %v6847_v12 = vld [vmem:[#allocation5 + $0x428] ss:$16 sps:$4 sm:$0xff]  }
  0xd4   :  { %1712 = vmatpush1.bf16.msra.mxu1 %v6755_v13  ;;  %1738 = vmatprep.subr.bf16.mxu0 %v6765_v15  ;;  %v6852_v13 = vld [vmem:[#allocation5 + $0x30c] ss:$16 sps:$4 sm:$0xff]   ;;  %v6850_v15 = vld [vmem:[#allocation5 + $0x308] ss:$16 sps:$4 sm:$0xff]  }
  0xd5   :  { %1713 = vmatprep.subr.bf16.mxu1 %v6762_v14  ;;  %v6855_v14 = vld [vmem:[#allocation5 + $0x40c] ss:$16 sps:$4 sm:$0xff]  }
  0xd6   :  { %1648 = vmatmul.mubr.bf16.vlgmr.msra.gmra.mxu0 %v7967_v16 }
  0xd7   :  { %1739 = vmatpush1.bf16.msra.mxu0 %v6763_v19  ;;  %1770 = vmatprep.mubr.bf16.mxu0 %v7946_v52  ;;  %v6787_v52 = vld [vmem:[#allocation5 + $0x268] ss:$16 sps:$4 sm:$0xff]   ;;  %v6858_v19 = vld [vmem:[#allocation5 + $0x5ec] ss:$16 sps:$4 sm:$0xff]  }
  0xd8   :  { %1714 = vmatpush2.bf16.msra.mxu1 %v6760_v18  ;;  %1740 = vmatprep.subr.bf16.mxu0 %v6771_v21  ;;  %v6853_v18 = vld [vmem:[#allocation5 + $0x408] ss:$16 sps:$4 sm:$0xff]  }
  0xd9   :  { %1715 = vmatprep.subr.bf16.mxu1 %v6768_v20  ;;  %v6861_v20 = vld [vmem:[#allocation5 + $0x6ec] ss:$16 sps:$4 sm:$0xff]   ;;  %v6856_v21 = vld [vmem:[#allocation5 + $0x5e8] ss:$16 sps:$4 sm:$0xff]  }
  0xdb   :  { %1741 = vmatpush1.bf16.msra.mxu0 %v6769_v23  ;;  %v6864_v23 = vld [vmem:[#allocation5 + $0x5cc] ss:$16 sps:$4 sm:$0xff]  }
  0xdc   :  { %1716 = vmatpush2.bf16.msra.mxu1 %v6766_v22  ;;  %1742 = vmatprep.subr.bf16.mxu0 %v6777_v25  ;;  %v6859_v22 = vld [vmem:[#allocation5 + $0x6e8] ss:$16 sps:$4 sm:$0xff]  }
  0xdd   :  { %1717 = vmatprep.subr.bf16.mxu1 %v6774_v24  ;;  %v6867_v24 = vld [vmem:[#allocation5 + $0x6cc] ss:$16 sps:$4 sm:$0xff]   ;;  %v6862_v25 = vld [vmem:[#allocation5 + $0x5c8] ss:$16 sps:$4 sm:$0xff]  }
  0xdf   :  { %1743 = vmatpush1.bf16.msra.mxu0 %v6775_v27  ;;  %v6870_v27 = vld [vmem:[#allocation5 + $0x5ac] ss:$16 sps:$4 sm:$0xff]  }
  0xe0   :  { %1718 = vmatpush2.bf16.msra.mxu1 %v6772_v26  ;;  %1744 = vmatprep.subr.bf16.mxu0 %v6783_v29  ;;  %v6865_v26 = vld [vmem:[#allocation5 + $0x6c8] ss:$16 sps:$4 sm:$0xff]  }
  0xe1   :  { %1719 = vmatprep.subr.bf16.mxu1 %v6780_v28  ;;  %v6873_v28 = vld [vmem:[#allocation5 + $0x6ac] ss:$16 sps:$4 sm:$0xff]   ;;  %v6868_v29 = vld [vmem:[#allocation5 + $0x5a8] ss:$16 sps:$4 sm:$0xff]  }
  0xe3   :  { %1745 = vmatpush1.bf16.msra.mxu0 %v6781_v31  ;;  %v6876_v31 = vld [vmem:[#allocation5 + $0x58c] ss:$16 sps:$4 sm:$0xff]  }
  0xe4   :  { %1720 = vmatpush2.bf16.msra.mxu1 %v6778_v30  ;;  %1746 = vmatprep.subr.bf16.mxu0 %v6789_v33  ;;  %v6871_v30 = vld [vmem:[#allocation5 + $0x6a8] ss:$16 sps:$4 sm:$0xff]  }
  0xe5   :  { %1721 = vmatprep.subr.bf16.mxu1 %v6786_v32  ;;  %v6879_v32 = vld [vmem:[#allocation5 + $0x68c] ss:$16 sps:$4 sm:$0xff]   ;;  %v6874_v33 = vld [vmem:[#allocation5 + $0x588] ss:$16 sps:$4 sm:$0xff]  }
  0xe7   :  { %1747 = vmatpush1.bf16.msra.mxu0 %v6787_v52  ;;  %v6882_v52 = vld [vmem:[#allocation5 + $0x56c] ss:$16 sps:$4 sm:$0xff]  }
  0xe8   :  { %1722 = vmatpush2.bf16.msra.mxu1 %v6784_v34  ;;  %1748 = vmatprep.subr.bf16.mxu0 %v6795_v37  ;;  %v6877_v34 = vld [vmem:[#allocation5 + $0x688] ss:$16 sps:$4 sm:$0xff]  }
  0xe9   :  { %1723 = vmatprep.subr.bf16.mxu1 %v6792_v35  ;;  %v6880_v35 = vld [vmem:[#allocation5 + $0x568] ss:$16 sps:$4 sm:$0xff]  }
  0xea   :  { %v6883_v37 = vld [vmem:[#allocation5 + $0x668] ss:$16 sps:$4 sm:$0xff]  }
  0xeb   :  { %1749 = vmatpush1.bf16.msra.mxu0 %v6793_v39  ;;  %v6886_v39 = vld [vmem:[#allocation5 + $0x548] ss:$16 sps:$4 sm:$0xff]  }
  0xec   :  { %1724 = vmatpush2.bf16.msra.mxu1 %v6790_v38  ;;  %1750 = vmatprep.subr.bf16.mxu0 %v6801_v41  ;;  %v6891_v38 = vld [vmem:[#allocation5 + $0x64c] ss:$16 sps:$4 sm:$0xff]  }
  0xed   :  { %1725 = vmatprep.subr.bf16.mxu1 %v6798_v40  ;;  %v6889_v40 = vld [vmem:[#allocation5 + $0x648] ss:$16 sps:$4 sm:$0xff]   ;;  %v6894_v41 = vld [vmem:[#allocation5 + $0x52c] ss:$16 sps:$4 sm:$0xff]  }
  0xef   :  { %1751 = vmatpush1.bf16.msra.mxu0 %v6799_v43  ;;  %v6892_v43 = vld [vmem:[#allocation5 + $0x528] ss:$16 sps:$4 sm:$0xff]  }
  0xf0   :  { %1726 = vmatpush2.bf16.msra.mxu1 %v6796_v42  ;;  %1752 = vmatprep.subr.bf16.mxu0 %v6807_v45  ;;  %v6897_v42 = vld [vmem:[#allocation5 + $0x62c] ss:$16 sps:$4 sm:$0xff]  }
  0xf1   :  { %1727 = vmatprep.subr.bf16.mxu1 %v6804_v44  ;;  %v6895_v44 = vld [vmem:[#allocation5 + $0x628] ss:$16 sps:$4 sm:$0xff]   ;;  %v6900_v45 = vld [vmem:[#allocation5 + $0x50c] ss:$16 sps:$4 sm:$0xff]  }
  0xf3   :  { %1753 = vmatpush1.bf16.msra.mxu0 %v6805_v47  ;;  %v6898_v47 = vld [vmem:[#allocation5 + $0x508] ss:$16 sps:$4 sm:$0xff]  }
  0xf4   :  { %1728 = vmatpush2.bf16.msra.mxu1 %v6802_v46  ;;  %1754 = vmatprep.subr.bf16.mxu0 %v6810_v49  ;;  %v6903_v46 = vld [vmem:[#allocation5 + $0x60c] ss:$16 sps:$4 sm:$0xff]   ;;  %v6901_v49 = vld [vmem:[#allocation5 + $0x608] ss:$16 sps:$4 sm:$0xff]  }
  0xf5   :  { %1779 = vmatprep.subr.bf16.mxu1 %v6813_v50  ;;  %v6906_v50 = vld [vmem:[#allocation7 + $0xe4] ss:$16 sps:$4 sm:$0xff]  }
  0xf7   :  { %1730 = vmatmul.mubr.bf16.vlgmr.msra.gmra.mxu1 %v7950_v7  ;;  %1755 = vmatpush2.bf16.msra.mxu0 %v6808_v51  ;;  %v6829_v7 = vld [vmem:[#allocation5 + $0x488] ss:$16 sps:$4 sm:$0xff]   ;;  %v6904_v51 = vld [vmem:[#allocation7 + $0xe0] ss:$16 sps:$4 sm:$0xff]  }
  0xf8   :  { %1780 = vmatpush1.bf16.msra.mxu1 %v6811_v53  ;;  %1756 = vmatprep.subr.bf16.mxu0 %v6816_v54  ;;  %v6909_v53 = vld [vmem:[#allocation7 + $0xc4] ss:$16 sps:$4 sm:$0xff]   ;;  %v6907_v54 = vld [vmem:[#allocation7 + $0xc0] ss:$16 sps:$4 sm:$0xff]  }
  0xf9   :  { %1781 = vmatprep.subr.bf16.mxu1 %v6819_v55  ;;  %1811 = vmatprep.mubr.bf16.mxu1 %v7961_v36  ;;  %v6838_v36 = vld [vmem:[#allocation5 + $0x348] ss:$16 sps:$4 sm:$0xff]   ;;  %v7676_v55 = vld [vmem:[#allocation3 + $0x18] ss:$0 sps:$4 sm:$0xff]  }
  0xfb   :  { %1757 = vmatpush2.bf16.msra.mxu0 %v6814_v56  ;;  %v6912_v56 = vld [vmem:[#allocation7 + $0xa4] ss:$16 sps:$4 sm:$0xff]  }
  0xfc   :  { %1782 = vmatpush1.bf16.msra.mxu1 %v6817_v57  ;;  %1758 = vmatprep.subr.bf16.mxu0 %v6822_v58  ;;  %v6910_v57 = vld [vmem:[#allocation7 + $0xa0] ss:$16 sps:$4 sm:$0xff]   ;;  %v6915_v58 = vld [vmem:[#allocation7 + $0x84] ss:$16 sps:$4 sm:$0xff]  }
  0xfd   :  { %1783 = vmatprep.subr.bf16.mxu1 %v6825_v59  ;;  %v6913_v59 = vld [vmem:[#allocation7 + $0x80] ss:$16 sps:$4 sm:$0xff]  }
  0xff   :  { %1759 = vmatpush2.bf16.msra.mxu0 %v6820_v60  ;;  %v6918_v60 = vld [vmem:[#allocation7 + $0x64] ss:$16 sps:$4 sm:$0xff]  }
 0x100   :  { %1784 = vmatpush1.bf16.msra.mxu1 %v6823_v61  ;;  %1760 = vmatprep.subr.bf16.mxu0 %v6828_v62  ;;  %v6976_v61 = vld [vmem:[#allocation7 + $0x2e0] ss:$16 sps:$4 sm:$0xff]   ;;  %v6978_v62 = vld [vmem:[#allocation7 + $0x2e4] ss:$16 sps:$4 sm:$0xff]  }
 0x101   :  { %1785 = vmatprep.subr.bf16.mxu1 %v6831_v63  ;;  %v6916_v63 = vld [vmem:[#allocation7 + $0x60] ss:$16 sps:$4 sm:$0xff]  }
 0x103   :  { %1761 = vmatpush2.bf16.msra.mxu0 %v6826_v48  ;;  %v6982_v48 = vld [vmem:[#allocation7 + $0x2c0] ss:$16 sps:$4 sm:$0xff]  }
 0x104   :  { %1786 = vmatpush1.bf16.msra.mxu1 %v6829_v7  ;;  %1762 = vmatprep.subr.bf16.mxu0 %v6834_v0  ;;  %v6984_v7 = vld [vmem:[#allocation7 + $0x2c4] ss:$16 sps:$4 sm:$0xff]   ;;  %v6919_v0 = vld [vmem:[#allocation7 + $0x40] ss:$16 sps:$4 sm:$0xff]  }
 0x105   :  { %1787 = vmatprep.subr.bf16.mxu1 %v6837_v1  ;;  %v6924_v1 = vld [vmem:[#allocation7 + $0x24] ss:$16 sps:$4 sm:$0xff]  }
 0x107   :  { %1763 = vmatpush2.bf16.msra.mxu0 %v6832_v2  ;;  %v6988_v2 = vld [vmem:[#allocation7 + $0x2a0] ss:$16 sps:$4 sm:$0xff]  }
 0x108   :  { %1788 = vmatpush1.bf16.msra.mxu1 %v6835_v3  ;;  %1764 = vmatprep.subr.bf16.mxu0 %v6840_v4  ;;  %v6990_v3 = vld [vmem:[#allocation7 + $0x2a4] ss:$16 sps:$4 sm:$0xff]   ;;  %v6922_v4 = vld [vmem:[#allocation7 + $0x20] ss:$16 sps:$4 sm:$0xff]  }
 0x109   :  { %1789 = vmatprep.subr.bf16.mxu1 %v6843_v5  ;;  %v6927_v5 = vld [vmem:[#allocation7 + $0x4] ss:$16 sps:$4 sm:$0xff]  }
 0x10b   :  { %1765 = vmatpush2.bf16.msra.mxu0 %v6838_v36  ;;  %v6994_v36 = vld [vmem:[#allocation7 + $0x280] ss:$16 sps:$4 sm:$0xff]  }
 0x10c   :  { %1790 = vmatpush1.bf16.msra.mxu1 %v6841_v6  ;;  %1766 = vmatprep.subr.bf16.mxu0 %v6846_v9  ;;  %v6996_v6 = vld [vmem:[#allocation7 + $0x284] ss:$16 sps:$4 sm:$0xff]   ;;  %v6925_v9 = vld [vmem:[#allocation7] ss:$16 sps:$4 sm:$0xff]  }
 0x10d   :  { %1791 = vmatprep.subr.bf16.mxu1 %v6849_v10  ;;  %v6930_v10 = vld [vmem:[#allocation7 + $0x1e4] ss:$16 sps:$4 sm:$0xff]  }
 0x10f   :  { %1767 = vmatpush2.bf16.msra.mxu0 %v6844_v11  ;;  %v7000_v11 = vld [vmem:[#allocation7 + $0x260] ss:$16 sps:$4 sm:$0xff]  }
 0x110   :  { %1792 = vmatpush1.bf16.msra.mxu1 %v6847_v12  ;;  %1768 = vmatprep.subr.bf16.mxu0 %v6852_v13  ;;  %v7002_v12 = vld [vmem:[#allocation7 + $0x264] ss:$16 sps:$4 sm:$0xff]   ;;  %v6928_v13 = vld [vmem:[#allocation7 + $0x1e0] ss:$16 sps:$4 sm:$0xff]  }
 0x111   :  { %1793 = vmatprep.subr.bf16.mxu1 %v6855_v14  ;;  %v6933_v14 = vld [vmem:[#allocation7 + $0x1c4] ss:$16 sps:$4 sm:$0xff]  }
 0x113   :  { %1769 = vmatpush2.bf16.msra.mxu0 %v6850_v15  ;;  %v6931_v15 = vld [vmem:[#allocation7 + $0x1c0] ss:$16 sps:$4 sm:$0xff]  }
 0x114   :  { %1794 = vmatpush1.bf16.msra.mxu1 %v6853_v18  ;;  %1820 = vmatprep.subr.bf16.mxu0 %v6861_v20  ;;  %v7008_v18 = vld [vmem:[#allocation7 + $0x244] ss:$16 sps:$4 sm:$0xff]  }
 0x115   :  { %1795 = vmatprep.subr.bf16.mxu1 %v6858_v19 }
 0x116   :  { %1771 = vmatmul.mubr.bf16.vlgmr.msra.gmra.mxu0 %v7952_v8  ;;  %v6885_v8 = vld [vmem:[#allocation5 + $0x66c] ss:$16 sps:$4 sm:$0xff]  }
 0x117   :  { %1821 = vmatpush1.bf16.msra.mxu0 %v6859_v22  ;;  %1852 = vmatprep.mubr.bf16.mxu0 %v7834_v17  ;;  %v6888_v17 = vld [vmem:[#allocation5 + $0x54c] ss:$16 sps:$4 sm:$0xff]   ;;  %v7006_v22 = vld [vmem:[#allocation7 + $0x240] ss:$16 sps:$4 sm:$0xff]  }
 0x118   :  { %1796 = vmatpush2.bf16.msra.mxu1 %v6856_v21  ;;  %1822 = vmatprep.subr.bf16.mxu0 %v6867_v24  ;;  %v6936_v21 = vld [vmem:[#allocation7 + $0x1a4] ss:$16 sps:$4 sm:$0xff]  }
 0x119   :  { %1797 = vmatprep.subr.bf16.mxu1 %v6864_v23 }
 0x11b   :  { %1823 = vmatpush1.bf16.msra.mxu0 %v6865_v26 }
 0x11c   :  { %1798 = vmatpush2.bf16.msra.mxu1 %v6862_v25  ;;  %1824 = vmatprep.subr.bf16.mxu0 %v6873_v28  ;;  %v7014_v25 = vld [vmem:[#allocation7 + $0x224] ss:$16 sps:$4 sm:$0xff]   ;;  %v6934_v28 = vld [vmem:[#allocation7 + $0x1a0] ss:$16 sps:$4 sm:$0xff]  }
 0x11d   :  { %1799 = vmatprep.subr.bf16.mxu1 %v6870_v27 }
 0x11f   :  { %1825 = vmatpush1.bf16.msra.mxu0 %v6871_v30 }
 0x120   :  { %1800 = vmatpush2.bf16.msra.mxu1 %v6868_v29  ;;  %1826 = vmatprep.subr.bf16.mxu0 %v6879_v32  ;;  %v7012_v29 = vld [vmem:[#allocation7 + $0x220] ss:$16 sps:$4 sm:$0xff]   ;;  %v6939_v32 = vld [vmem:[#allocation7 + $0x184] ss:$16 sps:$4 sm:$0xff]  }
 0x121   :  { %1801 = vmatprep.subr.bf16.mxu1 %v6876_v31 }
 0x123   :  { %1827 = vmatpush1.bf16.msra.mxu0 %v6877_v34  ;;  %v7020_v34 = vld [vmem:[#allocation7 + $0x204] ss:$16 sps:$4 sm:$0xff]  }
 0x124   :  { %1802 = vmatpush2.bf16.msra.mxu1 %v6874_v33  ;;  %1828 = vmatprep.subr.bf16.mxu0 %v6885_v8  ;;  %v7018_v33 = vld [vmem:[#allocation7 + $0x200] ss:$16 sps:$4 sm:$0xff]   ;;  %v6942_v8 = vld [vmem:[#allocation7 + $0x164] ss:$16 sps:$4 sm:$0xff]  }
 0x125   :  { %1803 = vmatprep.subr.bf16.mxu1 %v6882_v52  ;;  %v6937_v52 = vld [vmem:[#allocation7 + $0x180] ss:$16 sps:$4 sm:$0xff]  }
 0x127   :  { %1829 = vmatpush1.bf16.msra.mxu0 %v6883_v37  ;;  %v7026_v37 = vld [vmem:[#allocation7 + $0x3e4] ss:$16 sps:$4 sm:$0xff]  }
 0x128   :  { %1804 = vmatpush2.bf16.msra.mxu1 %v6880_v35  ;;  %1830 = vmatprep.subr.bf16.mxu0 %v6891_v38  ;;  %v7024_v35 = vld [vmem:[#allocation7 + $0x3e0] ss:$16 sps:$4 sm:$0xff]   ;;  %v7029_v38 = vld [vmem:[#allocation7 + $0x3c4] ss:$16 sps:$4 sm:$0xff]  }
 0x129   :  { %1805 = vmatprep.subr.bf16.mxu1 %v6888_v17  ;;  %v6940_v17 = vld [vmem:[#allocation7 + $0x160] ss:$16 sps:$4 sm:$0xff]  }
 0x12b   :  { %1831 = vmatpush1.bf16.msra.mxu0 %v6889_v40  ;;  %v7027_v40 = vld [vmem:[#allocation7 + $0x3c0] ss:$16 sps:$4 sm:$0xff]  }
 0x12c   :  { %1806 = vmatpush2.bf16.msra.mxu1 %v6886_v39  ;;  %1832 = vmatprep.subr.bf16.mxu0 %v6897_v42  ;;  %v6945_v39 = vld [vmem:[#allocation7 + $0x144] ss:$16 sps:$4 sm:$0xff]  }
 0x12d   :  { %1807 = vmatprep.subr.bf16.mxu1 %v6894_v41  ;;  %v6943_v41 = vld [vmem:[#allocation7 + $0x140] ss:$16 sps:$4 sm:$0xff]   ;;  %v7032_v42 = vld [vmem:[#allocation7 + $0x3a4] ss:$16 sps:$4 sm:$0xff]  }
 0x12f   :  { %1833 = vmatpush1.bf16.msra.mxu0 %v6895_v44  ;;  %v7030_v44 = vld [vmem:[#allocation7 + $0x3a0] ss:$16 sps:$4 sm:$0xff]  }
 0x130   :  { %1808 = vmatpush2.bf16.msra.mxu1 %v6892_v43  ;;  %1834 = vmatprep.subr.bf16.mxu0 %v6903_v46  ;;  %v6948_v43 = vld [vmem:[#allocation7 + $0x124] ss:$16 sps:$4 sm:$0xff]   ;;  %v6946_v46 = vld [vmem:[#allocation7 + $0x120] ss:$16 sps:$4 sm:$0xff]  }
 0x131   :  { %1809 = vmatprep.subr.bf16.mxu1 %v6900_v45  ;;  %v7035_v45 = vld [vmem:[#allocation7 + $0x384] ss:$16 sps:$4 sm:$0xff]  }
 0x133   :  { %1835 = vmatpush1.bf16.msra.mxu0 %v6901_v49  ;;  %v7033_v49 = vld [vmem:[#allocation7 + $0x380] ss:$16 sps:$4 sm:$0xff]  }
 0x134   :  { %1810 = vmatpush2.bf16.msra.mxu1 %v6898_v47  ;;  %2667 = vmatprep.subr.bf16.mxu0 %v6906_v50  ;;  %v6951_v47 = vld [vmem:[#allocation7 + $0x104] ss:$16 sps:$4 sm:$0xff]  }
 0x135   :  { %2708 = vmatprep.subr.bf16.mxu1 %v6978_v62  ;;  %v7038_v50 = vld [vmem:[#allocation7 + $0x364] ss:$16 sps:$4 sm:$0xff]  }
 0x136   :  { %1853 = vmatmul.mubr.bf16.vlgmr.msra.gmra.mxu0 %v7676_v55  ;;  %v7041_v55 = vld [vmem:[#allocation7 + $0x344] ss:$16 sps:$4 sm:$0xff]  }
 0x137   :  { %1812 = vmatmul.mubr.bf16.vlgmr.msra.gmra.mxu1 %v7967_v16  ;;  %2668 = vmatpush1.bf16.msra.mxu0 %v6904_v51  ;;  %v6921_v16 = vld [vmem:[#allocation7 + $0x44] ss:$16 sps:$4 sm:$0xff]   ;;  %v6949_v51 = vld [vmem:[#allocation7 + $0x100] ss:$16 sps:$4 sm:$0xff]  }
 0x138   :  { %2669 = vmatprep.subr.bf16.mxu0 %v6909_v53  ;;  %2709 = vmatpush1.bf16.msra.mxu1 %v6976_v61  ;;  %v6954_v53 = vld [vmem:[#allocation7 + $0xec] ss:$16 sps:$4 sm:$0xff]   ;;  %v7042_v61 = vld [vmem:[#allocation7 + $0x320] ss:$16 sps:$4 sm:$0xff]  }
 0x139   :  { %2710 = vmatprep.subr.bf16.mxu1 %v6984_v7  ;;  %v7050_v7 = vld [vmem:[#allocation7 + $0x2ec] ss:$16 sps:$4 sm:$0xff]  }
 0x13b   :  { %2670 = vmatpush1.bf16.msra.mxu0 %v6907_v54  ;;  %v7036_v54 = vld [vmem:[#allocation7 + $0x360] ss:$16 sps:$4 sm:$0xff]  }
 0x13c   :  { %2671 = vmatprep.subr.bf16.mxu0 %v6912_v56  ;;  %2711 = vmatpush1.bf16.msra.mxu1 %v6982_v48  ;;  %v368_v48 = vlaneseq }
 0x13d   :  { %2712 = vmatprep.subr.bf16.mxu1 %v6990_v3 }
 0x13f   :  { %2672 = vmatpush1.bf16.msra.mxu0 %v6910_v57  ;;  %v7039_v57 = vld [vmem:[#allocation7 + $0x340] ss:$16 sps:$4 sm:$0xff]  }
 0x140   :  { %2673 = vmatprep.subr.bf16.mxu0 %v6915_v58  ;;  %2713 = vmatpush1.bf16.msra.mxu1 %v6988_v2 }
 0x141   :  { %2714 = vmatprep.subr.bf16.mxu1 %v6996_v6 }
 0x143   :  { %2674 = vmatpush1.bf16.msra.mxu0 %v6913_v59  ;;  %v7044_v59 = vld [vmem:[#allocation7 + $0x324] ss:$16 sps:$4 sm:$0xff]  }
 0x144   :  { %2675 = vmatprep.subr.bf16.mxu0 %v6918_v60  ;;  %2715 = vmatpush1.bf16.msra.mxu1 %v6994_v36 }
 0x145   :  { %2716 = vmatprep.subr.bf16.mxu1 %v7002_v12 }
 0x147   :  { %2676 = vmatpush1.bf16.msra.mxu0 %v6916_v63  ;;  %v7047_v63 = vld [vmem:[#allocation7 + $0x304] ss:$16 sps:$4 sm:$0xff]  }
 0x148   :  { %2677 = vmatprep.subr.bf16.mxu0 %v6921_v16  ;;  %2717 = vmatpush1.bf16.msra.mxu1 %v7000_v11  ;;  %v7045_v16 = vld [vmem:[#allocation7 + $0x300] ss:$16 sps:$4 sm:$0xff]  }
 0x149   :  { %2718 = vmatprep.subr.bf16.mxu1 %v7008_v18 }
 0x14b   :  { %2678 = vmatpush1.bf16.msra.mxu0 %v6919_v0  ;;  %v7984_v0 = vshrl.u32 %v368_v48, 7  ;;  %v7021_v48 = vld [vmem:[#allocation7 + $0x108] ss:$16 sps:$4 sm:$0xff]  }
 0x14c   :  { %2679 = vmatprep.subr.bf16.mxu0 %v6924_v1  ;;  %2719 = vmatpush1.bf16.msra.mxu1 %v7006_v22  ;;  %v7989_v1 = vld [vmem:[%s8126_s2] sm:$0xf] }
 0x14d   :  { %2720 = vmatprep.subr.bf16.mxu1 %v7014_v25  ;;  %v7992_v2 = vsub.s32 0, %v7984_v0  ;;  %v7995_v3 = vsub.s32 1, %v7984_v0 }
 0x14f   :  { %2680 = vmatpush1.bf16.msra.mxu0 %v6922_v4  ;;  %v371_v4 = vrot.slane %v7989_v1, %v7992_v2 }
 0x150   :  { %2681 = vmatprep.subr.bf16.mxu0 %v6927_v5  ;;  %2721 = vmatpush1.bf16.msra.mxu1 %v7012_v29  ;;  %v375_v5 = vrot.slane %v7989_v1, %v7995_v3  ;;  %v6957_v29 = vld [vmem:[#allocation7 + $0xcc] ss:$16 sps:$4 sm:$0xff]  }
 0x151   :  { %2722 = vmatprep.subr.bf16.mxu1 %v7020_v34  ;;  %v6966_v34 = vld [vmem:[#allocation7 + $0x6c] ss:$16 sps:$4 sm:$0xff]  }
 0x153   :  { %2682 = vmatpush1.bf16.msra.mxu0 %v6925_v9 }
 0x154   :  { %2683 = vmatprep.subr.bf16.mxu0 %v6930_v10  ;;  %2723 = vmatpush1.bf16.msra.mxu1 %v7018_v33  ;;  %v6961_v33 = vld [vmem:[#allocation7 + $0x88] ss:$16 sps:$4 sm:$0xff]  }
 0x155   :  { %2724 = vmatprep.subr.bf16.mxu1 %v7026_v37  ;;  %v6972_v37 = vld [vmem:[#allocation7 + $0x2c] ss:$16 sps:$4 sm:$0xff]  }
 0x156   :  { %v7976_v19 = vpop.f32.mrf.mxu0 }
 0x157   :  { %v7978_v20 = vpop.f32.mrf.mxu1  ;;  %2684 = vmatpush2.bf16.msra.mxu0 %v6928_v13  ;;  %v1568_v36 = vadd.f32 %v7976_v19, %v371_v4  ;;  %v7098_v4 = vld [vmem:[#allocation8 + $0xe4] ss:$16 sps:$4 sm:$0xff]  }
 0x158   :  { %v7980_v23 = vpop.f32.mrf.mxu0  ;;  %2685 = vmatprep.subr.bf16.mxu0 %v6933_v14  ;;  %2725 = vmatpush2.bf16.msra.mxu1 %v7024_v35  ;;  %v6967_v35 = vld [vmem:[#allocation7 + $0x48] ss:$16 sps:$4 sm:$0xff]  }
 0x159   :  { %v7982_v24 = vpop.f32.mrf.mxu1  ;;  %2726 = vmatprep.subr.bf16.mxu1 %v7029_v38  ;;  %v1570_v6 = vadd.f32 %v7980_v23, %v375_v5  ;;  %v1609_v9 = vadd.f32 %v7978_v20, %v1568_v36  ;;  %v6952_v23 = vld [vmem:[#allocation7 + $0xe8] ss:$16 sps:$4 sm:$0xff]   ;;  %v7101_v5 = vld [vmem:[#allocation8 + $0xc4] ss:$16 sps:$4 sm:$0xff]   ;;  %v8014_v36 = vsub.s32 2, %v7984_v0 }
 0x15a   :  { %v1571_v26 = vpop.f32.mrf.mxu0 }
 0x15b   :  { %v1612_v27 = vpop.f32.mrf.mxu1  ;;  %2686 = vmatpush2.bf16.msra.mxu0 %v6931_v15  ;;  %v1611_v11 = vadd.f32 %v7982_v24, %v1570_v6  ;;  %v6955_v24 = vld [vmem:[#allocation7 + $0xc8] ss:$16 sps:$4 sm:$0xff]   ;;  %v7099_v6 = vld [vmem:[#allocation8 + $0xc0] ss:$16 sps:$4 sm:$0xff]  }
 0x15c   :  { %v1572_v30 = vpop.f32.mrf.mxu0  ;;  %2687 = vmatprep.subr.bf16.mxu0 %v6936_v21  ;;  %2727 = vmatpush2.bf16.msra.mxu1 %v7027_v40  ;;  %v6975_v40 = vld [vmem:[#allocation7 + $0xc] ss:$16 sps:$4 sm:$0xff]  }
 0x15d   :  { %v1613_v31 = vpop.f32.mrf.mxu1  ;;  %2728 = vmatprep.subr.bf16.mxu1 %v7032_v42  ;;  %v6960_v30 = vld [vmem:[#allocation7 + $0xac] ss:$16 sps:$4 sm:$0xff]  }
 0x15e   :  { %v6958_v31 = vld [vmem:[#allocation7 + $0xa8] ss:$16 sps:$4 sm:$0xff]  }
 0x15f   :  { %2688 = vmatpush2.bf16.msra.mxu0 %v6934_v28 }
 0x160   :  { %2689 = vmatprep.subr.bf16.mxu0 %v6939_v32  ;;  %2729 = vmatpush2.bf16.msra.mxu1 %v7030_v44  ;;  %v6963_v32 = vld [vmem:[#allocation7 + $0x8c] ss:$16 sps:$4 sm:$0xff]  }
 0x161   :  { %2730 = vmatprep.subr.bf16.mxu1 %v7035_v45  ;;  %v6981_v44 = vld [vmem:[#allocation7 + $0x1ec] ss:$16 sps:$4 sm:$0xff]   ;;  %v6979_v45 = vld [vmem:[#allocation7 + $0x1e8] ss:$16 sps:$4 sm:$0xff]  }
 0x163   :  { %2690 = vmatpush2.bf16.msra.mxu0 %v6937_v52  ;;  %v6964_v52 = vld [vmem:[#allocation7 + $0x68] ss:$16 sps:$4 sm:$0xff]  }
 0x164   :  { %2691 = vmatprep.subr.bf16.mxu0 %v6942_v8  ;;  %2731 = vmatpush2.bf16.msra.mxu1 %v7033_v49  ;;  %v6969_v8 = vld [vmem:[#allocation7 + $0x4c] ss:$16 sps:$4 sm:$0xff]  }
 0x165   :  { %2732 = vmatprep.subr.bf16.mxu1 %v7038_v50  ;;  %v6993_v49 = vld [vmem:[#allocation7 + $0x1ac] ss:$16 sps:$4 sm:$0xff]   ;;  %v6991_v50 = vld [vmem:[#allocation7 + $0x1a8] ss:$16 sps:$4 sm:$0xff]  }
 0x167   :  { %2692 = vmatpush2.bf16.msra.mxu0 %v6940_v17 }
 0x168   :  { %2693 = vmatprep.subr.bf16.mxu0 %v6945_v39  ;;  %2733 = vmatpush2.bf16.msra.mxu1 %v7036_v54  ;;  %v6970_v39 = vld [vmem:[#allocation7 + $0x28] ss:$16 sps:$4 sm:$0xff]   ;;  %v7005_v54 = vld [vmem:[#allocation7 + $0x16c] ss:$16 sps:$4 sm:$0xff]  }
 0x169   :  { %2734 = vmatprep.subr.bf16.mxu1 %v7041_v55  ;;  %v7003_v55 = vld [vmem:[#allocation7 + $0x168] ss:$16 sps:$4 sm:$0xff]  }
 0x16b   :  { %2694 = vmatpush2.bf16.msra.mxu0 %v6943_v41 }
 0x16c   :  { %2695 = vmatprep.subr.bf16.mxu0 %v6948_v43  ;;  %2735 = vmatpush2.bf16.msra.mxu1 %v7039_v57  ;;  %v6973_v43 = vld [vmem:[#allocation7 + $0x8] ss:$16 sps:$4 sm:$0xff]  }
 0x16d   :  { %2736 = vmatprep.subr.bf16.mxu1 %v7044_v59  ;;  %v7009_v57 = vld [vmem:[#allocation7 + $0x148] ss:$16 sps:$4 sm:$0xff]  }
 0x16f   :  { %2696 = vmatpush2.bf16.msra.mxu0 %v6946_v46  ;;  %v6987_v46 = vld [vmem:[#allocation7 + $0x1cc] ss:$16 sps:$4 sm:$0xff]  }
 0x170   :  { %2697 = vmatprep.subr.bf16.mxu0 %v6951_v47  ;;  %2737 = vmatpush2.bf16.msra.mxu1 %v7042_v61  ;;  %v6985_v47 = vld [vmem:[#allocation7 + $0x1c8] ss:$16 sps:$4 sm:$0xff]  }
 0x171   :  { %2738 = vmatprep.subr.bf16.mxu1 %v7047_v63  ;;  %v7015_v61 = vld [vmem:[#allocation7 + $0x128] ss:$16 sps:$4 sm:$0xff]  }
 0x173   :  { %2698 = vmatpush2.bf16.msra.mxu0 %v6949_v51  ;;  %v6999_v51 = vld [vmem:[#allocation7 + $0x18c] ss:$16 sps:$4 sm:$0xff]  }
 0x174   :  { %2749 = vmatprep.subr.bf16.mxu0 %v6954_v53  ;;  %2739 = vmatpush2.bf16.msra.mxu1 %v7045_v16  ;;  %v6997_v53 = vld [vmem:[#allocation7 + $0x188] ss:$16 sps:$4 sm:$0xff]  }
 0x175   :  { %2790 = vmatprep.subr.bf16.mxu1 %v7050_v7  ;;  %v7096_v7 = vld [vmem:[#allocation8 + $0xe0] ss:$16 sps:$4 sm:$0xff]  }
 0x177   :  { %v1690_v56 = vpop.f32.mrf.mxu1 }
 0x179   :  { %v1692_v58 = vpop.f32.mrf.mxu1 }
 0x17b   :  { %v1694_v60 = vpop.f32.mrf.mxu1 }
 0x17d   :  { %v1695_v62 = vpop.f32.mrf.mxu1 }
 0x17e   :  { %v7023_v62 = vld [vmem:[#allocation7 + $0x10c] ss:$16 sps:$4 sm:$0xff]  }
 0x196   :  { %v1649_v10 = vpop.f32.mrf.mxu0 }
 0x197   :  { %v1650_v12 = vadd.f32 %v1649_v10, %v1609_v9  ;;  %v8017_v9 = vsub.s32 3, %v7984_v0  ;;  %v7104_v10 = vld [vmem:[#allocation8 + $0xa4] ss:$16 sps:$4 sm:$0xff]  }
 0x198   :  { %v1651_v13 = vpop.f32.mrf.mxu0 }
 0x199   :  { %v1691_v14 = vadd.f32 %v1690_v56, %v1650_v12  ;;  %v1652_v15 = vadd.f32 %v1651_v13, %v1611_v11  ;;  %v7011_v56 = vld [vmem:[#allocation7 + $0x14c] ss:$16 sps:$4 sm:$0xff]   ;;  %v379_v11 = vrot.slane %v7989_v1, %v8014_v36  ;;  %v7102_v12 = vld [vmem:[#allocation8 + $0xa0] ss:$16 sps:$4 sm:$0xff]   ;;  %v383_v13 = vrot.slane %v7989_v1, %v8017_v9 }
 0x19a   :  { %v1653_v18 = vpop.f32.mrf.mxu0 }
 0x19b   :  { %vm1861_vm0 = vcmp.gt.f32.partialorder %v1691_v14, 0.0  ;;  %v1865_v21 = vmul.f32 0.2, %v1691_v14  ;;  %v1693_v22 = vadd.f32 %v1692_v58, %v1652_v15  ;;  %v7017_v58 = vld [vmem:[#allocation7 + $0x12c] ss:$16 sps:$4 sm:$0xff]  }
 0x19c   :  { %v1654_v25 = vpop.f32.mrf.mxu0  ;;  %v7105_v18 = vld [vmem:[#allocation8 + $0x80] ss:$16 sps:$4 sm:$0xff]  }
 0x19d   :  { %v1866_v26 = vmul.f32 0.2, %v1693_v22  ;;  %vm1862_vm1 = vcmp.gt.f32.partialorder %v1693_v22, 0.0  ;;  %v1869_v27 = vsel %vm1861_vm0, %v1691_v14, %v1865_v21  ;;  %v7107_v14 = vld [vmem:[#allocation8 + $0x84] ss:$16 sps:$4 sm:$0xff]  }
 0x19e   :  { %v8005_v20 = vpack.c.bf16 %v1869_v27, %v1869_v27 }
 0x19f   :  { %v1870_v19 = vsel %vm1862_vm1, %v1693_v22, %v1866_v26  ;;  %v7110_v22 = vld [vmem:[#allocation8 + $0x64] ss:$16 sps:$4 sm:$0xff]  }
 0x1a0   :  { %v1874_v28 = vpack.c.bf16 %v1870_v19, %v1870_v19 }
 0x1a2   :  { %2699 = vmatprep.mubr.bf16.mxu0 %v1874_v28 }
 0x1a3   :  { %2700 = vmatmul.mubr.bf16.vlgmr.msra.gmra.mxu0 %v8005_v20 }
 0x1a4   :  { %2750 = vmatpush1.bf16.msra.mxu0 %v6952_v23  ;;  %2781 = vmatprep.mubr.bf16.mxu0 %v1874_v28 }
 0x1a5   :  { %2751 = vmatprep.subr.bf16.mxu0 %v6957_v29  ;;  %v7108_v29 = vld [vmem:[#allocation8 + $0x60] ss:$16 sps:$4 sm:$0xff]  }
 0x1a8   :  { %2752 = vmatpush1.bf16.msra.mxu0 %v6955_v24  ;;  %v7113_v24 = vld [vmem:[#allocation8 + $0x44] ss:$16 sps:$4 sm:$0xff]  }
 0x1a9   :  { %2753 = vmatprep.subr.bf16.mxu0 %v6960_v30 }
 0x1ac   :  { %2754 = vmatpush1.bf16.msra.mxu0 %v6958_v31 }
 0x1ad   :  { %2755 = vmatprep.subr.bf16.mxu0 %v6963_v32 }
 0x1b0   :  { %2756 = vmatpush1.bf16.msra.mxu0 %v6961_v33 }
 0x1b1   :  { %2757 = vmatprep.subr.bf16.mxu0 %v6966_v34 }
 0x1b4   :  { %2758 = vmatpush1.bf16.msra.mxu0 %v6964_v52 }
 0x1b5   :  { %2759 = vmatprep.subr.bf16.mxu0 %v6969_v8  ;;  %v7111_v8 = vld [vmem:[#allocation8 + $0x40] ss:$16 sps:$4 sm:$0xff]  }
 0x1b7   :  { %v8008_v17 = vpop.f32.mrf.mxu1 }
 0x1b8   :  { %2760 = vmatpush1.bf16.msra.mxu0 %v6967_v35  ;;  %v1732_v15 = vadd.f32 %v8008_v17, %v379_v11  ;;  %v7125_v11 = vld [vmem:[#allocation8 + $0x1c4] ss:$16 sps:$4 sm:$0xff]  }
 0x1b9   :  { %v8010_v38 = vpop.f32.mrf.mxu1  ;;  %2761 = vmatprep.subr.bf16.mxu0 %v6972_v37 }
 0x1ba   :  { %v1734_v21 = vadd.f32 %v8010_v38, %v383_v13  ;;  %v7123_v13 = vld [vmem:[#allocation8 + $0x1c0] ss:$16 sps:$4 sm:$0xff]  }
 0x1bb   :  { %v1735_v41 = vpop.f32.mrf.mxu1 }
 0x1bc   :  { %2762 = vmatpush1.bf16.msra.mxu0 %v6970_v39  ;;  %v7048_v39 = vld [vmem:[#allocation7 + $0x2e8] ss:$16 sps:$4 sm:$0xff]   ;;  %v7053_v41 = vld [vmem:[#allocation7 + $0x2cc] ss:$16 sps:$4 sm:$0xff]  }
 0x1bd   :  { %v1736_v42 = vpop.f32.mrf.mxu1  ;;  %2763 = vmatprep.subr.bf16.mxu0 %v6975_v40 }
 0x1be   :  { %v7051_v42 = vld [vmem:[#allocation7 + $0x2c8] ss:$16 sps:$4 sm:$0xff]  }
 0x1c0   :  { %2764 = vmatpush1.bf16.msra.mxu0 %v6973_v43  ;;  %v7056_v43 = vld [vmem:[#allocation7 + $0x2ac] ss:$16 sps:$4 sm:$0xff]  }
 0x1c1   :  { %2765 = vmatprep.subr.bf16.mxu0 %v6981_v44  ;;  %v7054_v44 = vld [vmem:[#allocation7 + $0x2a8] ss:$16 sps:$4 sm:$0xff]  }
 0x1c4   :  { %2766 = vmatpush2.bf16.msra.mxu0 %v6979_v45  ;;  %v7059_v45 = vld [vmem:[#allocation7 + $0x28c] ss:$16 sps:$4 sm:$0xff]  }
 0x1c5   :  { %2767 = vmatprep.subr.bf16.mxu0 %v6987_v46  ;;  %v7057_v46 = vld [vmem:[#allocation7 + $0x288] ss:$16 sps:$4 sm:$0xff]  }
 0x1c8   :  { %2768 = vmatpush2.bf16.msra.mxu0 %v6985_v47  ;;  %v7062_v47 = vld [vmem:[#allocation7 + $0x26c] ss:$16 sps:$4 sm:$0xff]  }
 0x1c9   :  { %2769 = vmatprep.subr.bf16.mxu0 %v6993_v49  ;;  %v7060_v49 = vld [vmem:[#allocation7 + $0x268] ss:$16 sps:$4 sm:$0xff]  }
 0x1cc   :  { %2770 = vmatpush2.bf16.msra.mxu0 %v6991_v50  ;;  %v7065_v50 = vld [vmem:[#allocation7 + $0x24c] ss:$16 sps:$4 sm:$0xff]  }
 0x1cd   :  { %2771 = vmatprep.subr.bf16.mxu0 %v6999_v51  ;;  %v7063_v51 = vld [vmem:[#allocation7 + $0x248] ss:$16 sps:$4 sm:$0xff]  }
 0x1d0   :  { %2772 = vmatpush2.bf16.msra.mxu0 %v6997_v53  ;;  %v7068_v53 = vld [vmem:[#allocation7 + $0x22c] ss:$16 sps:$4 sm:$0xff]  }
 0x1d1   :  { %2773 = vmatprep.subr.bf16.mxu0 %v7005_v54  ;;  %v7066_v54 = vld [vmem:[#allocation7 + $0x228] ss:$16 sps:$4 sm:$0xff]  }
 0x1d4   :  { %2774 = vmatpush2.bf16.msra.mxu0 %v7003_v55  ;;  %v7071_v55 = vld [vmem:[#allocation7 + $0x20c] ss:$16 sps:$4 sm:$0xff]  }
 0x1d5   :  { %2775 = vmatprep.subr.bf16.mxu0 %v7011_v56  ;;  %v7069_v56 = vld [vmem:[#allocation7 + $0x208] ss:$16 sps:$4 sm:$0xff]  }
 0x1d6   :  { %v1772_v59 = vpop.f32.mrf.mxu0 }
 0x1d7   :  { %v1773_v0 = vadd.f32 %v1772_v59, %v1732_v15  ;;  %v7077_v59 = vld [vmem:[#allocation7 + $0x3cc] ss:$16 sps:$4 sm:$0xff]   ;;  %v7128_v15 = vld [vmem:[#allocation8 + $0x1a4] ss:$16 sps:$4 sm:$0xff]  }
 0x1d8   :  { %2776 = vmatpush2.bf16.msra.mxu0 %v7009_v57  ;;  %v1774_v60 = vpop.f32.mrf.mxu0  ;;  %v7074_v57 = vld [vmem:[#allocation7 + $0x3ec] ss:$16 sps:$4 sm:$0xff]  }
 0x1d9   :  { %2777 = vmatprep.subr.bf16.mxu0 %v7017_v58  ;;  %v1775_v27 = vadd.f32 %v1774_v60, %v1734_v21  ;;  %v7072_v58 = vld [vmem:[#allocation7 + $0x3e8] ss:$16 sps:$4 sm:$0xff]   ;;  %v7126_v21 = vld [vmem:[#allocation8 + $0x1a0] ss:$16 sps:$4 sm:$0xff]  }
 0x1da   :  { %v1776_v63 = vpop.f32.mrf.mxu0  ;;  %v7075_v60 = vld [vmem:[#allocation7 + $0x3c8] ss:$16 sps:$4 sm:$0xff]  }
 0x1db   :  { %v7114_v63 = vld [vmem:[#allocation8 + $0x20] ss:$16 sps:$4 sm:$0xff]  }
 0x1dc   :  { %2778 = vmatpush2.bf16.msra.mxu0 %v7015_v61  ;;  %v1777_v16 = vpop.f32.mrf.mxu0  ;;  %v7116_v61 = vld [vmem:[#allocation8 + $0x24] ss:$16 sps:$4 sm:$0xff]  }
 0x1dd   :  { %2779 = vmatprep.subr.bf16.mxu0 %v7023_v62  ;;  %v7080_v62 = vld [vmem:[#allocation7 + $0x3ac] ss:$16 sps:$4 sm:$0xff]   ;;  %v7078_v16 = vld [vmem:[#allocation7 + $0x3a8] ss:$16 sps:$4 sm:$0xff]  }
 0x1e0   :  { %2780 = vmatpush2.bf16.msra.mxu0 %v7021_v48  ;;  %v7119_v48 = vld [vmem:[#allocation8 + $0x4] ss:$16 sps:$4 sm:$0xff]  }
 0x1e1   :  { %3637 = vmatprep.subr.bf16.mxu0 %v7098_v4  ;;  %v7117_v4 = vld [vmem:[#allocation8] ss:$16 sps:$4 sm:$0xff]  }
 0x1e3   :  { %2782 = vmatmul.mubr.bf16.vlgmr.msra.gmra.mxu0 %v8005_v20 }
 0x1e4   :  { %3638 = vmatpush1.bf16.msra.mxu0 %v7096_v7  ;;  %v7083_v7 = vld [vmem:[#allocation7 + $0x38c] ss:$16 sps:$4 sm:$0xff]  }
 0x1e5   :  { %3639 = vmatprep.subr.bf16.mxu0 %v7101_v5  ;;  %v7122_v5 = vld [vmem:[#allocation8 + $0x1e4] ss:$16 sps:$4 sm:$0xff]  }
 0x1e8   :  { %3640 = vmatpush1.bf16.msra.mxu0 %v7099_v6  ;;  %v7120_v6 = vld [vmem:[#allocation8 + $0x1e0] ss:$16 sps:$4 sm:$0xff]  }
 0x1e9   :  { %3641 = vmatprep.subr.bf16.mxu0 %v7104_v10  ;;  %v7081_v10 = vld [vmem:[#allocation7 + $0x388] ss:$16 sps:$4 sm:$0xff]  }
 0x1ec   :  { %3642 = vmatpush1.bf16.msra.mxu0 %v7102_v12  ;;  %v7086_v12 = vld [vmem:[#allocation7 + $0x36c] ss:$16 sps:$4 sm:$0xff]  }
 0x1ed   :  { %3643 = vmatprep.subr.bf16.mxu0 %v7107_v14  ;;  %v7084_v14 = vld [vmem:[#allocation7 + $0x368] ss:$16 sps:$4 sm:$0xff]  }
 0x1f0   :  { %3644 = vmatpush1.bf16.msra.mxu0 %v7105_v18  ;;  %v7089_v18 = vld [vmem:[#allocation7 + $0x34c] ss:$16 sps:$4 sm:$0xff]  }
 0x1f1   :  { %3645 = vmatprep.subr.bf16.mxu0 %v7110_v22  ;;  %v7131_v22 = vld [vmem:[#allocation8 + $0x184] ss:$16 sps:$4 sm:$0xff]  }
 0x1f4   :  { %3646 = vmatpush1.bf16.msra.mxu0 %v7108_v29  ;;  %v7093_v29 = vld [vmem:[#allocation7 + $0x308] ss:$16 sps:$4 sm:$0xff]  }
 0x1f5   :  { %3647 = vmatprep.subr.bf16.mxu0 %v7113_v24  ;;  %v7140_v24 = vld [vmem:[#allocation8 + $0x124] ss:$16 sps:$4 sm:$0xff]  }
 0x1f6   :  { %v1854_v26 = vpop.f32.mrf.mxu0 }
 0x1f7   :  { %v1813_v25 = vpop.f32.mrf.mxu1 }
 0x1f8   :  { %v1814_v19 = vadd.f32 %v1813_v25, %v1773_v0  ;;  %v1856_v23 = vpop.f32.mrf.mxu0  ;;  %3648 = vmatpush1.bf16.msra.mxu0 %v7111_v8  ;;  %v7087_v0 = vld [vmem:[#allocation7 + $0x348] ss:$16 sps:$4 sm:$0xff]   ;;  %v7092_v25 = vld [vmem:[#allocation7 + $0x32c] ss:$16 sps:$4 sm:$0xff]   ;;  %v7150_v8 = vld [vmem:[#allocation8 + $0x2c0] ss:$16 sps:$4 sm:$0xff]  }
 0x1f9   :  { %v1815_v28 = vpop.f32.mrf.mxu1  ;;  %3649 = vmatprep.subr.bf16.mxu0 %v7116_v61  ;;  %v7212_v61 = vld [vmem:[#allocation8 + $0x384] ss:$16 sps:$4 sm:$0xff]  }
 0x1fa   :  { %v1855_v1 = vadd.f32 %v1854_v26, %v1814_v19  ;;  %v1816_v20 = vadd.f32 %v1815_v28, %v1775_v27  ;;  %v1858_v31 = vpop.f32.mrf.mxu0  ;;  %v7129_v26 = vld [vmem:[#allocation8 + $0x180] ss:$16 sps:$4 sm:$0xff]   ;;  %v7090_v27 = vld [vmem:[#allocation7 + $0x328] ss:$16 sps:$4 sm:$0xff]   ;;  %v7134_v19 = vld [vmem:[#allocation8 + $0x164] ss:$16 sps:$4 sm:$0xff]  }
 0x1fb   :  { %v1817_v30 = vpop.f32.mrf.mxu1  ;;  %v7095_v28 = vld [vmem:[#allocation7 + $0x30c] ss:$16 sps:$4 sm:$0xff]   ;;  %v7143_v31 = vld [vmem:[#allocation8 + $0x104] ss:$16 sps:$4 sm:$0xff]  }
 0x1fc   :  { %vm1863_vm2 = vcmp.gt.f32.partialorder %v1855_v1, 0.0  ;;  %v1867_v32 = vmul.f32 0.2, %v1855_v1  ;;  %v1857_v33 = vadd.f32 %v1856_v23, %v1816_v20  ;;  %v1859_v52 = vpop.f32.mrf.mxu0  ;;  %3650 = vmatpush1.bf16.msra.mxu0 %v7114_v63  ;;  %v7132_v23 = vld [vmem:[#allocation8 + $0x160] ss:$16 sps:$4 sm:$0xff]  }
 0x1fd   :  { %v1818_v34 = vpop.f32.mrf.mxu1  ;;  %3651 = vmatprep.subr.bf16.mxu0 %v7119_v48  ;;  %v7135_v20 = vld [vmem:[#allocation8 + $0x140] ss:$16 sps:$4 sm:$0xff]   ;;  %v7149_v52 = vld [vmem:[#allocation8 + $0xec] ss:$16 sps:$4 sm:$0xff]   ;;  %v7218_v63 = vld [vmem:[#allocation8 + $0x364] ss:$16 sps:$4 sm:$0xff]  }
 0x1fe   :  { %vm1864_vm3 = vcmp.gt.f32.partialorder %v1857_v33, 0.0  ;;  %v1868_v35 = vmul.f32 0.2, %v1857_v33  ;;  %v1871_v37 = vsel %vm1863_vm2, %v1855_v1, %v1867_v32  ;;  %v7137_v1 = vld [vmem:[#allocation8 + $0x144] ss:$16 sps:$4 sm:$0xff]  }
 0x1ff   :  { %v8025_v40 = vpack.c.bf16 %v1871_v37, %v1871_v37  ;;  %v7138_v30 = vld [vmem:[#allocation8 + $0x120] ss:$16 sps:$4 sm:$0xff]   ;;  %v7146_v34 = vld [vmem:[#allocation8 + $0x2e4] ss:$16 sps:$4 sm:$0xff]  }
 0x200   :  { %v1872_v17 = vsel %vm1864_vm3, %v1857_v33, %v1868_v35  ;;  %3652 = vmatpush1.bf16.msra.mxu0 %v7117_v4  ;;  %v7141_v32 = vld [vmem:[#allocation8 + $0x100] ss:$16 sps:$4 sm:$0xff]   ;;  %v7152_v35 = vld [vmem:[#allocation8 + $0x2c4] ss:$16 sps:$4 sm:$0xff]  }
 0x201   :  { %v1876_v38 = vpack.c.bf16 %v1872_v17, %v1872_v17  ;;  %3653 = vmatprep.subr.bf16.mxu0 %v7122_v5  ;;  %v7144_v33 = vld [vmem:[#allocation8 + $0x2e0] ss:$16 sps:$4 sm:$0xff]   ;;  %v7158_v17 = vld [vmem:[#allocation8 + $0x2a4] ss:$16 sps:$4 sm:$0xff]  }
 0x202   :  { %v7156_v37 = vld [vmem:[#allocation8 + $0x2a0] ss:$16 sps:$4 sm:$0xff]   ;;  %v7224_v48 = vld [vmem:[#allocation8 + $0x344] ss:$16 sps:$4 sm:$0xff]  }
 0x203   :  { %2740 = vmatprep.mubr.bf16.mxu1 %v1876_v38  ;;  %v7228_v4 = vld [vmem:[#allocation8 + $0x320] ss:$16 sps:$4 sm:$0xff]   ;;  %v7236_v5 = vld [vmem:[#allocation8 + $0x304] ss:$16 sps:$4 sm:$0xff]  }
 0x204   :  { %2741 = vmatmul.mubr.bf16.vlgmr.msra.gmra.mxu1 %v8025_v40  ;;  %3654 = vmatpush2.bf16.msra.mxu0 %v7120_v6  ;;  %v7234_v6 = vld [vmem:[#allocation8 + $0x300] ss:$16 sps:$4 sm:$0xff]  }
 0x205   :  { %2791 = vmatpush1.bf16.msra.mxu1 %v7048_v39  ;;  %2822 = vmatprep.mubr.bf16.mxu1 %v1876_v38  ;;  %v7162_v38 = vld [vmem:[#allocation8 + $0x280] ss:$16 sps:$4 sm:$0xff]   ;;  %v7164_v39 = vld [vmem:[#allocation8 + $0x284] ss:$16 sps:$4 sm:$0xff]  }
 0x206   :  { %2792 = vmatprep.subr.bf16.mxu1 %v7053_v41  ;;  %3655 = vmatprep.subr.bf16.mxu0 %v7125_v11  ;;  %v7170_v41 = vld [vmem:[#allocation8 + $0x264] ss:$16 sps:$4 sm:$0xff]  }
 0x208   :  { %3656 = vmatpush2.bf16.msra.mxu0 %v7123_v13 }
 0x209   :  { %2793 = vmatpush1.bf16.msra.mxu1 %v7051_v42  ;;  %3657 = vmatprep.subr.bf16.mxu0 %v7128_v15  ;;  %v7174_v42 = vld [vmem:[#allocation8 + $0x240] ss:$16 sps:$4 sm:$0xff]  }
 0x20a   :  { %2794 = vmatprep.subr.bf16.mxu1 %v7056_v43  ;;  %v7176_v43 = vld [vmem:[#allocation8 + $0x244] ss:$16 sps:$4 sm:$0xff]  }
 0x20b   :  { %v8036_v15 = vld [vmem:[%s8128_s4] sm:$0xf] }
 0x20c   :  { %3658 = vmatpush2.bf16.msra.mxu0 %v7126_v21  ;;  %v2014_v21 = vrot.slane %v8036_v15, %v7995_v3 }
 0x20d   :  { %2795 = vmatpush1.bf16.msra.mxu1 %v7054_v44  ;;  %3659 = vmatprep.subr.bf16.mxu0 %v7131_v22 }
 0x20e   :  { %2796 = vmatprep.subr.bf16.mxu1 %v7059_v45  ;;  %v7180_v45 = vld [vmem:[#allocation8 + $0x220] ss:$16 sps:$4 sm:$0xff]  }
 0x210   :  { %3660 = vmatpush2.bf16.msra.mxu0 %v7129_v26 }
 0x211   :  { %2797 = vmatpush1.bf16.msra.mxu1 %v7057_v46  ;;  %3661 = vmatprep.subr.bf16.mxu0 %v7134_v19  ;;  %v7182_v46 = vld [vmem:[#allocation8 + $0x224] ss:$16 sps:$4 sm:$0xff]  }
 0x212   :  { %2798 = vmatprep.subr.bf16.mxu1 %v7062_v47 }
 0x214   :  { %3662 = vmatpush2.bf16.msra.mxu0 %v7132_v23 }
 0x215   :  { %2799 = vmatpush1.bf16.msra.mxu1 %v7060_v49  ;;  %3663 = vmatprep.subr.bf16.mxu0 %v7137_v1 }
 0x216   :  { %2800 = vmatprep.subr.bf16.mxu1 %v7065_v50  ;;  %v7186_v50 = vld [vmem:[#allocation8 + $0x200] ss:$16 sps:$4 sm:$0xff]  }
 0x218   :  { %3664 = vmatpush2.bf16.msra.mxu0 %v7135_v20 }
 0x219   :  { %2801 = vmatpush1.bf16.msra.mxu1 %v7063_v51  ;;  %3665 = vmatprep.subr.bf16.mxu0 %v7140_v24  ;;  %v7188_v51 = vld [vmem:[#allocation8 + $0x204] ss:$16 sps:$4 sm:$0xff]  }
 0x21a   :  { %2802 = vmatprep.subr.bf16.mxu1 %v7068_v53 }
 0x21c   :  { %3666 = vmatpush2.bf16.msra.mxu0 %v7138_v30 }
 0x21d   :  { %2803 = vmatpush1.bf16.msra.mxu1 %v7066_v54  ;;  %3667 = vmatprep.subr.bf16.mxu0 %v7143_v31  ;;  %v7192_v54 = vld [vmem:[#allocation8 + $0x3e0] ss:$16 sps:$4 sm:$0xff]   ;;  %v7147_v31 = vld [vmem:[#allocation8 + $0xe8] ss:$16 sps:$4 sm:$0xff]  }
 0x21e   :  { %2804 = vmatprep.subr.bf16.mxu1 %v7071_v55  ;;  %v7194_v55 = vld [vmem:[#allocation8 + $0x3e4] ss:$16 sps:$4 sm:$0xff]  }
 0x220   :  { %3668 = vmatpush2.bf16.msra.mxu0 %v7141_v32 }
 0x221   :  { %2805 = vmatpush1.bf16.msra.mxu1 %v7069_v56  ;;  %3719 = vmatprep.subr.bf16.mxu0 %v7149_v52  ;;  %v7198_v56 = vld [vmem:[#allocation8 + $0x3c0] ss:$16 sps:$4 sm:$0xff]   ;;  %v7161_v52 = vld [vmem:[#allocation8 + $0xac] ss:$16 sps:$4 sm:$0xff]  }
 0x222   :  { %2806 = vmatprep.subr.bf16.mxu1 %v7074_v57  ;;  %v7200_v57 = vld [vmem:[#allocation8 + $0x3c4] ss:$16 sps:$4 sm:$0xff]  }
 0x225   :  { %2807 = vmatpush2.bf16.msra.mxu1 %v7072_v58  ;;  %v7204_v58 = vld [vmem:[#allocation8 + $0x3a0] ss:$16 sps:$4 sm:$0xff]  }
 0x226   :  { %2808 = vmatprep.subr.bf16.mxu1 %v7077_v59  ;;  %v7206_v59 = vld [vmem:[#allocation8 + $0x3a4] ss:$16 sps:$4 sm:$0xff]  }
 0x229   :  { %2809 = vmatpush2.bf16.msra.mxu1 %v7075_v60  ;;  %v7210_v60 = vld [vmem:[#allocation8 + $0x380] ss:$16 sps:$4 sm:$0xff]  }
 0x22a   :  { %2810 = vmatprep.subr.bf16.mxu1 %v7080_v62  ;;  %v7216_v62 = vld [vmem:[#allocation8 + $0x360] ss:$16 sps:$4 sm:$0xff]  }
 0x22d   :  { %2811 = vmatpush2.bf16.msra.mxu1 %v7078_v16  ;;  %v7222_v16 = vld [vmem:[#allocation8 + $0x340] ss:$16 sps:$4 sm:$0xff]  }
 0x22e   :  { %2812 = vmatprep.subr.bf16.mxu1 %v7083_v7  ;;  %v7230_v7 = vld [vmem:[#allocation8 + $0x324] ss:$16 sps:$4 sm:$0xff]  }
 0x231   :  { %2813 = vmatpush2.bf16.msra.mxu1 %v7081_v10  ;;  %v7242_v10 = vld [vmem:[#allocation8 + $0x2ec] ss:$16 sps:$4 sm:$0xff]  }
 0x232   :  { %2814 = vmatprep.subr.bf16.mxu1 %v7086_v12 }
 0x235   :  { %2815 = vmatpush2.bf16.msra.mxu1 %v7084_v14 }
 0x236   :  { %2816 = vmatprep.subr.bf16.mxu1 %v7089_v18  ;;  %v2010_v18 = vrot.slane %v8036_v15, %v7992_v2 }
 0x239   :  { %2817 = vmatpush2.bf16.msra.mxu1 %v7087_v0 }
 0x23a   :  { %2818 = vmatprep.subr.bf16.mxu1 %v7092_v25 }
 0x23d   :  { %2819 = vmatpush2.bf16.msra.mxu1 %v7090_v27 }
 0x23e   :  { %2820 = vmatprep.subr.bf16.mxu1 %v7095_v28 }
 0x241   :  { %2821 = vmatpush2.bf16.msra.mxu1 %v7093_v29 }
 0x242   :  { %3678 = vmatprep.subr.bf16.mxu1 %v7146_v34  ;;  %v7153_v34 = vld [vmem:[#allocation8 + $0xc8] ss:$16 sps:$4 sm:$0xff]  }
 0x244   :  { %2823 = vmatmul.mubr.bf16.vlgmr.msra.gmra.mxu1 %v8025_v40  ;;  %v7168_v40 = vld [vmem:[#allocation8 + $0x260] ss:$16 sps:$4 sm:$0xff]  }
 0x245   :  { %3679 = vmatpush1.bf16.msra.mxu1 %v7144_v33  ;;  %v7155_v33 = vld [vmem:[#allocation8 + $0xcc] ss:$16 sps:$4 sm:$0xff]  }
 0x246   :  { %3680 = vmatprep.subr.bf16.mxu1 %v7152_v35  ;;  %v7167_v35 = vld [vmem:[#allocation8 + $0x8c] ss:$16 sps:$4 sm:$0xff]  }
 0x249   :  { %3681 = vmatpush1.bf16.msra.mxu1 %v7150_v8  ;;  %v7159_v8 = vld [vmem:[#allocation8 + $0xa8] ss:$16 sps:$4 sm:$0xff]  }
 0x24a   :  { %3682 = vmatprep.subr.bf16.mxu1 %v7158_v17  ;;  %v7173_v17 = vld [vmem:[#allocation8 + $0x6c] ss:$16 sps:$4 sm:$0xff]  }
 0x24d   :  { %3683 = vmatpush1.bf16.msra.mxu1 %v7156_v37  ;;  %v7165_v37 = vld [vmem:[#allocation8 + $0x88] ss:$16 sps:$4 sm:$0xff]  }
 0x24e   :  { %3684 = vmatprep.subr.bf16.mxu1 %v7164_v39  ;;  %v7179_v39 = vld [vmem:[#allocation8 + $0x4c] ss:$16 sps:$4 sm:$0xff]  }
 0x251   :  { %3685 = vmatpush1.bf16.msra.mxu1 %v7162_v38  ;;  %v7171_v38 = vld [vmem:[#allocation8 + $0x68] ss:$16 sps:$4 sm:$0xff]  }
 0x252   :  { %3686 = vmatprep.subr.bf16.mxu1 %v7170_v41  ;;  %v7185_v41 = vld [vmem:[#allocation8 + $0x2c] ss:$16 sps:$4 sm:$0xff]  }
 0x255   :  { %3687 = vmatpush1.bf16.msra.mxu1 %v7168_v40  ;;  %v7177_v40 = vld [vmem:[#allocation8 + $0x48] ss:$16 sps:$4 sm:$0xff]  }
 0x256   :  { %3688 = vmatprep.subr.bf16.mxu1 %v7176_v43  ;;  %v7191_v43 = vld [vmem:[#allocation8 + $0xc] ss:$16 sps:$4 sm:$0xff]  }
 0x259   :  { %3689 = vmatpush1.bf16.msra.mxu1 %v7174_v42  ;;  %v7183_v42 = vld [vmem:[#allocation8 + $0x28] ss:$16 sps:$4 sm:$0xff]  }
 0x25a   :  { %3690 = vmatprep.subr.bf16.mxu1 %v7182_v46  ;;  %v7195_v46 = vld [vmem:[#allocation8 + $0x1e8] ss:$16 sps:$4 sm:$0xff]  }
 0x25d   :  { %3691 = vmatpush1.bf16.msra.mxu1 %v7180_v45  ;;  %v7197_v45 = vld [vmem:[#allocation8 + $0x1ec] ss:$16 sps:$4 sm:$0xff]  }
 0x25e   :  { %3692 = vmatprep.subr.bf16.mxu1 %v7188_v51  ;;  %v7207_v51 = vld [vmem:[#allocation8 + $0x1a8] ss:$16 sps:$4 sm:$0xff]  }
 0x261   :  { %3693 = vmatpush1.bf16.msra.mxu1 %v7186_v50  ;;  %v7209_v50 = vld [vmem:[#allocation8 + $0x1ac] ss:$16 sps:$4 sm:$0xff]  }
 0x262   :  { %3694 = vmatprep.subr.bf16.mxu1 %v7194_v55  ;;  %v7221_v55 = vld [vmem:[#allocation8 + $0x16c] ss:$16 sps:$4 sm:$0xff]  }
 0x263   :  { %v2701_v44 = vpop.f32.mrf.mxu0 }
 0x264   :  { %v2702_v0 = vadd.f32 %v2701_v44, %v2010_v18  ;;  %v7189_v44 = vld [vmem:[#allocation8 + $0x8] ss:$16 sps:$4 sm:$0xff]  }
 0x265   :  { %v2703_v47 = vpop.f32.mrf.mxu0  ;;  %3695 = vmatpush2.bf16.msra.mxu1 %v7192_v54  ;;  %v7213_v54 = vld [vmem:[#allocation8 + $0x188] ss:$16 sps:$4 sm:$0xff]  }
 0x266   :  { %3696 = vmatprep.subr.bf16.mxu1 %v7200_v57  ;;  %v2704_v25 = vadd.f32 %v2703_v47, %v2014_v21  ;;  %v7203_v47 = vld [vmem:[#allocation8 + $0x1cc] ss:$16 sps:$4 sm:$0xff]  }
 0x267   :  { %v2705_v49 = vpop.f32.mrf.mxu0  ;;  %v7227_v57 = vld [vmem:[#allocation8 + $0x14c] ss:$16 sps:$4 sm:$0xff]  }
 0x268   :  { %v7201_v49 = vld [vmem:[#allocation8 + $0x1c8] ss:$16 sps:$4 sm:$0xff]  }
 0x269   :  { %v2706_v53 = vpop.f32.mrf.mxu0  ;;  %3697 = vmatpush2.bf16.msra.mxu1 %v7198_v56  ;;  %v7219_v56 = vld [vmem:[#allocation8 + $0x168] ss:$16 sps:$4 sm:$0xff]  }
 0x26a   :  { %3698 = vmatprep.subr.bf16.mxu1 %v7206_v59  ;;  %v7215_v53 = vld [vmem:[#allocation8 + $0x18c] ss:$16 sps:$4 sm:$0xff]   ;;  %v7225_v59 = vld [vmem:[#allocation8 + $0x148] ss:$16 sps:$4 sm:$0xff]  }
 0x26d   :  { %3699 = vmatpush2.bf16.msra.mxu1 %v7204_v58  ;;  %v2018_v58 = vrot.slane %v8036_v15, %v8014_v36 }
 0x26e   :  { %3700 = vmatprep.subr.bf16.mxu1 %v7212_v61  ;;  %v7233_v61 = vld [vmem:[#allocation8 + $0x12c] ss:$16 sps:$4 sm:$0xff]  }
 0x271   :  { %3701 = vmatpush2.bf16.msra.mxu1 %v7210_v60  ;;  %v2022_v60 = vrot.slane %v8036_v15, %v8017_v9 }
 0x272   :  { %3702 = vmatprep.subr.bf16.mxu1 %v7218_v63 }
 0x275   :  { %3703 = vmatpush2.bf16.msra.mxu1 %v7216_v62 }
 0x276   :  { %3704 = vmatprep.subr.bf16.mxu1 %v7224_v48 }
 0x279   :  { %3705 = vmatpush2.bf16.msra.mxu1 %v7222_v16  ;;  %v7231_v16 = vld [vmem:[#allocation8 + $0x128] ss:$16 sps:$4 sm:$0xff]  }
 0x27a   :  { %3706 = vmatprep.subr.bf16.mxu1 %v7230_v7 }
 0x27d   :  { %3707 = vmatpush2.bf16.msra.mxu1 %v7228_v4  ;;  %v7239_v4 = vld [vmem:[#allocation8 + $0x10c] ss:$16 sps:$4 sm:$0xff]  }
 0x27e   :  { %3708 = vmatprep.subr.bf16.mxu1 %v7236_v5 }
 0x281   :  { %3709 = vmatpush2.bf16.msra.mxu1 %v7234_v6 }
 0x282   :  { %3760 = vmatprep.subr.bf16.mxu1 %v7242_v10 }
 0x2a3   :  { %v8029_v11 = vpop.f32.mrf.mxu0 }
 0x2a4   :  { %v2784_v62 = vadd.f32 %v8029_v11, %v2018_v58  ;;  %v7275_v58 = vld [vmem:[#allocation8 + $0x38c] ss:$16 sps:$4 sm:$0xff]  }
 0x2a5   :  { %v8031_v12 = vpop.f32.mrf.mxu0 }
 0x2a6   :  { %v2786_v48 = vadd.f32 %v8031_v12, %v2022_v60  ;;  %v7273_v60 = vld [vmem:[#allocation8 + $0x388] ss:$16 sps:$4 sm:$0xff]  }
 0x2a7   :  { %v2787_v13 = vpop.f32.mrf.mxu0 }
 0x2a9   :  { %v2788_v14 = vpop.f32.mrf.mxu0 }
 0x2aa   :  { %v7237_v14 = vld [vmem:[#allocation8 + $0x108] ss:$16 sps:$4 sm:$0xff]  }
 0x2c4   :  { %v2742_v22 = vpop.f32.mrf.mxu1 }
 0x2c5   :  { %v2743_v26 = vadd.f32 %v2742_v22, %v2702_v0  ;;  %v7240_v22 = vld [vmem:[#allocation8 + $0x2e8] ss:$16 sps:$4 sm:$0xff]  }
 0x2c6   :  { %v2744_v27 = vpop.f32.mrf.mxu1 }
 0x2c7   :  { %vm2831_vm4 = vcmp.gt.f32.partialorder %v2743_v26, 0.0  ;;  %v2835_v19 = vmul.f32 0.2, %v2743_v26  ;;  %v2745_v28 = vadd.f32 %v2744_v27, %v2704_v25  ;;  %v7245_v25 = vld [vmem:[#allocation8 + $0x2cc] ss:$16 sps:$4 sm:$0xff]  }
 0x2c8   :  { %v2746_v23 = vpop.f32.mrf.mxu1  ;;  %v7248_v27 = vld [vmem:[#allocation8 + $0x2ac] ss:$16 sps:$4 sm:$0xff]  }
 0x2c9   :  { %vm2832_vm5 = vcmp.gt.f32.partialorder %v2745_v28, 0.0  ;;  %v2836_v29 = vmul.f32 0.2, %v2745_v28  ;;  %v2839_v1 = vsel %vm2831_vm4, %v2743_v26, %v2835_v19  ;;  %v7243_v26 = vld [vmem:[#allocation8 + $0x2c8] ss:$16 sps:$4 sm:$0xff]   ;;  %vm5797_vm4 = vcmask 7168  }
 0x2ca   :  { %v2747_v20 = vpop.f32.mrf.mxu1  ;;  %v8042_v32 = vpack.c.bf16 %v2839_v1, %v2839_v1  ;;  %v7246_v19 = vld [vmem:[#allocation8 + $0x2a8] ss:$16 sps:$4 sm:$0xff]   ;;  %v7288_v23 = vld [vmem:[#allocation10 + $0xe0] ss:$16 sps:$4 sm:$0xff]   ;;  %v7293_v1 = vld [vmem:[#allocation10 + $0xc4] ss:$16 sps:$4 sm:$0xff]  }
 0x2cb   :  { %v2840_v24 = vsel %vm2832_vm5, %v2745_v28, %v2836_v29  ;;  %v7251_v28 = vld [vmem:[#allocation8 + $0x28c] ss:$16 sps:$4 sm:$0xff]   ;;  %v7290_v29 = vld [vmem:[#allocation10 + $0xe4] ss:$16 sps:$4 sm:$0xff]   ;;  %v7249_v20 = vld [vmem:[#allocation8 + $0x288] ss:$16 sps:$4 sm:$0xff]  }
 0x2cc   :  { %v2844_v30 = vpack.c.bf16 %v2840_v24, %v2840_v24  ;;  %v7291_v24 = vld [vmem:[#allocation10 + $0xc0] ss:$16 sps:$4 sm:$0xff]  }
 0x2ce   :  { %3669 = vmatprep.mubr.bf16.mxu0 %v2844_v30 }
 0x2cf   :  { %3670 = vmatmul.mubr.bf16.vlgmr.msra.gmra.mxu0 %v8042_v32 }
 0x2d0   :  { %3720 = vmatpush1.bf16.msra.mxu0 %v7147_v31  ;;  %3751 = vmatprep.mubr.bf16.mxu0 %v2844_v30  ;;  %v7254_v30 = vld [vmem:[#allocation8 + $0x26c] ss:$16 sps:$4 sm:$0xff]   ;;  %v7296_v31 = vld [vmem:[#allocation10 + $0xa4] ss:$16 sps:$4 sm:$0xff]  }
 0x2d1   :  { %3721 = vmatprep.subr.bf16.mxu0 %v7155_v33  ;;  %v7294_v33 = vld [vmem:[#allocation10 + $0xa0] ss:$16 sps:$4 sm:$0xff]  }
 0x2d4   :  { %3722 = vmatpush1.bf16.msra.mxu0 %v7153_v34  ;;  %v7257_v34 = vld [vmem:[#allocation8 + $0x24c] ss:$16 sps:$4 sm:$0xff]  }
 0x2d5   :  { %3723 = vmatprep.subr.bf16.mxu0 %v7161_v52  ;;  %v7299_v52 = vld [vmem:[#allocation10 + $0x84] ss:$16 sps:$4 sm:$0xff]  }
 0x2d8   :  { %3724 = vmatpush1.bf16.msra.mxu0 %v7159_v8  ;;  %v7255_v8 = vld [vmem:[#allocation8 + $0x248] ss:$16 sps:$4 sm:$0xff]  }
 0x2d9   :  { %3725 = vmatprep.subr.bf16.mxu0 %v7167_v35  ;;  %v7297_v35 = vld [vmem:[#allocation10 + $0x80] ss:$16 sps:$4 sm:$0xff]  }
 0x2dc   :  { %3726 = vmatpush1.bf16.msra.mxu0 %v7165_v37  ;;  %v7260_v37 = vld [vmem:[#allocation8 + $0x22c] ss:$16 sps:$4 sm:$0xff]  }
 0x2dd   :  { %3727 = vmatprep.subr.bf16.mxu0 %v7173_v17  ;;  %v7302_v17 = vld [vmem:[#allocation10 + $0x64] ss:$16 sps:$4 sm:$0xff]  }
 0x2e0   :  { %3728 = vmatpush1.bf16.msra.mxu0 %v7171_v38  ;;  %v7258_v38 = vld [vmem:[#allocation8 + $0x228] ss:$16 sps:$4 sm:$0xff]  }
 0x2e1   :  { %3729 = vmatprep.subr.bf16.mxu0 %v7179_v39  ;;  %v7300_v39 = vld [vmem:[#allocation10 + $0x60] ss:$16 sps:$4 sm:$0xff]  }
 0x2e4   :  { %3730 = vmatpush1.bf16.msra.mxu0 %v7177_v40  ;;  %v7263_v40 = vld [vmem:[#allocation8 + $0x20c] ss:$16 sps:$4 sm:$0xff]  }
 0x2e5   :  { %3731 = vmatprep.subr.bf16.mxu0 %v7185_v41  ;;  %v7305_v41 = vld [vmem:[#allocation10 + $0x44] ss:$16 sps:$4 sm:$0xff]  }
 0x2e8   :  { %3732 = vmatpush1.bf16.msra.mxu0 %v7183_v42  ;;  %v7261_v42 = vld [vmem:[#allocation8 + $0x208] ss:$16 sps:$4 sm:$0xff]  }
 0x2e9   :  { %3733 = vmatprep.subr.bf16.mxu0 %v7191_v43  ;;  %v7303_v43 = vld [vmem:[#allocation10 + $0x40] ss:$16 sps:$4 sm:$0xff]  }
 0x2ec   :  { %3734 = vmatpush1.bf16.msra.mxu0 %v7189_v44  ;;  %v7266_v44 = vld [vmem:[#allocation8 + $0x3ec] ss:$16 sps:$4 sm:$0xff]  }
 0x2ed   :  { %3735 = vmatprep.subr.bf16.mxu0 %v7197_v45  ;;  %v7308_v45 = vld [vmem:[#allocation10 + $0x24] ss:$16 sps:$4 sm:$0xff]  }
 0x2f0   :  { %3736 = vmatpush2.bf16.msra.mxu0 %v7195_v46  ;;  %v7264_v46 = vld [vmem:[#allocation8 + $0x3e8] ss:$16 sps:$4 sm:$0xff]  }
 0x2f1   :  { %3737 = vmatprep.subr.bf16.mxu0 %v7203_v47  ;;  %v7306_v47 = vld [vmem:[#allocation10 + $0x20] ss:$16 sps:$4 sm:$0xff]  }
 0x2f4   :  { %3738 = vmatpush2.bf16.msra.mxu0 %v7201_v49  ;;  %v7269_v49 = vld [vmem:[#allocation8 + $0x3cc] ss:$16 sps:$4 sm:$0xff]  }
 0x2f5   :  { %3739 = vmatprep.subr.bf16.mxu0 %v7209_v50  ;;  %v7311_v50 = vld [vmem:[#allocation10 + $0x4] ss:$16 sps:$4 sm:$0xff]  }
 0x2f8   :  { %3740 = vmatpush2.bf16.msra.mxu0 %v7207_v51  ;;  %v7267_v51 = vld [vmem:[#allocation8 + $0x3c8] ss:$16 sps:$4 sm:$0xff]  }
 0x2f9   :  { %3741 = vmatprep.subr.bf16.mxu0 %v7215_v53  ;;  %v7309_v53 = vld [vmem:[#allocation10] ss:$16 sps:$4 sm:$0xff]  }
 0x2fc   :  { %3742 = vmatpush2.bf16.msra.mxu0 %v7213_v54  ;;  %v7272_v54 = vld [vmem:[#allocation8 + $0x3ac] ss:$16 sps:$4 sm:$0xff]  }
 0x2fd   :  { %3743 = vmatprep.subr.bf16.mxu0 %v7221_v55  ;;  %v7314_v55 = vld [vmem:[#allocation10 + $0x1e4] ss:$16 sps:$4 sm:$0xff]  }
 0x300   :  { %3744 = vmatpush2.bf16.msra.mxu0 %v7219_v56  ;;  %v7270_v56 = vld [vmem:[#allocation8 + $0x3a8] ss:$16 sps:$4 sm:$0xff]  }
 0x301   :  { %3745 = vmatprep.subr.bf16.mxu0 %v7227_v57  ;;  %v7312_v57 = vld [vmem:[#allocation10 + $0x1e0] ss:$16 sps:$4 sm:$0xff]  }
 0x304   :  { %v2824_v63 = vpop.f32.mrf.mxu1  ;;  %3746 = vmatpush2.bf16.msra.mxu0 %v7225_v59  ;;  %v7317_v59 = vld [vmem:[#allocation10 + $0x1c4] ss:$16 sps:$4 sm:$0xff]  }
 0x305   :  { %v2825_v7 = vadd.f32 %v2824_v63, %v2784_v62  ;;  %3747 = vmatprep.subr.bf16.mxu0 %v7233_v61  ;;  %v7315_v61 = vld [vmem:[#allocation10 + $0x1c0] ss:$16 sps:$4 sm:$0xff]   ;;  %v7278_v62 = vld [vmem:[#allocation8 + $0x36c] ss:$16 sps:$4 sm:$0xff]   ;;  %v7320_v63 = vld [vmem:[#allocation10 + $0x1a4] ss:$16 sps:$4 sm:$0xff]  }
 0x306   :  { %v2826_v5 = vpop.f32.mrf.mxu1 }
 0x307   :  { %vm2833_vm6 = vcmp.gt.f32.partialorder %v2825_v7, 0.0  ;;  %v2837_v6 = vmul.f32 0.2, %v2825_v7  ;;  %v2827_v10 = vadd.f32 %v2826_v5, %v2786_v48  ;;  %v7318_v48 = vld [vmem:[#allocation10 + $0x1a0] ss:$16 sps:$4 sm:$0xff]  }
 0x308   :  { %v2828_v13 = vpop.f32.mrf.mxu1  ;;  %3748 = vmatpush2.bf16.msra.mxu0 %v7231_v16  ;;  %v7276_v16 = vld [vmem:[#allocation8 + $0x368] ss:$16 sps:$4 sm:$0xff]  }
 0x309   :  { %vm2834_vm7 = vcmp.gt.f32.partialorder %v2827_v10, 0.0  ;;  %v2838_v15 = vmul.f32 0.2, %v2827_v10  ;;  %3749 = vmatprep.subr.bf16.mxu0 %v7239_v4  ;;  %v2841_v18 = vsel %vm2833_vm6, %v2825_v7, %v2837_v6  ;;  %v7281_v7 = vld [vmem:[#allocation8 + $0x34c] ss:$16 sps:$4 sm:$0xff]  }
 0x30a   :  { %v2829_v11 = vpop.f32.mrf.mxu1  ;;  %v8051_v12 = vpack.c.bf16 %v2841_v18, %v2841_v18  ;;  %v7323_v4 = vld [vmem:[#allocation10 + $0x184] ss:$16 sps:$4 sm:$0xff]   ;;  %v7279_v5 = vld [vmem:[#allocation8 + $0x348] ss:$16 sps:$4 sm:$0xff]   ;;  %v7321_v6 = vld [vmem:[#allocation10 + $0x180] ss:$16 sps:$4 sm:$0xff]  }
 0x30b   :  { %v2842_v21 = vsel %vm2834_vm7, %v2827_v10, %v2838_v15  ;;  %v7284_v10 = vld [vmem:[#allocation8 + $0x32c] ss:$16 sps:$4 sm:$0xff]   ;;  %v7326_v13 = vld [vmem:[#allocation10 + $0x164] ss:$16 sps:$4 sm:$0xff]   ;;  %v7324_v15 = vld [vmem:[#allocation10 + $0x160] ss:$16 sps:$4 sm:$0xff]  }
 0x30c   :  { %3750 = vmatpush2.bf16.msra.mxu0 %v7237_v14  ;;  %v2846_v0 = vpack.c.bf16 %v2842_v21, %v2842_v21  ;;  %v7282_v14 = vld [vmem:[#allocation8 + $0x328] ss:$16 sps:$4 sm:$0xff]   ;;  %v7287_v18 = vld [vmem:[#allocation8 + $0x30c] ss:$16 sps:$4 sm:$0xff]   ;;  %v7329_v11 = vld [vmem:[#allocation10 + $0x144] ss:$16 sps:$4 sm:$0xff]  }
 0x30d   :  { %4607 = vmatprep.subr.bf16.mxu0 %v7290_v29  ;;  %v7285_v21 = vld [vmem:[#allocation8 + $0x308] ss:$16 sps:$4 sm:$0xff]   ;;  %v7342_v29 = vld [vmem:[#allocation10 + $0x2c0] ss:$16 sps:$4 sm:$0xff]  }
 0x30e   :  { %3710 = vmatprep.mubr.bf16.mxu1 %v2846_v0 }
 0x30f   :  { %3711 = vmatmul.mubr.bf16.vlgmr.msra.gmra.mxu1 %v8051_v12  ;;  %3752 = vmatmul.mubr.bf16.vlgmr.msra.gmra.mxu0 %v8042_v32  ;;  %v7252_v32 = vld [vmem:[#allocation8 + $0x268] ss:$16 sps:$4 sm:$0xff]  }
 0x310   :  { %3761 = vmatpush1.bf16.msra.mxu1 %v7240_v22  ;;  %3792 = vmatprep.mubr.bf16.mxu1 %v2846_v0  ;;  %v7327_v0 = vld [vmem:[#allocation10 + $0x140] ss:$16 sps:$4 sm:$0xff]   ;;  %v7332_v22 = vld [vmem:[#allocation10 + $0x124] ss:$16 sps:$4 sm:$0xff]  }
 0x311   :  { %3762 = vmatprep.subr.bf16.mxu1 %v7245_v25  ;;  %4608 = vmatpush1.bf16.msra.mxu0 %v7288_v23  ;;  %v7330_v25 = vld [vmem:[#allocation10 + $0x120] ss:$16 sps:$4 sm:$0xff]   ;;  %v7341_v23 = vld [vmem:[#allocation10 + $0xec] ss:$16 sps:$4 sm:$0xff]  }
 0x312   :  { %4609 = vmatprep.subr.bf16.mxu0 %v7293_v1  ;;  %v7344_v1 = vld [vmem:[#allocation10 + $0x2c4] ss:$16 sps:$4 sm:$0xff]  }
 0x314   :  { %3763 = vmatpush1.bf16.msra.mxu1 %v7243_v26  ;;  %v7335_v26 = vld [vmem:[#allocation10 + $0x104] ss:$16 sps:$4 sm:$0xff]  }
 0x315   :  { %3764 = vmatprep.subr.bf16.mxu1 %v7248_v27  ;;  %4610 = vmatpush1.bf16.msra.mxu0 %v7291_v24  ;;  %v7333_v27 = vld [vmem:[#allocation10 + $0x100] ss:$16 sps:$4 sm:$0xff]  }
 0x316   :  { %4611 = vmatprep.subr.bf16.mxu0 %v7296_v31  ;;  %v7354_v24 = vld [vmem:[#allocation10 + $0x280] ss:$16 sps:$4 sm:$0xff]  }
 0x317   :  { %v7360_v31 = vld [vmem:[#allocation10 + $0x260] ss:$16 sps:$4 sm:$0xff]  }
 0x318   :  { %3765 = vmatpush1.bf16.msra.mxu1 %v7246_v19  ;;  %v7336_v19 = vld [vmem:[#allocation10 + $0x2e0] ss:$16 sps:$4 sm:$0xff]  }
 0x319   :  { %3766 = vmatprep.subr.bf16.mxu1 %v7251_v28  ;;  %4612 = vmatpush1.bf16.msra.mxu0 %v7294_v33  ;;  %v7338_v28 = vld [vmem:[#allocation10 + $0x2e4] ss:$16 sps:$4 sm:$0xff]   ;;  %v7366_v33 = vld [vmem:[#allocation10 + $0x240] ss:$16 sps:$4 sm:$0xff]  }
 0x31a   :  { %4613 = vmatprep.subr.bf16.mxu0 %v7299_v52  ;;  %v7372_v52 = vld [vmem:[#allocation10 + $0x220] ss:$16 sps:$4 sm:$0xff]  }
 0x31c   :  { %3767 = vmatpush1.bf16.msra.mxu1 %v7249_v20  ;;  %v7348_v20 = vld [vmem:[#allocation10 + $0x2a0] ss:$16 sps:$4 sm:$0xff]  }
 0x31d   :  { %3768 = vmatprep.subr.bf16.mxu1 %v7254_v30  ;;  %4614 = vmatpush1.bf16.msra.mxu0 %v7297_v35  ;;  %v7356_v30 = vld [vmem:[#allocation10 + $0x284] ss:$16 sps:$4 sm:$0xff]   ;;  %v7378_v35 = vld [vmem:[#allocation10 + $0x200] ss:$16 sps:$4 sm:$0xff]  }
 0x31e   :  { %4615 = vmatprep.subr.bf16.mxu0 %v7302_v17  ;;  %v7384_v17 = vld [vmem:[#allocation10 + $0x3e0] ss:$16 sps:$4 sm:$0xff]  }
 0x320   :  { %3769 = vmatpush1.bf16.msra.mxu1 %v7252_v32  ;;  %v7362_v32 = vld [vmem:[#allocation10 + $0x264] ss:$16 sps:$4 sm:$0xff]  }
 0x321   :  { %3770 = vmatprep.subr.bf16.mxu1 %v7257_v34  ;;  %4616 = vmatpush1.bf16.msra.mxu0 %v7300_v39  ;;  %v7368_v34 = vld [vmem:[#allocation10 + $0x244] ss:$16 sps:$4 sm:$0xff]   ;;  %v7390_v39 = vld [vmem:[#allocation10 + $0x3c0] ss:$16 sps:$4 sm:$0xff]  }
 0x322   :  { %4617 = vmatprep.subr.bf16.mxu0 %v7305_v41  ;;  %v7396_v41 = vld [vmem:[#allocation10 + $0x3a0] ss:$16 sps:$4 sm:$0xff]  }
 0x324   :  { %3771 = vmatpush1.bf16.msra.mxu1 %v7255_v8  ;;  %v7374_v8 = vld [vmem:[#allocation10 + $0x224] ss:$16 sps:$4 sm:$0xff]  }
 0x325   :  { %3772 = vmatprep.subr.bf16.mxu1 %v7260_v37  ;;  %4618 = vmatpush1.bf16.msra.mxu0 %v7303_v43  ;;  %v7380_v37 = vld [vmem:[#allocation10 + $0x204] ss:$16 sps:$4 sm:$0xff]   ;;  %v7402_v43 = vld [vmem:[#allocation10 + $0x380] ss:$16 sps:$4 sm:$0xff]  }
 0x326   :  { %4619 = vmatprep.subr.bf16.mxu0 %v7308_v45  ;;  %v7408_v45 = vld [vmem:[#allocation10 + $0x360] ss:$16 sps:$4 sm:$0xff]  }
 0x328   :  { %3773 = vmatpush1.bf16.msra.mxu1 %v7258_v38  ;;  %v7386_v38 = vld [vmem:[#allocation10 + $0x3e4] ss:$16 sps:$4 sm:$0xff]  }
 0x329   :  { %3774 = vmatprep.subr.bf16.mxu1 %v7263_v40  ;;  %4620 = vmatpush1.bf16.msra.mxu0 %v7306_v47  ;;  %v7392_v40 = vld [vmem:[#allocation10 + $0x3c4] ss:$16 sps:$4 sm:$0xff]   ;;  %v7414_v47 = vld [vmem:[#allocation10 + $0x340] ss:$16 sps:$4 sm:$0xff]  }
 0x32a   :  { %4621 = vmatprep.subr.bf16.mxu0 %v7311_v50 }
 0x32c   :  { %3775 = vmatpush1.bf16.msra.mxu1 %v7261_v42  ;;  %v7398_v42 = vld [vmem:[#allocation10 + $0x3a4] ss:$16 sps:$4 sm:$0xff]  }
 0x32d   :  { %3776 = vmatprep.subr.bf16.mxu1 %v7266_v44  ;;  %4622 = vmatpush1.bf16.msra.mxu0 %v7309_v53  ;;  %v7404_v44 = vld [vmem:[#allocation10 + $0x384] ss:$16 sps:$4 sm:$0xff]   ;;  %v7420_v53 = vld [vmem:[#allocation10 + $0x320] ss:$16 sps:$4 sm:$0xff]  }
 0x32e   :  { %4623 = vmatprep.subr.bf16.mxu0 %v7314_v55 }
 0x330   :  { %3777 = vmatpush2.bf16.msra.mxu1 %v7264_v46  ;;  %v7410_v46 = vld [vmem:[#allocation10 + $0x364] ss:$16 sps:$4 sm:$0xff]  }
 0x331   :  { %3778 = vmatprep.subr.bf16.mxu1 %v7269_v49  ;;  %4624 = vmatpush2.bf16.msra.mxu0 %v7312_v57  ;;  %v7416_v49 = vld [vmem:[#allocation10 + $0x344] ss:$16 sps:$4 sm:$0xff]   ;;  %v7426_v57 = vld [vmem:[#allocation10 + $0x300] ss:$16 sps:$4 sm:$0xff]  }
 0x332   :  { %4625 = vmatprep.subr.bf16.mxu0 %v7317_v59  ;;  %v7434_v59 = vld [vmem:[#allocation10 + $0x2ec] ss:$16 sps:$4 sm:$0xff]  }
 0x334   :  { %3779 = vmatpush2.bf16.msra.mxu1 %v7267_v51  ;;  %v7422_v51 = vld [vmem:[#allocation10 + $0x324] ss:$16 sps:$4 sm:$0xff]  }
 0x335   :  { %3780 = vmatprep.subr.bf16.mxu1 %v7272_v54  ;;  %4626 = vmatpush2.bf16.msra.mxu0 %v7315_v61 }
 0x336   :  { %4627 = vmatprep.subr.bf16.mxu0 %v7320_v63 }
 0x338   :  { %3781 = vmatpush2.bf16.msra.mxu1 %v7270_v56  ;;  %v7428_v56 = vld [vmem:[#allocation10 + $0x304] ss:$16 sps:$4 sm:$0xff]  }
 0x339   :  { %3782 = vmatprep.subr.bf16.mxu1 %v7275_v58  ;;  %4628 = vmatpush2.bf16.msra.mxu0 %v7318_v48 }
 0x33a   :  { %4629 = vmatprep.subr.bf16.mxu0 %v7323_v4 }
 0x33c   :  { %3783 = vmatpush2.bf16.msra.mxu1 %v7273_v60  ;;  %v8059_v60 = vld [vmem:[%s8130_s6] sm:$0xf] }
 0x33d   :  { %3784 = vmatprep.subr.bf16.mxu1 %v7278_v62  ;;  %4630 = vmatpush2.bf16.msra.mxu0 %v7321_v6  ;;  %v2980_v61 = vrot.slane %v8059_v60, %v7992_v2  ;;  %v2984_v62 = vrot.slane %v8059_v60, %v7995_v3 }
 0x33e   :  { %4631 = vmatprep.subr.bf16.mxu0 %v7326_v13 }
 0x340   :  { %3785 = vmatpush2.bf16.msra.mxu1 %v7276_v16 }
 0x341   :  { %3786 = vmatprep.subr.bf16.mxu1 %v7281_v7  ;;  %4632 = vmatpush2.bf16.msra.mxu0 %v7324_v15 }
 0x342   :  { %4633 = vmatprep.subr.bf16.mxu0 %v7329_v11 }
 0x344   :  { %3787 = vmatpush2.bf16.msra.mxu1 %v7279_v5 }
 0x345   :  { %3788 = vmatprep.subr.bf16.mxu1 %v7284_v10  ;;  %4634 = vmatpush2.bf16.msra.mxu0 %v7327_v0 }
 0x346   :  { %4635 = vmatprep.subr.bf16.mxu0 %v7332_v22 }
 0x348   :  { %3789 = vmatpush2.bf16.msra.mxu1 %v7282_v14 }
 0x349   :  { %3790 = vmatprep.subr.bf16.mxu1 %v7287_v18  ;;  %4636 = vmatpush2.bf16.msra.mxu0 %v7330_v25 }
 0x34a   :  { %4637 = vmatprep.subr.bf16.mxu0 %v7335_v26  ;;  %v7339_v26 = vld [vmem:[#allocation10 + $0xe8] ss:$16 sps:$4 sm:$0xff]  }
 0x34c   :  { %3791 = vmatpush2.bf16.msra.mxu1 %v7285_v21 }
 0x34d   :  { %4638 = vmatpush2.bf16.msra.mxu0 %v7333_v27  ;;  %4648 = vmatprep.subr.bf16.mxu1 %v7338_v28  ;;  %v7345_v28 = vld [vmem:[#allocation10 + $0xc8] ss:$16 sps:$4 sm:$0xff]  }
 0x34e   :  { %4689 = vmatprep.subr.bf16.mxu0 %v7341_v23  ;;  %v7353_v23 = vld [vmem:[#allocation10 + $0xac] ss:$16 sps:$4 sm:$0xff]  }
 0x34f   :  { %3793 = vmatmul.mubr.bf16.vlgmr.msra.gmra.mxu1 %v8051_v12  ;;  %v7350_v12 = vld [vmem:[#allocation10 + $0x2a4] ss:$16 sps:$4 sm:$0xff]  }
 0x350   :  { %4649 = vmatpush1.bf16.msra.mxu1 %v7336_v19  ;;  %v7347_v19 = vld [vmem:[#allocation10 + $0xcc] ss:$16 sps:$4 sm:$0xff]  }
 0x351   :  { %4650 = vmatprep.subr.bf16.mxu1 %v7344_v1  ;;  %v7359_v1 = vld [vmem:[#allocation10 + $0x8c] ss:$16 sps:$4 sm:$0xff]  }
 0x354   :  { %4651 = vmatpush1.bf16.msra.mxu1 %v7342_v29  ;;  %v7351_v29 = vld [vmem:[#allocation10 + $0xa8] ss:$16 sps:$4 sm:$0xff]  }
 0x355   :  { %4652 = vmatprep.subr.bf16.mxu1 %v7350_v12  ;;  %v7365_v12 = vld [vmem:[#allocation10 + $0x6c] ss:$16 sps:$4 sm:$0xff]  }
 0x358   :  { %4653 = vmatpush1.bf16.msra.mxu1 %v7348_v20  ;;  %v7357_v20 = vld [vmem:[#allocation10 + $0x88] ss:$16 sps:$4 sm:$0xff]  }
 0x359   :  { %4654 = vmatprep.subr.bf16.mxu1 %v7356_v30  ;;  %v7371_v30 = vld [vmem:[#allocation10 + $0x4c] ss:$16 sps:$4 sm:$0xff]  }
 0x35c   :  { %4655 = vmatpush1.bf16.msra.mxu1 %v7354_v24  ;;  %v7363_v24 = vld [vmem:[#allocation10 + $0x68] ss:$16 sps:$4 sm:$0xff]  }
 0x35d   :  { %4656 = vmatprep.subr.bf16.mxu1 %v7362_v32  ;;  %v7377_v32 = vld [vmem:[#allocation10 + $0x2c] ss:$16 sps:$4 sm:$0xff]  }
 0x360   :  { %4657 = vmatpush1.bf16.msra.mxu1 %v7360_v31  ;;  %v7369_v31 = vld [vmem:[#allocation10 + $0x48] ss:$16 sps:$4 sm:$0xff]  }
 0x361   :  { %4658 = vmatprep.subr.bf16.mxu1 %v7368_v34  ;;  %v7383_v34 = vld [vmem:[#allocation10 + $0xc] ss:$16 sps:$4 sm:$0xff]  }
 0x364   :  { %4659 = vmatpush1.bf16.msra.mxu1 %v7366_v33  ;;  %v7375_v33 = vld [vmem:[#allocation10 + $0x28] ss:$16 sps:$4 sm:$0xff]  }
 0x365   :  { %4660 = vmatprep.subr.bf16.mxu1 %v7374_v8  ;;  %v7389_v8 = vld [vmem:[#allocation10 + $0x1ec] ss:$16 sps:$4 sm:$0xff]  }
 0x368   :  { %4661 = vmatpush1.bf16.msra.mxu1 %v7372_v52  ;;  %v7381_v52 = vld [vmem:[#allocation10 + $0x8] ss:$16 sps:$4 sm:$0xff]  }
 0x369   :  { %4662 = vmatprep.subr.bf16.mxu1 %v7380_v37  ;;  %v7395_v37 = vld [vmem:[#allocation10 + $0x1cc] ss:$16 sps:$4 sm:$0xff]  }
 0x36c   :  { %4663 = vmatpush1.bf16.msra.mxu1 %v7378_v35  ;;  %v7387_v35 = vld [vmem:[#allocation10 + $0x1e8] ss:$16 sps:$4 sm:$0xff]  }
 0x36d   :  { %4664 = vmatprep.subr.bf16.mxu1 %v7386_v38  ;;  %v7401_v38 = vld [vmem:[#allocation10 + $0x1ac] ss:$16 sps:$4 sm:$0xff]  }
 0x370   :  { %4665 = vmatpush2.bf16.msra.mxu1 %v7384_v17  ;;  %v7393_v17 = vld [vmem:[#allocation10 + $0x1c8] ss:$16 sps:$4 sm:$0xff]  }
 0x371   :  { %4666 = vmatprep.subr.bf16.mxu1 %v7392_v40  ;;  %v7407_v40 = vld [vmem:[#allocation10 + $0x18c] ss:$16 sps:$4 sm:$0xff]  }
 0x374   :  { %4667 = vmatpush2.bf16.msra.mxu1 %v7390_v39  ;;  %v7399_v39 = vld [vmem:[#allocation10 + $0x1a8] ss:$16 sps:$4 sm:$0xff]  }
 0x375   :  { %4668 = vmatprep.subr.bf16.mxu1 %v7398_v42  ;;  %v7413_v42 = vld [vmem:[#allocation10 + $0x16c] ss:$16 sps:$4 sm:$0xff]  }
 0x378   :  { %4669 = vmatpush2.bf16.msra.mxu1 %v7396_v41  ;;  %v7405_v41 = vld [vmem:[#allocation10 + $0x188] ss:$16 sps:$4 sm:$0xff]  }
 0x379   :  { %4670 = vmatprep.subr.bf16.mxu1 %v7404_v44  ;;  %v7419_v44 = vld [vmem:[#allocation10 + $0x14c] ss:$16 sps:$4 sm:$0xff]  }
 0x37c   :  { %4671 = vmatpush2.bf16.msra.mxu1 %v7402_v43  ;;  %v7411_v43 = vld [vmem:[#allocation10 + $0x168] ss:$16 sps:$4 sm:$0xff]  }
 0x37d   :  { %4672 = vmatprep.subr.bf16.mxu1 %v7410_v46  ;;  %v7417_v46 = vld [vmem:[#allocation10 + $0x148] ss:$16 sps:$4 sm:$0xff]  }
 0x380   :  { %4673 = vmatpush2.bf16.msra.mxu1 %v7408_v45  ;;  %v2988_v45 = vrot.slane %v8059_v60, %v8014_v36 }
 0x381   :  { %4674 = vmatprep.subr.bf16.mxu1 %v7416_v49  ;;  %v7425_v49 = vld [vmem:[#allocation10 + $0x12c] ss:$16 sps:$4 sm:$0xff]  }
 0x384   :  { %4675 = vmatpush2.bf16.msra.mxu1 %v7414_v47  ;;  %v2992_v47 = vrot.slane %v8059_v60, %v8017_v9 }
 0x385   :  { %4676 = vmatprep.subr.bf16.mxu1 %v7422_v51 }
 0x388   :  { %4677 = vmatpush2.bf16.msra.mxu1 %v7420_v53  ;;  %v7423_v53 = vld [vmem:[#allocation10 + $0x128] ss:$16 sps:$4 sm:$0xff]  }
 0x389   :  { %4678 = vmatprep.subr.bf16.mxu1 %v7428_v56  ;;  %v7431_v56 = vld [vmem:[#allocation10 + $0x10c] ss:$16 sps:$4 sm:$0xff]  }
 0x38c   :  { %4679 = vmatpush2.bf16.msra.mxu1 %v7426_v57 }
 0x38d   :  { %4730 = vmatprep.subr.bf16.mxu1 %v7434_v59 }
 0x38f   :  { %v3671_v50 = vpop.f32.mrf.mxu0 }
 0x390   :  { %v3672_v63 = vadd.f32 %v3671_v50, %v2980_v61 }
 0x391   :  { %v3673_v54 = vpop.f32.mrf.mxu0 }
 0x392   :  { %v3674_v7 = vadd.f32 %v3673_v54, %v2984_v62  ;;  %v7429_v62 = vld [vmem:[#allocation10 + $0x108] ss:$16 sps:$4 sm:$0xff]  }
 0x393   :  { %v3675_v55 = vpop.f32.mrf.mxu0 }
 0x395   :  { %v3676_v58 = vpop.f32.mrf.mxu0 }
 0x3cf   :  { %v3712_v16 = vpop.f32.mrf.mxu1  ;;  %v8065_v48 = vpop.f32.mrf.mxu0 }
 0x3d0   :  { %v3713_v4 = vadd.f32 %v3712_v16, %v3672_v63  ;;  %v3754_v50 = vadd.f32 %v8065_v48, %v2988_v45  ;;  %v7467_v45 = vld [vmem:[#allocation10 + $0x38c] ss:$16 sps:$4 sm:$0xff]  }
 0x3d1   :  { %v3714_v5 = vpop.f32.mrf.mxu1  ;;  %v8067_v6 = vpop.f32.mrf.mxu0 }
 0x3d2   :  { %vm3801_vm8 = vcmp.gt.f32.partialorder %v3713_v4, 0.0  ;;  %v3805_v10 = vmul.f32 0.2, %v3713_v4  ;;  %v3715_v13 = vadd.f32 %v3714_v5, %v3674_v7  ;;  %v3756_v54 = vadd.f32 %v8067_v6, %v2992_v47  ;;  %v7437_v6 = vld [vmem:[#allocation10 + $0x2cc] ss:$16 sps:$4 sm:$0xff]  }
 0x3d3   :  { %v3716_v14 = vpop.f32.mrf.mxu1  ;;  %v3757_v15 = vpop.f32.mrf.mxu0  ;;  %v7465_v47 = vld [vmem:[#allocation10 + $0x388] ss:$16 sps:$4 sm:$0xff]  }
 0x3d4   :  { %vm3802_vm9 = vcmp.gt.f32.partialorder %v3715_v13, 0.0  ;;  %v3806_v18 = vmul.f32 0.2, %v3715_v13  ;;  %v3809_v11 = vsel %vm3801_vm8, %v3713_v4, %v3805_v10  ;;  %v7432_v4 = vld [vmem:[#allocation10 + $0x2e8] ss:$16 sps:$4 sm:$0xff]  }
 0x3d5   :  { %v3717_v21 = vpop.f32.mrf.mxu1  ;;  %v3758_v0 = vpop.f32.mrf.mxu0  ;;  %v8069_v27 = vpack.c.bf16 %v3809_v11, %v3809_v11  ;;  %v7435_v10 = vld [vmem:[#allocation10 + $0x2c8] ss:$16 sps:$4 sm:$0xff]   ;;  %v7443_v15 = vld [vmem:[#allocation10 + $0x28c] ss:$16 sps:$4 sm:$0xff]   ;;  %v7482_v11 = vld [vmem:[#allocation11 + $0xe4] ss:$16 sps:$4 sm:$0xff]  }
 0x3d6   :  { %v3810_v22 = vsel %vm3802_vm9, %v3715_v13, %v3806_v18  ;;  %v7440_v13 = vld [vmem:[#allocation10 + $0x2ac] ss:$16 sps:$4 sm:$0xff]   ;;  %v7438_v14 = vld [vmem:[#allocation10 + $0x2a8] ss:$16 sps:$4 sm:$0xff]   ;;  %v7480_v18 = vld [vmem:[#allocation11 + $0xe0] ss:$16 sps:$4 sm:$0xff]  }
 0x3d7   :  { %v3814_v25 = vpack.c.bf16 %v3810_v22, %v3810_v22  ;;  %v7485_v21 = vld [vmem:[#allocation11 + $0xc4] ss:$16 sps:$4 sm:$0xff]   ;;  %v7441_v0 = vld [vmem:[#allocation10 + $0x288] ss:$16 sps:$4 sm:$0xff]   ;;  %v7483_v22 = vld [vmem:[#allocation11 + $0xc0] ss:$16 sps:$4 sm:$0xff]  }
 0x3d9   :  { %4639 = vmatprep.mubr.bf16.mxu0 %v3814_v25 }
 0x3da   :  { %4640 = vmatmul.mubr.bf16.vlgmr.msra.gmra.mxu0 %v8069_v27 }
 0x3db   :  { %4690 = vmatpush1.bf16.msra.mxu0 %v7339_v26  ;;  %4721 = vmatprep.mubr.bf16.mxu0 %v3814_v25  ;;  %v7446_v25 = vld [vmem:[#allocation10 + $0x26c] ss:$16 sps:$4 sm:$0xff]   ;;  %v7488_v26 = vld [vmem:[#allocation11 + $0xa4] ss:$16 sps:$4 sm:$0xff]  }
 0x3dc   :  { %4691 = vmatprep.subr.bf16.mxu0 %v7347_v19  ;;  %v7486_v19 = vld [vmem:[#allocation11 + $0xa0] ss:$16 sps:$4 sm:$0xff]  }
 0x3df   :  { %4692 = vmatpush1.bf16.msra.mxu0 %v7345_v28  ;;  %v7449_v28 = vld [vmem:[#allocation10 + $0x24c] ss:$16 sps:$4 sm:$0xff]  }
 0x3e0   :  { %4693 = vmatprep.subr.bf16.mxu0 %v7353_v23  ;;  %v7491_v23 = vld [vmem:[#allocation11 + $0x84] ss:$16 sps:$4 sm:$0xff]  }
 0x3e3   :  { %4694 = vmatpush1.bf16.msra.mxu0 %v7351_v29  ;;  %v7447_v29 = vld [vmem:[#allocation10 + $0x248] ss:$16 sps:$4 sm:$0xff]  }
 0x3e4   :  { %4695 = vmatprep.subr.bf16.mxu0 %v7359_v1  ;;  %v7489_v1 = vld [vmem:[#allocation11 + $0x80] ss:$16 sps:$4 sm:$0xff]  }
 0x3e7   :  { %4696 = vmatpush1.bf16.msra.mxu0 %v7357_v20  ;;  %v7452_v20 = vld [vmem:[#allocation10 + $0x22c] ss:$16 sps:$4 sm:$0xff]  }
 0x3e8   :  { %4697 = vmatprep.subr.bf16.mxu0 %v7365_v12  ;;  %v7494_v12 = vld [vmem:[#allocation11 + $0x64] ss:$16 sps:$4 sm:$0xff]  }
 0x3eb   :  { %4698 = vmatpush1.bf16.msra.mxu0 %v7363_v24  ;;  %v7450_v24 = vld [vmem:[#allocation10 + $0x228] ss:$16 sps:$4 sm:$0xff]  }
 0x3ec   :  { %4699 = vmatprep.subr.bf16.mxu0 %v7371_v30  ;;  %v7492_v30 = vld [vmem:[#allocation11 + $0x60] ss:$16 sps:$4 sm:$0xff]  }
 0x3ef   :  { %4700 = vmatpush1.bf16.msra.mxu0 %v7369_v31  ;;  %v7455_v31 = vld [vmem:[#allocation10 + $0x20c] ss:$16 sps:$4 sm:$0xff]  }
 0x3f0   :  { %4701 = vmatprep.subr.bf16.mxu0 %v7377_v32  ;;  %v7497_v32 = vld [vmem:[#allocation11 + $0x44] ss:$16 sps:$4 sm:$0xff]  }
 0x3f3   :  { %4702 = vmatpush1.bf16.msra.mxu0 %v7375_v33  ;;  %v7453_v33 = vld [vmem:[#allocation10 + $0x208] ss:$16 sps:$4 sm:$0xff]  }
 0x3f4   :  { %4703 = vmatprep.subr.bf16.mxu0 %v7383_v34  ;;  %v7495_v34 = vld [vmem:[#allocation11 + $0x40] ss:$16 sps:$4 sm:$0xff]  }
 0x3f7   :  { %4704 = vmatpush1.bf16.msra.mxu0 %v7381_v52  ;;  %v7458_v52 = vld [vmem:[#allocation10 + $0x3ec] ss:$16 sps:$4 sm:$0xff]  }
 0x3f8   :  { %4705 = vmatprep.subr.bf16.mxu0 %v7389_v8  ;;  %v7500_v8 = vld [vmem:[#allocation11 + $0x24] ss:$16 sps:$4 sm:$0xff]  }
 0x3fb   :  { %4706 = vmatpush2.bf16.msra.mxu0 %v7387_v35  ;;  %v7456_v35 = vld [vmem:[#allocation10 + $0x3e8] ss:$16 sps:$4 sm:$0xff]  }
 0x3fc   :  { %4707 = vmatprep.subr.bf16.mxu0 %v7395_v37  ;;  %v7498_v37 = vld [vmem:[#allocation11 + $0x20] ss:$16 sps:$4 sm:$0xff]  }
 0x3ff   :  { %4708 = vmatpush2.bf16.msra.mxu0 %v7393_v17  ;;  %v7461_v17 = vld [vmem:[#allocation10 + $0x3cc] ss:$16 sps:$4 sm:$0xff]  }
 0x400   :  { %4709 = vmatprep.subr.bf16.mxu0 %v7401_v38  ;;  %v7503_v38 = vld [vmem:[#allocation11 + $0x4] ss:$16 sps:$4 sm:$0xff]  }
 0x403   :  { %4710 = vmatpush2.bf16.msra.mxu0 %v7399_v39  ;;  %v7459_v39 = vld [vmem:[#allocation10 + $0x3c8] ss:$16 sps:$4 sm:$0xff]  }
 0x404   :  { %4711 = vmatprep.subr.bf16.mxu0 %v7407_v40  ;;  %v7501_v40 = vld [vmem:[#allocation11] ss:$16 sps:$4 sm:$0xff]  }
 0x407   :  { %4712 = vmatpush2.bf16.msra.mxu0 %v7405_v41  ;;  %v7464_v41 = vld [vmem:[#allocation10 + $0x3ac] ss:$16 sps:$4 sm:$0xff]  }
 0x408   :  { %4713 = vmatprep.subr.bf16.mxu0 %v7413_v42  ;;  %v7506_v42 = vld [vmem:[#allocation11 + $0x1e4] ss:$16 sps:$4 sm:$0xff]  }
 0x40b   :  { %4714 = vmatpush2.bf16.msra.mxu0 %v7411_v43  ;;  %v7462_v43 = vld [vmem:[#allocation10 + $0x3a8] ss:$16 sps:$4 sm:$0xff]  }
 0x40c   :  { %4715 = vmatprep.subr.bf16.mxu0 %v7419_v44  ;;  %v7504_v44 = vld [vmem:[#allocation11 + $0x1e0] ss:$16 sps:$4 sm:$0xff]  }
 0x40f   :  { %v3794_v51 = vpop.f32.mrf.mxu1  ;;  %4716 = vmatpush2.bf16.msra.mxu0 %v7417_v46  ;;  %v7509_v46 = vld [vmem:[#allocation11 + $0x1c4] ss:$16 sps:$4 sm:$0xff]  }
 0x410   :  { %v3795_v55 = vadd.f32 %v3794_v51, %v3754_v50  ;;  %4717 = vmatprep.subr.bf16.mxu0 %v7425_v49  ;;  %v7507_v49 = vld [vmem:[#allocation11 + $0x1c0] ss:$16 sps:$4 sm:$0xff]   ;;  %v7470_v50 = vld [vmem:[#allocation10 + $0x36c] ss:$16 sps:$4 sm:$0xff]   ;;  %v7512_v51 = vld [vmem:[#allocation11 + $0x1a4] ss:$16 sps:$4 sm:$0xff]  }
 0x411   :  { %v3796_v57 = vpop.f32.mrf.mxu1 }
 0x412   :  { %vm3803_vm10 = vcmp.gt.f32.partialorder %v3795_v55, 0.0  ;;  %v3807_v58 = vmul.f32 0.2, %v3795_v55  ;;  %v3797_v59 = vadd.f32 %v3796_v57, %v3756_v54  ;;  %v7510_v54 = vld [vmem:[#allocation11 + $0x1a0] ss:$16 sps:$4 sm:$0xff]  }
 0x413   :  { %v3798_v61 = vpop.f32.mrf.mxu1  ;;  %4718 = vmatpush2.bf16.msra.mxu0 %v7423_v53  ;;  %v7468_v53 = vld [vmem:[#allocation10 + $0x368] ss:$16 sps:$4 sm:$0xff]  }
 0x414   :  { %vm3804_vm11 = vcmp.gt.f32.partialorder %v3797_v59, 0.0  ;;  %v3808_v60 = vmul.f32 0.2, %v3797_v59  ;;  %4719 = vmatprep.subr.bf16.mxu0 %v7431_v56  ;;  %v3811_v63 = vsel %vm3803_vm10, %v3795_v55, %v3807_v58  ;;  %v7473_v55 = vld [vmem:[#allocation10 + $0x34c] ss:$16 sps:$4 sm:$0xff]  }
 0x415   :  { %v3799_v16 = vpop.f32.mrf.mxu1  ;;  %v8078_v5 = vpack.c.bf16 %v3811_v63, %v3811_v63  ;;  %v7515_v56 = vld [vmem:[#allocation11 + $0x184] ss:$16 sps:$4 sm:$0xff]   ;;  %v7471_v57 = vld [vmem:[#allocation10 + $0x348] ss:$16 sps:$4 sm:$0xff]   ;;  %v7513_v58 = vld [vmem:[#allocation11 + $0x180] ss:$16 sps:$4 sm:$0xff]  }
 0x416   :  { %v3812_v48 = vsel %vm3804_vm11, %v3797_v59, %v3808_v60  ;;  %v7476_v59 = vld [vmem:[#allocation10 + $0x32c] ss:$16 sps:$4 sm:$0xff]   ;;  %v7518_v61 = vld [vmem:[#allocation11 + $0x164] ss:$16 sps:$4 sm:$0xff]   ;;  %v7516_v60 = vld [vmem:[#allocation11 + $0x160] ss:$16 sps:$4 sm:$0xff]  }
 0x417   :  { %4720 = vmatpush2.bf16.msra.mxu0 %v7429_v62  ;;  %v3816_v7 = vpack.c.bf16 %v3812_v48, %v3812_v48  ;;  %v7474_v62 = vld [vmem:[#allocation10 + $0x328] ss:$16 sps:$4 sm:$0xff]   ;;  %v7479_v63 = vld [vmem:[#allocation10 + $0x30c] ss:$16 sps:$4 sm:$0xff]   ;;  %v7521_v16 = vld [vmem:[#allocation11 + $0x144] ss:$16 sps:$4 sm:$0xff]  }
 0x418   :  { %5577 = vmatprep.subr.bf16.mxu0 %v7482_v11  ;;  %v7477_v48 = vld [vmem:[#allocation10 + $0x308] ss:$16 sps:$4 sm:$0xff]   ;;  %v7534_v11 = vld [vmem:[#allocation11 + $0x2c0] ss:$16 sps:$4 sm:$0xff]  }
 0x419   :  { %4680 = vmatprep.mubr.bf16.mxu1 %v3816_v7 }
 0x41a   :  { %4681 = vmatmul.mubr.bf16.vlgmr.msra.gmra.mxu1 %v8078_v5  ;;  %4722 = vmatmul.mubr.bf16.vlgmr.msra.gmra.mxu0 %v8069_v27  ;;  %v7444_v27 = vld [vmem:[#allocation10 + $0x268] ss:$16 sps:$4 sm:$0xff]  }
 0x41b   :  { %4731 = vmatpush1.bf16.msra.mxu1 %v7432_v4  ;;  %4762 = vmatprep.mubr.bf16.mxu1 %v3816_v7  ;;  %v7519_v7 = vld [vmem:[#allocation11 + $0x140] ss:$16 sps:$4 sm:$0xff]   ;;  %v7524_v4 = vld [vmem:[#allocation11 + $0x124] ss:$16 sps:$4 sm:$0xff]  }
 0x41c   :  { %4732 = vmatprep.subr.bf16.mxu1 %v7437_v6  ;;  %5578 = vmatpush1.bf16.msra.mxu0 %v7480_v18  ;;  %v7522_v6 = vld [vmem:[#allocation11 + $0x120] ss:$16 sps:$4 sm:$0xff]   ;;  %v7533_v18 = vld [vmem:[#allocation11 + $0xec] ss:$16 sps:$4 sm:$0xff]  }
 0x41d   :  { %5579 = vmatprep.subr.bf16.mxu0 %v7485_v21  ;;  %v7536_v21 = vld [vmem:[#allocation11 + $0x2c4] ss:$16 sps:$4 sm:$0xff]  }
 0x41f   :  { %4733 = vmatpush1.bf16.msra.mxu1 %v7435_v10  ;;  %v7527_v10 = vld [vmem:[#allocation11 + $0x104] ss:$16 sps:$4 sm:$0xff]  }
 0x420   :  { %4734 = vmatprep.subr.bf16.mxu1 %v7440_v13  ;;  %5580 = vmatpush1.bf16.msra.mxu0 %v7483_v22  ;;  %v7525_v13 = vld [vmem:[#allocation11 + $0x100] ss:$16 sps:$4 sm:$0xff]  }
 0x421   :  { %5581 = vmatprep.subr.bf16.mxu0 %v7488_v26  ;;  %v7546_v22 = vld [vmem:[#allocation11 + $0x280] ss:$16 sps:$4 sm:$0xff]  }
 0x422   :  { %v7552_v26 = vld [vmem:[#allocation11 + $0x260] ss:$16 sps:$4 sm:$0xff]  }
 0x423   :  { %4735 = vmatpush1.bf16.msra.mxu1 %v7438_v14  ;;  %v7528_v14 = vld [vmem:[#allocation11 + $0x2e0] ss:$16 sps:$4 sm:$0xff]  }
 0x424   :  { %4736 = vmatprep.subr.bf16.mxu1 %v7443_v15  ;;  %5582 = vmatpush1.bf16.msra.mxu0 %v7486_v19  ;;  %v7530_v15 = vld [vmem:[#allocation11 + $0x2e4] ss:$16 sps:$4 sm:$0xff]   ;;  %v7558_v19 = vld [vmem:[#allocation11 + $0x240] ss:$16 sps:$4 sm:$0xff]  }
 0x425   :  { %5583 = vmatprep.subr.bf16.mxu0 %v7491_v23  ;;  %v7564_v23 = vld [vmem:[#allocation11 + $0x220] ss:$16 sps:$4 sm:$0xff]  }
 0x427   :  { %4737 = vmatpush1.bf16.msra.mxu1 %v7441_v0  ;;  %v7540_v0 = vld [vmem:[#allocation11 + $0x2a0] ss:$16 sps:$4 sm:$0xff]  }
 0x428   :  { %4738 = vmatprep.subr.bf16.mxu1 %v7446_v25  ;;  %5584 = vmatpush1.bf16.msra.mxu0 %v7489_v1  ;;  %v7548_v25 = vld [vmem:[#allocation11 + $0x284] ss:$16 sps:$4 sm:$0xff]   ;;  %v7570_v1 = vld [vmem:[#allocation11 + $0x200] ss:$16 sps:$4 sm:$0xff]  }
 0x429   :  { %5585 = vmatprep.subr.bf16.mxu0 %v7494_v12  ;;  %v7576_v12 = vld [vmem:[#allocation11 + $0x3e0] ss:$16 sps:$4 sm:$0xff]  }
 0x42b   :  { %4739 = vmatpush1.bf16.msra.mxu1 %v7444_v27  ;;  %v7554_v27 = vld [vmem:[#allocation11 + $0x264] ss:$16 sps:$4 sm:$0xff]  }
 0x42c   :  { %4740 = vmatprep.subr.bf16.mxu1 %v7449_v28  ;;  %5586 = vmatpush1.bf16.msra.mxu0 %v7492_v30  ;;  %v7560_v28 = vld [vmem:[#allocation11 + $0x244] ss:$16 sps:$4 sm:$0xff]   ;;  %v7582_v30 = vld [vmem:[#allocation11 + $0x3c0] ss:$16 sps:$4 sm:$0xff]  }
 0x42d   :  { %5587 = vmatprep.subr.bf16.mxu0 %v7497_v32  ;;  %v7588_v32 = vld [vmem:[#allocation11 + $0x3a0] ss:$16 sps:$4 sm:$0xff]  }
 0x42f   :  { %4741 = vmatpush1.bf16.msra.mxu1 %v7447_v29  ;;  %v7566_v29 = vld [vmem:[#allocation11 + $0x224] ss:$16 sps:$4 sm:$0xff]  }
 0x430   :  { %4742 = vmatprep.subr.bf16.mxu1 %v7452_v20  ;;  %5588 = vmatpush1.bf16.msra.mxu0 %v7495_v34  ;;  %v7572_v20 = vld [vmem:[#allocation11 + $0x204] ss:$16 sps:$4 sm:$0xff]   ;;  %v7594_v34 = vld [vmem:[#allocation11 + $0x380] ss:$16 sps:$4 sm:$0xff]  }
 0x431   :  { %5589 = vmatprep.subr.bf16.mxu0 %v7500_v8  ;;  %v7600_v8 = vld [vmem:[#allocation11 + $0x360] ss:$16 sps:$4 sm:$0xff]  }
 0x433   :  { %4743 = vmatpush1.bf16.msra.mxu1 %v7450_v24  ;;  %v7578_v24 = vld [vmem:[#allocation11 + $0x3e4] ss:$16 sps:$4 sm:$0xff]  }
 0x434   :  { %4744 = vmatprep.subr.bf16.mxu1 %v7455_v31  ;;  %5590 = vmatpush1.bf16.msra.mxu0 %v7498_v37  ;;  %v7584_v31 = vld [vmem:[#allocation11 + $0x3c4] ss:$16 sps:$4 sm:$0xff]   ;;  %v7606_v37 = vld [vmem:[#allocation11 + $0x340] ss:$16 sps:$4 sm:$0xff]  }
 0x435   :  { %5591 = vmatprep.subr.bf16.mxu0 %v7503_v38 }
 0x437   :  { %4745 = vmatpush1.bf16.msra.mxu1 %v7453_v33  ;;  %v7590_v33 = vld [vmem:[#allocation11 + $0x3a4] ss:$16 sps:$4 sm:$0xff]  }
 0x438   :  { %4746 = vmatprep.subr.bf16.mxu1 %v7458_v52  ;;  %5592 = vmatpush1.bf16.msra.mxu0 %v7501_v40  ;;  %v7596_v52 = vld [vmem:[#allocation11 + $0x384] ss:$16 sps:$4 sm:$0xff]   ;;  %v7612_v40 = vld [vmem:[#allocation11 + $0x320] ss:$16 sps:$4 sm:$0xff]  }
 0x439   :  { %5593 = vmatprep.subr.bf16.mxu0 %v7506_v42 }
 0x43b   :  { %4747 = vmatpush2.bf16.msra.mxu1 %v7456_v35  ;;  %v7602_v35 = vld [vmem:[#allocation11 + $0x364] ss:$16 sps:$4 sm:$0xff]  }
 0x43c   :  { %4748 = vmatprep.subr.bf16.mxu1 %v7461_v17  ;;  %5594 = vmatpush2.bf16.msra.mxu0 %v7504_v44  ;;  %v7608_v17 = vld [vmem:[#allocation11 + $0x344] ss:$16 sps:$4 sm:$0xff]   ;;  %v7618_v44 = vld [vmem:[#allocation11 + $0x300] ss:$16 sps:$4 sm:$0xff]  }
 0x43d   :  { %5595 = vmatprep.subr.bf16.mxu0 %v7509_v46  ;;  %v7626_v46 = vld [vmem:[#allocation11 + $0x2ec] ss:$16 sps:$4 sm:$0xff]  }
 0x43f   :  { %4749 = vmatpush2.bf16.msra.mxu1 %v7459_v39  ;;  %v7614_v39 = vld [vmem:[#allocation11 + $0x324] ss:$16 sps:$4 sm:$0xff]  }
 0x440   :  { %4750 = vmatprep.subr.bf16.mxu1 %v7464_v41  ;;  %5596 = vmatpush2.bf16.msra.mxu0 %v7507_v49 }
 0x441   :  { %5597 = vmatprep.subr.bf16.mxu0 %v7512_v51 }
 0x443   :  { %4751 = vmatpush2.bf16.msra.mxu1 %v7462_v43  ;;  %v7620_v43 = vld [vmem:[#allocation11 + $0x304] ss:$16 sps:$4 sm:$0xff]  }
 0x444   :  { %4752 = vmatprep.subr.bf16.mxu1 %v7467_v45  ;;  %5598 = vmatpush2.bf16.msra.mxu0 %v7510_v54 }
 0x445   :  { %5599 = vmatprep.subr.bf16.mxu0 %v7515_v56 }
 0x447   :  { %4753 = vmatpush2.bf16.msra.mxu1 %v7465_v47  ;;  %v8086_v47 = vld [vmem:[%s8132_s8] sm:$0xf] }
 0x448   :  { %4754 = vmatprep.subr.bf16.mxu1 %v7470_v50  ;;  %5600 = vmatpush2.bf16.msra.mxu0 %v7513_v58  ;;  %v3950_v49 = vrot.slane %v8086_v47, %v7992_v2  ;;  %v3954_v50 = vrot.slane %v8086_v47, %v7995_v3 }
 0x449   :  { %5601 = vmatprep.subr.bf16.mxu0 %v7518_v61 }
 0x44b   :  { %4755 = vmatpush2.bf16.msra.mxu1 %v7468_v53 }
 0x44c   :  { %4756 = vmatprep.subr.bf16.mxu1 %v7473_v55  ;;  %5602 = vmatpush2.bf16.msra.mxu0 %v7516_v60 }
 0x44d   :  { %5603 = vmatprep.subr.bf16.mxu0 %v7521_v16 }
 0x44f   :  { %4757 = vmatpush2.bf16.msra.mxu1 %v7471_v57 }
 0x450   :  { %4758 = vmatprep.subr.bf16.mxu1 %v7476_v59  ;;  %5604 = vmatpush2.bf16.msra.mxu0 %v7519_v7 }
 0x451   :  { %5605 = vmatprep.subr.bf16.mxu0 %v7524_v4 }
 0x453   :  { %4759 = vmatpush2.bf16.msra.mxu1 %v7474_v62 }
 0x454   :  { %4760 = vmatprep.subr.bf16.mxu1 %v7479_v63  ;;  %5606 = vmatpush2.bf16.msra.mxu0 %v7522_v6 }
 0x455   :  { %5607 = vmatprep.subr.bf16.mxu0 %v7527_v10  ;;  %v7531_v10 = vld [vmem:[#allocation11 + $0xe8] ss:$16 sps:$4 sm:$0xff]  }
 0x457   :  { %4761 = vmatpush2.bf16.msra.mxu1 %v7477_v48 }
 0x458   :  { %5608 = vmatpush2.bf16.msra.mxu0 %v7525_v13  ;;  %5618 = vmatprep.subr.bf16.mxu1 %v7530_v15  ;;  %v7537_v15 = vld [vmem:[#allocation11 + $0xc8] ss:$16 sps:$4 sm:$0xff]  }
 0x459   :  { %5659 = vmatprep.subr.bf16.mxu0 %v7533_v18  ;;  %v7545_v18 = vld [vmem:[#allocation11 + $0xac] ss:$16 sps:$4 sm:$0xff]  }
 0x45a   :  { %4763 = vmatmul.mubr.bf16.vlgmr.msra.gmra.mxu1 %v8078_v5  ;;  %v7542_v5 = vld [vmem:[#allocation11 + $0x2a4] ss:$16 sps:$4 sm:$0xff]  }
 0x45b   :  { %5619 = vmatpush1.bf16.msra.mxu1 %v7528_v14  ;;  %v7539_v14 = vld [vmem:[#allocation11 + $0xcc] ss:$16 sps:$4 sm:$0xff]  }
 0x45c   :  { %5620 = vmatprep.subr.bf16.mxu1 %v7536_v21  ;;  %v7551_v21 = vld [vmem:[#allocation11 + $0x8c] ss:$16 sps:$4 sm:$0xff]  }
 0x45f   :  { %5621 = vmatpush1.bf16.msra.mxu1 %v7534_v11  ;;  %v7543_v11 = vld [vmem:[#allocation11 + $0xa8] ss:$16 sps:$4 sm:$0xff]  }
 0x460   :  { %5622 = vmatprep.subr.bf16.mxu1 %v7542_v5  ;;  %v7557_v5 = vld [vmem:[#allocation11 + $0x6c] ss:$16 sps:$4 sm:$0xff]  }
 0x463   :  { %5623 = vmatpush1.bf16.msra.mxu1 %v7540_v0  ;;  %v7549_v0 = vld [vmem:[#allocation11 + $0x88] ss:$16 sps:$4 sm:$0xff]  }
 0x464   :  { %5624 = vmatprep.subr.bf16.mxu1 %v7548_v25  ;;  %v7563_v25 = vld [vmem:[#allocation11 + $0x4c] ss:$16 sps:$4 sm:$0xff]  }
 0x467   :  { %5625 = vmatpush1.bf16.msra.mxu1 %v7546_v22  ;;  %v7555_v22 = vld [vmem:[#allocation11 + $0x68] ss:$16 sps:$4 sm:$0xff]  }
 0x468   :  { %5626 = vmatprep.subr.bf16.mxu1 %v7554_v27  ;;  %v7569_v27 = vld [vmem:[#allocation11 + $0x2c] ss:$16 sps:$4 sm:$0xff]  }
 0x46b   :  { %5627 = vmatpush1.bf16.msra.mxu1 %v7552_v26  ;;  %v7561_v26 = vld [vmem:[#allocation11 + $0x48] ss:$16 sps:$4 sm:$0xff]  }
 0x46c   :  { %5628 = vmatprep.subr.bf16.mxu1 %v7560_v28  ;;  %v7575_v28 = vld [vmem:[#allocation11 + $0xc] ss:$16 sps:$4 sm:$0xff]  }
 0x46f   :  { %5629 = vmatpush1.bf16.msra.mxu1 %v7558_v19  ;;  %v7567_v19 = vld [vmem:[#allocation11 + $0x28] ss:$16 sps:$4 sm:$0xff]  }
 0x470   :  { %5630 = vmatprep.subr.bf16.mxu1 %v7566_v29  ;;  %v7581_v29 = vld [vmem:[#allocation11 + $0x1ec] ss:$16 sps:$4 sm:$0xff]  }
 0x473   :  { %5631 = vmatpush1.bf16.msra.mxu1 %v7564_v23  ;;  %v7573_v23 = vld [vmem:[#allocation11 + $0x8] ss:$16 sps:$4 sm:$0xff]  }
 0x474   :  { %5632 = vmatprep.subr.bf16.mxu1 %v7572_v20  ;;  %v7587_v20 = vld [vmem:[#allocation11 + $0x1cc] ss:$16 sps:$4 sm:$0xff]  }
 0x477   :  { %5633 = vmatpush1.bf16.msra.mxu1 %v7570_v1  ;;  %v7579_v1 = vld [vmem:[#allocation11 + $0x1e8] ss:$16 sps:$4 sm:$0xff]  }
 0x478   :  { %5634 = vmatprep.subr.bf16.mxu1 %v7578_v24  ;;  %v7593_v24 = vld [vmem:[#allocation11 + $0x1ac] ss:$16 sps:$4 sm:$0xff]  }
 0x47b   :  { %5635 = vmatpush2.bf16.msra.mxu1 %v7576_v12  ;;  %v7585_v12 = vld [vmem:[#allocation11 + $0x1c8] ss:$16 sps:$4 sm:$0xff]  }
 0x47c   :  { %5636 = vmatprep.subr.bf16.mxu1 %v7584_v31  ;;  %v7599_v31 = vld [vmem:[#allocation11 + $0x18c] ss:$16 sps:$4 sm:$0xff]  }
 0x47f   :  { %5637 = vmatpush2.bf16.msra.mxu1 %v7582_v30  ;;  %v7591_v30 = vld [vmem:[#allocation11 + $0x1a8] ss:$16 sps:$4 sm:$0xff]  }
 0x480   :  { %5638 = vmatprep.subr.bf16.mxu1 %v7590_v33  ;;  %v7605_v33 = vld [vmem:[#allocation11 + $0x16c] ss:$16 sps:$4 sm:$0xff]  }
 0x483   :  { %5639 = vmatpush2.bf16.msra.mxu1 %v7588_v32  ;;  %v7597_v32 = vld [vmem:[#allocation11 + $0x188] ss:$16 sps:$4 sm:$0xff]  }
 0x484   :  { %5640 = vmatprep.subr.bf16.mxu1 %v7596_v52  ;;  %v7611_v52 = vld [vmem:[#allocation11 + $0x14c] ss:$16 sps:$4 sm:$0xff]  }
 0x487   :  { %5641 = vmatpush2.bf16.msra.mxu1 %v7594_v34  ;;  %v7603_v34 = vld [vmem:[#allocation11 + $0x168] ss:$16 sps:$4 sm:$0xff]  }
 0x488   :  { %5642 = vmatprep.subr.bf16.mxu1 %v7602_v35  ;;  %v7609_v35 = vld [vmem:[#allocation11 + $0x148] ss:$16 sps:$4 sm:$0xff]  }
 0x48b   :  { %5643 = vmatpush2.bf16.msra.mxu1 %v7600_v8  ;;  %v3958_v8 = vrot.slane %v8086_v47, %v8014_v36 }
 0x48c   :  { %5644 = vmatprep.subr.bf16.mxu1 %v7608_v17  ;;  %v7617_v17 = vld [vmem:[#allocation11 + $0x12c] ss:$16 sps:$4 sm:$0xff]  }
 0x48f   :  { %5645 = vmatpush2.bf16.msra.mxu1 %v7606_v37  ;;  %v3962_v37 = vrot.slane %v8086_v47, %v8017_v9 }
 0x490   :  { %5646 = vmatprep.subr.bf16.mxu1 %v7614_v39 }
 0x493   :  { %5647 = vmatpush2.bf16.msra.mxu1 %v7612_v40  ;;  %v7615_v40 = vld [vmem:[#allocation11 + $0x128] ss:$16 sps:$4 sm:$0xff]  }
 0x494   :  { %5648 = vmatprep.subr.bf16.mxu1 %v7620_v43  ;;  %v7623_v43 = vld [vmem:[#allocation11 + $0x10c] ss:$16 sps:$4 sm:$0xff]  }
 0x497   :  { %5649 = vmatpush2.bf16.msra.mxu1 %v7618_v44 }
 0x498   :  { %5700 = vmatprep.subr.bf16.mxu1 %v7626_v46 }
 0x49a   :  { %v4641_v38 = vpop.f32.mrf.mxu0 }
 0x49b   :  { %v4642_v51 = vadd.f32 %v4641_v38, %v3950_v49 }
 0x49c   :  { %v4643_v41 = vpop.f32.mrf.mxu0 }
 0x49d   :  { %v4644_v55 = vadd.f32 %v4643_v41, %v3954_v50  ;;  %v7621_v50 = vld [vmem:[#allocation11 + $0x108] ss:$16 sps:$4 sm:$0xff]  }
 0x49e   :  { %v4645_v42 = vpop.f32.mrf.mxu0 }
 0x4a0   :  { %v4646_v45 = vpop.f32.mrf.mxu0 }
 0x4da   :  { %v4682_v53 = vpop.f32.mrf.mxu1  ;;  %v8092_v54 = vpop.f32.mrf.mxu0 }
 0x4db   :  { %v4683_v56 = vadd.f32 %v4682_v53, %v4642_v51  ;;  %v4724_v38 = vadd.f32 %v8092_v54, %v3958_v8 }
 0x4dc   :  { %v4684_v57 = vpop.f32.mrf.mxu1  ;;  %v8094_v58 = vpop.f32.mrf.mxu0 }
 0x4dd   :  { %vm4771_vm12 = vcmp.gt.f32.partialorder %v4683_v56, 0.0  ;;  %v4775_v59 = vmul.f32 0.2, %v4683_v56  ;;  %v4685_v61 = vadd.f32 %v4684_v57, %v4644_v55  ;;  %v4726_v41 = vadd.f32 %v8094_v58, %v3962_v37  ;;  %v7629_v58 = vld [vmem:[#allocation11 + $0x2cc] ss:$16 sps:$4 sm:$0xff]  }
 0x4de   :  { %v4686_v62 = vpop.f32.mrf.mxu1  ;;  %v4727_v60 = vpop.f32.mrf.mxu0 }
 0x4df   :  { %vm4772_vm13 = vcmp.gt.f32.partialorder %v4685_v61, 0.0  ;;  %v4776_v63 = vmul.f32 0.2, %v4685_v61  ;;  %v4779_v16 = vsel %vm4771_vm12, %v4683_v56, %v4775_v59  ;;  %v7624_v56 = vld [vmem:[#allocation11 + $0x2e8] ss:$16 sps:$4 sm:$0xff]  }
 0x4e0   :  { %v4687_v48 = vpop.f32.mrf.mxu1  ;;  %v4728_v7 = vpop.f32.mrf.mxu0  ;;  %v8096_v13 = vpack.c.bf16 %v4779_v16, %v4779_v16  ;;  %v7627_v59 = vld [vmem:[#allocation11 + $0x2c8] ss:$16 sps:$4 sm:$0xff]   ;;  %v7635_v60 = vld [vmem:[#allocation11 + $0x28c] ss:$16 sps:$4 sm:$0xff]  }
 0x4e1   :  { %v4780_v4 = vsel %vm4772_vm13, %v4685_v61, %v4776_v63  ;;  %v7632_v61 = vld [vmem:[#allocation11 + $0x2ac] ss:$16 sps:$4 sm:$0xff]   ;;  %v7630_v62 = vld [vmem:[#allocation11 + $0x2a8] ss:$16 sps:$4 sm:$0xff]  }
 0x4e2   :  { %v4784_v6 = vpack.c.bf16 %v4780_v4, %v4780_v4  ;;  %v7633_v63 = vld [vmem:[#allocation11 + $0x288] ss:$16 sps:$4 sm:$0xff]   ;;  %v7638_v16 = vld [vmem:[#allocation11 + $0x26c] ss:$16 sps:$4 sm:$0xff]  }
 0x4e3   :  { %v7636_v48 = vld [vmem:[#allocation11 + $0x268] ss:$16 sps:$4 sm:$0xff]   ;;  %v7641_v7 = vld [vmem:[#allocation11 + $0x24c] ss:$16 sps:$4 sm:$0xff]  }
 0x4e4   :  { %5609 = vmatprep.mubr.bf16.mxu0 %v4784_v6  ;;  %v7639_v4 = vld [vmem:[#allocation11 + $0x248] ss:$16 sps:$4 sm:$0xff]  }
 0x4e5   :  { %5610 = vmatmul.mubr.bf16.vlgmr.msra.gmra.mxu0 %v8096_v13 }
 0x4e6   :  { %5660 = vmatpush1.bf16.msra.mxu0 %v7531_v10  ;;  %5691 = vmatprep.mubr.bf16.mxu0 %v4784_v6  ;;  %v7644_v6 = vld [vmem:[#allocation11 + $0x22c] ss:$16 sps:$4 sm:$0xff]   ;;  %v7642_v10 = vld [vmem:[#allocation11 + $0x228] ss:$16 sps:$4 sm:$0xff]  }
 0x4e7   :  { %5661 = vmatprep.subr.bf16.mxu0 %v7539_v14  ;;  %v7645_v14 = vld [vmem:[#allocation11 + $0x208] ss:$16 sps:$4 sm:$0xff]  }
 0x4ea   :  { %5662 = vmatpush1.bf16.msra.mxu0 %v7537_v15  ;;  %v7650_v15 = vld [vmem:[#allocation11 + $0x3ec] ss:$16 sps:$4 sm:$0xff]  }
 0x4eb   :  { %5663 = vmatprep.subr.bf16.mxu0 %v7545_v18  ;;  %v7648_v18 = vld [vmem:[#allocation11 + $0x3e8] ss:$16 sps:$4 sm:$0xff]  }
 0x4ee   :  { %5664 = vmatpush1.bf16.msra.mxu0 %v7543_v11  ;;  %v7653_v11 = vld [vmem:[#allocation11 + $0x3cc] ss:$16 sps:$4 sm:$0xff]  }
 0x4ef   :  { %5665 = vmatprep.subr.bf16.mxu0 %v7551_v21  ;;  %v7651_v21 = vld [vmem:[#allocation11 + $0x3c8] ss:$16 sps:$4 sm:$0xff]  }
 0x4f2   :  { %5666 = vmatpush1.bf16.msra.mxu0 %v7549_v0  ;;  %v7656_v0 = vld [vmem:[#allocation11 + $0x3ac] ss:$16 sps:$4 sm:$0xff]  }
 0x4f3   :  { %5667 = vmatprep.subr.bf16.mxu0 %v7557_v5  ;;  %v7654_v5 = vld [vmem:[#allocation11 + $0x3a8] ss:$16 sps:$4 sm:$0xff]  }
 0x4f6   :  { %5668 = vmatpush1.bf16.msra.mxu0 %v7555_v22  ;;  %v7659_v22 = vld [vmem:[#allocation11 + $0x38c] ss:$16 sps:$4 sm:$0xff]  }
 0x4f7   :  { %5669 = vmatprep.subr.bf16.mxu0 %v7563_v25  ;;  %v7657_v25 = vld [vmem:[#allocation11 + $0x388] ss:$16 sps:$4 sm:$0xff]  }
 0x4fa   :  { %5670 = vmatpush1.bf16.msra.mxu0 %v7561_v26  ;;  %v7662_v26 = vld [vmem:[#allocation11 + $0x36c] ss:$16 sps:$4 sm:$0xff]  }
 0x4fb   :  { %5671 = vmatprep.subr.bf16.mxu0 %v7569_v27  ;;  %v7660_v27 = vld [vmem:[#allocation11 + $0x368] ss:$16 sps:$4 sm:$0xff]  }
 0x4fe   :  { %5672 = vmatpush1.bf16.msra.mxu0 %v7567_v19  ;;  %v7665_v19 = vld [vmem:[#allocation11 + $0x34c] ss:$16 sps:$4 sm:$0xff]  }
 0x4ff   :  { %5673 = vmatprep.subr.bf16.mxu0 %v7575_v28  ;;  %v7663_v28 = vld [vmem:[#allocation11 + $0x348] ss:$16 sps:$4 sm:$0xff]  }
 0x502   :  { %5674 = vmatpush1.bf16.msra.mxu0 %v7573_v23  ;;  %v7668_v23 = vld [vmem:[#allocation11 + $0x32c] ss:$16 sps:$4 sm:$0xff]  }
 0x503   :  { %5675 = vmatprep.subr.bf16.mxu0 %v7581_v29  ;;  %v7666_v29 = vld [vmem:[#allocation11 + $0x328] ss:$16 sps:$4 sm:$0xff]  }
 0x506   :  { %5676 = vmatpush2.bf16.msra.mxu0 %v7579_v1  ;;  %v7671_v1 = vld [vmem:[#allocation11 + $0x30c] ss:$16 sps:$4 sm:$0xff]  }
 0x507   :  { %5677 = vmatprep.subr.bf16.mxu0 %v7587_v20  ;;  %v7669_v20 = vld [vmem:[#allocation11 + $0x308] ss:$16 sps:$4 sm:$0xff]  }
 0x50a   :  { %5678 = vmatpush2.bf16.msra.mxu0 %v7585_v12 }
 0x50b   :  { %5679 = vmatprep.subr.bf16.mxu0 %v7593_v24 }
 0x50e   :  { %5680 = vmatpush2.bf16.msra.mxu0 %v7591_v30 }
 0x50f   :  { %5681 = vmatprep.subr.bf16.mxu0 %v7599_v31 }
 0x512   :  { %5682 = vmatpush2.bf16.msra.mxu0 %v7597_v32  ;;  %v4915_v32 = vld [vmem:[%s8134_s10] sm:$0xf] }
 0x513   :  { %5683 = vmatprep.subr.bf16.mxu0 %v7605_v33  ;;  %v4920_v33 = vrot.slane %v4915_v32, %v7992_v2 }
 0x516   :  { %5684 = vmatpush2.bf16.msra.mxu0 %v7603_v34  ;;  %v4924_v34 = vrot.slane %v4915_v32, %v7995_v3 }
 0x517   :  { %5685 = vmatprep.subr.bf16.mxu0 %v7611_v52 }
 0x51a   :  { %v4764_v39 = vpop.f32.mrf.mxu1  ;;  %5686 = vmatpush2.bf16.msra.mxu0 %v7609_v35 }
 0x51b   :  { %v4765_v42 = vadd.f32 %v4764_v39, %v4724_v38  ;;  %5687 = vmatprep.subr.bf16.mxu0 %v7617_v17  ;;  %v5753_v38 = vld [vmem:[#allocation13] sm:$0xf] }
 0x51c   :  { %v4766_v44 = vpop.f32.mrf.mxu1 }
 0x51d   :  { %vm4773_vm14 = vcmp.gt.f32.partialorder %v4765_v42, 0.0  ;;  %v4777_v45 = vmul.f32 0.2, %v4765_v42  ;;  %v4767_v46 = vadd.f32 %v4766_v44, %v4726_v41 }
 0x51e   :  { %v4768_v49 = vpop.f32.mrf.mxu1  ;;  %5688 = vmatpush2.bf16.msra.mxu0 %v7615_v40 }
 0x51f   :  { %vm4774_vm15 = vcmp.gt.f32.partialorder %v4767_v46, 0.0  ;;  %v4778_v47 = vmul.f32 0.2, %v4767_v46  ;;  %5689 = vmatprep.subr.bf16.mxu0 %v7623_v43  ;;  %v4781_v51 = vsel %vm4773_vm14, %v4765_v42, %v4777_v45  ;;  %v5758_v45 = vrot.slane %v5753_v38, %v7992_v2 }
 0x520   :  { %v4769_v53 = vpop.f32.mrf.mxu1  ;;  %v8105_v57 = vpack.c.bf16 %v4781_v51, %v4781_v51 }
 0x521   :  { %v4782_v54 = vsel %vm4774_vm15, %v4767_v46, %v4778_v47  ;;  %v5762_v46 = vrot.slane %v5753_v38, %v7995_v3  ;;  %v5766_v3 = vrot.slane %v5753_v38, %v8014_v36 }
 0x522   :  { %5690 = vmatpush2.bf16.msra.mxu0 %v7621_v50  ;;  %v4786_v55 = vpack.c.bf16 %v4782_v54, %v4782_v54 }
 0x524   :  { %5650 = vmatprep.mubr.bf16.mxu1 %v4786_v55 }
 0x525   :  { %5651 = vmatmul.mubr.bf16.vlgmr.msra.gmra.mxu1 %v8105_v57  ;;  %5692 = vmatmul.mubr.bf16.vlgmr.msra.gmra.mxu0 %v8096_v13  ;;  %v7647_v13 = vld [vmem:[#allocation11 + $0x20c] ss:$16 sps:$4 sm:$0xff]  }
 0x526   :  { %5701 = vmatpush1.bf16.msra.mxu1 %v7624_v56  ;;  %5732 = vmatprep.mubr.bf16.mxu1 %v4786_v55 }
 0x527   :  { %5702 = vmatprep.subr.bf16.mxu1 %v7629_v58  ;;  %v4932_v58 = vrot.slane %v4915_v32, %v8017_v9 }
 0x52a   :  { %5703 = vmatpush1.bf16.msra.mxu1 %v7627_v59 }
 0x52b   :  { %5704 = vmatprep.subr.bf16.mxu1 %v7632_v61 }
 0x52e   :  { %5705 = vmatpush1.bf16.msra.mxu1 %v7630_v62 }
 0x52f   :  { %5706 = vmatprep.subr.bf16.mxu1 %v7635_v60 }
 0x532   :  { %5707 = vmatpush1.bf16.msra.mxu1 %v7633_v63 }
 0x533   :  { %5708 = vmatprep.subr.bf16.mxu1 %v7638_v16 }
 0x536   :  { %5709 = vmatpush1.bf16.msra.mxu1 %v7636_v48 }
 0x537   :  { %5710 = vmatprep.subr.bf16.mxu1 %v7641_v7  ;;  %v5770_v7 = vrot.slane %v5753_v38, %v8017_v9 }
 0x53a   :  { %5711 = vmatpush1.bf16.msra.mxu1 %v7639_v4 }
 0x53b   :  { %5712 = vmatprep.subr.bf16.mxu1 %v7644_v6 }
 0x53e   :  { %5713 = vmatpush1.bf16.msra.mxu1 %v7642_v10 }
 0x53f   :  { %5714 = vmatprep.subr.bf16.mxu1 %v7647_v13 }
 0x542   :  { %5715 = vmatpush1.bf16.msra.mxu1 %v7645_v14 }
 0x543   :  { %5716 = vmatprep.subr.bf16.mxu1 %v7650_v15 }
 0x546   :  { %5717 = vmatpush2.bf16.msra.mxu1 %v7648_v18 }
 0x547   :  { %5718 = vmatprep.subr.bf16.mxu1 %v7653_v11 }
 0x54a   :  { %5719 = vmatpush2.bf16.msra.mxu1 %v7651_v21  ;;  %v6550_v21 = vld [vmem:[#allocation2] ss:$0 sm:$0xff] }
 0x54b   :  { %5720 = vmatprep.subr.bf16.mxu1 %v7656_v0 }
 0x54e   :  { %5721 = vmatpush2.bf16.msra.mxu1 %v7654_v5 }
 0x54f   :  { %5722 = vmatprep.subr.bf16.mxu1 %v7659_v22 }
 0x552   :  { %5723 = vmatpush2.bf16.msra.mxu1 %v7657_v25 }
 0x553   :  { %5724 = vmatprep.subr.bf16.mxu1 %v7662_v26 }
 0x556   :  { %5725 = vmatpush2.bf16.msra.mxu1 %v7660_v27 }
 0x557   :  { %5726 = vmatprep.subr.bf16.mxu1 %v7665_v19 }
 0x55a   :  { %5727 = vmatpush2.bf16.msra.mxu1 %v7663_v28 }
 0x55b   :  { %5728 = vmatprep.subr.bf16.mxu1 %v7668_v23 }
 0x55e   :  { %5729 = vmatpush2.bf16.msra.mxu1 %v7666_v29 }
 0x55f   :  { %5730 = vmatprep.subr.bf16.mxu1 %v7671_v1 }
 0x562   :  { %5731 = vmatpush2.bf16.msra.mxu1 %v7669_v20 }
 0x565   :  { %5733 = vmatmul.mubr.bf16.vlgmr.msra.gmra.mxu1 %v8105_v57  ;;  %v4928_v57 = vrot.slane %v4915_v32, %v8014_v36 }
 0x5a5   :  { %v5611_v12 = vpop.f32.mrf.mxu0 }
 0x5a6   :  { %v5612_v52 = vadd.f32 %v5611_v12, %v4920_v33 }
 0x5a7   :  { %v5613_v24 = vpop.f32.mrf.mxu0 }
 0x5a8   :  { %v5614_v37 = vadd.f32 %v5613_v24, %v4924_v34 }
 0x5a9   :  { %v5615_v30 = vpop.f32.mrf.mxu0 }
 0x5ab   :  { %v5616_v31 = vpop.f32.mrf.mxu0 }
 0x5e5   :  { %v5652_v8 = vpop.f32.mrf.mxu1  ;;  %v5693_v35 = vpop.f32.mrf.mxu0 }
 0x5e6   :  { %v5653_v17 = vadd.f32 %v5652_v8, %v5612_v52  ;;  %v5694_v59 = vadd.f32 %v5693_v35, %v4928_v57 }
 0x5e7   :  { %v5654_v39 = vpop.f32.mrf.mxu1  ;;  %v5695_v40 = vpop.f32.mrf.mxu0 }
 0x5e8   :  { %vm5741_vm0 = vcmp.gt.f32.partialorder %v5653_v17, 0.0  ;;  %v5745_v41 = vmul.f32 0.2, %v5653_v17  ;;  %v5655_v42 = vadd.f32 %v5654_v39, %v5614_v37  ;;  %v5696_v62 = vadd.f32 %v5695_v40, %v4932_v58 }
 0x5e9   :  { %v5656_v43 = vpop.f32.mrf.mxu1  ;;  %v5697_v44 = vpop.f32.mrf.mxu0 }
 0x5ea   :  { %v5749_v49 = vsel %vm5741_vm0, %v5653_v17, %v5745_v41  ;;  %vm5742_vm1 = vcmp.gt.f32.partialorder %v5655_v42, 0.0  ;;  %v5746_v50 = vmul.f32 0.2, %v5655_v42 }
 0x5eb   :  { %v5657_v47 = vpop.f32.mrf.mxu1  ;;  %v5698_v51 = vpop.f32.mrf.mxu0  ;;  %v5775_v54 = vmul.f32 %v5758_v45, %v5749_v49 }
 0x5ec   :  { %v5750_v53 = vsel %vm5742_vm1, %v5655_v42, %v5746_v50 }
 0x5ed   :  { %v5776_v55 = vmul.f32 %v5762_v46, %v5750_v53 }
 0x5ef   :  { %v5779_v56 = vadd.f32 %v5776_v55, %v5775_v54 }
 0x625   :  { %v5734_v61 = vpop.f32.mrf.mxu1 }
 0x626   :  { %v5735_v60 = vadd.f32 %v5734_v61, %v5694_v59 }
 0x627   :  { %v5736_v2 = vpop.f32.mrf.mxu1 }
 0x628   :  { %vm5743_vm2 = vcmp.gt.f32.partialorder %v5735_v60, 0.0  ;;  %v5747_v63 = vmul.f32 0.2, %v5735_v60  ;;  %v5737_v16 = vadd.f32 %v5736_v2, %v5696_v62 }
 0x629   :  { %v5738_v48 = vpop.f32.mrf.mxu1 }
 0x62a   :  { %vm5744_vm3 = vcmp.gt.f32.partialorder %v5737_v16, 0.0  ;;  %v5748_v4 = vmul.f32 0.2, %v5737_v16  ;;  %v5751_v6 = vsel %vm5743_vm2, %v5735_v60, %v5747_v63 }
 0x62b   :  { %v5739_v10 = vpop.f32.mrf.mxu1  ;;  %v5777_v13 = vmul.f32 %v5766_v3, %v5751_v6 }
 0x62c   :  { %v5752_v14 = vsel %vm5744_vm3, %v5737_v16, %v5748_v4 }
 0x62d   :  { %v5778_v15 = vmul.f32 %v5770_v7, %v5752_v14  ;;  %v5780_v18 = vadd.f32 %v5779_v56, %v5777_v13 }
 0x62f   :  { %v5781_v11 = vadd.f32 %v5780_v18, %v5778_v15 }
 0x631   :  { %5782 = vadd.xlane.f32.xlu0 %v5781_v11 }
 0x6ba   :  { %v5783_v0 = vpop.xlane.xlu0 %5782 }
 0x6bb   :  { %v5791_v5 = vadd.f32 %v6550_v21, %v5783_v0 }
 0x6bd   :  { %v5792_v36 = vsub.f32 0.0, %v5791_v5 }
 0x6bf   :  { %v5793_v22 = vmul.f32 1.442695, %v5792_v36 }
 0x6c1   :  { %7672 = vpow2.f32 %v5793_v22 }
 0x6ce   :  { %v7673_v25 = vpop.eup %7672 }
 0x6cf   :  { %v5795_v26 = vadd.f32 1.0, %v7673_v25 }
 0x6d1   :  { %7674 = vrcp.f32 %v5795_v26 }
 0x6de   :  { %v7675_v9 = vpop.eup %7674 }
 0x6df   :  { %5798 = vst.msk [vmem:[%s8137_s13] sm:$0xff] %vm5797_vm4, %v7675_v9 }
 0x6e0   :  { %5803 = vsyncpa [#allocation4], 1 }
 0x6e1   :  { %5804 = vsyncpa [#allocation6], 1 }
 0x6e2   :  { %5805 = vsyncpa [#allocation9], 1 }
 0x6e3   :  { %5806 = vsyncpa [#allocation12], 1 }

</bundles_post_ra>
